<compile_context>
chip_gen: v7x
topology: tpu7x:2x2x1
jax: 0.10.0
libtpu: 0.0.40
codegen_flags: <defaults>
</compile_context>

<pallas_src>
import functools
import itertools

import jax
import jax.numpy as jnp
from jax.experimental import pallas as pl
from jax.experimental.pallas import tpu as pltpu


# ----------------------------- Pallas kernels -----------------------------

_VMEM_SPEC = pl.BlockSpec(memory_space=pltpu.MemorySpace.VMEM)


def _pallas(kernel, out_shape, *args):
    return pl.pallas_call(
        kernel,
        out_shape=out_shape,
        in_specs=[_VMEM_SPEC] * len(args),
        out_specs=_VMEM_SPEC,
    )(*args)


def _conv_mm_kernel(x_ref, w_ref, b_ref, o_ref, *, relu):
    # x_ref: (M, K) bf16   w_ref: (K, Cout) bf16   b_ref: (1, Cout) f32   o_ref: (M, Cout) f32
    acc = jnp.dot(x_ref[...], w_ref[...], preferred_element_type=jnp.float32)
    acc = acc + b_ref[...]
    if relu:  # static flag -> fused conv+bias+ReLU, no extra launch / HBM trip
        acc = jnp.maximum(acc, 0.0)
    o_ref[...] = acc.astype(o_ref.dtype)


def _maxpool_kernel(x_ref, o_ref, *, taps, ch):
    # x_ref: (M, taps*ch) with the k*k window taps packed along the lane axis.
    x = x_ref[...]
    out = x[:, 0:ch]
    for t in range(1, taps):
        out = jnp.maximum(out, x[:, t * ch:(t + 1) * ch])
    o_ref[...] = out


def _softmax_cols_kernel(x_ref, o_ref):
    # Softmax over axis 0 of a (num_classes, N) block: N (the long axis) sits on lanes.
    x = x_ref[...]
    m = jnp.max(x, axis=0, keepdims=True)
    e = jnp.exp(x - m)
    o_ref[...] = e / jnp.sum(e, axis=0, keepdims=True)


# ----------------------------- Op wrappers (JAX glue) -----------------------------

def conv2d_nhwc(x, p):
    """Fused conv + bias (+ ReLU).  p["w"]: (k*k*Cin, Cout) bf16, p["b"]: (1, Cout) f32."""
    B, H, W, Cin = x.shape
    k, s, pad, dil = p["k"], p["stride"], p["padding"], p["dilation"]
    Cout = p["b"].shape[-1]
    xp = x
    if pad:
        xp = jnp.pad(xp, ((0, 0), (pad, pad), (pad, pad), (0, 0)))
    xp = xp.astype(jnp.bfloat16)                       # bf16 MXU inputs, f32 accumulation
    Hp, Wp = H + 2 * pad, W + 2 * pad
    Ho = (Hp - dil * (k - 1) - 1) // s + 1
    Wo = (Wp - dil * (k - 1) - 1) // s + 1
    M = B * Ho * Wo
    taps = []
    for kh in range(k):
        for kw in range(k):
            h0, w0 = kh * dil, kw * dil
            patch = xp[:, h0:h0 + (Ho - 1) * s + 1:s,
                          w0:w0 + (Wo - 1) * s + 1:s, :]
            taps.append(patch.reshape(M, Cin))
    # Pack taps into the contraction dim -> one lane-dense (M, T*Cin) operand.
    xk = taps[0] if len(taps) == 1 else jnp.concatenate(taps, axis=-1)
    kern = functools.partial(_conv_mm_kernel, relu=p["relu"])
    out = _pallas(kern, jax.ShapeDtypeStruct((M, Cout), jnp.float32), xk, p["w"], p["b"])
    return out.reshape(B, Ho, Wo, Cout)


def max_pool2d_nhwc(x, k, stride, padding=0, ceil_mode=False):
    B, H, W, C = x.shape
    if ceil_mode:
        Ho = -(-(H + 2 * padding - k) // stride) + 1
        Wo = -(-(W + 2 * padding - k) // stride) + 1
    else:
        Ho = (H + 2 * padding - k) // stride + 1
        Wo = (W + 2 * padding - k) // stride + 1
    rpad_h = max(0, (Ho - 1) * stride + k - (H + padding))
    rpad_w = max(0, (Wo - 1) * stride + k - (W + padding))
    # TODO(synk): PyTorch ceil_mode drops windows that start entirely in right padding;
    #             does not trigger for this configuration.
    xp = jnp.pad(x, ((0, 0), (padding, rpad_h), (padding, rpad_w), (0, 0)),
                 constant_values=-jnp.inf)             # max-pool padding semantics
    M = B * Ho * Wo
    taps = []
    for kh in range(k):
        for kw in range(k):
            patch = xp[:, kh:kh + (Ho - 1) * stride + 1:stride,
                          kw:kw + (Wo - 1) * stride + 1:stride, :]
            taps.append(patch.reshape(M, C))
    xw = jnp.concatenate(taps, axis=-1)                # (M, k*k*C): taps on the lane axis
    kern = functools.partial(_maxpool_kernel, taps=k * k, ch=C)
    out = _pallas(kern, jax.ShapeDtypeStruct((M, C), x.dtype), xw)
    return out.reshape(B, Ho, Wo, C)


def softmax_lastdim(x2d):
    xt = x2d.T                                         # (num_classes, N): long axis on lanes
    out = _pallas(_softmax_cols_kernel, jax.ShapeDtypeStruct(xt.shape, xt.dtype), xt)
    return out.T


# ----------------------------- Parameter construction -----------------------------

_key_counter = itertools.count()
_ROOT_KEY = jax.random.PRNGKey(0)


def _next_key():
    return jax.random.fold_in(_ROOT_KEY, next(_key_counter))


def _conv_params(cin, cout, k, stride=1, padding=0, dilation=1, relu=False):
    wkey, bkey = jax.random.split(_next_key())
    fan_in = cin * k * k
    w = jax.random.normal(wkey, (k, k, cin, cout), jnp.float32) * (2.0 / fan_in) ** 0.5
    b = jax.random.normal(bkey, (cout,), jnp.float32) * 0.01
    return dict(w=w.reshape(k * k * cin, cout).astype(jnp.bfloat16),  # taps-major packed
                b=b.reshape(1, cout),
                k=k, stride=stride, padding=padding, dilation=dilation, relu=relu)


# Tiny, structurally-faithful version of base['300'] (channels scaled down 16x).
TINY_BASE_CFG = [8, 8, 'M', 16, 16, 'M', 16, 16, 16, 'C', 32, 32, 32, 'M', 32, 32, 32]
C67 = 32          # conv6 / conv7 channels (1024 in the real net)
NUM_CLASSES = 3
NUM_ANCHORS = [4, 4, 4, 4]


def build_issd_params(in_channels=3):
    def seg_from_cfg(cfg, cin):
        layers, c = [], cin
        for v in cfg:
            if v == 'M':
                layers.append(("pool", 2, 2, 0, False))
            elif v == 'C':
                layers.append(("pool", 2, 2, 0, True))
            else:
                layers.append(("conv", _conv_params(c, v, 3, padding=1, relu=True)))
                c = v
        return layers, c

    # base[:23] in nn.ModuleList indexing == everything through relu(conv4_3),
    # i.e. all cfg entries up to (but not including) the last 'M'.
    idx_last_m = len(TINY_BASE_CFG) - 1 - TINY_BASE_CFG[::-1].index('M')
    base1, c1 = seg_from_cfg(TINY_BASE_CFG[:idx_last_m], in_channels)
    base2, c2 = seg_from_cfg(TINY_BASE_CFG[idx_last_m:], c1)
    base2.append(("pool", 3, 1, 1, False))                                    # pool5
    base2.append(("conv", _conv_params(c2, C67, 3, padding=6, dilation=6, relu=True)))  # conv6
    base2.append(("conv", _conv_params(C67, C67, 1, relu=True)))              # conv7
    conv43_ch = c1

    # extras: two [conv1x1+relu, conv3x3/s2] groups; a source is taken after each group
    # (matches the (k+1)%3==0 source points of a [conv, relu, conv] ModuleList).
    extras, ce, extra_out = [], C67, 32
    for _ in range(2):
        extras.append([("conv", _conv_params(ce, 16, 1, relu=True)),
                       ("conv", _conv_params(16, extra_out, 3, stride=2, padding=1, relu=False))])
        ce = extra_out

    # multibox heads: loc and conf fused into one conv per source (split along Cout later).
    src_channels = [conv43_ch, C67, extra_out, extra_out]
    heads = []
    for sc, a in zip(src_channels, NUM_ANCHORS):
        head = _conv_params(sc, a * 4 + a * NUM_CLASSES, 3, padding=1, relu=False)
        head["loc_ch"] = a * 4
        heads.append(head)

    return dict(base1=base1, base2=base2, extras=extras, heads=heads)


# ----------------------------- Forward pass -----------------------------

def _run_layers(x, layers):
    for layer in layers:
        if layer[0] == "conv":
            x = conv2d_nhwc(x, layer[1])
        else:
            _, k, s, pad, ceil = layer
            x = max_pool2d_nhwc(x, k, s, pad, ceil)
    return x


def issd_forward(params, x_nchw, phase="train"):
    """Mirrors ISSDNet.forward.  x_nchw: (B, 3, H, W) float32."""
    x = jnp.transpose(x_nchw, (0, 2, 3, 1))  # NCHW -> NHWC (internal layout)
    sources = []
    x = _run_layers(x, params["base1"]); sources.append(x)   # after relu(conv4_3)  (base[:23])
    x = _run_layers(x, params["base2"]); sources.append(x)   # after relu(conv7)
    for group in params["extras"]:
        x = _run_layers(x, group); sources.append(x)

    loc_list, conf_list = [], []
    for s, head in zip(sources, params["heads"]):
        out = conv2d_nhwc(s, head)            # NHWC == permute(0, 2, 3, 1).contiguous()
        B = out.shape[0]
        lc = head["loc_ch"]
        loc_list.append(out[..., :lc].reshape(B, -1))
        conf_list.append(out[..., lc:].reshape(B, -1))

    loc = jnp.concatenate(loc_list, axis=1)
    conf = jnp.concatenate(conf_list, axis=1)
    B = loc.shape[0]
    if phase == "test":
        return (loc.reshape(B, -1, 4),
                softmax_lastdim(conf.reshape(-1, NUM_CLASSES)))
    return (loc.reshape(B, -1, 4), conf.reshape(B, -1, NUM_CLASSES))


# TODO(synk): load_weights (.pth/.pkl checkpoint I/O) intentionally not ported; weights are synthetic.


if __name__ == "__main__":
    params = build_issd_params(in_channels=3)
    x = jax.random.normal(jax.random.PRNGKey(0), (2, 3, 32, 32), jnp.float32)

    # Whole forward jitted (params closed over -> layer hyperparams stay static).
    fwd_train = jax.jit(lambda inp: issd_forward(params, inp, phase="train"))
    fwd_test = jax.jit(lambda inp: issd_forward(params, inp, phase="test"))

    # 4x4 + 2x2 + 1x1 + 1x1 feature maps, 4 anchors each -> 88 priors
    loc_tr, conf_tr = fwd_train(x)
    jax.block_until_ready((loc_tr, conf_tr))
    assert loc_tr.shape == (2, 88, 4), loc_tr.shape
    assert conf_tr.shape == (2, 88, NUM_CLASSES), conf_tr.shape

    loc_te, conf_te = fwd_test(x)
    jax.block_until_ready((loc_te, conf_te))
    assert loc_te.shape == (2, 88, 4), loc_te.shape
    assert conf_te.shape == (2 * 88, NUM_CLASSES), conf_te.shape

    print("KERNEL_OK")
</pallas_src>

<mosaic_0001>
module attributes {stable_mosaic.version = 11 : i64} {
  func.func @_conv_mm_kernel(%arg0: memref<2048x27xbf16, #tpu.memory_space<vmem>>, %arg1: memref<27x8xbf16, #tpu.memory_space<vmem>>, %arg2: memref<1x8xf32, #tpu.memory_space<vmem>>, %arg3: memref<2048x8xf32, #tpu.memory_space<vmem>>) attributes {dimension_semantics = [], scalar_prefetch = 0 : i64, scratch_operands = 0 : i64, tpu.core_type = #tpu.core_type<tc>} {
    %c0 = arith.constant 0 : index
    %c0_0 = arith.constant 0 : index
    %0 = vector.load %arg0[%c0, %c0_0] : memref<2048x27xbf16, #tpu.memory_space<vmem>>, vector<2048x27xbf16>
    %c0_1 = arith.constant 0 : index
    %c0_2 = arith.constant 0 : index
    %1 = vector.load %arg1[%c0_1, %c0_2] : memref<27x8xbf16, #tpu.memory_space<vmem>>, vector<27x8xbf16>
    %cst = arith.constant dense<0.000000e+00> : vector<2048x8xf32>
    %2 = tpu.matmul %0, %1, %cst {dimension_numbers = #tpu.dot_dimension_numbers<[1], [0], [0], [1], [0, 0, 1, 1], [], []>} : vector<2048x27xbf16>, vector<27x8xbf16>, vector<2048x8xf32> -> vector<2048x8xf32>
    %c0_3 = arith.constant 0 : index
    %c0_4 = arith.constant 0 : index
    %3 = vector.load %arg2[%c0_3, %c0_4] : memref<1x8xf32, #tpu.memory_space<vmem>>, vector<1x8xf32>
    %4 = vector.broadcast %3 : vector<1x8xf32> to vector<2048x8xf32>
    %5 = arith.addf %2, %4 : vector<2048x8xf32>
    %cst_5 = arith.constant 0.000000e+00 : f32
    %6 = vector.broadcast %cst_5 : f32 to vector<2048x8xf32>
    %7 = arith.maximumf %5, %6 : vector<2048x8xf32>
    %c0_6 = arith.constant 0 : index
    %c0_7 = arith.constant 0 : index
    %8 = vector.load %arg3[%c0_6, %c0_7] : memref<2048x8xf32, #tpu.memory_space<vmem>>, vector<2048x8xf32>
    tpu.vector_store %arg3[%c0_6, %c0_7], %7 {strides = array<i32>} : memref<2048x8xf32, #tpu.memory_space<vmem>>, vector<2048x8xf32>,
    return
  }
}

module attributes {stable_mosaic.version = 11 : i64} {
  func.func @_conv_mm_kernel(%arg0: memref<2048x72xbf16, #tpu.memory_space<vmem>>, %arg1: memref<72x8xbf16, #tpu.memory_space<vmem>>, %arg2: memref<1x8xf32, #tpu.memory_space<vmem>>, %arg3: memref<2048x8xf32, #tpu.memory_space<vmem>>) attributes {dimension_semantics = [], scalar_prefetch = 0 : i64, scratch_operands = 0 : i64, tpu.core_type = #tpu.core_type<tc>} {
    %c0 = arith.constant 0 : index
    %c0_0 = arith.constant 0 : index
    %0 = vector.load %arg0[%c0, %c0_0] : memref<2048x72xbf16, #tpu.memory_space<vmem>>, vector<2048x72xbf16>
    %c0_1 = arith.constant 0 : index
    %c0_2 = arith.constant 0 : index
    %1 = vector.load %arg1[%c0_1, %c0_2] : memref<72x8xbf16, #tpu.memory_space<vmem>>, vector<72x8xbf16>
    %cst = arith.constant dense<0.000000e+00> : vector<2048x8xf32>
    %2 = tpu.matmul %0, %1, %cst {dimension_numbers = #tpu.dot_dimension_numbers<[1], [0], [0], [1], [0, 0, 1, 1], [], []>} : vector<2048x72xbf16>, vector<72x8xbf16>, vector<2048x8xf32> -> vector<2048x8xf32>
    %c0_3 = arith.constant 0 : index
    %c0_4 = arith.constant 0 : index
    %3 = vector.load %arg2[%c0_3, %c0_4] : memref<1x8xf32, #tpu.memory_space<vmem>>, vector<1x8xf32>
    %4 = vector.broadcast %3 : vector<1x8xf32> to vector<2048x8xf32>
    %5 = arith.addf %2, %4 : vector<2048x8xf32>
    %cst_5 = arith.constant 0.000000e+00 : f32
    %6 = vector.broadcast %cst_5 : f32 to vector<2048x8xf32>
    %7 = arith.maximumf %5, %6 : vector<2048x8xf32>
    %c0_6 = arith.constant 0 : index
    %c0_7 = arith.constant 0 : index
    %8 = vector.load %arg3[%c0_6, %c0_7] : memref<2048x8xf32, #tpu.memory_space<vmem>>, vector<2048x8xf32>
    tpu.vector_store %arg3[%c0_6, %c0_7], %7 {strides = array<i32>} : memref<2048x8xf32, #tpu.memory_space<vmem>>, vector<2048x8xf32>,
    return
  }
}

module attributes {stable_mosaic.version = 11 : i64} {
  func.func @_maxpool_kernel(%arg0: memref<512x32xf32, #tpu.memory_space<vmem>>, %arg1: memref<512x8xf32, #tpu.memory_space<vmem>>) attributes {dimension_semantics = [], scalar_prefetch = 0 : i64, scratch_operands = 0 : i64, tpu.core_type = #tpu.core_type<tc>} {
    %c0 = arith.constant 0 : index
    %c0_0 = arith.constant 0 : index
    %0 = vector.load %arg0[%c0, %c0_0] : memref<512x32xf32, #tpu.memory_space<vmem>>, vector<512x32xf32>
    %1 = vector.extract_strided_slice %0 {offsets = [0, 0], sizes = [512, 8], strides = [1, 1]} : vector<512x32xf32> to vector<512x8xf32>
    %2 = vector.extract_strided_slice %0 {offsets = [0, 8], sizes = [512, 8], strides = [1, 1]} : vector<512x32xf32> to vector<512x8xf32>
    %3 = arith.maximumf %1, %2 : vector<512x8xf32>
    %4 = vector.extract_strided_slice %0 {offsets = [0, 16], sizes = [512, 8], strides = [1, 1]} : vector<512x32xf32> to vector<512x8xf32>
    %5 = arith.maximumf %3, %4 : vector<512x8xf32>
    %6 = vector.extract_strided_slice %0 {offsets = [0, 24], sizes = [512, 8], strides = [1, 1]} : vector<512x32xf32> to vector<512x8xf32>
    %7 = arith.maximumf %5, %6 : vector<512x8xf32>
    %c0_1 = arith.constant 0 : index
    %c0_2 = arith.constant 0 : index
    %8 = vector.load %arg1[%c0_1, %c0_2] : memref<512x8xf32, #tpu.memory_space<vmem>>, vector<512x8xf32>
    tpu.vector_store %arg1[%c0_1, %c0_2], %7 {strides = array<i32>} : memref<512x8xf32, #tpu.memory_space<vmem>>, vector<512x8xf32>,
    return
  }
}

module attributes {stable_mosaic.version = 11 : i64} {
  func.func @_conv_mm_kernel(%arg0: memref<512x72xbf16, #tpu.memory_space<vmem>>, %arg1: memref<72x16xbf16, #tpu.memory_space<vmem>>, %arg2: memref<1x16xf32, #tpu.memory_space<vmem>>, %arg3: memref<512x16xf32, #tpu.memory_space<vmem>>) attributes {dimension_semantics = [], scalar_prefetch = 0 : i64, scratch_operands = 0 : i64, tpu.core_type = #tpu.core_type<tc>} {
    %c0 = arith.constant 0 : index
    %c0_0 = arith.constant 0 : index
    %0 = vector.load %arg0[%c0, %c0_0] : memref<512x72xbf16, #tpu.memory_space<vmem>>, vector<512x72xbf16>
    %c0_1 = arith.constant 0 : index
    %c0_2 = arith.constant 0 : index
    %1 = vector.load %arg1[%c0_1, %c0_2] : memref<72x16xbf16, #tpu.memory_space<vmem>>, vector<72x16xbf16>
    %cst = arith.constant dense<0.000000e+00> : vector<512x16xf32>
    %2 = tpu.matmul %0, %1, %cst {dimension_numbers = #tpu.dot_dimension_numbers<[1], [0], [0], [1], [0, 0, 1, 1], [], []>} : vector<512x72xbf16>, vector<72x16xbf16>, vector<512x16xf32> -> vector<512x16xf32>
    %c0_3 = arith.constant 0 : index
    %c0_4 = arith.constant 0 : index
    %3 = vector.load %arg2[%c0_3, %c0_4] : memref<1x16xf32, #tpu.memory_space<vmem>>, vector<1x16xf32>
    %4 = vector.broadcast %3 : vector<1x16xf32> to vector<512x16xf32>
    %5 = arith.addf %2, %4 : vector<512x16xf32>
    %cst_5 = arith.constant 0.000000e+00 : f32
    %6 = vector.broadcast %cst_5 : f32 to vector<512x16xf32>
    %7 = arith.maximumf %5, %6 : vector<512x16xf32>
    %c0_6 = arith.constant 0 : index
    %c0_7 = arith.constant 0 : index
    %8 = vector.load %arg3[%c0_6, %c0_7] : memref<512x16xf32, #tpu.memory_space<vmem>>, vector<512x16xf32>
    tpu.vector_store %arg3[%c0_6, %c0_7], %7 {strides = array<i32>} : memref<512x16xf32, #tpu.memory_space<vmem>>, vector<512x16xf32>,
    return
  }
}

module attributes {stable_mosaic.version = 11 : i64} {
  func.func @_conv_mm_kernel(%arg0: memref<512x144xbf16, #tpu.memory_space<vmem>>, %arg1: memref<144x16xbf16, #tpu.memory_space<vmem>>, %arg2: memref<1x16xf32, #tpu.memory_space<vmem>>, %arg3: memref<512x16xf32, #tpu.memory_space<vmem>>) attributes {dimension_semantics = [], scalar_prefetch = 0 : i64, scratch_operands = 0 : i64, tpu.core_type = #tpu.core_type<tc>} {
    %c0 = arith.constant 0 : index
    %c0_0 = arith.constant 0 : index
    %0 = vector.load %arg0[%c0, %c0_0] : memref<512x144xbf16, #tpu.memory_space<vmem>>, vector<512x144xbf16>
    %c0_1 = arith.constant 0 : index
    %c0_2 = arith.constant 0 : index
    %1 = vector.load %arg1[%c0_1, %c0_2] : memref<144x16xbf16, #tpu.memory_space<vmem>>, vector<144x16xbf16>
    %cst = arith.constant dense<0.000000e+00> : vector<512x16xf32>
    %2 = tpu.matmul %0, %1, %cst {dimension_numbers = #tpu.dot_dimension_numbers<[1], [0], [0], [1], [0, 0, 1, 1], [], []>} : vector<512x144xbf16>, vector<144x16xbf16>, vector<512x16xf32> -> vector<512x16xf32>
    %c0_3 = arith.constant 0 : index
    %c0_4 = arith.constant 0 : index
    %3 = vector.load %arg2[%c0_3, %c0_4] : memref<1x16xf32, #tpu.memory_space<vmem>>, vector<1x16xf32>
    %4 = vector.broadcast %3 : vector<1x16xf32> to vector<512x16xf32>
    %5 = arith.addf %2, %4 : vector<512x16xf32>
    %cst_5 = arith.constant 0.000000e+00 : f32
    %6 = vector.broadcast %cst_5 : f32 to vector<512x16xf32>
    %7 = arith.maximumf %5, %6 : vector<512x16xf32>
    %c0_6 = arith.constant 0 : index
    %c0_7 = arith.constant 0 : index
    %8 = vector.load %arg3[%c0_6, %c0_7] : memref<512x16xf32, #tpu.memory_space<vmem>>, vector<512x16xf32>
    tpu.vector_store %arg3[%c0_6, %c0_7], %7 {strides = array<i32>} : memref<512x16xf32, #tpu.memory_space<vmem>>, vector<512x16xf32>,
    return
  }
}

module attributes {stable_mosaic.version = 11 : i64} {
  func.func @_maxpool_kernel(%arg0: memref<128x64xf32, #tpu.memory_space<vmem>>, %arg1: memref<128x16xf32, #tpu.memory_space<vmem>>) attributes {dimension_semantics = [], scalar_prefetch = 0 : i64, scratch_operands = 0 : i64, tpu.core_type = #tpu.core_type<tc>} {
    %c0 = arith.constant 0 : index
    %c0_0 = arith.constant 0 : index
    %0 = vector.load %arg0[%c0, %c0_0] : memref<128x64xf32, #tpu.memory_space<vmem>>, vector<128x64xf32>
    %1 = vector.extract_strided_slice %0 {offsets = [0, 0], sizes = [128, 16], strides = [1, 1]} : vector<128x64xf32> to vector<128x16xf32>
    %2 = vector.extract_strided_slice %0 {offsets = [0, 16], sizes = [128, 16], strides = [1, 1]} : vector<128x64xf32> to vector<128x16xf32>
    %3 = arith.maximumf %1, %2 : vector<128x16xf32>
    %4 = vector.extract_strided_slice %0 {offsets = [0, 32], sizes = [128, 16], strides = [1, 1]} : vector<128x64xf32> to vector<128x16xf32>
    %5 = arith.maximumf %3, %4 : vector<128x16xf32>
    %6 = vector.extract_strided_slice %0 {offsets = [0, 48], sizes = [128, 16], strides = [1, 1]} : vector<128x64xf32> to vector<128x16xf32>
    %7 = arith.maximumf %5, %6 : vector<128x16xf32>
    %c0_1 = arith.constant 0 : index
    %c0_2 = arith.constant 0 : index
    %8 = vector.load %arg1[%c0_1, %c0_2] : memref<128x16xf32, #tpu.memory_space<vmem>>, vector<128x16xf32>
    tpu.vector_store %arg1[%c0_1, %c0_2], %7 {strides = array<i32>} : memref<128x16xf32, #tpu.memory_space<vmem>>, vector<128x16xf32>,
    return
  }
}

module attributes {stable_mosaic.version = 11 : i64} {
  func.func @_conv_mm_kernel(%arg0: memref<128x144xbf16, #tpu.memory_space<vmem>>, %arg1: memref<144x16xbf16, #tpu.memory_space<vmem>>, %arg2: memref<1x16xf32, #tpu.memory_space<vmem>>, %arg3: memref<128x16xf32, #tpu.memory_space<vmem>>) attributes {dimension_semantics = [], scalar_prefetch = 0 : i64, scratch_operands = 0 : i64, tpu.core_type = #tpu.core_type<tc>} {
    %c0 = arith.constant 0 : index
    %c0_0 = arith.constant 0 : index
    %0 = vector.load %arg0[%c0, %c0_0] : memref<128x144xbf16, #tpu.memory_space<vmem>>, vector<128x144xbf16>
    %c0_1 = arith.constant 0 : index
    %c0_2 = arith.constant 0 : index
    %1 = vector.load %arg1[%c0_1, %c0_2] : memref<144x16xbf16, #tpu.memory_space<vmem>>, vector<144x16xbf16>
    %cst = arith.constant dense<0.000000e+00> : vector<128x16xf32>
    %2 = tpu.matmul %0, %1, %cst {dimension_numbers = #tpu.dot_dimension_numbers<[1], [0], [0], [1], [0, 0, 1, 1], [], []>} : vector<128x144xbf16>, vector<144x16xbf16>, vector<128x16xf32> -> vector<128x16xf32>
    %c0_3 = arith.constant 0 : index
    %c0_4 = arith.constant 0 : index
    %3 = vector.load %arg2[%c0_3, %c0_4] : memref<1x16xf32, #tpu.memory_space<vmem>>, vector<1x16xf32>
    %4 = vector.broadcast %3 : vector<1x16xf32> to vector<128x16xf32>
    %5 = arith.addf %2, %4 : vector<128x16xf32>
    %cst_5 = arith.constant 0.000000e+00 : f32
    %6 = vector.broadcast %cst_5 : f32 to vector<128x16xf32>
    %7 = arith.maximumf %5, %6 : vector<128x16xf32>
    %c0_6 = arith.constant 0 : index
    %c0_7 = arith.constant 0 : index
    %8 = vector.load %arg3[%c0_6, %c0_7] : memref<128x16xf32, #tpu.memory_space<vmem>>, vector<128x16xf32>
    tpu.vector_store %arg3[%c0_6, %c0_7], %7 {strides = array<i32>} : memref<128x16xf32, #tpu.memory_space<vmem>>, vector<128x16xf32>,
    return
  }
}

module attributes {stable_mosaic.version = 11 : i64} {
  func.func @_maxpool_kernel(%arg0: memref<32x64xf32, #tpu.memory_space<vmem>>, %arg1: memref<32x16xf32, #tpu.memory_space<vmem>>) attributes {dimension_semantics = [], scalar_prefetch = 0 : i64, scratch_operands = 0 : i64, tpu.core_type = #tpu.core_type<tc>} {
    %c0 = arith.constant 0 : index
    %c0_0 = arith.constant 0 : index
    %0 = vector.load %arg0[%c0, %c0_0] : memref<32x64xf32, #tpu.memory_space<vmem>>, vector<32x64xf32>
    %1 = vector.extract_strided_slice %0 {offsets = [0, 0], sizes = [32, 16], strides = [1, 1]} : vector<32x64xf32> to vector<32x16xf32>
    %2 = vector.extract_strided_slice %0 {offsets = [0, 16], sizes = [32, 16], strides = [1, 1]} : vector<32x64xf32> to vector<32x16xf32>
    %3 = arith.maximumf %1, %2 : vector<32x16xf32>
    %4 = vector.extract_strided_slice %0 {offsets = [0, 32], sizes = [32, 16], strides = [1, 1]} : vector<32x64xf32> to vector<32x16xf32>
    %5 = arith.maximumf %3, %4 : vector<32x16xf32>
    %6 = vector.extract_strided_slice %0 {offsets = [0, 48], sizes = [32, 16], strides = [1, 1]} : vector<32x64xf32> to vector<32x16xf32>
    %7 = arith.maximumf %5, %6 : vector<32x16xf32>
    %c0_1 = arith.constant 0 : index
    %c0_2 = arith.constant 0 : index
    %8 = vector.load %arg1[%c0_1, %c0_2] : memref<32x16xf32, #tpu.memory_space<vmem>>, vector<32x16xf32>
    tpu.vector_store %arg1[%c0_1, %c0_2], %7 {strides = array<i32>} : memref<32x16xf32, #tpu.memory_space<vmem>>, vector<32x16xf32>,
    return
  }
}

module attributes {stable_mosaic.version = 11 : i64} {
  func.func @_conv_mm_kernel(%arg0: memref<32x144xbf16, #tpu.memory_space<vmem>>, %arg1: memref<144x32xbf16, #tpu.memory_space<vmem>>, %arg2: memref<1x32xf32, #tpu.memory_space<vmem>>, %arg3: memref<32x32xf32, #tpu.memory_space<vmem>>) attributes {dimension_semantics = [], scalar_prefetch = 0 : i64, scratch_operands = 0 : i64, tpu.core_type = #tpu.core_type<tc>} {
    %c0 = arith.constant 0 : index
    %c0_0 = arith.constant 0 : index
    %0 = vector.load %arg0[%c0, %c0_0] : memref<32x144xbf16, #tpu.memory_space<vmem>>, vector<32x144xbf16>
    %c0_1 = arith.constant 0 : index
    %c0_2 = arith.constant 0 : index
    %1 = vector.load %arg1[%c0_1, %c0_2] : memref<144x32xbf16, #tpu.memory_space<vmem>>, vector<144x32xbf16>
    %cst = arith.constant dense<0.000000e+00> : vector<32x32xf32>
    %2 = tpu.matmul %0, %1, %cst {dimension_numbers = #tpu.dot_dimension_numbers<[1], [0], [0], [1], [0, 0, 1, 1], [], []>} : vector<32x144xbf16>, vector<144x32xbf16>, vector<32x32xf32> -> vector<32x32xf32>
    %c0_3 = arith.constant 0 : index
    %c0_4 = arith.constant 0 : index
    %3 = vector.load %arg2[%c0_3, %c0_4] : memref<1x32xf32, #tpu.memory_space<vmem>>, vector<1x32xf32>
    %4 = vector.broadcast %3 : vector<1x32xf32> to vector<32x32xf32>
    %5 = arith.addf %2, %4 : vector<32x32xf32>
    %cst_5 = arith.constant 0.000000e+00 : f32
    %6 = vector.broadcast %cst_5 : f32 to vector<32x32xf32>
    %7 = arith.maximumf %5, %6 : vector<32x32xf32>
    %c0_6 = arith.constant 0 : index
    %c0_7 = arith.constant 0 : index
    %8 = vector.load %arg3[%c0_6, %c0_7] : memref<32x32xf32, #tpu.memory_space<vmem>>, vector<32x32xf32>
    tpu.vector_store %arg3[%c0_6, %c0_7], %7 {strides = array<i32>} : memref<32x32xf32, #tpu.memory_space<vmem>>, vector<32x32xf32>,
    return
  }
}

module attributes {stable_mosaic.version = 11 : i64} {
  func.func @_conv_mm_kernel(%arg0: memref<32x288xbf16, #tpu.memory_space<vmem>>, %arg1: memref<288x28xbf16, #tpu.memory_space<vmem>>, %arg2: memref<1x28xf32, #tpu.memory_space<vmem>>, %arg3: memref<32x28xf32, #tpu.memory_space<vmem>>) attributes {dimension_semantics = [], scalar_prefetch = 0 : i64, scratch_operands = 0 : i64, tpu.core_type = #tpu.core_type<tc>} {
    %c0 = arith.constant 0 : index
    %c0_0 = arith.constant 0 : index
    %0 = vector.load %arg0[%c0, %c0_0] : memref<32x288xbf16, #tpu.memory_space<vmem>>, vector<32x288xbf16>
    %c0_1 = arith.constant 0 : index
    %c0_2 = arith.constant 0 : index
    %1 = vector.load %arg1[%c0_1, %c0_2] : memref<288x28xbf16, #tpu.memory_space<vmem>>, vector<288x28xbf16>
    %cst = arith.constant dense<0.000000e+00> : vector<32x28xf32>
    %2 = tpu.matmul %0, %1, %cst {dimension_numbers = #tpu.dot_dimension_numbers<[1], [0], [0], [1], [0, 0, 1, 1], [], []>} : vector<32x288xbf16>, vector<288x28xbf16>, vector<32x28xf32> -> vector<32x28xf32>
    %c0_3 = arith.constant 0 : index
    %c0_4 = arith.constant 0 : index
    %3 = vector.load %arg2[%c0_3, %c0_4] : memref<1x28xf32, #tpu.memory_space<vmem>>, vector<1x28xf32>
    %4 = vector.broadcast %3 : vector<1x28xf32> to vector<32x28xf32>
    %5 = arith.addf %2, %4 : vector<32x28xf32>
    %c0_5 = arith.constant 0 : index
    %c0_6 = arith.constant 0 : index
    %6 = vector.load %arg3[%c0_5, %c0_6] : memref<32x28xf32, #tpu.memory_space<vmem>>, vector<32x28xf32>
    tpu.vector_store %arg3[%c0_5, %c0_6], %5 {strides = array<i32>} : memref<32x28xf32, #tpu.memory_space<vmem>>, vector<32x28xf32>,
    return
  }
}

module attributes {stable_mosaic.version = 11 : i64} {
  func.func @_conv_mm_kernel(%arg0: memref<32x288xbf16, #tpu.memory_space<vmem>>, %arg1: memref<288x32xbf16, #tpu.memory_space<vmem>>, %arg2: memref<1x32xf32, #tpu.memory_space<vmem>>, %arg3: memref<32x32xf32, #tpu.memory_space<vmem>>) attributes {dimension_semantics = [], scalar_prefetch = 0 : i64, scratch_operands = 0 : i64, tpu.core_type = #tpu.core_type<tc>} {
    %c0 = arith.constant 0 : index
    %c0_0 = arith.constant 0 : index
    %0 = vector.load %arg0[%c0, %c0_0] : memref<32x288xbf16, #tpu.memory_space<vmem>>, vector<32x288xbf16>
    %c0_1 = arith.constant 0 : index
    %c0_2 = arith.constant 0 : index
    %1 = vector.load %arg1[%c0_1, %c0_2] : memref<288x32xbf16, #tpu.memory_space<vmem>>, vector<288x32xbf16>
    %cst = arith.constant dense<0.000000e+00> : vector<32x32xf32>
    %2 = tpu.matmul %0, %1, %cst {dimension_numbers = #tpu.dot_dimension_numbers<[1], [0], [0], [1], [0, 0, 1, 1], [], []>} : vector<32x288xbf16>, vector<288x32xbf16>, vector<32x32xf32> -> vector<32x32xf32>
    %c0_3 = arith.constant 0 : index
    %c0_4 = arith.constant 0 : index
    %3 = vector.load %arg2[%c0_3, %c0_4] : memref<1x32xf32, #tpu.memory_space<vmem>>, vector<1x32xf32>
    %4 = vector.broadcast %3 : vector<1x32xf32> to vector<32x32xf32>
    %5 = arith.addf %2, %4 : vector<32x32xf32>
    %cst_5 = arith.constant 0.000000e+00 : f32
    %6 = vector.broadcast %cst_5 : f32 to vector<32x32xf32>
    %7 = arith.maximumf %5, %6 : vector<32x32xf32>
    %c0_6 = arith.constant 0 : index
    %c0_7 = arith.constant 0 : index
    %8 = vector.load %arg3[%c0_6, %c0_7] : memref<32x32xf32, #tpu.memory_space<vmem>>, vector<32x32xf32>
    tpu.vector_store %arg3[%c0_6, %c0_7], %7 {strides = array<i32>} : memref<32x32xf32, #tpu.memory_space<vmem>>, vector<32x32xf32>,
    return
  }
}

module attributes {stable_mosaic.version = 11 : i64} {
  func.func @_maxpool_kernel(%arg0: memref<8x128xf32, #tpu.memory_space<vmem>>, %arg1: memref<8x32xf32, #tpu.memory_space<vmem>>) attributes {dimension_semantics = [], scalar_prefetch = 0 : i64, scratch_operands = 0 : i64, tpu.core_type = #tpu.core_type<tc>} {
    %c0 = arith.constant 0 : index
    %c0_0 = arith.constant 0 : index
    %0 = vector.load %arg0[%c0, %c0_0] : memref<8x128xf32, #tpu.memory_space<vmem>>, vector<8x128xf32>
    %1 = vector.extract_strided_slice %0 {offsets = [0, 0], sizes = [8, 32], strides = [1, 1]} : vector<8x128xf32> to vector<8x32xf32>
    %2 = vector.extract_strided_slice %0 {offsets = [0, 32], sizes = [8, 32], strides = [1, 1]} : vector<8x128xf32> to vector<8x32xf32>
    %3 = arith.maximumf %1, %2 : vector<8x32xf32>
    %4 = vector.extract_strided_slice %0 {offsets = [0, 64], sizes = [8, 32], strides = [1, 1]} : vector<8x128xf32> to vector<8x32xf32>
    %5 = arith.maximumf %3, %4 : vector<8x32xf32>
    %6 = vector.extract_strided_slice %0 {offsets = [0, 96], sizes = [8, 32], strides = [1, 1]} : vector<8x128xf32> to vector<8x32xf32>
    %7 = arith.maximumf %5, %6 : vector<8x32xf32>
    %c0_1 = arith.constant 0 : index
    %c0_2 = arith.constant 0 : index
    %8 = vector.load %arg1[%c0_1, %c0_2] : memref<8x32xf32, #tpu.memory_space<vmem>>, vector<8x32xf32>
    tpu.vector_store %arg1[%c0_1, %c0_2], %7 {strides = array<i32>} : memref<8x32xf32, #tpu.memory_space<vmem>>, vector<8x32xf32>,
    return
  }
}

module attributes {stable_mosaic.version = 11 : i64} {
  func.func @_conv_mm_kernel(%arg0: memref<8x288xbf16, #tpu.memory_space<vmem>>, %arg1: memref<288x32xbf16, #tpu.memory_space<vmem>>, %arg2: memref<1x32xf32, #tpu.memory_space<vmem>>, %arg3: memref<8x32xf32, #tpu.memory_space<vmem>>) attributes {dimension_semantics = [], scalar_prefetch = 0 : i64, scratch_operands = 0 : i64, tpu.core_type = #tpu.core_type<tc>} {
    %c0 = arith.constant 0 : index
    %c0_0 = arith.constant 0 : index
    %0 = vector.load %arg0[%c0, %c0_0] : memref<8x288xbf16, #tpu.memory_space<vmem>>, vector<8x288xbf16>
    %c0_1 = arith.constant 0 : index
    %c0_2 = arith.constant 0 : index
    %1 = vector.load %arg1[%c0_1, %c0_2] : memref<288x32xbf16, #tpu.memory_space<vmem>>, vector<288x32xbf16>
    %cst = arith.constant dense<0.000000e+00> : vector<8x32xf32>
    %2 = tpu.matmul %0, %1, %cst {dimension_numbers = #tpu.dot_dimension_numbers<[1], [0], [0], [1], [0, 0, 1, 1], [], []>} : vector<8x288xbf16>, vector<288x32xbf16>, vector<8x32xf32> -> vector<8x32xf32>
    %c0_3 = arith.constant 0 : index
    %c0_4 = arith.constant 0 : index
    %3 = vector.load %arg2[%c0_3, %c0_4] : memref<1x32xf32, #tpu.memory_space<vmem>>, vector<1x32xf32>
    %4 = vector.broadcast %3 : vector<1x32xf32> to vector<8x32xf32>
    %5 = arith.addf %2, %4 : vector<8x32xf32>
    %cst_5 = arith.constant 0.000000e+00 : f32
    %6 = vector.broadcast %cst_5 : f32 to vector<8x32xf32>
    %7 = arith.maximumf %5, %6 : vector<8x32xf32>
    %c0_6 = arith.constant 0 : index
    %c0_7 = arith.constant 0 : index
    %8 = vector.load %arg3[%c0_6, %c0_7] : memref<8x32xf32, #tpu.memory_space<vmem>>, vector<8x32xf32>
    tpu.vector_store %arg3[%c0_6, %c0_7], %7 {strides = array<i32>} : memref<8x32xf32, #tpu.memory_space<vmem>>, vector<8x32xf32>,
    return
  }
}

module attributes {stable_mosaic.version = 11 : i64} {
  func.func @_maxpool_kernel(%arg0: memref<8x288xf32, #tpu.memory_space<vmem>>, %arg1: memref<8x32xf32, #tpu.memory_space<vmem>>) attributes {dimension_semantics = [], scalar_prefetch = 0 : i64, scratch_operands = 0 : i64, tpu.core_type = #tpu.core_type<tc>} {
    %c0 = arith.constant 0 : index
    %c0_0 = arith.constant 0 : index
    %0 = vector.load %arg0[%c0, %c0_0] : memref<8x288xf32, #tpu.memory_space<vmem>>, vector<8x288xf32>
    %1 = vector.extract_strided_slice %0 {offsets = [0, 0], sizes = [8, 32], strides = [1, 1]} : vector<8x288xf32> to vector<8x32xf32>
    %2 = vector.extract_strided_slice %0 {offsets = [0, 32], sizes = [8, 32], strides = [1, 1]} : vector<8x288xf32> to vector<8x32xf32>
    %3 = arith.maximumf %1, %2 : vector<8x32xf32>
    %4 = vector.extract_strided_slice %0 {offsets = [0, 64], sizes = [8, 32], strides = [1, 1]} : vector<8x288xf32> to vector<8x32xf32>
    %5 = arith.maximumf %3, %4 : vector<8x32xf32>
    %6 = vector.extract_strided_slice %0 {offsets = [0, 96], sizes = [8, 32], strides = [1, 1]} : vector<8x288xf32> to vector<8x32xf32>
    %7 = arith.maximumf %5, %6 : vector<8x32xf32>
    %8 = vector.extract_strided_slice %0 {offsets = [0, 128], sizes = [8, 32], strides = [1, 1]} : vector<8x288xf32> to vector<8x32xf32>
    %9 = arith.maximumf %7, %8 : vector<8x32xf32>
    %10 = vector.extract_strided_slice %0 {offsets = [0, 160], sizes = [8, 32], strides = [1, 1]} : vector<8x288xf32> to vector<8x32xf32>
    %11 = arith.maximumf %9, %10 : vector<8x32xf32>
    %12 = vector.extract_strided_slice %0 {offsets = [0, 192], sizes = [8, 32], strides = [1, 1]} : vector<8x288xf32> to vector<8x32xf32>
    %13 = arith.maximumf %11, %12 : vector<8x32xf32>
    %14 = vector.extract_strided_slice %0 {offsets = [0, 224], sizes = [8, 32], strides = [1, 1]} : vector<8x288xf32> to vector<8x32xf32>
    %15 = arith.maximumf %13, %14 : vector<8x32xf32>
    %16 = vector.extract_strided_slice %0 {offsets = [0, 256], sizes = [8, 32], strides = [1, 1]} : vector<8x288xf32> to vector<8x32xf32>
    %17 = arith.maximumf %15, %16 : vector<8x32xf32>
    %c0_1 = arith.constant 0 : index
    %c0_2 = arith.constant 0 : index
    %18 = vector.load %arg1[%c0_1, %c0_2] : memref<8x32xf32, #tpu.memory_space<vmem>>, vector<8x32xf32>
    tpu.vector_store %arg1[%c0_1, %c0_2], %17 {strides = array<i32>} : memref<8x32xf32, #tpu.memory_space<vmem>>, vector<8x32xf32>,
    return
  }
}

module attributes {stable_mosaic.version = 11 : i64} {
  func.func @_conv_mm_kernel(%arg0: memref<8x32xbf16, #tpu.memory_space<vmem>>, %arg1: memref<32x32xbf16, #tpu.memory_space<vmem>>, %arg2: memref<1x32xf32, #tpu.memory_space<vmem>>, %arg3: memref<8x32xf32, #tpu.memory_space<vmem>>) attributes {dimension_semantics = [], scalar_prefetch = 0 : i64, scratch_operands = 0 : i64, tpu.core_type = #tpu.core_type<tc>} {
    %c0 = arith.constant 0 : index
    %c0_0 = arith.constant 0 : index
    %0 = vector.load %arg0[%c0, %c0_0] : memref<8x32xbf16, #tpu.memory_space<vmem>>, vector<8x32xbf16>
    %c0_1 = arith.constant 0 : index
    %c0_2 = arith.constant 0 : index
    %1 = vector.load %arg1[%c0_1, %c0_2] : memref<32x32xbf16, #tpu.memory_space<vmem>>, vector<32x32xbf16>
    %cst = arith.constant dense<0.000000e+00> : vector<8x32xf32>
    %2 = tpu.matmul %0, %1, %cst {dimension_numbers = #tpu.dot_dimension_numbers<[1], [0], [0], [1], [0, 0, 1, 1], [], []>} : vector<8x32xbf16>, vector<32x32xbf16>, vector<8x32xf32> -> vector<8x32xf32>
    %c0_3 = arith.constant 0 : index
    %c0_4 = arith.constant 0 : index
    %3 = vector.load %arg2[%c0_3, %c0_4] : memref<1x32xf32, #tpu.memory_space<vmem>>, vector<1x32xf32>
    %4 = vector.broadcast %3 : vector<1x32xf32> to vector<8x32xf32>
    %5 = arith.addf %2, %4 : vector<8x32xf32>
    %cst_5 = arith.constant 0.000000e+00 : f32
    %6 = vector.broadcast %cst_5 : f32 to vector<8x32xf32>
    %7 = arith.maximumf %5, %6 : vector<8x32xf32>
    %c0_6 = arith.constant 0 : index
    %c0_7 = arith.constant 0 : index
    %8 = vector.load %arg3[%c0_6, %c0_7] : memref<8x32xf32, #tpu.memory_space<vmem>>, vector<8x32xf32>
    tpu.vector_store %arg3[%c0_6, %c0_7], %7 {strides = array<i32>} : memref<8x32xf32, #tpu.memory_space<vmem>>, vector<8x32xf32>,
    return
  }
}

module attributes {stable_mosaic.version = 11 : i64} {
  func.func @_conv_mm_kernel(%arg0: memref<8x288xbf16, #tpu.memory_space<vmem>>, %arg1: memref<288x28xbf16, #tpu.memory_space<vmem>>, %arg2: memref<1x28xf32, #tpu.memory_space<vmem>>, %arg3: memref<8x28xf32, #tpu.memory_space<vmem>>) attributes {dimension_semantics = [], scalar_prefetch = 0 : i64, scratch_operands = 0 : i64, tpu.core_type = #tpu.core_type<tc>} {
    %c0 = arith.constant 0 : index
    %c0_0 = arith.constant 0 : index
    %0 = vector.load %arg0[%c0, %c0_0] : memref<8x288xbf16, #tpu.memory_space<vmem>>, vector<8x288xbf16>
    %c0_1 = arith.constant 0 : index
    %c0_2 = arith.constant 0 : index
    %1 = vector.load %arg1[%c0_1, %c0_2] : memref<288x28xbf16, #tpu.memory_space<vmem>>, vector<288x28xbf16>
    %cst = arith.constant dense<0.000000e+00> : vector<8x28xf32>
    %2 = tpu.matmul %0, %1, %cst {dimension_numbers = #tpu.dot_dimension_numbers<[1], [0], [0], [1], [0, 0, 1, 1], [], []>} : vector<8x288xbf16>, vector<288x28xbf16>, vector<8x28xf32> -> vector<8x28xf32>
    %c0_3 = arith.constant 0 : index
    %c0_4 = arith.constant 0 : index
    %3 = vector.load %arg2[%c0_3, %c0_4] : memref<1x28xf32, #tpu.memory_space<vmem>>, vector<1x28xf32>
    %4 = vector.broadcast %3 : vector<1x28xf32> to vector<8x28xf32>
    %5 = arith.addf %2, %4 : vector<8x28xf32>
    %c0_5 = arith.constant 0 : index
    %c0_6 = arith.constant 0 : index
    %6 = vector.load %arg3[%c0_5, %c0_6] : memref<8x28xf32, #tpu.memory_space<vmem>>, vector<8x28xf32>
    tpu.vector_store %arg3[%c0_5, %c0_6], %5 {strides = array<i32>} : memref<8x28xf32, #tpu.memory_space<vmem>>, vector<8x28xf32>,
    return
  }
}

module attributes {stable_mosaic.version = 11 : i64} {
  func.func @_conv_mm_kernel(%arg0: memref<8x32xbf16, #tpu.memory_space<vmem>>, %arg1: memref<32x16xbf16, #tpu.memory_space<vmem>>, %arg2: memref<1x16xf32, #tpu.memory_space<vmem>>, %arg3: memref<8x16xf32, #tpu.memory_space<vmem>>) attributes {dimension_semantics = [], scalar_prefetch = 0 : i64, scratch_operands = 0 : i64, tpu.core_type = #tpu.core_type<tc>} {
    %c0 = arith.constant 0 : index
    %c0_0 = arith.constant 0 : index
    %0 = vector.load %arg0[%c0, %c0_0] : memref<8x32xbf16, #tpu.memory_space<vmem>>, vector<8x32xbf16>
    %c0_1 = arith.constant 0 : index
    %c0_2 = arith.constant 0 : index
    %1 = vector.load %arg1[%c0_1, %c0_2] : memref<32x16xbf16, #tpu.memory_space<vmem>>, vector<32x16xbf16>
    %cst = arith.constant dense<0.000000e+00> : vector<8x16xf32>
    %2 = tpu.matmul %0, %1, %cst {dimension_numbers = #tpu.dot_dimension_numbers<[1], [0], [0], [1], [0, 0, 1, 1], [], []>} : vector<8x32xbf16>, vector<32x16xbf16>, vector<8x16xf32> -> vector<8x16xf32>
    %c0_3 = arith.constant 0 : index
    %c0_4 = arith.constant 0 : index
    %3 = vector.load %arg2[%c0_3, %c0_4] : memref<1x16xf32, #tpu.memory_space<vmem>>, vector<1x16xf32>
    %4 = vector.broadcast %3 : vector<1x16xf32> to vector<8x16xf32>
    %5 = arith.addf %2, %4 : vector<8x16xf32>
    %cst_5 = arith.constant 0.000000e+00 : f32
    %6 = vector.broadcast %cst_5 : f32 to vector<8x16xf32>
    %7 = arith.maximumf %5, %6 : vector<8x16xf32>
    %c0_6 = arith.constant 0 : index
    %c0_7 = arith.constant 0 : index
    %8 = vector.load %arg3[%c0_6, %c0_7] : memref<8x16xf32, #tpu.memory_space<vmem>>, vector<8x16xf32>
    tpu.vector_store %arg3[%c0_6, %c0_7], %7 {strides = array<i32>} : memref<8x16xf32, #tpu.memory_space<vmem>>, vector<8x16xf32>,
    return
  }
}

module attributes {stable_mosaic.version = 11 : i64} {
  func.func @_conv_mm_kernel(%arg0: memref<2x144xbf16, #tpu.memory_space<vmem>>, %arg1: memref<144x32xbf16, #tpu.memory_space<vmem>>, %arg2: memref<1x32xf32, #tpu.memory_space<vmem>>, %arg3: memref<2x32xf32, #tpu.memory_space<vmem>>) attributes {dimension_semantics = [], scalar_prefetch = 0 : i64, scratch_operands = 0 : i64, tpu.core_type = #tpu.core_type<tc>} {
    %c0 = arith.constant 0 : index
    %c0_0 = arith.constant 0 : index
    %0 = vector.load %arg0[%c0, %c0_0] : memref<2x144xbf16, #tpu.memory_space<vmem>>, vector<2x144xbf16>
    %c0_1 = arith.constant 0 : index
    %c0_2 = arith.constant 0 : index
    %1 = vector.load %arg1[%c0_1, %c0_2] : memref<144x32xbf16, #tpu.memory_space<vmem>>, vector<144x32xbf16>
    %cst = arith.constant dense<0.000000e+00> : vector<2x32xf32>
    %2 = tpu.matmul %0, %1, %cst {dimension_numbers = #tpu.dot_dimension_numbers<[1], [0], [0], [1], [0, 0, 1, 1], [], []>} : vector<2x144xbf16>, vector<144x32xbf16>, vector<2x32xf32> -> vector<2x32xf32>
    %c0_3 = arith.constant 0 : index
    %c0_4 = arith.constant 0 : index
    %3 = vector.load %arg2[%c0_3, %c0_4] : memref<1x32xf32, #tpu.memory_space<vmem>>, vector<1x32xf32>
    %4 = vector.broadcast %3 : vector<1x32xf32> to vector<2x32xf32>
    %5 = arith.addf %2, %4 : vector<2x32xf32>
    %c0_5 = arith.constant 0 : index
    %c0_6 = arith.constant 0 : index
    %6 = vector.load %arg3[%c0_5, %c0_6] : memref<2x32xf32, #tpu.memory_space<vmem>>, vector<2x32xf32>
    tpu.vector_store %arg3[%c0_5, %c0_6], %5 {strides = array<i32>} : memref<2x32xf32, #tpu.memory_space<vmem>>, vector<2x32xf32>,
    return
  }
}

module attributes {stable_mosaic.version = 11 : i64} {
  func.func @_conv_mm_kernel(%arg0: memref<2x32xbf16, #tpu.memory_space<vmem>>, %arg1: memref<32x16xbf16, #tpu.memory_space<vmem>>, %arg2: memref<1x16xf32, #tpu.memory_space<vmem>>, %arg3: memref<2x16xf32, #tpu.memory_space<vmem>>) attributes {dimension_semantics = [], scalar_prefetch = 0 : i64, scratch_operands = 0 : i64, tpu.core_type = #tpu.core_type<tc>} {
    %c0 = arith.constant 0 : index
    %c0_0 = arith.constant 0 : index
    %0 = vector.load %arg0[%c0, %c0_0] : memref<2x32xbf16, #tpu.memory_space<vmem>>, vector<2x32xbf16>
    %c0_1 = arith.constant 0 : index
    %c0_2 = arith.constant 0 : index
    %1 = vector.load %arg1[%c0_1, %c0_2] : memref<32x16xbf16, #tpu.memory_space<vmem>>, vector<32x16xbf16>
    %cst = arith.constant dense<0.000000e+00> : vector<2x16xf32>
    %2 = tpu.matmul %0, %1, %cst {dimension_numbers = #tpu.dot_dimension_numbers<[1], [0], [0], [1], [0, 0, 1, 1], [], []>} : vector<2x32xbf16>, vector<32x16xbf16>, vector<2x16xf32> -> vector<2x16xf32>
    %c0_3 = arith.constant 0 : index
    %c0_4 = arith.constant 0 : index
    %3 = vector.load %arg2[%c0_3, %c0_4] : memref<1x16xf32, #tpu.memory_space<vmem>>, vector<1x16xf32>
    %4 = vector.broadcast %3 : vector<1x16xf32> to vector<2x16xf32>
    %5 = arith.addf %2, %4 : vector<2x16xf32>
    %cst_5 = arith.constant 0.000000e+00 : f32
    %6 = vector.broadcast %cst_5 : f32 to vector<2x16xf32>
    %7 = arith.maximumf %5, %6 : vector<2x16xf32>
    %c0_6 = arith.constant 0 : index
    %c0_7 = arith.constant 0 : index
    %8 = vector.load %arg3[%c0_6, %c0_7] : memref<2x16xf32, #tpu.memory_space<vmem>>, vector<2x16xf32>
    tpu.vector_store %arg3[%c0_6, %c0_7], %7 {strides = array<i32>} : memref<2x16xf32, #tpu.memory_space<vmem>>, vector<2x16xf32>,
    return
  }
}

module attributes {stable_mosaic.version = 11 : i64} {
  func.func @_conv_mm_kernel(%arg0: memref<2x288xbf16, #tpu.memory_space<vmem>>, %arg1: memref<288x28xbf16, #tpu.memory_space<vmem>>, %arg2: memref<1x28xf32, #tpu.memory_space<vmem>>, %arg3: memref<2x28xf32, #tpu.memory_space<vmem>>) attributes {dimension_semantics = [], scalar_prefetch = 0 : i64, scratch_operands = 0 : i64, tpu.core_type = #tpu.core_type<tc>} {
    %c0 = arith.constant 0 : index
    %c0_0 = arith.constant 0 : index
    %0 = vector.load %arg0[%c0, %c0_0] : memref<2x288xbf16, #tpu.memory_space<vmem>>, vector<2x288xbf16>
    %c0_1 = arith.constant 0 : index
    %c0_2 = arith.constant 0 : index
    %1 = vector.load %arg1[%c0_1, %c0_2] : memref<288x28xbf16, #tpu.memory_space<vmem>>, vector<288x28xbf16>
    %cst = arith.constant dense<0.000000e+00> : vector<2x28xf32>
    %2 = tpu.matmul %0, %1, %cst {dimension_numbers = #tpu.dot_dimension_numbers<[1], [0], [0], [1], [0, 0, 1, 1], [], []>} : vector<2x288xbf16>, vector<288x28xbf16>, vector<2x28xf32> -> vector<2x28xf32>
    %c0_3 = arith.constant 0 : index
    %c0_4 = arith.constant 0 : index
    %3 = vector.load %arg2[%c0_3, %c0_4] : memref<1x28xf32, #tpu.memory_space<vmem>>, vector<1x28xf32>
    %4 = vector.broadcast %3 : vector<1x28xf32> to vector<2x28xf32>
    %5 = arith.addf %2, %4 : vector<2x28xf32>
    %c0_5 = arith.constant 0 : index
    %c0_6 = arith.constant 0 : index
    %6 = vector.load %arg3[%c0_5, %c0_6] : memref<2x28xf32, #tpu.memory_space<vmem>>, vector<2x28xf32>
    tpu.vector_store %arg3[%c0_5, %c0_6], %5 {strides = array<i32>} : memref<2x28xf32, #tpu.memory_space<vmem>>, vector<2x28xf32>,
    return
  }
}

</mosaic_0001>

<bundles_post_ra>
// kernel: _lambda_.28
= control target key start
LH: loop header
LB: loop body
LE: loop exit
PB: predicated region body
PF: predicated region fallthrough
CT: control target
= control target key end

     0   :  { %vm1318_vm0 = vcmask 1044480   ;;  %vm1319_vm1 = vcmask 1045504   ;;  %vm933_vm2 = vcmask 220160   ;;  %v3685_v1 = vmov 65535   ;;  %s5509_s1 = inlined_call_operand.vmem [shape: bf16[27,8], index: 1, kind: input, shape index: {}]   ;;  %s5510_s0 = inlined_call_operand.vmem [shape: bf16[2048,27], index: 0, kind: input, shape index: {}]   ;;  %s5511_s2 = inlined_call_operand.vmem [shape: f32[1,8], index: 2, kind: input, shape index: {}]   ;;  %s5512_s3 = inlined_call_operand.vmem [shape: f32[2048,8], index: 3, kind: output, shape index: {}]  }
   0x1   :  { %v3553_v0 = vld [vmem:[%s5509_s1] sm:$0xff]   ;;  %v1320_v2 = vsel %vm1318_vm0, 4294967295, %v3685_v1  ;;  %v3554_v3 = vld [vmem:[%s5509_s1 + $0x8] sm:$0x3f]   ;;  %v3559_v10 = vld [vmem:[%s5510_s0 + $0x10] sm:$0xff]   ;;  %vm2638_vm3 = vcmask 64512  }
   0x2   :  { %3288 = vmatprep.subr.bf16.mxu0 %v3553_v0  ;;  %3548 = vmatprep.subr.bf16.mxu1 %v3553_v0  ;;  %v1321_v4 = vsel %vm1319_vm1, %v1320_v2, 0  ;;  %v3555_v5 = vld [vmem:[%s5510_s0] sm:$0xff]   ;;  %v3557_v8 = vld [vmem:[%s5510_s0 + $0x8] sm:$0xff]   ;;  %v3560_v11 = vld [vmem:[%s5510_s0 + $0x210] sm:$0xff]  }
   0x3   :  { %3289 = vmatpush3.bf16.msra.mxu0 %v3553_v0  ;;  %3550 = vmatpush3.bf16.msra.mxu1 %v3553_v0  ;;  %v1323_v6 = vand.u32 %v3554_v3, %v1321_v4  ;;  %v3556_v7 = vld [vmem:[%s5510_s0 + $0x200] sm:$0xff]   ;;  %v3558_v9 = vld [vmem:[%s5510_s0 + $0x208] sm:$0xff]   ;;  %v3561_v12 = vld [vmem:[%s5510_s0 + $0x18] sm:$0xff]  }
   0x4   :  { %3292 = vmatprep.mubr.msk.bf16.mxu0 %vm933_vm2, %v3555_v5  ;;  %3420 = vmatprep.mubr.msk.bf16.mxu1 %vm933_vm2, %v3556_v7  ;;  %v3562_v13 = vld [vmem:[%s5510_s0 + $0x218] sm:$0xff]   ;;  %v3563_v14 = vld [vmem:[%s5510_s0 + $0x20] sm:$0xff]   ;;  %v3565_v16 = vld [vmem:[%s5510_s0 + $0x28] sm:$0xff]  }
   0x5   :  { %3290 = vmatprep.subr.bf16.mxu0 %v1323_v6  ;;  %3549 = vmatprep.subr.bf16.mxu1 %v1323_v6  ;;  %v3564_v15 = vld [vmem:[%s5510_s0 + $0x220] sm:$0xff]   ;;  %v3566_v17 = vld [vmem:[%s5510_s0 + $0x228] sm:$0xff]   ;;  %v3567_v18 = vld [vmem:[%s5510_s0 + $0x30] sm:$0xff]  }
   0x6   :  { %v3568_v19 = vld [vmem:[%s5510_s0 + $0x230] sm:$0xff]   ;;  %v3569_v20 = vld [vmem:[%s5510_s0 + $0x38] sm:$0xff]   ;;  %v3571_v22 = vld [vmem:[%s5510_s0 + $0x40] sm:$0xff]  }
   0x7   :  { %3291 = vmatpush3.bf16.msra.mxu0 %v1323_v6  ;;  %3551 = vmatpush3.bf16.msra.mxu1 %v1323_v6  ;;  %v3570_v21 = vld [vmem:[%s5510_s0 + $0x238] sm:$0xff]   ;;  %v3572_v23 = vld [vmem:[%s5510_s0 + $0x240] sm:$0xff]   ;;  %v3573_v24 = vld [vmem:[%s5510_s0 + $0x48] sm:$0xff]  }
   0x8   :  { %v3574_v25 = vld [vmem:[%s5510_s0 + $0x248] sm:$0xff]   ;;  %v3575_v26 = vld [vmem:[%s5510_s0 + $0x50] sm:$0xff]   ;;  %v3577_v28 = vld [vmem:[%s5510_s0 + $0x58] sm:$0xff]  }
   0x9   :  { %v3576_v27 = vld [vmem:[%s5510_s0 + $0x250] sm:$0xff]   ;;  %v3578_v29 = vld [vmem:[%s5510_s0 + $0x258] sm:$0xff]   ;;  %v3579_v30 = vld [vmem:[%s5510_s0 + $0x60] sm:$0xff]  }
   0xa   :  { %3293 = vmatmul.mubr.msk.bf16.vlgmr.msra.gmra.mrb[0].mxu0 %vm933_vm2, %v3557_v8  ;;  %3421 = vmatmul.mubr.msk.bf16.vlgmr.msra.gmra.mrb[0].mxu1 %vm933_vm2, %v3558_v9  ;;  %v3580_v31 = vld [vmem:[%s5510_s0 + $0x260] sm:$0xff]   ;;  %v3581_v32 = vld [vmem:[%s5510_s0 + $0x68] sm:$0xff]   ;;  %v3583_v34 = vld [vmem:[%s5510_s0 + $0x70] sm:$0xff]  }
   0xb   :  { %3296 = vmatprep.mubr.msk.bf16.mxu0 %vm933_vm2, %v3559_v10  ;;  %3424 = vmatprep.mubr.msk.bf16.mxu1 %vm933_vm2, %v3560_v11  ;;  %v3582_v33 = vld [vmem:[%s5510_s0 + $0x268] sm:$0xff]   ;;  %v3584_v35 = vld [vmem:[%s5510_s0 + $0x270] sm:$0xff]   ;;  %v3585_v36 = vld [vmem:[%s5510_s0 + $0x78] sm:$0xff]  }
   0xc   :  { %v3586_v37 = vld [vmem:[%s5510_s0 + $0x278] sm:$0xff]   ;;  %v3587_v38 = vld [vmem:[%s5510_s0 + $0x80] sm:$0xff]   ;;  %v3589_v40 = vld [vmem:[%s5510_s0 + $0x88] sm:$0xff]  }
   0xd   :  { %v3588_v39 = vld [vmem:[%s5510_s0 + $0x280] sm:$0xff]   ;;  %v3590_v41 = vld [vmem:[%s5510_s0 + $0x288] sm:$0xff]   ;;  %v3591_v42 = vld [vmem:[%s5510_s0 + $0x90] sm:$0xff]  }
   0xe   :  { %v3592_v43 = vld [vmem:[%s5510_s0 + $0x290] sm:$0xff]   ;;  %v3593_v44 = vld [vmem:[%s5510_s0 + $0x98] sm:$0xff]   ;;  %v3595_v46 = vld [vmem:[%s5510_s0 + $0xa0] sm:$0xff]  }
   0xf   :  { %v3594_v45 = vld [vmem:[%s5510_s0 + $0x298] sm:$0xff]   ;;  %v3596_v47 = vld [vmem:[%s5510_s0 + $0x2a0] sm:$0xff]   ;;  %v3597_v48 = vld [vmem:[%s5510_s0 + $0xa8] sm:$0xff]  }
  0x10   :  { %v3598_v49 = vld [vmem:[%s5510_s0 + $0x2a8] sm:$0xff]   ;;  %v3599_v50 = vld [vmem:[%s5510_s0 + $0xb0] sm:$0xff]   ;;  %v3601_v52 = vld [vmem:[%s5510_s0 + $0xb8] sm:$0xff]  }
  0x11   :  { %v3600_v51 = vld [vmem:[%s5510_s0 + $0x2b0] sm:$0xff]   ;;  %v3602_v53 = vld [vmem:[%s5510_s0 + $0x2b8] sm:$0xff]   ;;  %v3603_v54 = vld [vmem:[%s5510_s0 + $0xc0] sm:$0xff]  }
  0x12   :  { %3297 = vmatmul.mubr.msk.bf16.gmra.mrb[4].mxu0 %vm933_vm2, %v3561_v12  ;;  %3425 = vmatmul.mubr.msk.bf16.gmra.mrb[4].mxu1 %vm933_vm2, %v3562_v13  ;;  %v3604_v55 = vld [vmem:[%s5510_s0 + $0x2c0] sm:$0xff]   ;;  %v3605_v56 = vld [vmem:[%s5510_s0 + $0xc8] sm:$0xff]   ;;  %v3607_v58 = vld [vmem:[%s5510_s0 + $0xd0] sm:$0xff]  }
  0x13   :  { %3300 = vmatprep.mubr.msk.bf16.mxu0 %vm933_vm2, %v3563_v14  ;;  %3428 = vmatprep.mubr.msk.bf16.mxu1 %vm933_vm2, %v3564_v15  ;;  %v3606_v57 = vld [vmem:[%s5510_s0 + $0x2c8] sm:$0xff]   ;;  %v3608_v59 = vld [vmem:[%s5510_s0 + $0x2d0] sm:$0xff]   ;;  %v3609_v60 = vld [vmem:[%s5510_s0 + $0xd8] sm:$0xff]  }
  0x14   :  { %v3610_v61 = vld [vmem:[%s5510_s0 + $0x2d8] sm:$0xff]   ;;  %v3611_v62 = vld [vmem:[%s5510_s0 + $0xe0] sm:$0xff]   ;;  %v3613_v0 = vld [vmem:[%s5510_s0 + $0xe8] sm:$0xff]  }
  0x15   :  { %v3612_v63 = vld [vmem:[%s5510_s0 + $0x2e0] sm:$0xff]   ;;  %v3614_v1 = vld [vmem:[%s5510_s0 + $0x2e8] sm:$0xff]   ;;  %v3615_v2 = vld [vmem:[%s5510_s0 + $0xf0] sm:$0xff]  }
  0x16   :  { %v3616_v3 = vld [vmem:[%s5510_s0 + $0x2f0] sm:$0xff]   ;;  %v3617_v4 = vld [vmem:[%s5510_s0 + $0xf8] sm:$0xff]   ;;  %v3619_v6 = vld [vmem:[%s5510_s0 + $0x100] sm:$0xff]  }
  0x17   :  { %v3618_v5 = vld [vmem:[%s5510_s0 + $0x2f8] sm:$0xff]   ;;  %v3620_v7 = vld [vmem:[%s5510_s0 + $0x300] sm:$0xff]   ;;  %v3621_v8 = vld [vmem:[%s5510_s0 + $0x108] sm:$0xff]  }
  0x18   :  { %v3622_v9 = vld [vmem:[%s5510_s0 + $0x308] sm:$0xff]   ;;  %v3623_v10 = vld [vmem:[%s5510_s0 + $0x110] sm:$0xff]   ;;  %v3625_v12 = vld [vmem:[%s5510_s0 + $0x118] sm:$0xff]  }
  0x19   :  { %v3624_v11 = vld [vmem:[%s5510_s0 + $0x310] sm:$0xff]   ;;  %v3626_v13 = vld [vmem:[%s5510_s0 + $0x318] sm:$0xff]   ;;  %v3627_v14 = vld [vmem:[%s5510_s0 + $0x120] sm:$0xff]  }
  0x1a   :  { %3301 = vmatmul.mubr.msk.bf16.gmra.mrb[8].mxu0 %vm933_vm2, %v3565_v16  ;;  %3429 = vmatmul.mubr.msk.bf16.gmra.mrb[8].mxu1 %vm933_vm2, %v3566_v17  ;;  %v3628_v15 = vld [vmem:[%s5510_s0 + $0x320] sm:$0xff]   ;;  %v3629_v16 = vld [vmem:[%s5510_s0 + $0x128] sm:$0xff]  }
  0x1b   :  { %3304 = vmatprep.mubr.msk.bf16.mxu0 %vm933_vm2, %v3567_v18  ;;  %3432 = vmatprep.mubr.msk.bf16.mxu1 %vm933_vm2, %v3568_v19  ;;  %v3630_v17 = vld [vmem:[%s5510_s0 + $0x328] sm:$0xff]   ;;  %v3631_v18 = vld [vmem:[%s5510_s0 + $0x130] sm:$0xff]  }
  0x1c   :  { %v3632_v19 = vld [vmem:[%s5510_s0 + $0x330] sm:$0xff]  }
  0x22   :  { %3305 = vmatmul.mubr.msk.bf16.gmra.mrb[12].mxu0 %vm933_vm2, %v3569_v20  ;;  %3433 = vmatmul.mubr.msk.bf16.gmra.mrb[12].mxu1 %vm933_vm2, %v3570_v21  ;;  %v3633_v20 = vld [vmem:[%s5510_s0 + $0x138] sm:$0xff]  }
  0x23   :  { %3308 = vmatprep.mubr.msk.bf16.mxu0 %vm933_vm2, %v3571_v22  ;;  %3436 = vmatprep.mubr.msk.bf16.mxu1 %vm933_vm2, %v3572_v23  ;;  %v3634_v21 = vld [vmem:[%s5510_s0 + $0x338] sm:$0xff]   ;;  %v3635_v22 = vld [vmem:[%s5510_s0 + $0x140] sm:$0xff]  }
  0x24   :  { %v3636_v23 = vld [vmem:[%s5510_s0 + $0x340] sm:$0xff]  }
  0x2a   :  { %3309 = vmatmul.mubr.msk.bf16.gmra.mrb[16].mxu0 %vm933_vm2, %v3573_v24  ;;  %3437 = vmatmul.mubr.msk.bf16.gmra.mrb[16].mxu1 %vm933_vm2, %v3574_v25  ;;  %v3637_v24 = vld [vmem:[%s5510_s0 + $0x148] sm:$0xff]  }
  0x2b   :  { %3312 = vmatprep.mubr.msk.bf16.mxu0 %vm933_vm2, %v3575_v26  ;;  %3440 = vmatprep.mubr.msk.bf16.mxu1 %vm933_vm2, %v3576_v27  ;;  %v3638_v25 = vld [vmem:[%s5510_s0 + $0x348] sm:$0xff]   ;;  %v3639_v26 = vld [vmem:[%s5510_s0 + $0x150] sm:$0xff]  }
  0x2c   :  { %v3640_v27 = vld [vmem:[%s5510_s0 + $0x350] sm:$0xff]  }
  0x32   :  { %3313 = vmatmul.mubr.msk.bf16.gmra.mrb[20].mxu0 %vm933_vm2, %v3577_v28  ;;  %3441 = vmatmul.mubr.msk.bf16.gmra.mrb[20].mxu1 %vm933_vm2, %v3578_v29  ;;  %v3641_v28 = vld [vmem:[%s5510_s0 + $0x158] sm:$0xff]  }
  0x33   :  { %3316 = vmatprep.mubr.msk.bf16.mxu0 %vm933_vm2, %v3579_v30  ;;  %3444 = vmatprep.mubr.msk.bf16.mxu1 %vm933_vm2, %v3580_v31  ;;  %v3642_v29 = vld [vmem:[%s5510_s0 + $0x358] sm:$0xff]   ;;  %v3643_v30 = vld [vmem:[%s5510_s0 + $0x160] sm:$0xff]  }
  0x34   :  { %v3644_v31 = vld [vmem:[%s5510_s0 + $0x360] sm:$0xff]  }
  0x3a   :  { %3317 = vmatmul.mubr.msk.bf16.gmra.mrb[24].mxu0 %vm933_vm2, %v3581_v32  ;;  %3445 = vmatmul.mubr.msk.bf16.gmra.mrb[24].mxu1 %vm933_vm2, %v3582_v33  ;;  %v3645_v32 = vld [vmem:[%s5510_s0 + $0x168] sm:$0xff]  }
  0x3b   :  { %3320 = vmatprep.mubr.msk.bf16.mxu0 %vm933_vm2, %v3583_v34  ;;  %3448 = vmatprep.mubr.msk.bf16.mxu1 %vm933_vm2, %v3584_v35  ;;  %v3646_v33 = vld [vmem:[%s5510_s0 + $0x368] sm:$0xff]   ;;  %v3647_v34 = vld [vmem:[%s5510_s0 + $0x170] sm:$0xff]  }
  0x3c   :  { %v3648_v35 = vld [vmem:[%s5510_s0 + $0x370] sm:$0xff]  }
  0x42   :  { %3321 = vmatmul.mubr.msk.bf16.gmra.mrb[28].mxu0 %vm933_vm2, %v3585_v36  ;;  %3449 = vmatmul.mubr.msk.bf16.gmra.mrb[28].mxu1 %vm933_vm2, %v3586_v37  ;;  %v3649_v36 = vld [vmem:[%s5510_s0 + $0x178] sm:$0xff]  }
  0x43   :  { %3324 = vmatprep.mubr.msk.bf16.mxu0 %vm933_vm2, %v3587_v38  ;;  %3452 = vmatprep.mubr.msk.bf16.mxu1 %vm933_vm2, %v3588_v39  ;;  %v3650_v37 = vld [vmem:[%s5510_s0 + $0x378] sm:$0xff]   ;;  %v3651_v38 = vld [vmem:[%s5510_s0 + $0x180] sm:$0xff]  }
  0x44   :  { %v3652_v39 = vld [vmem:[%s5510_s0 + $0x380] sm:$0xff]  }
  0x4a   :  { %3325 = vmatmul.mubr.msk.bf16.gmra.mrb[32].mxu0 %vm933_vm2, %v3589_v40  ;;  %3453 = vmatmul.mubr.msk.bf16.gmra.mrb[32].mxu1 %vm933_vm2, %v3590_v41  ;;  %v3653_v40 = vld [vmem:[%s5510_s0 + $0x188] sm:$0xff]  }
  0x4b   :  { %3328 = vmatprep.mubr.msk.bf16.mxu0 %vm933_vm2, %v3591_v42  ;;  %3456 = vmatprep.mubr.msk.bf16.mxu1 %vm933_vm2, %v3592_v43  ;;  %v3654_v41 = vld [vmem:[%s5510_s0 + $0x388] sm:$0xff]   ;;  %v3655_v42 = vld [vmem:[%s5510_s0 + $0x190] sm:$0xff]  }
  0x4c   :  { %v3656_v43 = vld [vmem:[%s5510_s0 + $0x390] sm:$0xff]  }
  0x52   :  { %3329 = vmatmul.mubr.msk.bf16.gmra.mrb[36].mxu0 %vm933_vm2, %v3593_v44  ;;  %3457 = vmatmul.mubr.msk.bf16.gmra.mrb[36].mxu1 %vm933_vm2, %v3594_v45  ;;  %v3657_v44 = vld [vmem:[%s5510_s0 + $0x198] sm:$0xff]  }
  0x53   :  { %3332 = vmatprep.mubr.msk.bf16.mxu0 %vm933_vm2, %v3595_v46  ;;  %3460 = vmatprep.mubr.msk.bf16.mxu1 %vm933_vm2, %v3596_v47  ;;  %v3658_v45 = vld [vmem:[%s5510_s0 + $0x398] sm:$0xff]   ;;  %v3659_v46 = vld [vmem:[%s5510_s0 + $0x1a0] sm:$0xff]  }
  0x54   :  { %v3660_v47 = vld [vmem:[%s5510_s0 + $0x3a0] sm:$0xff]  }
  0x5a   :  { %3333 = vmatmul.mubr.msk.bf16.gmra.mrb[40].mxu0 %vm933_vm2, %v3597_v48  ;;  %3461 = vmatmul.mubr.msk.bf16.gmra.mrb[40].mxu1 %vm933_vm2, %v3598_v49  ;;  %v3661_v48 = vld [vmem:[%s5510_s0 + $0x1a8] sm:$0xff]  }
  0x5b   :  { %3336 = vmatprep.mubr.msk.bf16.mxu0 %vm933_vm2, %v3599_v50  ;;  %3464 = vmatprep.mubr.msk.bf16.mxu1 %vm933_vm2, %v3600_v51  ;;  %v3662_v49 = vld [vmem:[%s5510_s0 + $0x3a8] sm:$0xff]   ;;  %v3663_v50 = vld [vmem:[%s5510_s0 + $0x1b0] sm:$0xff]  }
  0x5c   :  { %v3664_v51 = vld [vmem:[%s5510_s0 + $0x3b0] sm:$0xff]  }
  0x62   :  { %3337 = vmatmul.mubr.msk.bf16.gmra.mrb[44].mxu0 %vm933_vm2, %v3601_v52  ;;  %3465 = vmatmul.mubr.msk.bf16.gmra.mrb[44].mxu1 %vm933_vm2, %v3602_v53  ;;  %v4153_v52 = vld [vmem:[%s5511_s2] ss:$0 sm:$0xff] }
  0x63   :  { %3340 = vmatprep.mubr.msk.bf16.mxu0 %vm933_vm2, %v3603_v54  ;;  %3468 = vmatprep.mubr.msk.bf16.mxu1 %vm933_vm2, %v3604_v55 }
  0x6a   :  { %3341 = vmatmul.mubr.msk.bf16.gmra.mrb[48].mxu0 %vm933_vm2, %v3605_v56  ;;  %3469 = vmatmul.mubr.msk.bf16.gmra.mrb[48].mxu1 %vm933_vm2, %v3606_v57 }
  0x6b   :  { %3344 = vmatprep.mubr.msk.bf16.mxu0 %vm933_vm2, %v3607_v58  ;;  %3472 = vmatprep.mubr.msk.bf16.mxu1 %vm933_vm2, %v3608_v59  ;;  %v3665_v59 = vld [vmem:[%s5510_s0 + $0x1b8] sm:$0xff]  }
  0x72   :  { %3345 = vmatmul.mubr.msk.bf16.gmra.mrb[52].mxu0 %vm933_vm2, %v3609_v60  ;;  %3473 = vmatmul.mubr.msk.bf16.gmra.mrb[52].mxu1 %vm933_vm2, %v3610_v61  ;;  %v3666_v60 = vld [vmem:[%s5510_s0 + $0x3b8] sm:$0xff]  }
  0x73   :  { %3348 = vmatprep.mubr.msk.bf16.mxu0 %vm933_vm2, %v3611_v62  ;;  %3476 = vmatprep.mubr.msk.bf16.mxu1 %vm933_vm2, %v3612_v63 }
  0x7a   :  { %3349 = vmatmul.mubr.msk.bf16.gmra.mrb[56].mxu0 %vm933_vm2, %v3613_v0  ;;  %3477 = vmatmul.mubr.msk.bf16.gmra.mrb[56].mxu1 %vm933_vm2, %v3614_v1  ;;  %v3667_v1 = vld [vmem:[%s5510_s0 + $0x1c0] sm:$0xff]  }
  0x7b   :  { %3352 = vmatprep.mubr.msk.bf16.mxu0 %vm933_vm2, %v3615_v2  ;;  %3480 = vmatprep.mubr.msk.bf16.mxu1 %vm933_vm2, %v3616_v3  ;;  %v3668_v2 = vld [vmem:[%s5510_s0 + $0x3c0] sm:$0xff]  }
  0x82   :  { %3353 = vmatmul.mubr.msk.bf16.gmra.mrb[60].mxu0 %vm933_vm2, %v3617_v4  ;;  %3481 = vmatmul.mubr.msk.bf16.gmra.mrb[60].mxu1 %vm933_vm2, %v3618_v5 }
  0x83   :  { %3356 = vmatprep.mubr.msk.bf16.mxu0 %vm933_vm2, %v3619_v6  ;;  %3484 = vmatprep.mubr.msk.bf16.mxu1 %vm933_vm2, %v3620_v7 }
  0x8a   :  { %3357 = vmatmul.mubr.msk.bf16.gmra.mrb[64].mxu0 %vm933_vm2, %v3621_v8  ;;  %3485 = vmatmul.mubr.msk.bf16.gmra.mrb[64].mxu1 %vm933_vm2, %v3622_v9 }
  0x8b   :  { %3360 = vmatprep.mubr.msk.bf16.mxu0 %vm933_vm2, %v3623_v10  ;;  %3488 = vmatprep.mubr.msk.bf16.mxu1 %vm933_vm2, %v3624_v11 }
  0x92   :  { %3361 = vmatmul.mubr.msk.bf16.gmra.mrb[68].mxu0 %vm933_vm2, %v3625_v12  ;;  %3489 = vmatmul.mubr.msk.bf16.gmra.mrb[68].mxu1 %vm933_vm2, %v3626_v13 }
  0x93   :  { %3364 = vmatprep.mubr.msk.bf16.mxu0 %vm933_vm2, %v3627_v14  ;;  %3492 = vmatprep.mubr.msk.bf16.mxu1 %vm933_vm2, %v3628_v15 }
  0x9a   :  { %3365 = vmatmul.mubr.msk.bf16.gmra.mrb[72].mxu0 %vm933_vm2, %v3629_v16  ;;  %3493 = vmatmul.mubr.msk.bf16.gmra.mrb[72].mxu1 %vm933_vm2, %v3630_v17 }
  0x9b   :  { %3368 = vmatprep.mubr.msk.bf16.mxu0 %vm933_vm2, %v3631_v18  ;;  %3496 = vmatprep.mubr.msk.bf16.mxu1 %vm933_vm2, %v3632_v19 }
  0xa2   :  { %3369 = vmatmul.mubr.msk.bf16.gmra.mrb[76].mxu0 %vm933_vm2, %v3633_v20  ;;  %3497 = vmatmul.mubr.msk.bf16.gmra.mrb[76].mxu1 %vm933_vm2, %v3634_v21 }
  0xa3   :  { %3372 = vmatprep.mubr.msk.bf16.mxu0 %vm933_vm2, %v3635_v22  ;;  %3500 = vmatprep.mubr.msk.bf16.mxu1 %vm933_vm2, %v3636_v23  ;;  %v3669_v23 = vld [vmem:[%s5510_s0 + $0x1c8] sm:$0xff]  }
  0xaa   :  { %3373 = vmatmul.mubr.msk.bf16.gmra.mrb[80].mxu0 %vm933_vm2, %v3637_v24  ;;  %3501 = vmatmul.mubr.msk.bf16.gmra.mrb[80].mxu1 %vm933_vm2, %v3638_v25  ;;  %v3670_v24 = vld [vmem:[%s5510_s0 + $0x3c8] sm:$0xff]  }
  0xab   :  { %3376 = vmatprep.mubr.msk.bf16.mxu0 %vm933_vm2, %v3639_v26  ;;  %3504 = vmatprep.mubr.msk.bf16.mxu1 %vm933_vm2, %v3640_v27 }
  0xb2   :  { %3377 = vmatmul.mubr.msk.bf16.gmra.mrb[84].mxu0 %vm933_vm2, %v3641_v28  ;;  %3505 = vmatmul.mubr.msk.bf16.gmra.mrb[84].mxu1 %vm933_vm2, %v3642_v29  ;;  %v3671_v29 = vld [vmem:[%s5510_s0 + $0x1d0] sm:$0xff]  }
  0xb3   :  { %3380 = vmatprep.mubr.msk.bf16.mxu0 %vm933_vm2, %v3643_v30  ;;  %3508 = vmatprep.mubr.msk.bf16.mxu1 %vm933_vm2, %v3644_v31  ;;  %v3672_v30 = vld [vmem:[%s5510_s0 + $0x3d0] sm:$0xff]  }
  0xba   :  { %3381 = vmatmul.mubr.msk.bf16.gmra.mrb[88].mxu0 %vm933_vm2, %v3645_v32  ;;  %3509 = vmatmul.mubr.msk.bf16.gmra.mrb[88].mxu1 %vm933_vm2, %v3646_v33 }
  0xbb   :  { %3384 = vmatprep.mubr.msk.bf16.mxu0 %vm933_vm2, %v3647_v34  ;;  %3512 = vmatprep.mubr.msk.bf16.mxu1 %vm933_vm2, %v3648_v35 }
  0xc2   :  { %3385 = vmatmul.mubr.msk.bf16.gmra.mrb[92].mxu0 %vm933_vm2, %v3649_v36  ;;  %3513 = vmatmul.mubr.msk.bf16.gmra.mrb[92].mxu1 %vm933_vm2, %v3650_v37 }
  0xc3   :  { %3388 = vmatprep.mubr.msk.bf16.mxu0 %vm933_vm2, %v3651_v38  ;;  %3516 = vmatprep.mubr.msk.bf16.mxu1 %vm933_vm2, %v3652_v39 }
  0xca   :  { %3389 = vmatmul.mubr.msk.bf16.gmra.mrb[96].mxu0 %vm933_vm2, %v3653_v40  ;;  %3517 = vmatmul.mubr.msk.bf16.gmra.mrb[96].mxu1 %vm933_vm2, %v3654_v41 }
  0xcb   :  { %3392 = vmatprep.mubr.msk.bf16.mxu0 %vm933_vm2, %v3655_v42  ;;  %3520 = vmatprep.mubr.msk.bf16.mxu1 %vm933_vm2, %v3656_v43 }
  0xd2   :  { %3393 = vmatmul.mubr.msk.bf16.gmra.mrb[100].mxu0 %vm933_vm2, %v3657_v44  ;;  %3521 = vmatmul.mubr.msk.bf16.gmra.mrb[100].mxu1 %vm933_vm2, %v3658_v45 }
  0xd3   :  { %3396 = vmatprep.mubr.msk.bf16.mxu0 %vm933_vm2, %v3659_v46  ;;  %3524 = vmatprep.mubr.msk.bf16.mxu1 %vm933_vm2, %v3660_v47 }
  0xda   :  { %3397 = vmatmul.mubr.msk.bf16.gmra.mrb[104].mxu0 %vm933_vm2, %v3661_v48  ;;  %3525 = vmatmul.mubr.msk.bf16.gmra.mrb[104].mxu1 %vm933_vm2, %v3662_v49 }
  0xdb   :  { %3400 = vmatprep.mubr.msk.bf16.mxu0 %vm933_vm2, %v3663_v50  ;;  %3528 = vmatprep.mubr.msk.bf16.mxu1 %vm933_vm2, %v3664_v51  ;;  %v3673_v51 = vld [vmem:[%s5510_s0 + $0x1d8] sm:$0xff]  }
  0xdd   :  { %v3294_v53 = vpop.f32.mrb[0].mxu0  ;;  %v3422_v54 = vpop.f32.mrb[0].mxu1 }
  0xde   :  { %v1368_v55 = vadd.f32 %v3294_v53, %v4153_v52  ;;  %v1880_v56 = vadd.f32 %v3422_v54, %v4153_v52  ;;  %v1359_v57 = vpop.f32.mrb[1].mxu0  ;;  %v1871_v58 = vpop.f32.mrb[1].mxu1  ;;  %v3674_v53 = vld [vmem:[%s5510_s0 + $0x3d8] sm:$0xff]  }
  0xdf   :  { %v1360_v61 = vadd.f32 %v4153_v52, %v1359_v57  ;;  %v1872_v62 = vadd.f32 %v4153_v52, %v1871_v58  ;;  %v3295_v63 = vpop.f32.mrb[2].mxu0  ;;  %v3423_v0 = vpop.f32.mrb[2].mxu1  ;;  %v3675_v58 = vld [vmem:[%s5510_s0 + $0x1e0] sm:$0xff]  }
  0xe0   :  { %v2384_v3 = vmax.f32 %v1368_v55, 0.0  ;;  %v2512_v4 = vmax.f32 %v1880_v56, 0.0  ;;  %v1371_v5 = vadd.f32 %v3295_v63, %v4153_v52  ;;  %v1883_v6 = vadd.f32 %v3423_v0, %v4153_v52  ;;  %v1362_v7 = vpop.f32.mrb[3].mxu0  ;;  %v1874_v8 = vpop.f32.mrb[3].mxu1 }
  0xe1   :  { %v2382_v9 = vmax.f32 %v1360_v61, 0.0  ;;  %v2510_v10 = vmax.f32 %v1872_v62, 0.0  ;;  %v1363_v11 = vadd.f32 %v4153_v52, %v1362_v7  ;;  %v1875_v12 = vadd.f32 %v4153_v52, %v1874_v8 }
  0xe2   :  { %2641 = vst.msk [vmem:[%s5512_s3 + $0x10] sm:$0xff] %vm2638_vm3, %v2384_v3  ;;  %2769 = vst.msk [vmem:[%s5512_s3 + $0x410] sm:$0xff] %vm2638_vm3, %v2512_v4  ;;  %v2385_v13 = vmax.f32 %v1371_v5, 0.0  ;;  %v2513_v14 = vmax.f32 %v1883_v6, 0.0  ;;  %3401 = vmatmul.mubr.msk.bf16.gmra.mrb[108].mxu0 %vm933_vm2, %v3665_v59  ;;  %3529 = vmatmul.mubr.msk.bf16.gmra.mrb[108].mxu1 %vm933_vm2, %v3666_v60  ;;  %v3676_v59 = vld [vmem:[%s5510_s0 + $0x3e0] sm:$0xff]  }
  0xe3   :  { %2639 = vst.msk [vmem:[%s5512_s3] sm:$0xff] %vm2638_vm3, %v2382_v9  ;;  %2767 = vst.msk [vmem:[%s5512_s3 + $0x400] sm:$0xff] %vm2638_vm3, %v2510_v10  ;;  %v2383_v15 = vmax.f32 %v1363_v11, 0.0  ;;  %v2511_v16 = vmax.f32 %v1875_v12, 0.0  ;;  %3404 = vmatprep.mubr.msk.bf16.mxu0 %vm933_vm2, %v3667_v1  ;;  %3532 = vmatprep.mubr.msk.bf16.mxu1 %vm933_vm2, %v3668_v2 }
  0xe4   :  { %2642 = vst.msk [vmem:[%s5512_s3 + $0x18] sm:$0xff] %vm2638_vm3, %v2385_v13  ;;  %2770 = vst.msk [vmem:[%s5512_s3 + $0x418] sm:$0xff] %vm2638_vm3, %v2513_v14 }
  0xe5   :  { %2640 = vst.msk [vmem:[%s5512_s3 + $0x8] sm:$0xff] %vm2638_vm3, %v2383_v15  ;;  %2768 = vst.msk [vmem:[%s5512_s3 + $0x408] sm:$0xff] %vm2638_vm3, %v2511_v16  ;;  %v3298_v17 = vpop.f32.mrb[4].mxu0  ;;  %v3426_v18 = vpop.f32.mrb[4].mxu1  ;;  %v3677_v16 = vld [vmem:[%s5510_s0 + $0x1e8] sm:$0xff]  }
  0xe6   :  { %v1384_v19 = vadd.f32 %v3298_v17, %v4153_v52  ;;  %v1896_v20 = vadd.f32 %v3426_v18, %v4153_v52  ;;  %v1375_v21 = vpop.f32.mrb[5].mxu0  ;;  %v1887_v22 = vpop.f32.mrb[5].mxu1  ;;  %v3678_v17 = vld [vmem:[%s5510_s0 + $0x3e8] sm:$0xff]  }
  0xe7   :  { %v1376_v25 = vadd.f32 %v4153_v52, %v1375_v21  ;;  %v1888_v26 = vadd.f32 %v4153_v52, %v1887_v22  ;;  %v3299_v27 = vpop.f32.mrb[6].mxu0  ;;  %v3427_v28 = vpop.f32.mrb[6].mxu1  ;;  %v3679_v22 = vld [vmem:[%s5510_s0 + $0x1f0] sm:$0xff]  }
  0xe8   :  { %v2388_v31 = vmax.f32 %v1384_v19, 0.0  ;;  %v2516_v32 = vmax.f32 %v1896_v20, 0.0  ;;  %v1387_v33 = vadd.f32 %v3299_v27, %v4153_v52  ;;  %v1899_v34 = vadd.f32 %v3427_v28, %v4153_v52  ;;  %v1378_v35 = vpop.f32.mrb[7].mxu0  ;;  %v1890_v36 = vpop.f32.mrb[7].mxu1 }
  0xe9   :  { %v2386_v37 = vmax.f32 %v1376_v25, 0.0  ;;  %v2514_v38 = vmax.f32 %v1888_v26, 0.0  ;;  %v1379_v39 = vadd.f32 %v4153_v52, %v1378_v35  ;;  %v1891_v40 = vadd.f32 %v4153_v52, %v1890_v36 }
  0xea   :  { %2645 = vst.msk [vmem:[%s5512_s3 + $0x30] sm:$0xff] %vm2638_vm3, %v2388_v31  ;;  %2773 = vst.msk [vmem:[%s5512_s3 + $0x430] sm:$0xff] %vm2638_vm3, %v2516_v32  ;;  %v2389_v41 = vmax.f32 %v1387_v33, 0.0  ;;  %v2517_v42 = vmax.f32 %v1899_v34, 0.0  ;;  %3405 = vmatmul.mubr.msk.bf16.gmra.mrb[112].mxu0 %vm933_vm2, %v3669_v23  ;;  %3533 = vmatmul.mubr.msk.bf16.gmra.mrb[112].mxu1 %vm933_vm2, %v3670_v24  ;;  %v3680_v23 = vld [vmem:[%s5510_s0 + $0x3f0] sm:$0xff]  }
  0xeb   :  { %2643 = vst.msk [vmem:[%s5512_s3 + $0x20] sm:$0xff] %vm2638_vm3, %v2386_v37  ;;  %2771 = vst.msk [vmem:[%s5512_s3 + $0x420] sm:$0xff] %vm2638_vm3, %v2514_v38  ;;  %v2387_v43 = vmax.f32 %v1379_v39, 0.0  ;;  %v2515_v44 = vmax.f32 %v1891_v40, 0.0  ;;  %3408 = vmatprep.mubr.msk.bf16.mxu0 %vm933_vm2, %v3671_v29  ;;  %3536 = vmatprep.mubr.msk.bf16.mxu1 %vm933_vm2, %v3672_v30 }
  0xec   :  { %2646 = vst.msk [vmem:[%s5512_s3 + $0x38] sm:$0xff] %vm2638_vm3, %v2389_v41  ;;  %2774 = vst.msk [vmem:[%s5512_s3 + $0x438] sm:$0xff] %vm2638_vm3, %v2517_v42 }
  0xed   :  { %2644 = vst.msk [vmem:[%s5512_s3 + $0x28] sm:$0xff] %vm2638_vm3, %v2387_v43  ;;  %2772 = vst.msk [vmem:[%s5512_s3 + $0x428] sm:$0xff] %vm2638_vm3, %v2515_v44  ;;  %v3302_v45 = vpop.f32.mrb[8].mxu0  ;;  %v3430_v46 = vpop.f32.mrb[8].mxu1  ;;  %v3681_v44 = vld [vmem:[%s5510_s0 + $0x1f8] sm:$0xff]  }
  0xee   :  { %v1400_v47 = vadd.f32 %v3302_v45, %v4153_v52  ;;  %v1912_v48 = vadd.f32 %v3430_v46, %v4153_v52  ;;  %v1391_v49 = vpop.f32.mrb[9].mxu0  ;;  %v1903_v50 = vpop.f32.mrb[9].mxu1  ;;  %v3682_v45 = vld [vmem:[%s5510_s0 + $0x3f8] sm:$0xff]  }
  0xef   :  { %v1392_v54 = vadd.f32 %v4153_v52, %v1391_v49  ;;  %v1904_v55 = vadd.f32 %v4153_v52, %v1903_v50  ;;  %v3303_v56 = vpop.f32.mrb[10].mxu0  ;;  %v3431_v57 = vpop.f32.mrb[10].mxu1 }
  0xf0   :  { %v2392_v60 = vmax.f32 %v1400_v47, 0.0  ;;  %v2520_v61 = vmax.f32 %v1912_v48, 0.0  ;;  %v1403_v62 = vadd.f32 %v3303_v56, %v4153_v52  ;;  %v1915_v63 = vadd.f32 %v3431_v57, %v4153_v52  ;;  %v1394_v0 = vpop.f32.mrb[11].mxu0  ;;  %v1906_v1 = vpop.f32.mrb[11].mxu1 }
  0xf1   :  { %v2390_v2 = vmax.f32 %v1392_v54, 0.0  ;;  %v2518_v3 = vmax.f32 %v1904_v55, 0.0  ;;  %v1395_v4 = vadd.f32 %v4153_v52, %v1394_v0  ;;  %v1907_v5 = vadd.f32 %v4153_v52, %v1906_v1 }
  0xf2   :  { %2649 = vst.msk [vmem:[%s5512_s3 + $0x50] sm:$0xff] %vm2638_vm3, %v2392_v60  ;;  %2777 = vst.msk [vmem:[%s5512_s3 + $0x450] sm:$0xff] %vm2638_vm3, %v2520_v61  ;;  %v2393_v6 = vmax.f32 %v1403_v62, 0.0  ;;  %v2521_v7 = vmax.f32 %v1915_v63, 0.0  ;;  %3409 = vmatmul.mubr.msk.bf16.gmra.mrb[116].mxu0 %vm933_vm2, %v3673_v51  ;;  %3537 = vmatmul.mubr.msk.bf16.gmra.mrb[116].mxu1 %vm933_vm2, %v3674_v53 }
  0xf3   :  { %2647 = vst.msk [vmem:[%s5512_s3 + $0x40] sm:$0xff] %vm2638_vm3, %v2390_v2  ;;  %2775 = vst.msk [vmem:[%s5512_s3 + $0x440] sm:$0xff] %vm2638_vm3, %v2518_v3  ;;  %v2391_v8 = vmax.f32 %v1395_v4, 0.0  ;;  %v2519_v9 = vmax.f32 %v1907_v5, 0.0  ;;  %3412 = vmatprep.mubr.msk.bf16.mxu0 %vm933_vm2, %v3675_v58  ;;  %3540 = vmatprep.mubr.msk.bf16.mxu1 %vm933_vm2, %v3676_v59 }
  0xf4   :  { %2650 = vst.msk [vmem:[%s5512_s3 + $0x58] sm:$0xff] %vm2638_vm3, %v2393_v6  ;;  %2778 = vst.msk [vmem:[%s5512_s3 + $0x458] sm:$0xff] %vm2638_vm3, %v2521_v7 }
  0xf5   :  { %2648 = vst.msk [vmem:[%s5512_s3 + $0x48] sm:$0xff] %vm2638_vm3, %v2391_v8  ;;  %2776 = vst.msk [vmem:[%s5512_s3 + $0x448] sm:$0xff] %vm2638_vm3, %v2519_v9  ;;  %v3306_v10 = vpop.f32.mrb[12].mxu0  ;;  %v3434_v11 = vpop.f32.mrb[12].mxu1 }
  0xf6   :  { %v1416_v12 = vadd.f32 %v3306_v10, %v4153_v52  ;;  %v1928_v13 = vadd.f32 %v3434_v11, %v4153_v52  ;;  %v1407_v14 = vpop.f32.mrb[13].mxu0  ;;  %v1919_v15 = vpop.f32.mrb[13].mxu1 }
  0xf7   :  { %v1408_v18 = vadd.f32 %v4153_v52, %v1407_v14  ;;  %v1920_v19 = vadd.f32 %v4153_v52, %v1919_v15  ;;  %v3307_v20 = vpop.f32.mrb[14].mxu0  ;;  %v3435_v21 = vpop.f32.mrb[14].mxu1 }
  0xf8   :  { %v2396_v24 = vmax.f32 %v1416_v12, 0.0  ;;  %v2524_v25 = vmax.f32 %v1928_v13, 0.0  ;;  %v1419_v26 = vadd.f32 %v3307_v20, %v4153_v52  ;;  %v1931_v27 = vadd.f32 %v3435_v21, %v4153_v52  ;;  %v1410_v28 = vpop.f32.mrb[15].mxu0  ;;  %v1922_v29 = vpop.f32.mrb[15].mxu1 }
  0xf9   :  { %v2394_v30 = vmax.f32 %v1408_v18, 0.0  ;;  %v2522_v31 = vmax.f32 %v1920_v19, 0.0  ;;  %v1411_v32 = vadd.f32 %v4153_v52, %v1410_v28  ;;  %v1923_v33 = vadd.f32 %v4153_v52, %v1922_v29 }
  0xfa   :  { %2653 = vst.msk [vmem:[%s5512_s3 + $0x70] sm:$0xff] %vm2638_vm3, %v2396_v24  ;;  %2781 = vst.msk [vmem:[%s5512_s3 + $0x470] sm:$0xff] %vm2638_vm3, %v2524_v25  ;;  %v2397_v34 = vmax.f32 %v1419_v26, 0.0  ;;  %v2525_v35 = vmax.f32 %v1931_v27, 0.0  ;;  %3413 = vmatmul.mubr.msk.bf16.gmra.mrb[120].mxu0 %vm933_vm2, %v3677_v16  ;;  %3541 = vmatmul.mubr.msk.bf16.gmra.mrb[120].mxu1 %vm933_vm2, %v3678_v17 }
  0xfb   :  { %2651 = vst.msk [vmem:[%s5512_s3 + $0x60] sm:$0xff] %vm2638_vm3, %v2394_v30  ;;  %2779 = vst.msk [vmem:[%s5512_s3 + $0x460] sm:$0xff] %vm2638_vm3, %v2522_v31  ;;  %v2395_v36 = vmax.f32 %v1411_v32, 0.0  ;;  %v2523_v37 = vmax.f32 %v1923_v33, 0.0  ;;  %3416 = vmatprep.mubr.msk.bf16.mxu0 %vm933_vm2, %v3679_v22  ;;  %3544 = vmatprep.mubr.msk.bf16.mxu1 %vm933_vm2, %v3680_v23 }
  0xfc   :  { %2654 = vst.msk [vmem:[%s5512_s3 + $0x78] sm:$0xff] %vm2638_vm3, %v2397_v34  ;;  %2782 = vst.msk [vmem:[%s5512_s3 + $0x478] sm:$0xff] %vm2638_vm3, %v2525_v35 }
  0xfd   :  { %2652 = vst.msk [vmem:[%s5512_s3 + $0x68] sm:$0xff] %vm2638_vm3, %v2395_v36  ;;  %2780 = vst.msk [vmem:[%s5512_s3 + $0x468] sm:$0xff] %vm2638_vm3, %v2523_v37  ;;  %v3310_v38 = vpop.f32.mrb[16].mxu0  ;;  %v3438_v39 = vpop.f32.mrb[16].mxu1 }
  0xfe   :  { %v1432_v40 = vadd.f32 %v3310_v38, %v4153_v52  ;;  %v1944_v41 = vadd.f32 %v3438_v39, %v4153_v52  ;;  %v1423_v42 = vpop.f32.mrb[17].mxu0  ;;  %v1935_v43 = vpop.f32.mrb[17].mxu1 }
  0xff   :  { %v1424_v46 = vadd.f32 %v4153_v52, %v1423_v42  ;;  %v1936_v47 = vadd.f32 %v4153_v52, %v1935_v43  ;;  %v3311_v48 = vpop.f32.mrb[18].mxu0  ;;  %v3439_v49 = vpop.f32.mrb[18].mxu1 }
 0x100   :  { %v2400_v50 = vmax.f32 %v1432_v40, 0.0  ;;  %v2528_v51 = vmax.f32 %v1944_v41, 0.0  ;;  %v1435_v53 = vadd.f32 %v3311_v48, %v4153_v52  ;;  %v1947_v54 = vadd.f32 %v3439_v49, %v4153_v52  ;;  %v1426_v55 = vpop.f32.mrb[19].mxu0  ;;  %v1938_v56 = vpop.f32.mrb[19].mxu1 }
 0x101   :  { %v2398_v57 = vmax.f32 %v1424_v46, 0.0  ;;  %v2526_v58 = vmax.f32 %v1936_v47, 0.0  ;;  %v1427_v59 = vadd.f32 %v4153_v52, %v1426_v55  ;;  %v1939_v60 = vadd.f32 %v4153_v52, %v1938_v56 }
 0x102   :  { %2657 = vst.msk [vmem:[%s5512_s3 + $0x90] sm:$0xff] %vm2638_vm3, %v2400_v50  ;;  %2785 = vst.msk [vmem:[%s5512_s3 + $0x490] sm:$0xff] %vm2638_vm3, %v2528_v51  ;;  %v2401_v61 = vmax.f32 %v1435_v53, 0.0  ;;  %v2529_v62 = vmax.f32 %v1947_v54, 0.0  ;;  %3417 = vmatmul.mubr.msk.bf16.gmra.mrb[124].mxu0 %vm933_vm2, %v3681_v44  ;;  %3545 = vmatmul.mubr.msk.bf16.gmra.mrb[124].mxu1 %vm933_vm2, %v3682_v45 }
 0x103   :  { %2655 = vst.msk [vmem:[%s5512_s3 + $0x80] sm:$0xff] %vm2638_vm3, %v2398_v57  ;;  %2783 = vst.msk [vmem:[%s5512_s3 + $0x480] sm:$0xff] %vm2638_vm3, %v2526_v58  ;;  %v2399_v63 = vmax.f32 %v1427_v59, 0.0  ;;  %v2527_v0 = vmax.f32 %v1939_v60, 0.0 }
 0x104   :  { %2658 = vst.msk [vmem:[%s5512_s3 + $0x98] sm:$0xff] %vm2638_vm3, %v2401_v61  ;;  %2786 = vst.msk [vmem:[%s5512_s3 + $0x498] sm:$0xff] %vm2638_vm3, %v2529_v62 }
 0x105   :  { %2656 = vst.msk [vmem:[%s5512_s3 + $0x88] sm:$0xff] %vm2638_vm3, %v2399_v63  ;;  %2784 = vst.msk [vmem:[%s5512_s3 + $0x488] sm:$0xff] %vm2638_vm3, %v2527_v0  ;;  %v3314_v1 = vpop.f32.mrb[20].mxu0  ;;  %v3442_v2 = vpop.f32.mrb[20].mxu1 }
 0x106   :  { %v1448_v3 = vadd.f32 %v3314_v1, %v4153_v52  ;;  %v1960_v4 = vadd.f32 %v3442_v2, %v4153_v52  ;;  %v1439_v5 = vpop.f32.mrb[21].mxu0  ;;  %v1951_v6 = vpop.f32.mrb[21].mxu1 }
 0x107   :  { %v1440_v7 = vadd.f32 %v4153_v52, %v1439_v5  ;;  %v1952_v8 = vadd.f32 %v4153_v52, %v1951_v6  ;;  %v3315_v9 = vpop.f32.mrb[22].mxu0  ;;  %v3443_v10 = vpop.f32.mrb[22].mxu1 }
 0x108   :  { %v2404_v11 = vmax.f32 %v1448_v3, 0.0  ;;  %v2532_v12 = vmax.f32 %v1960_v4, 0.0  ;;  %v1451_v13 = vadd.f32 %v3315_v9, %v4153_v52  ;;  %v1963_v14 = vadd.f32 %v3443_v10, %v4153_v52  ;;  %v1442_v15 = vpop.f32.mrb[23].mxu0  ;;  %v1954_v16 = vpop.f32.mrb[23].mxu1 }
 0x109   :  { %v2402_v17 = vmax.f32 %v1440_v7, 0.0  ;;  %v2530_v18 = vmax.f32 %v1952_v8, 0.0  ;;  %v1443_v19 = vadd.f32 %v4153_v52, %v1442_v15  ;;  %v1955_v20 = vadd.f32 %v4153_v52, %v1954_v16 }
 0x10a   :  { %2661 = vst.msk [vmem:[%s5512_s3 + $0xb0] sm:$0xff] %vm2638_vm3, %v2404_v11  ;;  %2789 = vst.msk [vmem:[%s5512_s3 + $0x4b0] sm:$0xff] %vm2638_vm3, %v2532_v12  ;;  %v2405_v21 = vmax.f32 %v1451_v13, 0.0  ;;  %v2533_v22 = vmax.f32 %v1963_v14, 0.0 }
 0x10b   :  { %2659 = vst.msk [vmem:[%s5512_s3 + $0xa0] sm:$0xff] %vm2638_vm3, %v2402_v17  ;;  %2787 = vst.msk [vmem:[%s5512_s3 + $0x4a0] sm:$0xff] %vm2638_vm3, %v2530_v18  ;;  %v2403_v23 = vmax.f32 %v1443_v19, 0.0  ;;  %v2531_v24 = vmax.f32 %v1955_v20, 0.0 }
 0x10c   :  { %2662 = vst.msk [vmem:[%s5512_s3 + $0xb8] sm:$0xff] %vm2638_vm3, %v2405_v21  ;;  %2790 = vst.msk [vmem:[%s5512_s3 + $0x4b8] sm:$0xff] %vm2638_vm3, %v2533_v22 }
 0x10d   :  { %2660 = vst.msk [vmem:[%s5512_s3 + $0xa8] sm:$0xff] %vm2638_vm3, %v2403_v23  ;;  %2788 = vst.msk [vmem:[%s5512_s3 + $0x4a8] sm:$0xff] %vm2638_vm3, %v2531_v24  ;;  %v3318_v25 = vpop.f32.mrb[24].mxu0  ;;  %v3446_v26 = vpop.f32.mrb[24].mxu1 }
 0x10e   :  { %v1464_v27 = vadd.f32 %v3318_v25, %v4153_v52  ;;  %v1976_v28 = vadd.f32 %v3446_v26, %v4153_v52  ;;  %v1455_v29 = vpop.f32.mrb[25].mxu0  ;;  %v1967_v30 = vpop.f32.mrb[25].mxu1 }
 0x10f   :  { %v1456_v31 = vadd.f32 %v4153_v52, %v1455_v29  ;;  %v1968_v32 = vadd.f32 %v4153_v52, %v1967_v30  ;;  %v3319_v33 = vpop.f32.mrb[26].mxu0  ;;  %v3447_v34 = vpop.f32.mrb[26].mxu1 }
 0x110   :  { %v2408_v35 = vmax.f32 %v1464_v27, 0.0  ;;  %v2536_v36 = vmax.f32 %v1976_v28, 0.0  ;;  %v1467_v37 = vadd.f32 %v3319_v33, %v4153_v52  ;;  %v1979_v38 = vadd.f32 %v3447_v34, %v4153_v52  ;;  %v1458_v39 = vpop.f32.mrb[27].mxu0  ;;  %v1970_v40 = vpop.f32.mrb[27].mxu1 }
 0x111   :  { %v2406_v41 = vmax.f32 %v1456_v31, 0.0  ;;  %v2534_v42 = vmax.f32 %v1968_v32, 0.0  ;;  %v1459_v43 = vadd.f32 %v4153_v52, %v1458_v39  ;;  %v1971_v44 = vadd.f32 %v4153_v52, %v1970_v40 }
 0x112   :  { %2665 = vst.msk [vmem:[%s5512_s3 + $0xd0] sm:$0xff] %vm2638_vm3, %v2408_v35  ;;  %2793 = vst.msk [vmem:[%s5512_s3 + $0x4d0] sm:$0xff] %vm2638_vm3, %v2536_v36  ;;  %v2409_v45 = vmax.f32 %v1467_v37, 0.0  ;;  %v2537_v46 = vmax.f32 %v1979_v38, 0.0 }
 0x113   :  { %2663 = vst.msk [vmem:[%s5512_s3 + $0xc0] sm:$0xff] %vm2638_vm3, %v2406_v41  ;;  %2791 = vst.msk [vmem:[%s5512_s3 + $0x4c0] sm:$0xff] %vm2638_vm3, %v2534_v42  ;;  %v2407_v47 = vmax.f32 %v1459_v43, 0.0  ;;  %v2535_v48 = vmax.f32 %v1971_v44, 0.0 }
 0x114   :  { %2666 = vst.msk [vmem:[%s5512_s3 + $0xd8] sm:$0xff] %vm2638_vm3, %v2409_v45  ;;  %2794 = vst.msk [vmem:[%s5512_s3 + $0x4d8] sm:$0xff] %vm2638_vm3, %v2537_v46 }
 0x115   :  { %2664 = vst.msk [vmem:[%s5512_s3 + $0xc8] sm:$0xff] %vm2638_vm3, %v2407_v47  ;;  %2792 = vst.msk [vmem:[%s5512_s3 + $0x4c8] sm:$0xff] %vm2638_vm3, %v2535_v48  ;;  %v3322_v49 = vpop.f32.mrb[28].mxu0  ;;  %v3450_v50 = vpop.f32.mrb[28].mxu1 }
 0x116   :  { %v1480_v51 = vadd.f32 %v3322_v49, %v4153_v52  ;;  %v1992_v53 = vadd.f32 %v3450_v50, %v4153_v52  ;;  %v1471_v54 = vpop.f32.mrb[29].mxu0  ;;  %v1983_v55 = vpop.f32.mrb[29].mxu1 }
 0x117   :  { %v1472_v56 = vadd.f32 %v4153_v52, %v1471_v54  ;;  %v1984_v57 = vadd.f32 %v4153_v52, %v1983_v55  ;;  %v3323_v58 = vpop.f32.mrb[30].mxu0  ;;  %v3451_v59 = vpop.f32.mrb[30].mxu1 }
 0x118   :  { %v2412_v60 = vmax.f32 %v1480_v51, 0.0  ;;  %v2540_v61 = vmax.f32 %v1992_v53, 0.0  ;;  %v1483_v62 = vadd.f32 %v3323_v58, %v4153_v52  ;;  %v1995_v63 = vadd.f32 %v3451_v59, %v4153_v52  ;;  %v1474_v0 = vpop.f32.mrb[31].mxu0  ;;  %v1986_v1 = vpop.f32.mrb[31].mxu1 }
 0x119   :  { %v2410_v2 = vmax.f32 %v1472_v56, 0.0  ;;  %v2538_v3 = vmax.f32 %v1984_v57, 0.0  ;;  %v1475_v4 = vadd.f32 %v4153_v52, %v1474_v0  ;;  %v1987_v5 = vadd.f32 %v4153_v52, %v1986_v1 }
 0x11a   :  { %2669 = vst.msk [vmem:[%s5512_s3 + $0xf0] sm:$0xff] %vm2638_vm3, %v2412_v60  ;;  %2797 = vst.msk [vmem:[%s5512_s3 + $0x4f0] sm:$0xff] %vm2638_vm3, %v2540_v61  ;;  %v2413_v6 = vmax.f32 %v1483_v62, 0.0  ;;  %v2541_v7 = vmax.f32 %v1995_v63, 0.0 }
 0x11b   :  { %2667 = vst.msk [vmem:[%s5512_s3 + $0xe0] sm:$0xff] %vm2638_vm3, %v2410_v2  ;;  %2795 = vst.msk [vmem:[%s5512_s3 + $0x4e0] sm:$0xff] %vm2638_vm3, %v2538_v3  ;;  %v2411_v8 = vmax.f32 %v1475_v4, 0.0  ;;  %v2539_v9 = vmax.f32 %v1987_v5, 0.0 }
 0x11c   :  { %2670 = vst.msk [vmem:[%s5512_s3 + $0xf8] sm:$0xff] %vm2638_vm3, %v2413_v6  ;;  %2798 = vst.msk [vmem:[%s5512_s3 + $0x4f8] sm:$0xff] %vm2638_vm3, %v2541_v7 }
 0x11d   :  { %2668 = vst.msk [vmem:[%s5512_s3 + $0xe8] sm:$0xff] %vm2638_vm3, %v2411_v8  ;;  %2796 = vst.msk [vmem:[%s5512_s3 + $0x4e8] sm:$0xff] %vm2638_vm3, %v2539_v9  ;;  %v3326_v10 = vpop.f32.mrb[32].mxu0  ;;  %v3454_v11 = vpop.f32.mrb[32].mxu1 }
 0x11e   :  { %v1496_v12 = vadd.f32 %v3326_v10, %v4153_v52  ;;  %v2008_v13 = vadd.f32 %v3454_v11, %v4153_v52  ;;  %v1487_v14 = vpop.f32.mrb[33].mxu0  ;;  %v1999_v15 = vpop.f32.mrb[33].mxu1 }
 0x11f   :  { %v1488_v16 = vadd.f32 %v4153_v52, %v1487_v14  ;;  %v2000_v17 = vadd.f32 %v4153_v52, %v1999_v15  ;;  %v3327_v18 = vpop.f32.mrb[34].mxu0  ;;  %v3455_v19 = vpop.f32.mrb[34].mxu1 }
 0x120   :  { %v2416_v20 = vmax.f32 %v1496_v12, 0.0  ;;  %v2544_v21 = vmax.f32 %v2008_v13, 0.0  ;;  %v1499_v22 = vadd.f32 %v3327_v18, %v4153_v52  ;;  %v2011_v23 = vadd.f32 %v3455_v19, %v4153_v52  ;;  %v1490_v24 = vpop.f32.mrb[35].mxu0  ;;  %v2002_v25 = vpop.f32.mrb[35].mxu1 }
 0x121   :  { %v2414_v26 = vmax.f32 %v1488_v16, 0.0  ;;  %v2542_v27 = vmax.f32 %v2000_v17, 0.0  ;;  %v1491_v28 = vadd.f32 %v4153_v52, %v1490_v24  ;;  %v2003_v29 = vadd.f32 %v4153_v52, %v2002_v25 }
 0x122   :  { %2673 = vst.msk [vmem:[%s5512_s3 + $0x110] sm:$0xff] %vm2638_vm3, %v2416_v20  ;;  %2801 = vst.msk [vmem:[%s5512_s3 + $0x510] sm:$0xff] %vm2638_vm3, %v2544_v21  ;;  %v2417_v30 = vmax.f32 %v1499_v22, 0.0  ;;  %v2545_v31 = vmax.f32 %v2011_v23, 0.0 }
 0x123   :  { %2671 = vst.msk [vmem:[%s5512_s3 + $0x100] sm:$0xff] %vm2638_vm3, %v2414_v26  ;;  %2799 = vst.msk [vmem:[%s5512_s3 + $0x500] sm:$0xff] %vm2638_vm3, %v2542_v27  ;;  %v2415_v32 = vmax.f32 %v1491_v28, 0.0  ;;  %v2543_v33 = vmax.f32 %v2003_v29, 0.0 }
 0x124   :  { %2674 = vst.msk [vmem:[%s5512_s3 + $0x118] sm:$0xff] %vm2638_vm3, %v2417_v30  ;;  %2802 = vst.msk [vmem:[%s5512_s3 + $0x518] sm:$0xff] %vm2638_vm3, %v2545_v31 }
 0x125   :  { %2672 = vst.msk [vmem:[%s5512_s3 + $0x108] sm:$0xff] %vm2638_vm3, %v2415_v32  ;;  %2800 = vst.msk [vmem:[%s5512_s3 + $0x508] sm:$0xff] %vm2638_vm3, %v2543_v33  ;;  %v3330_v34 = vpop.f32.mrb[36].mxu0  ;;  %v3458_v35 = vpop.f32.mrb[36].mxu1 }
 0x126   :  { %v1512_v36 = vadd.f32 %v3330_v34, %v4153_v52  ;;  %v2024_v37 = vadd.f32 %v3458_v35, %v4153_v52  ;;  %v1503_v38 = vpop.f32.mrb[37].mxu0  ;;  %v2015_v39 = vpop.f32.mrb[37].mxu1 }
 0x127   :  { %v1504_v40 = vadd.f32 %v4153_v52, %v1503_v38  ;;  %v2016_v41 = vadd.f32 %v4153_v52, %v2015_v39  ;;  %v3331_v42 = vpop.f32.mrb[38].mxu0  ;;  %v3459_v43 = vpop.f32.mrb[38].mxu1 }
 0x128   :  { %v2420_v44 = vmax.f32 %v1512_v36, 0.0  ;;  %v2548_v45 = vmax.f32 %v2024_v37, 0.0  ;;  %v1515_v46 = vadd.f32 %v3331_v42, %v4153_v52  ;;  %v2027_v47 = vadd.f32 %v3459_v43, %v4153_v52  ;;  %v1506_v48 = vpop.f32.mrb[39].mxu0  ;;  %v2018_v49 = vpop.f32.mrb[39].mxu1 }
 0x129   :  { %v2418_v50 = vmax.f32 %v1504_v40, 0.0  ;;  %v2546_v51 = vmax.f32 %v2016_v41, 0.0  ;;  %v1507_v53 = vadd.f32 %v4153_v52, %v1506_v48  ;;  %v2019_v54 = vadd.f32 %v4153_v52, %v2018_v49 }
 0x12a   :  { %2677 = vst.msk [vmem:[%s5512_s3 + $0x130] sm:$0xff] %vm2638_vm3, %v2420_v44  ;;  %2805 = vst.msk [vmem:[%s5512_s3 + $0x530] sm:$0xff] %vm2638_vm3, %v2548_v45  ;;  %v2421_v55 = vmax.f32 %v1515_v46, 0.0  ;;  %v2549_v56 = vmax.f32 %v2027_v47, 0.0 }
 0x12b   :  { %2675 = vst.msk [vmem:[%s5512_s3 + $0x120] sm:$0xff] %vm2638_vm3, %v2418_v50  ;;  %2803 = vst.msk [vmem:[%s5512_s3 + $0x520] sm:$0xff] %vm2638_vm3, %v2546_v51  ;;  %v2419_v57 = vmax.f32 %v1507_v53, 0.0  ;;  %v2547_v58 = vmax.f32 %v2019_v54, 0.0 }
 0x12c   :  { %2678 = vst.msk [vmem:[%s5512_s3 + $0x138] sm:$0xff] %vm2638_vm3, %v2421_v55  ;;  %2806 = vst.msk [vmem:[%s5512_s3 + $0x538] sm:$0xff] %vm2638_vm3, %v2549_v56 }
 0x12d   :  { %2676 = vst.msk [vmem:[%s5512_s3 + $0x128] sm:$0xff] %vm2638_vm3, %v2419_v57  ;;  %2804 = vst.msk [vmem:[%s5512_s3 + $0x528] sm:$0xff] %vm2638_vm3, %v2547_v58  ;;  %v3334_v59 = vpop.f32.mrb[40].mxu0  ;;  %v3462_v60 = vpop.f32.mrb[40].mxu1 }
 0x12e   :  { %v1528_v61 = vadd.f32 %v3334_v59, %v4153_v52  ;;  %v2040_v62 = vadd.f32 %v3462_v60, %v4153_v52  ;;  %v1519_v63 = vpop.f32.mrb[41].mxu0  ;;  %v2031_v0 = vpop.f32.mrb[41].mxu1 }
 0x12f   :  { %v1520_v1 = vadd.f32 %v4153_v52, %v1519_v63  ;;  %v2032_v2 = vadd.f32 %v4153_v52, %v2031_v0  ;;  %v3335_v3 = vpop.f32.mrb[42].mxu0  ;;  %v3463_v4 = vpop.f32.mrb[42].mxu1 }
 0x130   :  { %v2424_v5 = vmax.f32 %v1528_v61, 0.0  ;;  %v2552_v6 = vmax.f32 %v2040_v62, 0.0  ;;  %v1531_v7 = vadd.f32 %v3335_v3, %v4153_v52  ;;  %v2043_v8 = vadd.f32 %v3463_v4, %v4153_v52  ;;  %v1522_v9 = vpop.f32.mrb[43].mxu0  ;;  %v2034_v10 = vpop.f32.mrb[43].mxu1 }
 0x131   :  { %v2422_v11 = vmax.f32 %v1520_v1, 0.0  ;;  %v2550_v12 = vmax.f32 %v2032_v2, 0.0  ;;  %v1523_v13 = vadd.f32 %v4153_v52, %v1522_v9  ;;  %v2035_v14 = vadd.f32 %v4153_v52, %v2034_v10 }
 0x132   :  { %2681 = vst.msk [vmem:[%s5512_s3 + $0x150] sm:$0xff] %vm2638_vm3, %v2424_v5  ;;  %2809 = vst.msk [vmem:[%s5512_s3 + $0x550] sm:$0xff] %vm2638_vm3, %v2552_v6  ;;  %v2425_v15 = vmax.f32 %v1531_v7, 0.0  ;;  %v2553_v16 = vmax.f32 %v2043_v8, 0.0 }
 0x133   :  { %2679 = vst.msk [vmem:[%s5512_s3 + $0x140] sm:$0xff] %vm2638_vm3, %v2422_v11  ;;  %2807 = vst.msk [vmem:[%s5512_s3 + $0x540] sm:$0xff] %vm2638_vm3, %v2550_v12  ;;  %v2423_v17 = vmax.f32 %v1523_v13, 0.0  ;;  %v2551_v18 = vmax.f32 %v2035_v14, 0.0 }
 0x134   :  { %2682 = vst.msk [vmem:[%s5512_s3 + $0x158] sm:$0xff] %vm2638_vm3, %v2425_v15  ;;  %2810 = vst.msk [vmem:[%s5512_s3 + $0x558] sm:$0xff] %vm2638_vm3, %v2553_v16 }
 0x135   :  { %2680 = vst.msk [vmem:[%s5512_s3 + $0x148] sm:$0xff] %vm2638_vm3, %v2423_v17  ;;  %2808 = vst.msk [vmem:[%s5512_s3 + $0x548] sm:$0xff] %vm2638_vm3, %v2551_v18  ;;  %v3338_v19 = vpop.f32.mrb[44].mxu0  ;;  %v3466_v20 = vpop.f32.mrb[44].mxu1 }
 0x136   :  { %v1544_v21 = vadd.f32 %v3338_v19, %v4153_v52  ;;  %v2056_v22 = vadd.f32 %v3466_v20, %v4153_v52  ;;  %v1535_v23 = vpop.f32.mrb[45].mxu0  ;;  %v2047_v24 = vpop.f32.mrb[45].mxu1 }
 0x137   :  { %v1536_v25 = vadd.f32 %v4153_v52, %v1535_v23  ;;  %v2048_v26 = vadd.f32 %v4153_v52, %v2047_v24  ;;  %v3339_v27 = vpop.f32.mrb[46].mxu0  ;;  %v3467_v28 = vpop.f32.mrb[46].mxu1 }
 0x138   :  { %v2428_v29 = vmax.f32 %v1544_v21, 0.0  ;;  %v2556_v30 = vmax.f32 %v2056_v22, 0.0  ;;  %v1547_v31 = vadd.f32 %v3339_v27, %v4153_v52  ;;  %v2059_v32 = vadd.f32 %v3467_v28, %v4153_v52  ;;  %v1538_v33 = vpop.f32.mrb[47].mxu0  ;;  %v2050_v34 = vpop.f32.mrb[47].mxu1 }
 0x139   :  { %v2426_v35 = vmax.f32 %v1536_v25, 0.0  ;;  %v2554_v36 = vmax.f32 %v2048_v26, 0.0  ;;  %v1539_v37 = vadd.f32 %v4153_v52, %v1538_v33  ;;  %v2051_v38 = vadd.f32 %v4153_v52, %v2050_v34 }
 0x13a   :  { %2685 = vst.msk [vmem:[%s5512_s3 + $0x170] sm:$0xff] %vm2638_vm3, %v2428_v29  ;;  %2813 = vst.msk [vmem:[%s5512_s3 + $0x570] sm:$0xff] %vm2638_vm3, %v2556_v30  ;;  %v2429_v39 = vmax.f32 %v1547_v31, 0.0  ;;  %v2557_v40 = vmax.f32 %v2059_v32, 0.0 }
 0x13b   :  { %2683 = vst.msk [vmem:[%s5512_s3 + $0x160] sm:$0xff] %vm2638_vm3, %v2426_v35  ;;  %2811 = vst.msk [vmem:[%s5512_s3 + $0x560] sm:$0xff] %vm2638_vm3, %v2554_v36  ;;  %v2427_v41 = vmax.f32 %v1539_v37, 0.0  ;;  %v2555_v42 = vmax.f32 %v2051_v38, 0.0 }
 0x13c   :  { %2686 = vst.msk [vmem:[%s5512_s3 + $0x178] sm:$0xff] %vm2638_vm3, %v2429_v39  ;;  %2814 = vst.msk [vmem:[%s5512_s3 + $0x578] sm:$0xff] %vm2638_vm3, %v2557_v40 }
 0x13d   :  { %2684 = vst.msk [vmem:[%s5512_s3 + $0x168] sm:$0xff] %vm2638_vm3, %v2427_v41  ;;  %2812 = vst.msk [vmem:[%s5512_s3 + $0x568] sm:$0xff] %vm2638_vm3, %v2555_v42  ;;  %v3342_v43 = vpop.f32.mrb[48].mxu0  ;;  %v3470_v44 = vpop.f32.mrb[48].mxu1 }
 0x13e   :  { %v1560_v45 = vadd.f32 %v3342_v43, %v4153_v52  ;;  %v2072_v46 = vadd.f32 %v3470_v44, %v4153_v52  ;;  %v1551_v47 = vpop.f32.mrb[49].mxu0  ;;  %v2063_v48 = vpop.f32.mrb[49].mxu1 }
 0x13f   :  { %v1552_v49 = vadd.f32 %v4153_v52, %v1551_v47  ;;  %v2064_v50 = vadd.f32 %v4153_v52, %v2063_v48  ;;  %v3343_v51 = vpop.f32.mrb[50].mxu0  ;;  %v3471_v53 = vpop.f32.mrb[50].mxu1 }
 0x140   :  { %v2432_v54 = vmax.f32 %v1560_v45, 0.0  ;;  %v2560_v55 = vmax.f32 %v2072_v46, 0.0  ;;  %v1563_v56 = vadd.f32 %v3343_v51, %v4153_v52  ;;  %v2075_v57 = vadd.f32 %v3471_v53, %v4153_v52  ;;  %v1554_v58 = vpop.f32.mrb[51].mxu0  ;;  %v2066_v59 = vpop.f32.mrb[51].mxu1 }
 0x141   :  { %v2430_v60 = vmax.f32 %v1552_v49, 0.0  ;;  %v2558_v61 = vmax.f32 %v2064_v50, 0.0  ;;  %v1555_v62 = vadd.f32 %v4153_v52, %v1554_v58  ;;  %v2067_v63 = vadd.f32 %v4153_v52, %v2066_v59 }
 0x142   :  { %2689 = vst.msk [vmem:[%s5512_s3 + $0x190] sm:$0xff] %vm2638_vm3, %v2432_v54  ;;  %2817 = vst.msk [vmem:[%s5512_s3 + $0x590] sm:$0xff] %vm2638_vm3, %v2560_v55  ;;  %v2433_v0 = vmax.f32 %v1563_v56, 0.0  ;;  %v2561_v1 = vmax.f32 %v2075_v57, 0.0  ;;  %v4832_v54 = vld [vmem:[%s5511_s2] ss:$0 sm:$0xff] }
 0x143   :  { %2687 = vst.msk [vmem:[%s5512_s3 + $0x180] sm:$0xff] %vm2638_vm3, %v2430_v60  ;;  %2815 = vst.msk [vmem:[%s5512_s3 + $0x580] sm:$0xff] %vm2638_vm3, %v2558_v61  ;;  %v2431_v2 = vmax.f32 %v1555_v62, 0.0  ;;  %v2559_v3 = vmax.f32 %v2067_v63, 0.0 }
 0x144   :  { %2690 = vst.msk [vmem:[%s5512_s3 + $0x198] sm:$0xff] %vm2638_vm3, %v2433_v0  ;;  %2818 = vst.msk [vmem:[%s5512_s3 + $0x598] sm:$0xff] %vm2638_vm3, %v2561_v1 }
 0x145   :  { %2688 = vst.msk [vmem:[%s5512_s3 + $0x188] sm:$0xff] %vm2638_vm3, %v2431_v2  ;;  %2816 = vst.msk [vmem:[%s5512_s3 + $0x588] sm:$0xff] %vm2638_vm3, %v2559_v3  ;;  %v3346_v4 = vpop.f32.mrb[52].mxu0  ;;  %v3474_v5 = vpop.f32.mrb[52].mxu1 }
 0x146   :  { %v1576_v6 = vadd.f32 %v3346_v4, %v4153_v52  ;;  %v2088_v7 = vadd.f32 %v3474_v5, %v4153_v52  ;;  %v1567_v8 = vpop.f32.mrb[53].mxu0  ;;  %v2079_v9 = vpop.f32.mrb[53].mxu1 }
 0x147   :  { %v1568_v10 = vadd.f32 %v4153_v52, %v1567_v8  ;;  %v2080_v11 = vadd.f32 %v4153_v52, %v2079_v9  ;;  %v3347_v12 = vpop.f32.mrb[54].mxu0  ;;  %v3475_v13 = vpop.f32.mrb[54].mxu1 }
 0x148   :  { %v2436_v14 = vmax.f32 %v1576_v6, 0.0  ;;  %v2564_v15 = vmax.f32 %v2088_v7, 0.0  ;;  %v1579_v16 = vadd.f32 %v3347_v12, %v4153_v52  ;;  %v2091_v17 = vadd.f32 %v3475_v13, %v4153_v52  ;;  %v1570_v18 = vpop.f32.mrb[55].mxu0  ;;  %v2082_v19 = vpop.f32.mrb[55].mxu1 }
 0x149   :  { %v2434_v20 = vmax.f32 %v1568_v10, 0.0  ;;  %v2562_v21 = vmax.f32 %v2080_v11, 0.0  ;;  %v1571_v22 = vadd.f32 %v4153_v52, %v1570_v18  ;;  %v2083_v23 = vadd.f32 %v4153_v52, %v2082_v19 }
 0x14a   :  { %2693 = vst.msk [vmem:[%s5512_s3 + $0x1b0] sm:$0xff] %vm2638_vm3, %v2436_v14  ;;  %2821 = vst.msk [vmem:[%s5512_s3 + $0x5b0] sm:$0xff] %vm2638_vm3, %v2564_v15  ;;  %v2437_v24 = vmax.f32 %v1579_v16, 0.0  ;;  %v2565_v25 = vmax.f32 %v2091_v17, 0.0 }
 0x14b   :  { %2691 = vst.msk [vmem:[%s5512_s3 + $0x1a0] sm:$0xff] %vm2638_vm3, %v2434_v20  ;;  %2819 = vst.msk [vmem:[%s5512_s3 + $0x5a0] sm:$0xff] %vm2638_vm3, %v2562_v21  ;;  %v2435_v26 = vmax.f32 %v1571_v22, 0.0  ;;  %v2563_v27 = vmax.f32 %v2083_v23, 0.0 }
 0x14c   :  { %2694 = vst.msk [vmem:[%s5512_s3 + $0x1b8] sm:$0xff] %vm2638_vm3, %v2437_v24  ;;  %2822 = vst.msk [vmem:[%s5512_s3 + $0x5b8] sm:$0xff] %vm2638_vm3, %v2565_v25 }
 0x14d   :  { %2692 = vst.msk [vmem:[%s5512_s3 + $0x1a8] sm:$0xff] %vm2638_vm3, %v2435_v26  ;;  %2820 = vst.msk [vmem:[%s5512_s3 + $0x5a8] sm:$0xff] %vm2638_vm3, %v2563_v27  ;;  %v3350_v28 = vpop.f32.mrb[56].mxu0  ;;  %v3478_v29 = vpop.f32.mrb[56].mxu1 }
 0x14e   :  { %v1592_v30 = vadd.f32 %v3350_v28, %v4153_v52  ;;  %v2104_v31 = vadd.f32 %v3478_v29, %v4153_v52  ;;  %v1583_v32 = vpop.f32.mrb[57].mxu0  ;;  %v2095_v33 = vpop.f32.mrb[57].mxu1 }
 0x14f   :  { %v1584_v34 = vadd.f32 %v4153_v52, %v1583_v32  ;;  %v2096_v35 = vadd.f32 %v4153_v52, %v2095_v33  ;;  %v3351_v36 = vpop.f32.mrb[58].mxu0  ;;  %v3479_v37 = vpop.f32.mrb[58].mxu1 }
 0x150   :  { %v2440_v38 = vmax.f32 %v1592_v30, 0.0  ;;  %v2568_v39 = vmax.f32 %v2104_v31, 0.0  ;;  %v1595_v40 = vadd.f32 %v3351_v36, %v4153_v52  ;;  %v2107_v41 = vadd.f32 %v3479_v37, %v4153_v52  ;;  %v1586_v42 = vpop.f32.mrb[59].mxu0  ;;  %v2098_v43 = vpop.f32.mrb[59].mxu1 }
 0x151   :  { %v2438_v44 = vmax.f32 %v1584_v34, 0.0  ;;  %v2566_v45 = vmax.f32 %v2096_v35, 0.0  ;;  %v1587_v46 = vadd.f32 %v4153_v52, %v1586_v42  ;;  %v2099_v47 = vadd.f32 %v4153_v52, %v2098_v43 }
 0x152   :  { %2697 = vst.msk [vmem:[%s5512_s3 + $0x1d0] sm:$0xff] %vm2638_vm3, %v2440_v38  ;;  %2825 = vst.msk [vmem:[%s5512_s3 + $0x5d0] sm:$0xff] %vm2638_vm3, %v2568_v39  ;;  %v2441_v48 = vmax.f32 %v1595_v40, 0.0  ;;  %v2569_v49 = vmax.f32 %v2107_v41, 0.0 }
 0x153   :  { %2695 = vst.msk [vmem:[%s5512_s3 + $0x1c0] sm:$0xff] %vm2638_vm3, %v2438_v44  ;;  %2823 = vst.msk [vmem:[%s5512_s3 + $0x5c0] sm:$0xff] %vm2638_vm3, %v2566_v45  ;;  %v2439_v52 = vmax.f32 %v1587_v46, 0.0  ;;  %v2567_v50 = vmax.f32 %v2099_v47, 0.0 }
 0x154   :  { %2698 = vst.msk [vmem:[%s5512_s3 + $0x1d8] sm:$0xff] %vm2638_vm3, %v2441_v48  ;;  %2826 = vst.msk [vmem:[%s5512_s3 + $0x5d8] sm:$0xff] %vm2638_vm3, %v2569_v49 }
 0x155   :  { %2696 = vst.msk [vmem:[%s5512_s3 + $0x1c8] sm:$0xff] %vm2638_vm3, %v2439_v52  ;;  %2824 = vst.msk [vmem:[%s5512_s3 + $0x5c8] sm:$0xff] %vm2638_vm3, %v2567_v50  ;;  %v3354_v51 = vpop.f32.mrb[60].mxu0  ;;  %v3482_v53 = vpop.f32.mrb[60].mxu1 }
 0x156   :  { %v1608_v55 = vadd.f32 %v4832_v54, %v3354_v51  ;;  %v2120_v56 = vadd.f32 %v4832_v54, %v3482_v53  ;;  %v1599_v57 = vpop.f32.mrb[61].mxu0  ;;  %v2111_v58 = vpop.f32.mrb[61].mxu1 }
 0x157   :  { %v1600_v59 = vadd.f32 %v4832_v54, %v1599_v57  ;;  %v2112_v60 = vadd.f32 %v4832_v54, %v2111_v58  ;;  %v3355_v61 = vpop.f32.mrb[62].mxu0  ;;  %v3483_v62 = vpop.f32.mrb[62].mxu1 }
 0x158   :  { %v2444_v63 = vmax.f32 %v1608_v55, 0.0  ;;  %v2572_v0 = vmax.f32 %v2120_v56, 0.0  ;;  %v1611_v1 = vadd.f32 %v4832_v54, %v3355_v61  ;;  %v2123_v2 = vadd.f32 %v4832_v54, %v3483_v62  ;;  %v1602_v3 = vpop.f32.mrb[63].mxu0  ;;  %v2114_v4 = vpop.f32.mrb[63].mxu1 }
 0x159   :  { %v2442_v5 = vmax.f32 %v1600_v59, 0.0  ;;  %v2570_v6 = vmax.f32 %v2112_v60, 0.0  ;;  %v1603_v7 = vadd.f32 %v4832_v54, %v1602_v3  ;;  %v2115_v8 = vadd.f32 %v4832_v54, %v2114_v4 }
 0x15a   :  { %2701 = vst.msk [vmem:[%s5512_s3 + $0x1f0] sm:$0xff] %vm2638_vm3, %v2444_v63  ;;  %2829 = vst.msk [vmem:[%s5512_s3 + $0x5f0] sm:$0xff] %vm2638_vm3, %v2572_v0  ;;  %v2445_v9 = vmax.f32 %v1611_v1, 0.0  ;;  %v2573_v10 = vmax.f32 %v2123_v2, 0.0 }
 0x15b   :  { %2699 = vst.msk [vmem:[%s5512_s3 + $0x1e0] sm:$0xff] %vm2638_vm3, %v2442_v5  ;;  %2827 = vst.msk [vmem:[%s5512_s3 + $0x5e0] sm:$0xff] %vm2638_vm3, %v2570_v6  ;;  %v2443_v11 = vmax.f32 %v1603_v7, 0.0  ;;  %v2571_v12 = vmax.f32 %v2115_v8, 0.0 }
 0x15c   :  { %2702 = vst.msk [vmem:[%s5512_s3 + $0x1f8] sm:$0xff] %vm2638_vm3, %v2445_v9  ;;  %2830 = vst.msk [vmem:[%s5512_s3 + $0x5f8] sm:$0xff] %vm2638_vm3, %v2573_v10 }
 0x15d   :  { %2700 = vst.msk [vmem:[%s5512_s3 + $0x1e8] sm:$0xff] %vm2638_vm3, %v2443_v11  ;;  %2828 = vst.msk [vmem:[%s5512_s3 + $0x5e8] sm:$0xff] %vm2638_vm3, %v2571_v12  ;;  %v3358_v13 = vpop.f32.mrb[64].mxu0  ;;  %v3486_v14 = vpop.f32.mrb[64].mxu1 }
 0x15e   :  { %v1624_v15 = vadd.f32 %v4832_v54, %v3358_v13  ;;  %v2136_v16 = vadd.f32 %v4832_v54, %v3486_v14  ;;  %v1615_v17 = vpop.f32.mrb[65].mxu0  ;;  %v2127_v18 = vpop.f32.mrb[65].mxu1 }
 0x15f   :  { %v1616_v19 = vadd.f32 %v4832_v54, %v1615_v17  ;;  %v2128_v20 = vadd.f32 %v4832_v54, %v2127_v18  ;;  %v3359_v21 = vpop.f32.mrb[66].mxu0  ;;  %v3487_v22 = vpop.f32.mrb[66].mxu1 }
 0x160   :  { %v2448_v23 = vmax.f32 %v1624_v15, 0.0  ;;  %v2576_v24 = vmax.f32 %v2136_v16, 0.0  ;;  %v1627_v25 = vadd.f32 %v4832_v54, %v3359_v21  ;;  %v2139_v26 = vadd.f32 %v4832_v54, %v3487_v22  ;;  %v1618_v27 = vpop.f32.mrb[67].mxu0  ;;  %v2130_v28 = vpop.f32.mrb[67].mxu1 }
 0x161   :  { %v2446_v29 = vmax.f32 %v1616_v19, 0.0  ;;  %v2574_v30 = vmax.f32 %v2128_v20, 0.0  ;;  %v1619_v31 = vadd.f32 %v4832_v54, %v1618_v27  ;;  %v2131_v32 = vadd.f32 %v4832_v54, %v2130_v28 }
 0x162   :  { %2705 = vst.msk [vmem:[%s5512_s3 + $0x210] sm:$0xff] %vm2638_vm3, %v2448_v23  ;;  %2833 = vst.msk [vmem:[%s5512_s3 + $0x610] sm:$0xff] %vm2638_vm3, %v2576_v24  ;;  %v2449_v33 = vmax.f32 %v1627_v25, 0.0  ;;  %v2577_v34 = vmax.f32 %v2139_v26, 0.0 }
 0x163   :  { %2703 = vst.msk [vmem:[%s5512_s3 + $0x200] sm:$0xff] %vm2638_vm3, %v2446_v29  ;;  %2831 = vst.msk [vmem:[%s5512_s3 + $0x600] sm:$0xff] %vm2638_vm3, %v2574_v30  ;;  %v2447_v35 = vmax.f32 %v1619_v31, 0.0  ;;  %v2575_v36 = vmax.f32 %v2131_v32, 0.0 }
 0x164   :  { %2706 = vst.msk [vmem:[%s5512_s3 + $0x218] sm:$0xff] %vm2638_vm3, %v2449_v33  ;;  %2834 = vst.msk [vmem:[%s5512_s3 + $0x618] sm:$0xff] %vm2638_vm3, %v2577_v34 }
 0x165   :  { %2704 = vst.msk [vmem:[%s5512_s3 + $0x208] sm:$0xff] %vm2638_vm3, %v2447_v35  ;;  %2832 = vst.msk [vmem:[%s5512_s3 + $0x608] sm:$0xff] %vm2638_vm3, %v2575_v36  ;;  %v3362_v37 = vpop.f32.mrb[68].mxu0  ;;  %v3490_v38 = vpop.f32.mrb[68].mxu1 }
 0x166   :  { %v1640_v39 = vadd.f32 %v4832_v54, %v3362_v37  ;;  %v2152_v40 = vadd.f32 %v4832_v54, %v3490_v38  ;;  %v1631_v41 = vpop.f32.mrb[69].mxu0  ;;  %v2143_v42 = vpop.f32.mrb[69].mxu1 }
 0x167   :  { %v1632_v43 = vadd.f32 %v4832_v54, %v1631_v41  ;;  %v2144_v44 = vadd.f32 %v4832_v54, %v2143_v42  ;;  %v3363_v45 = vpop.f32.mrb[70].mxu0  ;;  %v3491_v46 = vpop.f32.mrb[70].mxu1 }
 0x168   :  { %v2452_v47 = vmax.f32 %v1640_v39, 0.0  ;;  %v2580_v48 = vmax.f32 %v2152_v40, 0.0  ;;  %v1643_v49 = vadd.f32 %v4832_v54, %v3363_v45  ;;  %v2155_v52 = vadd.f32 %v4832_v54, %v3491_v46  ;;  %v1634_v50 = vpop.f32.mrb[71].mxu0  ;;  %v2146_v51 = vpop.f32.mrb[71].mxu1 }
 0x169   :  { %v2450_v53 = vmax.f32 %v1632_v43, 0.0  ;;  %v2578_v55 = vmax.f32 %v2144_v44, 0.0  ;;  %v1635_v56 = vadd.f32 %v4832_v54, %v1634_v50  ;;  %v2147_v57 = vadd.f32 %v4832_v54, %v2146_v51 }
 0x16a   :  { %2709 = vst.msk [vmem:[%s5512_s3 + $0x230] sm:$0xff] %vm2638_vm3, %v2452_v47  ;;  %2837 = vst.msk [vmem:[%s5512_s3 + $0x630] sm:$0xff] %vm2638_vm3, %v2580_v48  ;;  %v2453_v58 = vmax.f32 %v1643_v49, 0.0  ;;  %v2581_v59 = vmax.f32 %v2155_v52, 0.0 }
 0x16b   :  { %2707 = vst.msk [vmem:[%s5512_s3 + $0x220] sm:$0xff] %vm2638_vm3, %v2450_v53  ;;  %2835 = vst.msk [vmem:[%s5512_s3 + $0x620] sm:$0xff] %vm2638_vm3, %v2578_v55  ;;  %v2451_v60 = vmax.f32 %v1635_v56, 0.0  ;;  %v2579_v61 = vmax.f32 %v2147_v57, 0.0 }
 0x16c   :  { %2710 = vst.msk [vmem:[%s5512_s3 + $0x238] sm:$0xff] %vm2638_vm3, %v2453_v58  ;;  %2838 = vst.msk [vmem:[%s5512_s3 + $0x638] sm:$0xff] %vm2638_vm3, %v2581_v59 }
 0x16d   :  { %2708 = vst.msk [vmem:[%s5512_s3 + $0x228] sm:$0xff] %vm2638_vm3, %v2451_v60  ;;  %2836 = vst.msk [vmem:[%s5512_s3 + $0x628] sm:$0xff] %vm2638_vm3, %v2579_v61  ;;  %v3366_v62 = vpop.f32.mrb[72].mxu0  ;;  %v3494_v63 = vpop.f32.mrb[72].mxu1 }
 0x16e   :  { %v1656_v0 = vadd.f32 %v4832_v54, %v3366_v62  ;;  %v2168_v1 = vadd.f32 %v4832_v54, %v3494_v63  ;;  %v1647_v2 = vpop.f32.mrb[73].mxu0  ;;  %v2159_v3 = vpop.f32.mrb[73].mxu1 }
 0x16f   :  { %v1648_v4 = vadd.f32 %v4832_v54, %v1647_v2  ;;  %v2160_v5 = vadd.f32 %v4832_v54, %v2159_v3  ;;  %v3367_v6 = vpop.f32.mrb[74].mxu0  ;;  %v3495_v7 = vpop.f32.mrb[74].mxu1 }
 0x170   :  { %v2456_v8 = vmax.f32 %v1656_v0, 0.0  ;;  %v2584_v9 = vmax.f32 %v2168_v1, 0.0  ;;  %v1659_v10 = vadd.f32 %v4832_v54, %v3367_v6  ;;  %v2171_v11 = vadd.f32 %v4832_v54, %v3495_v7  ;;  %v1650_v12 = vpop.f32.mrb[75].mxu0  ;;  %v2162_v13 = vpop.f32.mrb[75].mxu1 }
 0x171   :  { %v2454_v14 = vmax.f32 %v1648_v4, 0.0  ;;  %v2582_v15 = vmax.f32 %v2160_v5, 0.0  ;;  %v1651_v16 = vadd.f32 %v4832_v54, %v1650_v12  ;;  %v2163_v17 = vadd.f32 %v4832_v54, %v2162_v13 }
 0x172   :  { %2713 = vst.msk [vmem:[%s5512_s3 + $0x250] sm:$0xff] %vm2638_vm3, %v2456_v8  ;;  %2841 = vst.msk [vmem:[%s5512_s3 + $0x650] sm:$0xff] %vm2638_vm3, %v2584_v9  ;;  %v2457_v18 = vmax.f32 %v1659_v10, 0.0  ;;  %v2585_v19 = vmax.f32 %v2171_v11, 0.0 }
 0x173   :  { %2711 = vst.msk [vmem:[%s5512_s3 + $0x240] sm:$0xff] %vm2638_vm3, %v2454_v14  ;;  %2839 = vst.msk [vmem:[%s5512_s3 + $0x640] sm:$0xff] %vm2638_vm3, %v2582_v15  ;;  %v2455_v20 = vmax.f32 %v1651_v16, 0.0  ;;  %v2583_v21 = vmax.f32 %v2163_v17, 0.0 }
 0x174   :  { %2714 = vst.msk [vmem:[%s5512_s3 + $0x258] sm:$0xff] %vm2638_vm3, %v2457_v18  ;;  %2842 = vst.msk [vmem:[%s5512_s3 + $0x658] sm:$0xff] %vm2638_vm3, %v2585_v19 }
 0x175   :  { %2712 = vst.msk [vmem:[%s5512_s3 + $0x248] sm:$0xff] %vm2638_vm3, %v2455_v20  ;;  %2840 = vst.msk [vmem:[%s5512_s3 + $0x648] sm:$0xff] %vm2638_vm3, %v2583_v21  ;;  %v3370_v22 = vpop.f32.mrb[76].mxu0  ;;  %v3498_v23 = vpop.f32.mrb[76].mxu1 }
 0x176   :  { %v1672_v24 = vadd.f32 %v4832_v54, %v3370_v22  ;;  %v2184_v25 = vadd.f32 %v4832_v54, %v3498_v23  ;;  %v1663_v26 = vpop.f32.mrb[77].mxu0  ;;  %v2175_v27 = vpop.f32.mrb[77].mxu1 }
 0x177   :  { %v1664_v28 = vadd.f32 %v4832_v54, %v1663_v26  ;;  %v2176_v29 = vadd.f32 %v4832_v54, %v2175_v27  ;;  %v3371_v30 = vpop.f32.mrb[78].mxu0  ;;  %v3499_v31 = vpop.f32.mrb[78].mxu1 }
 0x178   :  { %v2460_v32 = vmax.f32 %v1672_v24, 0.0  ;;  %v2588_v33 = vmax.f32 %v2184_v25, 0.0  ;;  %v1675_v34 = vadd.f32 %v4832_v54, %v3371_v30  ;;  %v2187_v35 = vadd.f32 %v4832_v54, %v3499_v31  ;;  %v1666_v36 = vpop.f32.mrb[79].mxu0  ;;  %v2178_v37 = vpop.f32.mrb[79].mxu1 }
 0x179   :  { %v2458_v38 = vmax.f32 %v1664_v28, 0.0  ;;  %v2586_v39 = vmax.f32 %v2176_v29, 0.0  ;;  %v1667_v40 = vadd.f32 %v4832_v54, %v1666_v36  ;;  %v2179_v41 = vadd.f32 %v4832_v54, %v2178_v37 }
 0x17a   :  { %2717 = vst.msk [vmem:[%s5512_s3 + $0x270] sm:$0xff] %vm2638_vm3, %v2460_v32  ;;  %2845 = vst.msk [vmem:[%s5512_s3 + $0x670] sm:$0xff] %vm2638_vm3, %v2588_v33  ;;  %v2461_v42 = vmax.f32 %v1675_v34, 0.0  ;;  %v2589_v43 = vmax.f32 %v2187_v35, 0.0 }
 0x17b   :  { %2715 = vst.msk [vmem:[%s5512_s3 + $0x260] sm:$0xff] %vm2638_vm3, %v2458_v38  ;;  %2843 = vst.msk [vmem:[%s5512_s3 + $0x660] sm:$0xff] %vm2638_vm3, %v2586_v39  ;;  %v2459_v44 = vmax.f32 %v1667_v40, 0.0  ;;  %v2587_v45 = vmax.f32 %v2179_v41, 0.0 }
 0x17c   :  { %2718 = vst.msk [vmem:[%s5512_s3 + $0x278] sm:$0xff] %vm2638_vm3, %v2461_v42  ;;  %2846 = vst.msk [vmem:[%s5512_s3 + $0x678] sm:$0xff] %vm2638_vm3, %v2589_v43 }
 0x17d   :  { %2716 = vst.msk [vmem:[%s5512_s3 + $0x268] sm:$0xff] %vm2638_vm3, %v2459_v44  ;;  %2844 = vst.msk [vmem:[%s5512_s3 + $0x668] sm:$0xff] %vm2638_vm3, %v2587_v45  ;;  %v3374_v46 = vpop.f32.mrb[80].mxu0  ;;  %v3502_v47 = vpop.f32.mrb[80].mxu1 }
 0x17e   :  { %v1688_v48 = vadd.f32 %v4832_v54, %v3374_v46  ;;  %v2200_v49 = vadd.f32 %v4832_v54, %v3502_v47  ;;  %v1679_v52 = vpop.f32.mrb[81].mxu0  ;;  %v2191_v50 = vpop.f32.mrb[81].mxu1 }
 0x17f   :  { %v1680_v51 = vadd.f32 %v4832_v54, %v1679_v52  ;;  %v2192_v53 = vadd.f32 %v4832_v54, %v2191_v50  ;;  %v3375_v55 = vpop.f32.mrb[82].mxu0  ;;  %v3503_v56 = vpop.f32.mrb[82].mxu1 }
 0x180   :  { %v2464_v57 = vmax.f32 %v1688_v48, 0.0  ;;  %v2592_v58 = vmax.f32 %v2200_v49, 0.0  ;;  %v1691_v59 = vadd.f32 %v4832_v54, %v3375_v55  ;;  %v2203_v60 = vadd.f32 %v4832_v54, %v3503_v56  ;;  %v1682_v61 = vpop.f32.mrb[83].mxu0  ;;  %v2194_v62 = vpop.f32.mrb[83].mxu1 }
 0x181   :  { %v2462_v63 = vmax.f32 %v1680_v51, 0.0  ;;  %v2590_v0 = vmax.f32 %v2192_v53, 0.0  ;;  %v1683_v1 = vadd.f32 %v4832_v54, %v1682_v61  ;;  %v2195_v2 = vadd.f32 %v4832_v54, %v2194_v62 }
 0x182   :  { %2721 = vst.msk [vmem:[%s5512_s3 + $0x290] sm:$0xff] %vm2638_vm3, %v2464_v57  ;;  %2849 = vst.msk [vmem:[%s5512_s3 + $0x690] sm:$0xff] %vm2638_vm3, %v2592_v58  ;;  %v2465_v3 = vmax.f32 %v1691_v59, 0.0  ;;  %v2593_v4 = vmax.f32 %v2203_v60, 0.0 }
 0x183   :  { %2719 = vst.msk [vmem:[%s5512_s3 + $0x280] sm:$0xff] %vm2638_vm3, %v2462_v63  ;;  %2847 = vst.msk [vmem:[%s5512_s3 + $0x680] sm:$0xff] %vm2638_vm3, %v2590_v0  ;;  %v2463_v5 = vmax.f32 %v1683_v1, 0.0  ;;  %v2591_v6 = vmax.f32 %v2195_v2, 0.0 }
 0x184   :  { %2722 = vst.msk [vmem:[%s5512_s3 + $0x298] sm:$0xff] %vm2638_vm3, %v2465_v3  ;;  %2850 = vst.msk [vmem:[%s5512_s3 + $0x698] sm:$0xff] %vm2638_vm3, %v2593_v4 }
 0x185   :  { %2720 = vst.msk [vmem:[%s5512_s3 + $0x288] sm:$0xff] %vm2638_vm3, %v2463_v5  ;;  %2848 = vst.msk [vmem:[%s5512_s3 + $0x688] sm:$0xff] %vm2638_vm3, %v2591_v6  ;;  %v3378_v7 = vpop.f32.mrb[84].mxu0  ;;  %v3506_v8 = vpop.f32.mrb[84].mxu1 }
 0x186   :  { %v1704_v9 = vadd.f32 %v4832_v54, %v3378_v7  ;;  %v2216_v10 = vadd.f32 %v4832_v54, %v3506_v8  ;;  %v1695_v11 = vpop.f32.mrb[85].mxu0  ;;  %v2207_v12 = vpop.f32.mrb[85].mxu1 }
 0x187   :  { %v1696_v13 = vadd.f32 %v4832_v54, %v1695_v11  ;;  %v2208_v14 = vadd.f32 %v4832_v54, %v2207_v12  ;;  %v3379_v15 = vpop.f32.mrb[86].mxu0  ;;  %v3507_v16 = vpop.f32.mrb[86].mxu1 }
 0x188   :  { %v2468_v17 = vmax.f32 %v1704_v9, 0.0  ;;  %v2596_v18 = vmax.f32 %v2216_v10, 0.0  ;;  %v1707_v19 = vadd.f32 %v4832_v54, %v3379_v15  ;;  %v2219_v20 = vadd.f32 %v4832_v54, %v3507_v16  ;;  %v1698_v21 = vpop.f32.mrb[87].mxu0  ;;  %v2210_v22 = vpop.f32.mrb[87].mxu1 }
 0x189   :  { %v2466_v23 = vmax.f32 %v1696_v13, 0.0  ;;  %v2594_v24 = vmax.f32 %v2208_v14, 0.0  ;;  %v1699_v25 = vadd.f32 %v4832_v54, %v1698_v21  ;;  %v2211_v26 = vadd.f32 %v4832_v54, %v2210_v22 }
 0x18a   :  { %2725 = vst.msk [vmem:[%s5512_s3 + $0x2b0] sm:$0xff] %vm2638_vm3, %v2468_v17  ;;  %2853 = vst.msk [vmem:[%s5512_s3 + $0x6b0] sm:$0xff] %vm2638_vm3, %v2596_v18  ;;  %v2469_v27 = vmax.f32 %v1707_v19, 0.0  ;;  %v2597_v28 = vmax.f32 %v2219_v20, 0.0 }
 0x18b   :  { %2723 = vst.msk [vmem:[%s5512_s3 + $0x2a0] sm:$0xff] %vm2638_vm3, %v2466_v23  ;;  %2851 = vst.msk [vmem:[%s5512_s3 + $0x6a0] sm:$0xff] %vm2638_vm3, %v2594_v24  ;;  %v2467_v29 = vmax.f32 %v1699_v25, 0.0  ;;  %v2595_v30 = vmax.f32 %v2211_v26, 0.0 }
 0x18c   :  { %2726 = vst.msk [vmem:[%s5512_s3 + $0x2b8] sm:$0xff] %vm2638_vm3, %v2469_v27  ;;  %2854 = vst.msk [vmem:[%s5512_s3 + $0x6b8] sm:$0xff] %vm2638_vm3, %v2597_v28 }
 0x18d   :  { %2724 = vst.msk [vmem:[%s5512_s3 + $0x2a8] sm:$0xff] %vm2638_vm3, %v2467_v29  ;;  %2852 = vst.msk [vmem:[%s5512_s3 + $0x6a8] sm:$0xff] %vm2638_vm3, %v2595_v30  ;;  %v3382_v31 = vpop.f32.mrb[88].mxu0  ;;  %v3510_v32 = vpop.f32.mrb[88].mxu1 }
 0x18e   :  { %v1720_v33 = vadd.f32 %v4832_v54, %v3382_v31  ;;  %v2232_v34 = vadd.f32 %v4832_v54, %v3510_v32  ;;  %v1711_v35 = vpop.f32.mrb[89].mxu0  ;;  %v2223_v36 = vpop.f32.mrb[89].mxu1 }
 0x18f   :  { %v1712_v37 = vadd.f32 %v4832_v54, %v1711_v35  ;;  %v2224_v38 = vadd.f32 %v4832_v54, %v2223_v36  ;;  %v3383_v39 = vpop.f32.mrb[90].mxu0  ;;  %v3511_v40 = vpop.f32.mrb[90].mxu1 }
 0x190   :  { %v2472_v41 = vmax.f32 %v1720_v33, 0.0  ;;  %v2600_v42 = vmax.f32 %v2232_v34, 0.0  ;;  %v1723_v43 = vadd.f32 %v4832_v54, %v3383_v39  ;;  %v2235_v44 = vadd.f32 %v4832_v54, %v3511_v40  ;;  %v1714_v45 = vpop.f32.mrb[91].mxu0  ;;  %v2226_v46 = vpop.f32.mrb[91].mxu1 }
 0x191   :  { %v2470_v47 = vmax.f32 %v1712_v37, 0.0  ;;  %v2598_v48 = vmax.f32 %v2224_v38, 0.0  ;;  %v1715_v49 = vadd.f32 %v4832_v54, %v1714_v45  ;;  %v2227_v52 = vadd.f32 %v4832_v54, %v2226_v46 }
 0x192   :  { %2729 = vst.msk [vmem:[%s5512_s3 + $0x2d0] sm:$0xff] %vm2638_vm3, %v2472_v41  ;;  %2857 = vst.msk [vmem:[%s5512_s3 + $0x6d0] sm:$0xff] %vm2638_vm3, %v2600_v42  ;;  %v2473_v50 = vmax.f32 %v1723_v43, 0.0  ;;  %v2601_v51 = vmax.f32 %v2235_v44, 0.0 }
 0x193   :  { %2727 = vst.msk [vmem:[%s5512_s3 + $0x2c0] sm:$0xff] %vm2638_vm3, %v2470_v47  ;;  %2855 = vst.msk [vmem:[%s5512_s3 + $0x6c0] sm:$0xff] %vm2638_vm3, %v2598_v48  ;;  %v2471_v53 = vmax.f32 %v1715_v49, 0.0  ;;  %v2599_v55 = vmax.f32 %v2227_v52, 0.0 }
 0x194   :  { %2730 = vst.msk [vmem:[%s5512_s3 + $0x2d8] sm:$0xff] %vm2638_vm3, %v2473_v50  ;;  %2858 = vst.msk [vmem:[%s5512_s3 + $0x6d8] sm:$0xff] %vm2638_vm3, %v2601_v51 }
 0x195   :  { %2728 = vst.msk [vmem:[%s5512_s3 + $0x2c8] sm:$0xff] %vm2638_vm3, %v2471_v53  ;;  %2856 = vst.msk [vmem:[%s5512_s3 + $0x6c8] sm:$0xff] %vm2638_vm3, %v2599_v55  ;;  %v3386_v56 = vpop.f32.mrb[92].mxu0  ;;  %v3514_v57 = vpop.f32.mrb[92].mxu1 }
 0x196   :  { %v1736_v58 = vadd.f32 %v4832_v54, %v3386_v56  ;;  %v2248_v59 = vadd.f32 %v4832_v54, %v3514_v57  ;;  %v1727_v60 = vpop.f32.mrb[93].mxu0  ;;  %v2239_v61 = vpop.f32.mrb[93].mxu1 }
 0x197   :  { %v1728_v62 = vadd.f32 %v4832_v54, %v1727_v60  ;;  %v2240_v63 = vadd.f32 %v4832_v54, %v2239_v61  ;;  %v3387_v0 = vpop.f32.mrb[94].mxu0  ;;  %v3515_v1 = vpop.f32.mrb[94].mxu1 }
 0x198   :  { %v2476_v2 = vmax.f32 %v1736_v58, 0.0  ;;  %v2604_v3 = vmax.f32 %v2248_v59, 0.0  ;;  %v1739_v4 = vadd.f32 %v4832_v54, %v3387_v0  ;;  %v2251_v5 = vadd.f32 %v4832_v54, %v3515_v1  ;;  %v1730_v6 = vpop.f32.mrb[95].mxu0  ;;  %v2242_v7 = vpop.f32.mrb[95].mxu1 }
 0x199   :  { %v2474_v8 = vmax.f32 %v1728_v62, 0.0  ;;  %v2602_v9 = vmax.f32 %v2240_v63, 0.0  ;;  %v1731_v10 = vadd.f32 %v4832_v54, %v1730_v6  ;;  %v2243_v11 = vadd.f32 %v4832_v54, %v2242_v7 }
 0x19a   :  { %2733 = vst.msk [vmem:[%s5512_s3 + $0x2f0] sm:$0xff] %vm2638_vm3, %v2476_v2  ;;  %2861 = vst.msk [vmem:[%s5512_s3 + $0x6f0] sm:$0xff] %vm2638_vm3, %v2604_v3  ;;  %v2477_v12 = vmax.f32 %v1739_v4, 0.0  ;;  %v2605_v13 = vmax.f32 %v2251_v5, 0.0 }
 0x19b   :  { %2731 = vst.msk [vmem:[%s5512_s3 + $0x2e0] sm:$0xff] %vm2638_vm3, %v2474_v8  ;;  %2859 = vst.msk [vmem:[%s5512_s3 + $0x6e0] sm:$0xff] %vm2638_vm3, %v2602_v9  ;;  %v2475_v14 = vmax.f32 %v1731_v10, 0.0  ;;  %v2603_v15 = vmax.f32 %v2243_v11, 0.0 }
 0x19c   :  { %2734 = vst.msk [vmem:[%s5512_s3 + $0x2f8] sm:$0xff] %vm2638_vm3, %v2477_v12  ;;  %2862 = vst.msk [vmem:[%s5512_s3 + $0x6f8] sm:$0xff] %vm2638_vm3, %v2605_v13 }
 0x19d   :  { %2732 = vst.msk [vmem:[%s5512_s3 + $0x2e8] sm:$0xff] %vm2638_vm3, %v2475_v14  ;;  %2860 = vst.msk [vmem:[%s5512_s3 + $0x6e8] sm:$0xff] %vm2638_vm3, %v2603_v15  ;;  %v3390_v16 = vpop.f32.mrb[96].mxu0  ;;  %v3518_v17 = vpop.f32.mrb[96].mxu1 }
 0x19e   :  { %v1752_v18 = vadd.f32 %v4832_v54, %v3390_v16  ;;  %v2264_v19 = vadd.f32 %v4832_v54, %v3518_v17  ;;  %v1743_v20 = vpop.f32.mrb[97].mxu0  ;;  %v2255_v21 = vpop.f32.mrb[97].mxu1 }
 0x19f   :  { %v1744_v22 = vadd.f32 %v4832_v54, %v1743_v20  ;;  %v2256_v23 = vadd.f32 %v4832_v54, %v2255_v21  ;;  %v3391_v24 = vpop.f32.mrb[98].mxu0  ;;  %v3519_v25 = vpop.f32.mrb[98].mxu1 }
 0x1a0   :  { %v2480_v26 = vmax.f32 %v1752_v18, 0.0  ;;  %v2608_v27 = vmax.f32 %v2264_v19, 0.0  ;;  %v1755_v28 = vadd.f32 %v4832_v54, %v3391_v24  ;;  %v2267_v29 = vadd.f32 %v4832_v54, %v3519_v25  ;;  %v1746_v30 = vpop.f32.mrb[99].mxu0  ;;  %v2258_v31 = vpop.f32.mrb[99].mxu1 }
 0x1a1   :  { %v2478_v32 = vmax.f32 %v1744_v22, 0.0  ;;  %v2606_v33 = vmax.f32 %v2256_v23, 0.0  ;;  %v1747_v34 = vadd.f32 %v4832_v54, %v1746_v30  ;;  %v2259_v35 = vadd.f32 %v4832_v54, %v2258_v31 }
 0x1a2   :  { %2737 = vst.msk [vmem:[%s5512_s3 + $0x310] sm:$0xff] %vm2638_vm3, %v2480_v26  ;;  %2865 = vst.msk [vmem:[%s5512_s3 + $0x710] sm:$0xff] %vm2638_vm3, %v2608_v27  ;;  %v2481_v36 = vmax.f32 %v1755_v28, 0.0  ;;  %v2609_v37 = vmax.f32 %v2267_v29, 0.0 }
 0x1a3   :  { %2735 = vst.msk [vmem:[%s5512_s3 + $0x300] sm:$0xff] %vm2638_vm3, %v2478_v32  ;;  %2863 = vst.msk [vmem:[%s5512_s3 + $0x700] sm:$0xff] %vm2638_vm3, %v2606_v33  ;;  %v2479_v38 = vmax.f32 %v1747_v34, 0.0  ;;  %v2607_v39 = vmax.f32 %v2259_v35, 0.0 }
 0x1a4   :  { %2738 = vst.msk [vmem:[%s5512_s3 + $0x318] sm:$0xff] %vm2638_vm3, %v2481_v36  ;;  %2866 = vst.msk [vmem:[%s5512_s3 + $0x718] sm:$0xff] %vm2638_vm3, %v2609_v37 }
 0x1a5   :  { %2736 = vst.msk [vmem:[%s5512_s3 + $0x308] sm:$0xff] %vm2638_vm3, %v2479_v38  ;;  %2864 = vst.msk [vmem:[%s5512_s3 + $0x708] sm:$0xff] %vm2638_vm3, %v2607_v39  ;;  %v3394_v40 = vpop.f32.mrb[100].mxu0  ;;  %v3522_v41 = vpop.f32.mrb[100].mxu1 }
 0x1a6   :  { %v1768_v42 = vadd.f32 %v4832_v54, %v3394_v40  ;;  %v2280_v43 = vadd.f32 %v4832_v54, %v3522_v41  ;;  %v1759_v44 = vpop.f32.mrb[101].mxu0  ;;  %v2271_v45 = vpop.f32.mrb[101].mxu1 }
 0x1a7   :  { %v1760_v46 = vadd.f32 %v4832_v54, %v1759_v44  ;;  %v2272_v47 = vadd.f32 %v4832_v54, %v2271_v45  ;;  %v3395_v48 = vpop.f32.mrb[102].mxu0  ;;  %v3523_v49 = vpop.f32.mrb[102].mxu1 }
 0x1a8   :  { %v2484_v52 = vmax.f32 %v1768_v42, 0.0  ;;  %v2612_v50 = vmax.f32 %v2280_v43, 0.0  ;;  %v1771_v51 = vadd.f32 %v4832_v54, %v3395_v48  ;;  %v2283_v53 = vadd.f32 %v4832_v54, %v3523_v49  ;;  %v1762_v55 = vpop.f32.mrb[103].mxu0  ;;  %v2274_v56 = vpop.f32.mrb[103].mxu1 }
 0x1a9   :  { %v2482_v57 = vmax.f32 %v1760_v46, 0.0  ;;  %v2610_v58 = vmax.f32 %v2272_v47, 0.0  ;;  %v1763_v59 = vadd.f32 %v4832_v54, %v1762_v55  ;;  %v2275_v60 = vadd.f32 %v4832_v54, %v2274_v56 }
 0x1aa   :  { %2741 = vst.msk [vmem:[%s5512_s3 + $0x330] sm:$0xff] %vm2638_vm3, %v2484_v52  ;;  %2869 = vst.msk [vmem:[%s5512_s3 + $0x730] sm:$0xff] %vm2638_vm3, %v2612_v50  ;;  %v2485_v61 = vmax.f32 %v1771_v51, 0.0  ;;  %v2613_v62 = vmax.f32 %v2283_v53, 0.0 }
 0x1ab   :  { %2739 = vst.msk [vmem:[%s5512_s3 + $0x320] sm:$0xff] %vm2638_vm3, %v2482_v57  ;;  %2867 = vst.msk [vmem:[%s5512_s3 + $0x720] sm:$0xff] %vm2638_vm3, %v2610_v58  ;;  %v2483_v63 = vmax.f32 %v1763_v59, 0.0  ;;  %v2611_v0 = vmax.f32 %v2275_v60, 0.0 }
 0x1ac   :  { %2742 = vst.msk [vmem:[%s5512_s3 + $0x338] sm:$0xff] %vm2638_vm3, %v2485_v61  ;;  %2870 = vst.msk [vmem:[%s5512_s3 + $0x738] sm:$0xff] %vm2638_vm3, %v2613_v62 }
 0x1ad   :  { %2740 = vst.msk [vmem:[%s5512_s3 + $0x328] sm:$0xff] %vm2638_vm3, %v2483_v63  ;;  %2868 = vst.msk [vmem:[%s5512_s3 + $0x728] sm:$0xff] %vm2638_vm3, %v2611_v0  ;;  %v3398_v1 = vpop.f32.mrb[104].mxu0  ;;  %v3526_v2 = vpop.f32.mrb[104].mxu1 }
 0x1ae   :  { %v1784_v3 = vadd.f32 %v4832_v54, %v3398_v1  ;;  %v2296_v4 = vadd.f32 %v4832_v54, %v3526_v2  ;;  %v1775_v5 = vpop.f32.mrb[105].mxu0  ;;  %v2287_v6 = vpop.f32.mrb[105].mxu1 }
 0x1af   :  { %v1776_v7 = vadd.f32 %v4832_v54, %v1775_v5  ;;  %v2288_v8 = vadd.f32 %v4832_v54, %v2287_v6  ;;  %v3399_v9 = vpop.f32.mrb[106].mxu0  ;;  %v3527_v10 = vpop.f32.mrb[106].mxu1 }
 0x1b0   :  { %v2488_v11 = vmax.f32 %v1784_v3, 0.0  ;;  %v2616_v12 = vmax.f32 %v2296_v4, 0.0  ;;  %v1787_v13 = vadd.f32 %v4832_v54, %v3399_v9  ;;  %v2299_v14 = vadd.f32 %v4832_v54, %v3527_v10  ;;  %v1778_v15 = vpop.f32.mrb[107].mxu0  ;;  %v2290_v16 = vpop.f32.mrb[107].mxu1 }
 0x1b1   :  { %v2486_v17 = vmax.f32 %v1776_v7, 0.0  ;;  %v2614_v18 = vmax.f32 %v2288_v8, 0.0  ;;  %v1779_v19 = vadd.f32 %v4832_v54, %v1778_v15  ;;  %v2291_v20 = vadd.f32 %v4832_v54, %v2290_v16 }
 0x1b2   :  { %2745 = vst.msk [vmem:[%s5512_s3 + $0x350] sm:$0xff] %vm2638_vm3, %v2488_v11  ;;  %2873 = vst.msk [vmem:[%s5512_s3 + $0x750] sm:$0xff] %vm2638_vm3, %v2616_v12  ;;  %v2489_v21 = vmax.f32 %v1787_v13, 0.0  ;;  %v2617_v22 = vmax.f32 %v2299_v14, 0.0 }
 0x1b3   :  { %2743 = vst.msk [vmem:[%s5512_s3 + $0x340] sm:$0xff] %vm2638_vm3, %v2486_v17  ;;  %2871 = vst.msk [vmem:[%s5512_s3 + $0x740] sm:$0xff] %vm2638_vm3, %v2614_v18  ;;  %v2487_v23 = vmax.f32 %v1779_v19, 0.0  ;;  %v2615_v24 = vmax.f32 %v2291_v20, 0.0 }
 0x1b4   :  { %2746 = vst.msk [vmem:[%s5512_s3 + $0x358] sm:$0xff] %vm2638_vm3, %v2489_v21  ;;  %2874 = vst.msk [vmem:[%s5512_s3 + $0x758] sm:$0xff] %vm2638_vm3, %v2617_v22 }
 0x1b5   :  { %2744 = vst.msk [vmem:[%s5512_s3 + $0x348] sm:$0xff] %vm2638_vm3, %v2487_v23  ;;  %2872 = vst.msk [vmem:[%s5512_s3 + $0x748] sm:$0xff] %vm2638_vm3, %v2615_v24  ;;  %v3402_v25 = vpop.f32.mrb[108].mxu0  ;;  %v3530_v26 = vpop.f32.mrb[108].mxu1 }
 0x1b6   :  { %v1800_v27 = vadd.f32 %v4832_v54, %v3402_v25  ;;  %v2312_v28 = vadd.f32 %v4832_v54, %v3530_v26  ;;  %v1791_v29 = vpop.f32.mrb[109].mxu0  ;;  %v2303_v30 = vpop.f32.mrb[109].mxu1 }
 0x1b7   :  { %v1792_v31 = vadd.f32 %v4832_v54, %v1791_v29  ;;  %v2304_v32 = vadd.f32 %v4832_v54, %v2303_v30  ;;  %v3403_v33 = vpop.f32.mrb[110].mxu0  ;;  %v3531_v34 = vpop.f32.mrb[110].mxu1 }
 0x1b8   :  { %v2492_v35 = vmax.f32 %v1800_v27, 0.0  ;;  %v2620_v36 = vmax.f32 %v2312_v28, 0.0  ;;  %v1803_v37 = vadd.f32 %v4832_v54, %v3403_v33  ;;  %v2315_v38 = vadd.f32 %v4832_v54, %v3531_v34  ;;  %v1794_v39 = vpop.f32.mrb[111].mxu0  ;;  %v2306_v40 = vpop.f32.mrb[111].mxu1 }
 0x1b9   :  { %v2490_v41 = vmax.f32 %v1792_v31, 0.0  ;;  %v2618_v42 = vmax.f32 %v2304_v32, 0.0  ;;  %v1795_v43 = vadd.f32 %v4832_v54, %v1794_v39  ;;  %v2307_v44 = vadd.f32 %v4832_v54, %v2306_v40 }
 0x1ba   :  { %2749 = vst.msk [vmem:[%s5512_s3 + $0x370] sm:$0xff] %vm2638_vm3, %v2492_v35  ;;  %2877 = vst.msk [vmem:[%s5512_s3 + $0x770] sm:$0xff] %vm2638_vm3, %v2620_v36  ;;  %v2493_v45 = vmax.f32 %v1803_v37, 0.0  ;;  %v2621_v46 = vmax.f32 %v2315_v38, 0.0 }
 0x1bb   :  { %2747 = vst.msk [vmem:[%s5512_s3 + $0x360] sm:$0xff] %vm2638_vm3, %v2490_v41  ;;  %2875 = vst.msk [vmem:[%s5512_s3 + $0x760] sm:$0xff] %vm2638_vm3, %v2618_v42  ;;  %v2491_v47 = vmax.f32 %v1795_v43, 0.0  ;;  %v2619_v48 = vmax.f32 %v2307_v44, 0.0 }
 0x1bc   :  { %2750 = vst.msk [vmem:[%s5512_s3 + $0x378] sm:$0xff] %vm2638_vm3, %v2493_v45  ;;  %2878 = vst.msk [vmem:[%s5512_s3 + $0x778] sm:$0xff] %vm2638_vm3, %v2621_v46 }
 0x1bd   :  { %2748 = vst.msk [vmem:[%s5512_s3 + $0x368] sm:$0xff] %vm2638_vm3, %v2491_v47  ;;  %2876 = vst.msk [vmem:[%s5512_s3 + $0x768] sm:$0xff] %vm2638_vm3, %v2619_v48  ;;  %v3406_v49 = vpop.f32.mrb[112].mxu0  ;;  %v3534_v52 = vpop.f32.mrb[112].mxu1 }
 0x1be   :  { %v1816_v50 = vadd.f32 %v4832_v54, %v3406_v49  ;;  %v2328_v51 = vadd.f32 %v4832_v54, %v3534_v52  ;;  %v1807_v53 = vpop.f32.mrb[113].mxu0  ;;  %v2319_v55 = vpop.f32.mrb[113].mxu1 }
 0x1bf   :  { %v1808_v56 = vadd.f32 %v4832_v54, %v1807_v53  ;;  %v2320_v57 = vadd.f32 %v4832_v54, %v2319_v55  ;;  %v3407_v58 = vpop.f32.mrb[114].mxu0  ;;  %v3535_v59 = vpop.f32.mrb[114].mxu1 }
 0x1c0   :  { %v2496_v60 = vmax.f32 %v1816_v50, 0.0  ;;  %v2624_v61 = vmax.f32 %v2328_v51, 0.0  ;;  %v1819_v62 = vadd.f32 %v4832_v54, %v3407_v58  ;;  %v2331_v63 = vadd.f32 %v4832_v54, %v3535_v59  ;;  %v1810_v0 = vpop.f32.mrb[115].mxu0  ;;  %v2322_v1 = vpop.f32.mrb[115].mxu1 }
 0x1c1   :  { %v2494_v2 = vmax.f32 %v1808_v56, 0.0  ;;  %v2622_v3 = vmax.f32 %v2320_v57, 0.0  ;;  %v1811_v4 = vadd.f32 %v4832_v54, %v1810_v0  ;;  %v2323_v5 = vadd.f32 %v4832_v54, %v2322_v1 }
 0x1c2   :  { %2753 = vst.msk [vmem:[%s5512_s3 + $0x390] sm:$0xff] %vm2638_vm3, %v2496_v60  ;;  %2881 = vst.msk [vmem:[%s5512_s3 + $0x790] sm:$0xff] %vm2638_vm3, %v2624_v61  ;;  %v2497_v6 = vmax.f32 %v1819_v62, 0.0  ;;  %v2625_v7 = vmax.f32 %v2331_v63, 0.0  ;;  %v3684_v60 = vld [vmem:[%s5511_s2] ss:$0 sm:$0xff] }
 0x1c3   :  { %2751 = vst.msk [vmem:[%s5512_s3 + $0x380] sm:$0xff] %vm2638_vm3, %v2494_v2  ;;  %2879 = vst.msk [vmem:[%s5512_s3 + $0x780] sm:$0xff] %vm2638_vm3, %v2622_v3  ;;  %v2495_v8 = vmax.f32 %v1811_v4, 0.0  ;;  %v2623_v9 = vmax.f32 %v2323_v5, 0.0 }
 0x1c4   :  { %2754 = vst.msk [vmem:[%s5512_s3 + $0x398] sm:$0xff] %vm2638_vm3, %v2497_v6  ;;  %2882 = vst.msk [vmem:[%s5512_s3 + $0x798] sm:$0xff] %vm2638_vm3, %v2625_v7 }
 0x1c5   :  { %2752 = vst.msk [vmem:[%s5512_s3 + $0x388] sm:$0xff] %vm2638_vm3, %v2495_v8  ;;  %2880 = vst.msk [vmem:[%s5512_s3 + $0x788] sm:$0xff] %vm2638_vm3, %v2623_v9  ;;  %v3410_v10 = vpop.f32.mrb[116].mxu0  ;;  %v3538_v11 = vpop.f32.mrb[116].mxu1 }
 0x1c6   :  { %v1832_v12 = vadd.f32 %v4832_v54, %v3410_v10  ;;  %v2344_v13 = vadd.f32 %v4832_v54, %v3538_v11  ;;  %v1823_v14 = vpop.f32.mrb[117].mxu0  ;;  %v2335_v15 = vpop.f32.mrb[117].mxu1 }
 0x1c7   :  { %v1824_v16 = vadd.f32 %v4832_v54, %v1823_v14  ;;  %v2336_v17 = vadd.f32 %v4832_v54, %v2335_v15  ;;  %v3411_v18 = vpop.f32.mrb[118].mxu0  ;;  %v3539_v19 = vpop.f32.mrb[118].mxu1 }
 0x1c8   :  { %v2500_v20 = vmax.f32 %v1832_v12, 0.0  ;;  %v2628_v21 = vmax.f32 %v2344_v13, 0.0  ;;  %v1835_v22 = vadd.f32 %v4832_v54, %v3411_v18  ;;  %v2347_v23 = vadd.f32 %v4832_v54, %v3539_v19  ;;  %v1826_v24 = vpop.f32.mrb[119].mxu0  ;;  %v2338_v25 = vpop.f32.mrb[119].mxu1 }
 0x1c9   :  { %v2498_v26 = vmax.f32 %v1824_v16, 0.0  ;;  %v2626_v27 = vmax.f32 %v2336_v17, 0.0  ;;  %v1827_v28 = vadd.f32 %v4832_v54, %v1826_v24  ;;  %v2339_v29 = vadd.f32 %v4832_v54, %v2338_v25 }
 0x1ca   :  { %2757 = vst.msk [vmem:[%s5512_s3 + $0x3b0] sm:$0xff] %vm2638_vm3, %v2500_v20  ;;  %2885 = vst.msk [vmem:[%s5512_s3 + $0x7b0] sm:$0xff] %vm2638_vm3, %v2628_v21  ;;  %v2501_v30 = vmax.f32 %v1835_v22, 0.0  ;;  %v2629_v31 = vmax.f32 %v2347_v23, 0.0 }
 0x1cb   :  { %2755 = vst.msk [vmem:[%s5512_s3 + $0x3a0] sm:$0xff] %vm2638_vm3, %v2498_v26  ;;  %2883 = vst.msk [vmem:[%s5512_s3 + $0x7a0] sm:$0xff] %vm2638_vm3, %v2626_v27  ;;  %v2499_v32 = vmax.f32 %v1827_v28, 0.0  ;;  %v2627_v33 = vmax.f32 %v2339_v29, 0.0 }
 0x1cc   :  { %2758 = vst.msk [vmem:[%s5512_s3 + $0x3b8] sm:$0xff] %vm2638_vm3, %v2501_v30  ;;  %2886 = vst.msk [vmem:[%s5512_s3 + $0x7b8] sm:$0xff] %vm2638_vm3, %v2629_v31 }
 0x1cd   :  { %2756 = vst.msk [vmem:[%s5512_s3 + $0x3a8] sm:$0xff] %vm2638_vm3, %v2499_v32  ;;  %2884 = vst.msk [vmem:[%s5512_s3 + $0x7a8] sm:$0xff] %vm2638_vm3, %v2627_v33  ;;  %v3414_v34 = vpop.f32.mrb[120].mxu0  ;;  %v3542_v35 = vpop.f32.mrb[120].mxu1 }
 0x1ce   :  { %v1848_v36 = vadd.f32 %v4832_v54, %v3414_v34  ;;  %v2360_v37 = vadd.f32 %v4832_v54, %v3542_v35  ;;  %v1839_v38 = vpop.f32.mrb[121].mxu0  ;;  %v2351_v39 = vpop.f32.mrb[121].mxu1 }
 0x1cf   :  { %v1840_v40 = vadd.f32 %v4832_v54, %v1839_v38  ;;  %v2352_v41 = vadd.f32 %v4832_v54, %v2351_v39  ;;  %v3415_v42 = vpop.f32.mrb[122].mxu0  ;;  %v3543_v43 = vpop.f32.mrb[122].mxu1 }
 0x1d0   :  { %v2504_v44 = vmax.f32 %v1848_v36, 0.0  ;;  %v2632_v45 = vmax.f32 %v2360_v37, 0.0  ;;  %v1851_v46 = vadd.f32 %v4832_v54, %v3415_v42  ;;  %v2363_v47 = vadd.f32 %v4832_v54, %v3543_v43  ;;  %v1842_v48 = vpop.f32.mrb[123].mxu0  ;;  %v2354_v49 = vpop.f32.mrb[123].mxu1 }
 0x1d1   :  { %v2502_v52 = vmax.f32 %v1840_v40, 0.0  ;;  %v2630_v50 = vmax.f32 %v2352_v41, 0.0  ;;  %v1843_v51 = vadd.f32 %v4832_v54, %v1842_v48  ;;  %v2355_v53 = vadd.f32 %v4832_v54, %v2354_v49 }
 0x1d2   :  { %2761 = vst.msk [vmem:[%s5512_s3 + $0x3d0] sm:$0xff] %vm2638_vm3, %v2504_v44  ;;  %2889 = vst.msk [vmem:[%s5512_s3 + $0x7d0] sm:$0xff] %vm2638_vm3, %v2632_v45  ;;  %v2505_v55 = vmax.f32 %v1851_v46, 0.0  ;;  %v2633_v56 = vmax.f32 %v2363_v47, 0.0 }
 0x1d3   :  { %2759 = vst.msk [vmem:[%s5512_s3 + $0x3c0] sm:$0xff] %vm2638_vm3, %v2502_v52  ;;  %2887 = vst.msk [vmem:[%s5512_s3 + $0x7c0] sm:$0xff] %vm2638_vm3, %v2630_v50  ;;  %v2503_v54 = vmax.f32 %v1843_v51, 0.0  ;;  %v2631_v57 = vmax.f32 %v2355_v53, 0.0 }
 0x1d4   :  { %2762 = vst.msk [vmem:[%s5512_s3 + $0x3d8] sm:$0xff] %vm2638_vm3, %v2505_v55  ;;  %2890 = vst.msk [vmem:[%s5512_s3 + $0x7d8] sm:$0xff] %vm2638_vm3, %v2633_v56 }
 0x1d5   :  { %2760 = vst.msk [vmem:[%s5512_s3 + $0x3c8] sm:$0xff] %vm2638_vm3, %v2503_v54  ;;  %2888 = vst.msk [vmem:[%s5512_s3 + $0x7c8] sm:$0xff] %vm2638_vm3, %v2631_v57  ;;  %v3418_v58 = vpop.f32.mrb[124].mxu0  ;;  %v3546_v59 = vpop.f32.mrb[124].mxu1 }
 0x1d6   :  { %v1864_v61 = vadd.f32 %v3684_v60, %v3418_v58  ;;  %v2376_v62 = vadd.f32 %v3684_v60, %v3546_v59  ;;  %v1855_v63 = vpop.f32.mrb[125].mxu0  ;;  %v2367_v0 = vpop.f32.mrb[125].mxu1 }
 0x1d7   :  { %v1856_v1 = vadd.f32 %v3684_v60, %v1855_v63  ;;  %v2368_v2 = vadd.f32 %v3684_v60, %v2367_v0  ;;  %v3419_v3 = vpop.f32.mrb[126].mxu0  ;;  %v3547_v4 = vpop.f32.mrb[126].mxu1 }
 0x1d8   :  { %v2508_v5 = vmax.f32 %v1864_v61, 0.0  ;;  %v2636_v6 = vmax.f32 %v2376_v62, 0.0  ;;  %v1867_v7 = vadd.f32 %v3684_v60, %v3419_v3  ;;  %v2379_v8 = vadd.f32 %v3684_v60, %v3547_v4  ;;  %v1858_v9 = vpop.f32.mrb[127].mxu0  ;;  %v2370_v10 = vpop.f32.mrb[127].mxu1 }
 0x1d9   :  { %v2506_v11 = vmax.f32 %v1856_v1, 0.0  ;;  %v2634_v12 = vmax.f32 %v2368_v2, 0.0  ;;  %v1859_v13 = vadd.f32 %v3684_v60, %v1858_v9  ;;  %v2371_v14 = vadd.f32 %v3684_v60, %v2370_v10 }
 0x1da   :  { %2765 = vst.msk [vmem:[%s5512_s3 + $0x3f0] sm:$0xff] %vm2638_vm3, %v2508_v5  ;;  %2893 = vst.msk [vmem:[%s5512_s3 + $0x7f0] sm:$0xff] %vm2638_vm3, %v2636_v6  ;;  %v2509_v15 = vmax.f32 %v1867_v7, 0.0  ;;  %v2637_v16 = vmax.f32 %v2379_v8, 0.0 }
 0x1db   :  { %2763 = vst.msk [vmem:[%s5512_s3 + $0x3e0] sm:$0xff] %vm2638_vm3, %v2506_v11  ;;  %2891 = vst.msk [vmem:[%s5512_s3 + $0x7e0] sm:$0xff] %vm2638_vm3, %v2634_v12  ;;  %v2507_v17 = vmax.f32 %v1859_v13, 0.0  ;;  %v2635_v18 = vmax.f32 %v2371_v14, 0.0 }
 0x1dc   :  { %2766 = vst.msk [vmem:[%s5512_s3 + $0x3f8] sm:$0xff] %vm2638_vm3, %v2509_v15  ;;  %2894 = vst.msk [vmem:[%s5512_s3 + $0x7f8] sm:$0xff] %vm2638_vm3, %v2637_v16 }
 0x1dd   :  { %2764 = vst.msk [vmem:[%s5512_s3 + $0x3e8] sm:$0xff] %vm2638_vm3, %v2507_v17  ;;  %2892 = vst.msk [vmem:[%s5512_s3 + $0x7e8] sm:$0xff] %vm2638_vm3, %v2635_v18 }

// kernel: _lambda_.29
= control target key start
LH: loop header
LB: loop body
LE: loop exit
PB: predicated region body
PF: predicated region fallthrough
CT: control target
= control target key end

     0   :  { %vm954_vm0 = vcmask 588800   ;;  %vm1339_vm1 = vcmask 1043456   ;;  %vm2656_vm2 = vcmask 64512   ;;  %s5557_s1 = inlined_call_operand.vmem [shape: bf16[72,8], index: 1, kind: input, shape index: {}]   ;;  %s5558_s0 = inlined_call_operand.vmem [shape: bf16[2048,72], index: 0, kind: input, shape index: {}]   ;;  %s5559_s2 = inlined_call_operand.vmem [shape: f32[1,8], index: 2, kind: input, shape index: {}]   ;;  %s5560_s3 = inlined_call_operand.vmem [shape: f32[2048,8], index: 3, kind: output, shape index: {}]  }
   0x1   :  { %v3590_v0 = vld [vmem:[%s5557_s1] sm:$0xff]   ;;  %v3591_v1 = vld [vmem:[%s5557_s1 + $0x8] sm:$0xff]   ;;  %v3592_v2 = vld [vmem:[%s5557_s1 + $0x10] sm:$0xff]  }
   0x2   :  { %3312 = vmatprep.subr.bf16.mxu0 %v3590_v0  ;;  %3578 = vmatprep.subr.bf16.mxu1 %v3590_v0  ;;  %v3595_v3 = vld [vmem:[%s5558_s0] sm:$0xff]   ;;  %v3593_v5 = vld [vmem:[%s5557_s1 + $0x18] sm:$0xff]   ;;  %v3597_v8 = vld [vmem:[%s5558_s0 + $0x8] sm:$0xff]  }
   0x3   :  { %3313 = vmatpush3.bf16.msra.mxu0 %v3590_v0  ;;  %3583 = vmatpush3.bf16.msra.mxu1 %v3590_v0  ;;  %v3596_v4 = vld [vmem:[%s5558_s0 + $0x200] sm:$0xff]   ;;  %v3598_v9 = vld [vmem:[%s5558_s0 + $0x208] sm:$0xff]   ;;  %v3599_v10 = vld [vmem:[%s5558_s0 + $0x10] sm:$0xff]  }
   0x4   :  { %3314 = vmatprep.subr.bf16.mxu0 %v3591_v1  ;;  %3579 = vmatprep.subr.bf16.mxu1 %v3591_v1  ;;  %v3594_v6 = vld [vmem:[%s5557_s1 + $0x20] ss:$0 sps:$4 sm:$0xff]   ;;  %v3600_v11 = vld [vmem:[%s5558_s0 + $0x210] sm:$0xff]   ;;  %v3601_v12 = vld [vmem:[%s5558_s0 + $0x18] sm:$0xff]  }
   0x5   :  { %3322 = vmatprep.mubr.msk.bf16.mxu0 %vm954_vm0, %v3595_v3  ;;  %3450 = vmatprep.mubr.msk.bf16.mxu1 %vm954_vm0, %v3596_v4  ;;  %v1341_v7 = vsel %vm1339_vm1, %v3594_v6, 0  ;;  %v3602_v13 = vld [vmem:[%s5558_s0 + $0x218] sm:$0xff]   ;;  %v3603_v14 = vld [vmem:[%s5558_s0 + $0x20] sm:$0xff]   ;;  %v3605_v16 = vld [vmem:[%s5558_s0 + $0x28] sm:$0xff]  }
   0x6   :  { %v3604_v15 = vld [vmem:[%s5558_s0 + $0x220] sm:$0xff]   ;;  %v3606_v17 = vld [vmem:[%s5558_s0 + $0x228] sm:$0xff]   ;;  %v3607_v18 = vld [vmem:[%s5558_s0 + $0x30] sm:$0xff]  }
   0x7   :  { %3315 = vmatpush3.bf16.msra.mxu0 %v3591_v1  ;;  %3584 = vmatpush3.bf16.msra.mxu1 %v3591_v1  ;;  %v3608_v19 = vld [vmem:[%s5558_s0 + $0x230] sm:$0xff]   ;;  %v3609_v20 = vld [vmem:[%s5558_s0 + $0x38] sm:$0xff]   ;;  %v3611_v22 = vld [vmem:[%s5558_s0 + $0x40] sm:$0xff]  }
   0x8   :  { %3316 = vmatprep.subr.bf16.mxu0 %v3592_v2  ;;  %3580 = vmatprep.subr.bf16.mxu1 %v3592_v2  ;;  %v3610_v21 = vld [vmem:[%s5558_s0 + $0x238] sm:$0xff]   ;;  %v3612_v23 = vld [vmem:[%s5558_s0 + $0x240] sm:$0xff]   ;;  %v3613_v24 = vld [vmem:[%s5558_s0 + $0x48] sm:$0xff]  }
   0x9   :  { %v3614_v25 = vld [vmem:[%s5558_s0 + $0x248] sm:$0xff]   ;;  %v3615_v26 = vld [vmem:[%s5558_s0 + $0x50] sm:$0xff]   ;;  %v3617_v28 = vld [vmem:[%s5558_s0 + $0x58] sm:$0xff]  }
   0xa   :  { %v3616_v27 = vld [vmem:[%s5558_s0 + $0x250] sm:$0xff]   ;;  %v3618_v29 = vld [vmem:[%s5558_s0 + $0x258] sm:$0xff]   ;;  %v3619_v30 = vld [vmem:[%s5558_s0 + $0x60] sm:$0xff]  }
   0xb   :  { %3317 = vmatpush3.bf16.msra.mxu0 %v3592_v2  ;;  %3585 = vmatpush3.bf16.msra.mxu1 %v3592_v2  ;;  %v3620_v31 = vld [vmem:[%s5558_s0 + $0x260] sm:$0xff]   ;;  %v3621_v32 = vld [vmem:[%s5558_s0 + $0x68] sm:$0xff]   ;;  %v3623_v34 = vld [vmem:[%s5558_s0 + $0x70] sm:$0xff]  }
   0xc   :  { %3318 = vmatprep.subr.bf16.mxu0 %v3593_v5  ;;  %3581 = vmatprep.subr.bf16.mxu1 %v3593_v5  ;;  %v3622_v33 = vld [vmem:[%s5558_s0 + $0x268] sm:$0xff]   ;;  %v3624_v35 = vld [vmem:[%s5558_s0 + $0x270] sm:$0xff]   ;;  %v3625_v36 = vld [vmem:[%s5558_s0 + $0x78] sm:$0xff]  }
   0xd   :  { %v3626_v37 = vld [vmem:[%s5558_s0 + $0x278] sm:$0xff]   ;;  %v3627_v38 = vld [vmem:[%s5558_s0 + $0x80] sm:$0xff]   ;;  %v3629_v40 = vld [vmem:[%s5558_s0 + $0x88] sm:$0xff]  }
   0xe   :  { %v3628_v39 = vld [vmem:[%s5558_s0 + $0x280] sm:$0xff]   ;;  %v3630_v41 = vld [vmem:[%s5558_s0 + $0x288] sm:$0xff]   ;;  %v3631_v42 = vld [vmem:[%s5558_s0 + $0x90] sm:$0xff]  }
   0xf   :  { %3319 = vmatpush3.bf16.msra.mxu0 %v3593_v5  ;;  %3586 = vmatpush3.bf16.msra.mxu1 %v3593_v5  ;;  %v3632_v43 = vld [vmem:[%s5558_s0 + $0x290] sm:$0xff]   ;;  %v3633_v44 = vld [vmem:[%s5558_s0 + $0x98] sm:$0xff]   ;;  %v3635_v46 = vld [vmem:[%s5558_s0 + $0xa0] sm:$0xff]  }
  0x10   :  { %3588 = vmatprep.subr.msk.bf16.mxu0 %vm1339_vm1, %v3594_v6  ;;  %3589 = vmatprep.subr.msk.bf16.mxu1 %vm1339_vm1, %v3594_v6  ;;  %v3634_v45 = vld [vmem:[%s5558_s0 + $0x298] sm:$0xff]   ;;  %v3636_v47 = vld [vmem:[%s5558_s0 + $0x2a0] sm:$0xff]   ;;  %v3637_v48 = vld [vmem:[%s5558_s0 + $0xa8] sm:$0xff]  }
  0x11   :  { %v3638_v49 = vld [vmem:[%s5558_s0 + $0x2a8] sm:$0xff]   ;;  %v3639_v50 = vld [vmem:[%s5558_s0 + $0xb0] sm:$0xff]   ;;  %v3641_v52 = vld [vmem:[%s5558_s0 + $0xb8] sm:$0xff]  }
  0x12   :  { %v3640_v51 = vld [vmem:[%s5558_s0 + $0x2b0] sm:$0xff]   ;;  %v3642_v53 = vld [vmem:[%s5558_s0 + $0x2b8] sm:$0xff]   ;;  %v3643_v54 = vld [vmem:[%s5558_s0 + $0xc0] sm:$0xff]  }
  0x13   :  { %3321 = vmatpush3.bf16.msra.mxu0 %v1341_v7  ;;  %3587 = vmatpush3.bf16.msra.mxu1 %v1341_v7  ;;  %v3644_v55 = vld [vmem:[%s5558_s0 + $0x2c0] sm:$0xff]   ;;  %v3645_v56 = vld [vmem:[%s5558_s0 + $0xc8] sm:$0xff]   ;;  %v3647_v58 = vld [vmem:[%s5558_s0 + $0xd0] sm:$0xff]  }
  0x14   :  { %v3646_v57 = vld [vmem:[%s5558_s0 + $0x2c8] sm:$0xff]   ;;  %v3648_v59 = vld [vmem:[%s5558_s0 + $0x2d0] sm:$0xff]   ;;  %v3649_v60 = vld [vmem:[%s5558_s0 + $0xd8] sm:$0xff]  }
  0x15   :  { %v3650_v61 = vld [vmem:[%s5558_s0 + $0x2d8] sm:$0xff]   ;;  %v3651_v62 = vld [vmem:[%s5558_s0 + $0xe0] sm:$0xff]   ;;  %v3653_v0 = vld [vmem:[%s5558_s0 + $0xe8] sm:$0xff]  }
  0x16   :  { %3323 = vmatmul.mubr.msk.bf16.vlgmr.msra.gmra.mrb[0].mxu0 %vm954_vm0, %v3597_v8  ;;  %3451 = vmatmul.mubr.msk.bf16.vlgmr.msra.gmra.mrb[0].mxu1 %vm954_vm0, %v3598_v9  ;;  %v3652_v63 = vld [vmem:[%s5558_s0 + $0x2e0] sm:$0xff]   ;;  %v3654_v1 = vld [vmem:[%s5558_s0 + $0x2e8] sm:$0xff]   ;;  %v3655_v2 = vld [vmem:[%s5558_s0 + $0xf0] sm:$0xff]  }
  0x17   :  { %3326 = vmatprep.mubr.msk.bf16.mxu0 %vm954_vm0, %v3599_v10  ;;  %3454 = vmatprep.mubr.msk.bf16.mxu1 %vm954_vm0, %v3600_v11  ;;  %v3656_v3 = vld [vmem:[%s5558_s0 + $0x2f0] sm:$0xff]   ;;  %v3657_v4 = vld [vmem:[%s5558_s0 + $0xf8] sm:$0xff]   ;;  %v3659_v6 = vld [vmem:[%s5558_s0 + $0x100] sm:$0xff]  }
  0x18   :  { %v3658_v5 = vld [vmem:[%s5558_s0 + $0x2f8] sm:$0xff]   ;;  %v3660_v7 = vld [vmem:[%s5558_s0 + $0x300] sm:$0xff]   ;;  %v3661_v8 = vld [vmem:[%s5558_s0 + $0x108] sm:$0xff]  }
  0x19   :  { %v3662_v9 = vld [vmem:[%s5558_s0 + $0x308] sm:$0xff]   ;;  %v3663_v10 = vld [vmem:[%s5558_s0 + $0x110] sm:$0xff]  }
  0x1a   :  { %v3664_v11 = vld [vmem:[%s5558_s0 + $0x310] sm:$0xff]  }
  0x1e   :  { %3327 = vmatmul.mubr.msk.bf16.gmra.mrb[4].mxu0 %vm954_vm0, %v3601_v12  ;;  %3455 = vmatmul.mubr.msk.bf16.gmra.mrb[4].mxu1 %vm954_vm0, %v3602_v13  ;;  %v3665_v12 = vld [vmem:[%s5558_s0 + $0x118] sm:$0xff]  }
  0x1f   :  { %3330 = vmatprep.mubr.msk.bf16.mxu0 %vm954_vm0, %v3603_v14  ;;  %3458 = vmatprep.mubr.msk.bf16.mxu1 %vm954_vm0, %v3604_v15  ;;  %v3666_v13 = vld [vmem:[%s5558_s0 + $0x318] sm:$0xff]   ;;  %v3667_v14 = vld [vmem:[%s5558_s0 + $0x120] sm:$0xff]  }
  0x20   :  { %v3668_v15 = vld [vmem:[%s5558_s0 + $0x320] sm:$0xff]  }
  0x26   :  { %3331 = vmatmul.mubr.msk.bf16.gmra.mrb[8].mxu0 %vm954_vm0, %v3605_v16  ;;  %3459 = vmatmul.mubr.msk.bf16.gmra.mrb[8].mxu1 %vm954_vm0, %v3606_v17  ;;  %v3669_v16 = vld [vmem:[%s5558_s0 + $0x128] sm:$0xff]  }
  0x27   :  { %3334 = vmatprep.mubr.msk.bf16.mxu0 %vm954_vm0, %v3607_v18  ;;  %3462 = vmatprep.mubr.msk.bf16.mxu1 %vm954_vm0, %v3608_v19  ;;  %v3670_v17 = vld [vmem:[%s5558_s0 + $0x328] sm:$0xff]   ;;  %v3671_v18 = vld [vmem:[%s5558_s0 + $0x130] sm:$0xff]  }
  0x28   :  { %v3672_v19 = vld [vmem:[%s5558_s0 + $0x330] sm:$0xff]  }
  0x2e   :  { %3335 = vmatmul.mubr.msk.bf16.gmra.mrb[12].mxu0 %vm954_vm0, %v3609_v20  ;;  %3463 = vmatmul.mubr.msk.bf16.gmra.mrb[12].mxu1 %vm954_vm0, %v3610_v21  ;;  %v3673_v20 = vld [vmem:[%s5558_s0 + $0x138] sm:$0xff]  }
  0x2f   :  { %3338 = vmatprep.mubr.msk.bf16.mxu0 %vm954_vm0, %v3611_v22  ;;  %3466 = vmatprep.mubr.msk.bf16.mxu1 %vm954_vm0, %v3612_v23  ;;  %v3674_v21 = vld [vmem:[%s5558_s0 + $0x338] sm:$0xff]   ;;  %v3675_v22 = vld [vmem:[%s5558_s0 + $0x140] sm:$0xff]  }
  0x30   :  { %v3676_v23 = vld [vmem:[%s5558_s0 + $0x340] sm:$0xff]  }
  0x36   :  { %3339 = vmatmul.mubr.msk.bf16.gmra.mrb[16].mxu0 %vm954_vm0, %v3613_v24  ;;  %3467 = vmatmul.mubr.msk.bf16.gmra.mrb[16].mxu1 %vm954_vm0, %v3614_v25  ;;  %v3677_v24 = vld [vmem:[%s5558_s0 + $0x148] sm:$0xff]  }
  0x37   :  { %3342 = vmatprep.mubr.msk.bf16.mxu0 %vm954_vm0, %v3615_v26  ;;  %3470 = vmatprep.mubr.msk.bf16.mxu1 %vm954_vm0, %v3616_v27  ;;  %v3678_v25 = vld [vmem:[%s5558_s0 + $0x348] sm:$0xff]   ;;  %v3679_v26 = vld [vmem:[%s5558_s0 + $0x150] sm:$0xff]  }
  0x38   :  { %v3680_v27 = vld [vmem:[%s5558_s0 + $0x350] sm:$0xff]  }
  0x3e   :  { %3343 = vmatmul.mubr.msk.bf16.gmra.mrb[20].mxu0 %vm954_vm0, %v3617_v28  ;;  %3471 = vmatmul.mubr.msk.bf16.gmra.mrb[20].mxu1 %vm954_vm0, %v3618_v29  ;;  %v3681_v28 = vld [vmem:[%s5558_s0 + $0x158] sm:$0xff]  }
  0x3f   :  { %3346 = vmatprep.mubr.msk.bf16.mxu0 %vm954_vm0, %v3619_v30  ;;  %3474 = vmatprep.mubr.msk.bf16.mxu1 %vm954_vm0, %v3620_v31  ;;  %v3682_v29 = vld [vmem:[%s5558_s0 + $0x358] sm:$0xff]   ;;  %v3683_v30 = vld [vmem:[%s5558_s0 + $0x160] sm:$0xff]  }
  0x40   :  { %v3684_v31 = vld [vmem:[%s5558_s0 + $0x360] sm:$0xff]  }
  0x46   :  { %3347 = vmatmul.mubr.msk.bf16.gmra.mrb[24].mxu0 %vm954_vm0, %v3621_v32  ;;  %3475 = vmatmul.mubr.msk.bf16.gmra.mrb[24].mxu1 %vm954_vm0, %v3622_v33  ;;  %v3685_v32 = vld [vmem:[%s5558_s0 + $0x168] sm:$0xff]  }
  0x47   :  { %3350 = vmatprep.mubr.msk.bf16.mxu0 %vm954_vm0, %v3623_v34  ;;  %3478 = vmatprep.mubr.msk.bf16.mxu1 %vm954_vm0, %v3624_v35  ;;  %v3686_v33 = vld [vmem:[%s5558_s0 + $0x368] sm:$0xff]   ;;  %v3687_v34 = vld [vmem:[%s5558_s0 + $0x170] sm:$0xff]  }
  0x48   :  { %v3688_v35 = vld [vmem:[%s5558_s0 + $0x370] sm:$0xff]  }
  0x4e   :  { %3351 = vmatmul.mubr.msk.bf16.gmra.mrb[28].mxu0 %vm954_vm0, %v3625_v36  ;;  %3479 = vmatmul.mubr.msk.bf16.gmra.mrb[28].mxu1 %vm954_vm0, %v3626_v37  ;;  %v3689_v36 = vld [vmem:[%s5558_s0 + $0x178] sm:$0xff]  }
  0x4f   :  { %3354 = vmatprep.mubr.msk.bf16.mxu0 %vm954_vm0, %v3627_v38  ;;  %3482 = vmatprep.mubr.msk.bf16.mxu1 %vm954_vm0, %v3628_v39  ;;  %v3690_v37 = vld [vmem:[%s5558_s0 + $0x378] sm:$0xff]   ;;  %v3691_v38 = vld [vmem:[%s5558_s0 + $0x180] sm:$0xff]  }
  0x50   :  { %v3692_v39 = vld [vmem:[%s5558_s0 + $0x380] sm:$0xff]  }
  0x56   :  { %3355 = vmatmul.mubr.msk.bf16.gmra.mrb[32].mxu0 %vm954_vm0, %v3629_v40  ;;  %3483 = vmatmul.mubr.msk.bf16.gmra.mrb[32].mxu1 %vm954_vm0, %v3630_v41  ;;  %v3693_v40 = vld [vmem:[%s5558_s0 + $0x188] sm:$0xff]  }
  0x57   :  { %3358 = vmatprep.mubr.msk.bf16.mxu0 %vm954_vm0, %v3631_v42  ;;  %3486 = vmatprep.mubr.msk.bf16.mxu1 %vm954_vm0, %v3632_v43  ;;  %v3694_v41 = vld [vmem:[%s5558_s0 + $0x388] sm:$0xff]   ;;  %v3695_v42 = vld [vmem:[%s5558_s0 + $0x190] sm:$0xff]  }
  0x58   :  { %v3696_v43 = vld [vmem:[%s5558_s0 + $0x390] sm:$0xff]  }
  0x5e   :  { %3359 = vmatmul.mubr.msk.bf16.gmra.mrb[36].mxu0 %vm954_vm0, %v3633_v44  ;;  %3487 = vmatmul.mubr.msk.bf16.gmra.mrb[36].mxu1 %vm954_vm0, %v3634_v45  ;;  %v3697_v44 = vld [vmem:[%s5558_s0 + $0x198] sm:$0xff]  }
  0x5f   :  { %3362 = vmatprep.mubr.msk.bf16.mxu0 %vm954_vm0, %v3635_v46  ;;  %3490 = vmatprep.mubr.msk.bf16.mxu1 %vm954_vm0, %v3636_v47  ;;  %v3698_v45 = vld [vmem:[%s5558_s0 + $0x398] sm:$0xff]   ;;  %v3699_v46 = vld [vmem:[%s5558_s0 + $0x1a0] sm:$0xff]  }
  0x60   :  { %v3700_v47 = vld [vmem:[%s5558_s0 + $0x3a0] sm:$0xff]  }
  0x66   :  { %3363 = vmatmul.mubr.msk.bf16.gmra.mrb[40].mxu0 %vm954_vm0, %v3637_v48  ;;  %3491 = vmatmul.mubr.msk.bf16.gmra.mrb[40].mxu1 %vm954_vm0, %v3638_v49  ;;  %v3701_v48 = vld [vmem:[%s5558_s0 + $0x1a8] sm:$0xff]  }
  0x67   :  { %3366 = vmatprep.mubr.msk.bf16.mxu0 %vm954_vm0, %v3639_v50  ;;  %3494 = vmatprep.mubr.msk.bf16.mxu1 %vm954_vm0, %v3640_v51  ;;  %v3702_v49 = vld [vmem:[%s5558_s0 + $0x3a8] sm:$0xff]   ;;  %v3703_v50 = vld [vmem:[%s5558_s0 + $0x1b0] sm:$0xff]  }
  0x68   :  { %v3704_v51 = vld [vmem:[%s5558_s0 + $0x3b0] sm:$0xff]  }
  0x6e   :  { %3367 = vmatmul.mubr.msk.bf16.gmra.mrb[44].mxu0 %vm954_vm0, %v3641_v52  ;;  %3495 = vmatmul.mubr.msk.bf16.gmra.mrb[44].mxu1 %vm954_vm0, %v3642_v53  ;;  %v4201_v52 = vld [vmem:[%s5559_s2] ss:$0 sm:$0xff] }
  0x6f   :  { %3370 = vmatprep.mubr.msk.bf16.mxu0 %vm954_vm0, %v3643_v54  ;;  %3498 = vmatprep.mubr.msk.bf16.mxu1 %vm954_vm0, %v3644_v55 }
  0x76   :  { %3371 = vmatmul.mubr.msk.bf16.gmra.mrb[48].mxu0 %vm954_vm0, %v3645_v56  ;;  %3499 = vmatmul.mubr.msk.bf16.gmra.mrb[48].mxu1 %vm954_vm0, %v3646_v57 }
  0x77   :  { %3374 = vmatprep.mubr.msk.bf16.mxu0 %vm954_vm0, %v3647_v58  ;;  %3502 = vmatprep.mubr.msk.bf16.mxu1 %vm954_vm0, %v3648_v59  ;;  %v3705_v59 = vld [vmem:[%s5558_s0 + $0x1b8] sm:$0xff]  }
  0x7e   :  { %3375 = vmatmul.mubr.msk.bf16.gmra.mrb[52].mxu0 %vm954_vm0, %v3649_v60  ;;  %3503 = vmatmul.mubr.msk.bf16.gmra.mrb[52].mxu1 %vm954_vm0, %v3650_v61  ;;  %v3706_v60 = vld [vmem:[%s5558_s0 + $0x3b8] sm:$0xff]  }
  0x7f   :  { %3378 = vmatprep.mubr.msk.bf16.mxu0 %vm954_vm0, %v3651_v62  ;;  %3506 = vmatprep.mubr.msk.bf16.mxu1 %vm954_vm0, %v3652_v63 }
  0x86   :  { %3379 = vmatmul.mubr.msk.bf16.gmra.mrb[56].mxu0 %vm954_vm0, %v3653_v0  ;;  %3507 = vmatmul.mubr.msk.bf16.gmra.mrb[56].mxu1 %vm954_vm0, %v3654_v1  ;;  %v3707_v1 = vld [vmem:[%s5558_s0 + $0x1c0] sm:$0xff]  }
  0x87   :  { %3382 = vmatprep.mubr.msk.bf16.mxu0 %vm954_vm0, %v3655_v2  ;;  %3510 = vmatprep.mubr.msk.bf16.mxu1 %vm954_vm0, %v3656_v3  ;;  %v3708_v2 = vld [vmem:[%s5558_s0 + $0x3c0] sm:$0xff]  }
  0x8e   :  { %3383 = vmatmul.mubr.msk.bf16.gmra.mrb[60].mxu0 %vm954_vm0, %v3657_v4  ;;  %3511 = vmatmul.mubr.msk.bf16.gmra.mrb[60].mxu1 %vm954_vm0, %v3658_v5 }
  0x8f   :  { %3386 = vmatprep.mubr.msk.bf16.mxu0 %vm954_vm0, %v3659_v6  ;;  %3514 = vmatprep.mubr.msk.bf16.mxu1 %vm954_vm0, %v3660_v7 }
  0x96   :  { %3387 = vmatmul.mubr.msk.bf16.gmra.mrb[64].mxu0 %vm954_vm0, %v3661_v8  ;;  %3515 = vmatmul.mubr.msk.bf16.gmra.mrb[64].mxu1 %vm954_vm0, %v3662_v9 }
  0x97   :  { %3390 = vmatprep.mubr.msk.bf16.mxu0 %vm954_vm0, %v3663_v10  ;;  %3518 = vmatprep.mubr.msk.bf16.mxu1 %vm954_vm0, %v3664_v11 }
  0x9e   :  { %3391 = vmatmul.mubr.msk.bf16.gmra.mrb[68].mxu0 %vm954_vm0, %v3665_v12  ;;  %3519 = vmatmul.mubr.msk.bf16.gmra.mrb[68].mxu1 %vm954_vm0, %v3666_v13 }
  0x9f   :  { %3394 = vmatprep.mubr.msk.bf16.mxu0 %vm954_vm0, %v3667_v14  ;;  %3522 = vmatprep.mubr.msk.bf16.mxu1 %vm954_vm0, %v3668_v15 }
  0xa6   :  { %3395 = vmatmul.mubr.msk.bf16.gmra.mrb[72].mxu0 %vm954_vm0, %v3669_v16  ;;  %3523 = vmatmul.mubr.msk.bf16.gmra.mrb[72].mxu1 %vm954_vm0, %v3670_v17 }
  0xa7   :  { %3398 = vmatprep.mubr.msk.bf16.mxu0 %vm954_vm0, %v3671_v18  ;;  %3526 = vmatprep.mubr.msk.bf16.mxu1 %vm954_vm0, %v3672_v19 }
  0xae   :  { %3399 = vmatmul.mubr.msk.bf16.gmra.mrb[76].mxu0 %vm954_vm0, %v3673_v20  ;;  %3527 = vmatmul.mubr.msk.bf16.gmra.mrb[76].mxu1 %vm954_vm0, %v3674_v21 }
  0xaf   :  { %3402 = vmatprep.mubr.msk.bf16.mxu0 %vm954_vm0, %v3675_v22  ;;  %3530 = vmatprep.mubr.msk.bf16.mxu1 %vm954_vm0, %v3676_v23  ;;  %v3709_v23 = vld [vmem:[%s5558_s0 + $0x1c8] sm:$0xff]  }
  0xb6   :  { %3403 = vmatmul.mubr.msk.bf16.gmra.mrb[80].mxu0 %vm954_vm0, %v3677_v24  ;;  %3531 = vmatmul.mubr.msk.bf16.gmra.mrb[80].mxu1 %vm954_vm0, %v3678_v25  ;;  %v3710_v24 = vld [vmem:[%s5558_s0 + $0x3c8] sm:$0xff]  }
  0xb7   :  { %3406 = vmatprep.mubr.msk.bf16.mxu0 %vm954_vm0, %v3679_v26  ;;  %3534 = vmatprep.mubr.msk.bf16.mxu1 %vm954_vm0, %v3680_v27 }
  0xbe   :  { %3407 = vmatmul.mubr.msk.bf16.gmra.mrb[84].mxu0 %vm954_vm0, %v3681_v28  ;;  %3535 = vmatmul.mubr.msk.bf16.gmra.mrb[84].mxu1 %vm954_vm0, %v3682_v29  ;;  %v3711_v29 = vld [vmem:[%s5558_s0 + $0x1d0] sm:$0xff]  }
  0xbf   :  { %3410 = vmatprep.mubr.msk.bf16.mxu0 %vm954_vm0, %v3683_v30  ;;  %3538 = vmatprep.mubr.msk.bf16.mxu1 %vm954_vm0, %v3684_v31  ;;  %v3712_v30 = vld [vmem:[%s5558_s0 + $0x3d0] sm:$0xff]  }
  0xc6   :  { %3411 = vmatmul.mubr.msk.bf16.gmra.mrb[88].mxu0 %vm954_vm0, %v3685_v32  ;;  %3539 = vmatmul.mubr.msk.bf16.gmra.mrb[88].mxu1 %vm954_vm0, %v3686_v33 }
  0xc7   :  { %3414 = vmatprep.mubr.msk.bf16.mxu0 %vm954_vm0, %v3687_v34  ;;  %3542 = vmatprep.mubr.msk.bf16.mxu1 %vm954_vm0, %v3688_v35 }
  0xce   :  { %3415 = vmatmul.mubr.msk.bf16.gmra.mrb[92].mxu0 %vm954_vm0, %v3689_v36  ;;  %3543 = vmatmul.mubr.msk.bf16.gmra.mrb[92].mxu1 %vm954_vm0, %v3690_v37 }
  0xcf   :  { %3418 = vmatprep.mubr.msk.bf16.mxu0 %vm954_vm0, %v3691_v38  ;;  %3546 = vmatprep.mubr.msk.bf16.mxu1 %vm954_vm0, %v3692_v39 }
  0xd6   :  { %3419 = vmatmul.mubr.msk.bf16.gmra.mrb[96].mxu0 %vm954_vm0, %v3693_v40  ;;  %3547 = vmatmul.mubr.msk.bf16.gmra.mrb[96].mxu1 %vm954_vm0, %v3694_v41 }
  0xd7   :  { %3422 = vmatprep.mubr.msk.bf16.mxu0 %vm954_vm0, %v3695_v42  ;;  %3550 = vmatprep.mubr.msk.bf16.mxu1 %vm954_vm0, %v3696_v43 }
  0xde   :  { %3423 = vmatmul.mubr.msk.bf16.gmra.mrb[100].mxu0 %vm954_vm0, %v3697_v44  ;;  %3551 = vmatmul.mubr.msk.bf16.gmra.mrb[100].mxu1 %vm954_vm0, %v3698_v45 }
  0xdf   :  { %3426 = vmatprep.mubr.msk.bf16.mxu0 %vm954_vm0, %v3699_v46  ;;  %3554 = vmatprep.mubr.msk.bf16.mxu1 %vm954_vm0, %v3700_v47 }
  0xe6   :  { %3427 = vmatmul.mubr.msk.bf16.gmra.mrb[104].mxu0 %vm954_vm0, %v3701_v48  ;;  %3555 = vmatmul.mubr.msk.bf16.gmra.mrb[104].mxu1 %vm954_vm0, %v3702_v49 }
  0xe7   :  { %3430 = vmatprep.mubr.msk.bf16.mxu0 %vm954_vm0, %v3703_v50  ;;  %3558 = vmatprep.mubr.msk.bf16.mxu1 %vm954_vm0, %v3704_v51  ;;  %v3713_v51 = vld [vmem:[%s5558_s0 + $0x1d8] sm:$0xff]  }
  0xe9   :  { %v3324_v53 = vpop.f32.mrb[0].mxu0  ;;  %v3452_v54 = vpop.f32.mrb[0].mxu1 }
  0xea   :  { %v1386_v55 = vadd.f32 %v3324_v53, %v4201_v52  ;;  %v1898_v56 = vadd.f32 %v3452_v54, %v4201_v52  ;;  %v1377_v57 = vpop.f32.mrb[1].mxu0  ;;  %v1889_v58 = vpop.f32.mrb[1].mxu1  ;;  %v3714_v53 = vld [vmem:[%s5558_s0 + $0x3d8] sm:$0xff]  }
  0xeb   :  { %v1378_v61 = vadd.f32 %v4201_v52, %v1377_v57  ;;  %v1890_v62 = vadd.f32 %v4201_v52, %v1889_v58  ;;  %v3325_v63 = vpop.f32.mrb[2].mxu0  ;;  %v3453_v0 = vpop.f32.mrb[2].mxu1  ;;  %v3715_v58 = vld [vmem:[%s5558_s0 + $0x1e0] sm:$0xff]  }
  0xec   :  { %v2402_v3 = vmax.f32 %v1386_v55, 0.0  ;;  %v2530_v4 = vmax.f32 %v1898_v56, 0.0  ;;  %v1389_v5 = vadd.f32 %v3325_v63, %v4201_v52  ;;  %v1901_v6 = vadd.f32 %v3453_v0, %v4201_v52  ;;  %v1380_v7 = vpop.f32.mrb[3].mxu0  ;;  %v1892_v8 = vpop.f32.mrb[3].mxu1 }
  0xed   :  { %v2400_v9 = vmax.f32 %v1378_v61, 0.0  ;;  %v2528_v10 = vmax.f32 %v1890_v62, 0.0  ;;  %v1381_v11 = vadd.f32 %v4201_v52, %v1380_v7  ;;  %v1893_v12 = vadd.f32 %v4201_v52, %v1892_v8 }
  0xee   :  { %2659 = vst.msk [vmem:[%s5560_s3 + $0x10] sm:$0xff] %vm2656_vm2, %v2402_v3  ;;  %2787 = vst.msk [vmem:[%s5560_s3 + $0x410] sm:$0xff] %vm2656_vm2, %v2530_v4  ;;  %v2403_v13 = vmax.f32 %v1389_v5, 0.0  ;;  %v2531_v14 = vmax.f32 %v1901_v6, 0.0  ;;  %3431 = vmatmul.mubr.msk.bf16.gmra.mrb[108].mxu0 %vm954_vm0, %v3705_v59  ;;  %3559 = vmatmul.mubr.msk.bf16.gmra.mrb[108].mxu1 %vm954_vm0, %v3706_v60  ;;  %v3716_v59 = vld [vmem:[%s5558_s0 + $0x3e0] sm:$0xff]  }
  0xef   :  { %2657 = vst.msk [vmem:[%s5560_s3] sm:$0xff] %vm2656_vm2, %v2400_v9  ;;  %2785 = vst.msk [vmem:[%s5560_s3 + $0x400] sm:$0xff] %vm2656_vm2, %v2528_v10  ;;  %v2401_v15 = vmax.f32 %v1381_v11, 0.0  ;;  %v2529_v16 = vmax.f32 %v1893_v12, 0.0  ;;  %3434 = vmatprep.mubr.msk.bf16.mxu0 %vm954_vm0, %v3707_v1  ;;  %3562 = vmatprep.mubr.msk.bf16.mxu1 %vm954_vm0, %v3708_v2 }
  0xf0   :  { %2660 = vst.msk [vmem:[%s5560_s3 + $0x18] sm:$0xff] %vm2656_vm2, %v2403_v13  ;;  %2788 = vst.msk [vmem:[%s5560_s3 + $0x418] sm:$0xff] %vm2656_vm2, %v2531_v14 }
  0xf1   :  { %2658 = vst.msk [vmem:[%s5560_s3 + $0x8] sm:$0xff] %vm2656_vm2, %v2401_v15  ;;  %2786 = vst.msk [vmem:[%s5560_s3 + $0x408] sm:$0xff] %vm2656_vm2, %v2529_v16  ;;  %v3328_v17 = vpop.f32.mrb[4].mxu0  ;;  %v3456_v18 = vpop.f32.mrb[4].mxu1  ;;  %v3717_v16 = vld [vmem:[%s5558_s0 + $0x1e8] sm:$0xff]  }
  0xf2   :  { %v1402_v19 = vadd.f32 %v3328_v17, %v4201_v52  ;;  %v1914_v20 = vadd.f32 %v3456_v18, %v4201_v52  ;;  %v1393_v21 = vpop.f32.mrb[5].mxu0  ;;  %v1905_v22 = vpop.f32.mrb[5].mxu1  ;;  %v3718_v17 = vld [vmem:[%s5558_s0 + $0x3e8] sm:$0xff]  }
  0xf3   :  { %v1394_v25 = vadd.f32 %v4201_v52, %v1393_v21  ;;  %v1906_v26 = vadd.f32 %v4201_v52, %v1905_v22  ;;  %v3329_v27 = vpop.f32.mrb[6].mxu0  ;;  %v3457_v28 = vpop.f32.mrb[6].mxu1  ;;  %v3719_v22 = vld [vmem:[%s5558_s0 + $0x1f0] sm:$0xff]  }
  0xf4   :  { %v2406_v31 = vmax.f32 %v1402_v19, 0.0  ;;  %v2534_v32 = vmax.f32 %v1914_v20, 0.0  ;;  %v1405_v33 = vadd.f32 %v3329_v27, %v4201_v52  ;;  %v1917_v34 = vadd.f32 %v3457_v28, %v4201_v52  ;;  %v1396_v35 = vpop.f32.mrb[7].mxu0  ;;  %v1908_v36 = vpop.f32.mrb[7].mxu1 }
  0xf5   :  { %v2404_v37 = vmax.f32 %v1394_v25, 0.0  ;;  %v2532_v38 = vmax.f32 %v1906_v26, 0.0  ;;  %v1397_v39 = vadd.f32 %v4201_v52, %v1396_v35  ;;  %v1909_v40 = vadd.f32 %v4201_v52, %v1908_v36 }
  0xf6   :  { %2663 = vst.msk [vmem:[%s5560_s3 + $0x30] sm:$0xff] %vm2656_vm2, %v2406_v31  ;;  %2791 = vst.msk [vmem:[%s5560_s3 + $0x430] sm:$0xff] %vm2656_vm2, %v2534_v32  ;;  %v2407_v41 = vmax.f32 %v1405_v33, 0.0  ;;  %v2535_v42 = vmax.f32 %v1917_v34, 0.0  ;;  %3435 = vmatmul.mubr.msk.bf16.gmra.mrb[112].mxu0 %vm954_vm0, %v3709_v23  ;;  %3563 = vmatmul.mubr.msk.bf16.gmra.mrb[112].mxu1 %vm954_vm0, %v3710_v24  ;;  %v3720_v23 = vld [vmem:[%s5558_s0 + $0x3f0] sm:$0xff]  }
  0xf7   :  { %2661 = vst.msk [vmem:[%s5560_s3 + $0x20] sm:$0xff] %vm2656_vm2, %v2404_v37  ;;  %2789 = vst.msk [vmem:[%s5560_s3 + $0x420] sm:$0xff] %vm2656_vm2, %v2532_v38  ;;  %v2405_v43 = vmax.f32 %v1397_v39, 0.0  ;;  %v2533_v44 = vmax.f32 %v1909_v40, 0.0  ;;  %3438 = vmatprep.mubr.msk.bf16.mxu0 %vm954_vm0, %v3711_v29  ;;  %3566 = vmatprep.mubr.msk.bf16.mxu1 %vm954_vm0, %v3712_v30 }
  0xf8   :  { %2664 = vst.msk [vmem:[%s5560_s3 + $0x38] sm:$0xff] %vm2656_vm2, %v2407_v41  ;;  %2792 = vst.msk [vmem:[%s5560_s3 + $0x438] sm:$0xff] %vm2656_vm2, %v2535_v42 }
  0xf9   :  { %2662 = vst.msk [vmem:[%s5560_s3 + $0x28] sm:$0xff] %vm2656_vm2, %v2405_v43  ;;  %2790 = vst.msk [vmem:[%s5560_s3 + $0x428] sm:$0xff] %vm2656_vm2, %v2533_v44  ;;  %v3332_v45 = vpop.f32.mrb[8].mxu0  ;;  %v3460_v46 = vpop.f32.mrb[8].mxu1  ;;  %v3721_v44 = vld [vmem:[%s5558_s0 + $0x1f8] sm:$0xff]  }
  0xfa   :  { %v1418_v47 = vadd.f32 %v3332_v45, %v4201_v52  ;;  %v1930_v48 = vadd.f32 %v3460_v46, %v4201_v52  ;;  %v1409_v49 = vpop.f32.mrb[9].mxu0  ;;  %v1921_v50 = vpop.f32.mrb[9].mxu1  ;;  %v3722_v45 = vld [vmem:[%s5558_s0 + $0x3f8] sm:$0xff]  }
  0xfb   :  { %v1410_v54 = vadd.f32 %v4201_v52, %v1409_v49  ;;  %v1922_v55 = vadd.f32 %v4201_v52, %v1921_v50  ;;  %v3333_v56 = vpop.f32.mrb[10].mxu0  ;;  %v3461_v57 = vpop.f32.mrb[10].mxu1 }
  0xfc   :  { %v2410_v60 = vmax.f32 %v1418_v47, 0.0  ;;  %v2538_v61 = vmax.f32 %v1930_v48, 0.0  ;;  %v1421_v62 = vadd.f32 %v3333_v56, %v4201_v52  ;;  %v1933_v63 = vadd.f32 %v3461_v57, %v4201_v52  ;;  %v1412_v0 = vpop.f32.mrb[11].mxu0  ;;  %v1924_v1 = vpop.f32.mrb[11].mxu1 }
  0xfd   :  { %v2408_v2 = vmax.f32 %v1410_v54, 0.0  ;;  %v2536_v3 = vmax.f32 %v1922_v55, 0.0  ;;  %v1413_v4 = vadd.f32 %v4201_v52, %v1412_v0  ;;  %v1925_v5 = vadd.f32 %v4201_v52, %v1924_v1 }
  0xfe   :  { %2667 = vst.msk [vmem:[%s5560_s3 + $0x50] sm:$0xff] %vm2656_vm2, %v2410_v60  ;;  %2795 = vst.msk [vmem:[%s5560_s3 + $0x450] sm:$0xff] %vm2656_vm2, %v2538_v61  ;;  %v2411_v6 = vmax.f32 %v1421_v62, 0.0  ;;  %v2539_v7 = vmax.f32 %v1933_v63, 0.0  ;;  %3439 = vmatmul.mubr.msk.bf16.gmra.mrb[116].mxu0 %vm954_vm0, %v3713_v51  ;;  %3567 = vmatmul.mubr.msk.bf16.gmra.mrb[116].mxu1 %vm954_vm0, %v3714_v53 }
  0xff   :  { %2665 = vst.msk [vmem:[%s5560_s3 + $0x40] sm:$0xff] %vm2656_vm2, %v2408_v2  ;;  %2793 = vst.msk [vmem:[%s5560_s3 + $0x440] sm:$0xff] %vm2656_vm2, %v2536_v3  ;;  %v2409_v8 = vmax.f32 %v1413_v4, 0.0  ;;  %v2537_v9 = vmax.f32 %v1925_v5, 0.0  ;;  %3442 = vmatprep.mubr.msk.bf16.mxu0 %vm954_vm0, %v3715_v58  ;;  %3570 = vmatprep.mubr.msk.bf16.mxu1 %vm954_vm0, %v3716_v59 }
 0x100   :  { %2668 = vst.msk [vmem:[%s5560_s3 + $0x58] sm:$0xff] %vm2656_vm2, %v2411_v6  ;;  %2796 = vst.msk [vmem:[%s5560_s3 + $0x458] sm:$0xff] %vm2656_vm2, %v2539_v7 }
 0x101   :  { %2666 = vst.msk [vmem:[%s5560_s3 + $0x48] sm:$0xff] %vm2656_vm2, %v2409_v8  ;;  %2794 = vst.msk [vmem:[%s5560_s3 + $0x448] sm:$0xff] %vm2656_vm2, %v2537_v9  ;;  %v3336_v10 = vpop.f32.mrb[12].mxu0  ;;  %v3464_v11 = vpop.f32.mrb[12].mxu1 }
 0x102   :  { %v1434_v12 = vadd.f32 %v3336_v10, %v4201_v52  ;;  %v1946_v13 = vadd.f32 %v3464_v11, %v4201_v52  ;;  %v1425_v14 = vpop.f32.mrb[13].mxu0  ;;  %v1937_v15 = vpop.f32.mrb[13].mxu1 }
 0x103   :  { %v1426_v18 = vadd.f32 %v4201_v52, %v1425_v14  ;;  %v1938_v19 = vadd.f32 %v4201_v52, %v1937_v15  ;;  %v3337_v20 = vpop.f32.mrb[14].mxu0  ;;  %v3465_v21 = vpop.f32.mrb[14].mxu1 }
 0x104   :  { %v2414_v24 = vmax.f32 %v1434_v12, 0.0  ;;  %v2542_v25 = vmax.f32 %v1946_v13, 0.0  ;;  %v1437_v26 = vadd.f32 %v3337_v20, %v4201_v52  ;;  %v1949_v27 = vadd.f32 %v3465_v21, %v4201_v52  ;;  %v1428_v28 = vpop.f32.mrb[15].mxu0  ;;  %v1940_v29 = vpop.f32.mrb[15].mxu1 }
 0x105   :  { %v2412_v30 = vmax.f32 %v1426_v18, 0.0  ;;  %v2540_v31 = vmax.f32 %v1938_v19, 0.0  ;;  %v1429_v32 = vadd.f32 %v4201_v52, %v1428_v28  ;;  %v1941_v33 = vadd.f32 %v4201_v52, %v1940_v29 }
 0x106   :  { %2671 = vst.msk [vmem:[%s5560_s3 + $0x70] sm:$0xff] %vm2656_vm2, %v2414_v24  ;;  %2799 = vst.msk [vmem:[%s5560_s3 + $0x470] sm:$0xff] %vm2656_vm2, %v2542_v25  ;;  %v2415_v34 = vmax.f32 %v1437_v26, 0.0  ;;  %v2543_v35 = vmax.f32 %v1949_v27, 0.0  ;;  %3443 = vmatmul.mubr.msk.bf16.gmra.mrb[120].mxu0 %vm954_vm0, %v3717_v16  ;;  %3571 = vmatmul.mubr.msk.bf16.gmra.mrb[120].mxu1 %vm954_vm0, %v3718_v17 }
 0x107   :  { %2669 = vst.msk [vmem:[%s5560_s3 + $0x60] sm:$0xff] %vm2656_vm2, %v2412_v30  ;;  %2797 = vst.msk [vmem:[%s5560_s3 + $0x460] sm:$0xff] %vm2656_vm2, %v2540_v31  ;;  %v2413_v36 = vmax.f32 %v1429_v32, 0.0  ;;  %v2541_v37 = vmax.f32 %v1941_v33, 0.0  ;;  %3446 = vmatprep.mubr.msk.bf16.mxu0 %vm954_vm0, %v3719_v22  ;;  %3574 = vmatprep.mubr.msk.bf16.mxu1 %vm954_vm0, %v3720_v23 }
 0x108   :  { %2672 = vst.msk [vmem:[%s5560_s3 + $0x78] sm:$0xff] %vm2656_vm2, %v2415_v34  ;;  %2800 = vst.msk [vmem:[%s5560_s3 + $0x478] sm:$0xff] %vm2656_vm2, %v2543_v35 }
 0x109   :  { %2670 = vst.msk [vmem:[%s5560_s3 + $0x68] sm:$0xff] %vm2656_vm2, %v2413_v36  ;;  %2798 = vst.msk [vmem:[%s5560_s3 + $0x468] sm:$0xff] %vm2656_vm2, %v2541_v37  ;;  %v3340_v38 = vpop.f32.mrb[16].mxu0  ;;  %v3468_v39 = vpop.f32.mrb[16].mxu1 }
 0x10a   :  { %v1450_v40 = vadd.f32 %v3340_v38, %v4201_v52  ;;  %v1962_v41 = vadd.f32 %v3468_v39, %v4201_v52  ;;  %v1441_v42 = vpop.f32.mrb[17].mxu0  ;;  %v1953_v43 = vpop.f32.mrb[17].mxu1 }
 0x10b   :  { %v1442_v46 = vadd.f32 %v4201_v52, %v1441_v42  ;;  %v1954_v47 = vadd.f32 %v4201_v52, %v1953_v43  ;;  %v3341_v48 = vpop.f32.mrb[18].mxu0  ;;  %v3469_v49 = vpop.f32.mrb[18].mxu1 }
 0x10c   :  { %v2418_v50 = vmax.f32 %v1450_v40, 0.0  ;;  %v2546_v51 = vmax.f32 %v1962_v41, 0.0  ;;  %v1453_v53 = vadd.f32 %v3341_v48, %v4201_v52  ;;  %v1965_v54 = vadd.f32 %v3469_v49, %v4201_v52  ;;  %v1444_v55 = vpop.f32.mrb[19].mxu0  ;;  %v1956_v56 = vpop.f32.mrb[19].mxu1 }
 0x10d   :  { %v2416_v57 = vmax.f32 %v1442_v46, 0.0  ;;  %v2544_v58 = vmax.f32 %v1954_v47, 0.0  ;;  %v1445_v59 = vadd.f32 %v4201_v52, %v1444_v55  ;;  %v1957_v60 = vadd.f32 %v4201_v52, %v1956_v56 }
 0x10e   :  { %2675 = vst.msk [vmem:[%s5560_s3 + $0x90] sm:$0xff] %vm2656_vm2, %v2418_v50  ;;  %2803 = vst.msk [vmem:[%s5560_s3 + $0x490] sm:$0xff] %vm2656_vm2, %v2546_v51  ;;  %v2419_v61 = vmax.f32 %v1453_v53, 0.0  ;;  %v2547_v62 = vmax.f32 %v1965_v54, 0.0  ;;  %3447 = vmatmul.mubr.msk.bf16.gmra.mrb[124].mxu0 %vm954_vm0, %v3721_v44  ;;  %3575 = vmatmul.mubr.msk.bf16.gmra.mrb[124].mxu1 %vm954_vm0, %v3722_v45 }
 0x10f   :  { %2673 = vst.msk [vmem:[%s5560_s3 + $0x80] sm:$0xff] %vm2656_vm2, %v2416_v57  ;;  %2801 = vst.msk [vmem:[%s5560_s3 + $0x480] sm:$0xff] %vm2656_vm2, %v2544_v58  ;;  %v2417_v63 = vmax.f32 %v1445_v59, 0.0  ;;  %v2545_v0 = vmax.f32 %v1957_v60, 0.0 }
 0x110   :  { %2676 = vst.msk [vmem:[%s5560_s3 + $0x98] sm:$0xff] %vm2656_vm2, %v2419_v61  ;;  %2804 = vst.msk [vmem:[%s5560_s3 + $0x498] sm:$0xff] %vm2656_vm2, %v2547_v62 }
 0x111   :  { %2674 = vst.msk [vmem:[%s5560_s3 + $0x88] sm:$0xff] %vm2656_vm2, %v2417_v63  ;;  %2802 = vst.msk [vmem:[%s5560_s3 + $0x488] sm:$0xff] %vm2656_vm2, %v2545_v0  ;;  %v3344_v1 = vpop.f32.mrb[20].mxu0  ;;  %v3472_v2 = vpop.f32.mrb[20].mxu1 }
 0x112   :  { %v1466_v3 = vadd.f32 %v3344_v1, %v4201_v52  ;;  %v1978_v4 = vadd.f32 %v3472_v2, %v4201_v52  ;;  %v1457_v5 = vpop.f32.mrb[21].mxu0  ;;  %v1969_v6 = vpop.f32.mrb[21].mxu1 }
 0x113   :  { %v1458_v7 = vadd.f32 %v4201_v52, %v1457_v5  ;;  %v1970_v8 = vadd.f32 %v4201_v52, %v1969_v6  ;;  %v3345_v9 = vpop.f32.mrb[22].mxu0  ;;  %v3473_v10 = vpop.f32.mrb[22].mxu1 }
 0x114   :  { %v2422_v11 = vmax.f32 %v1466_v3, 0.0  ;;  %v2550_v12 = vmax.f32 %v1978_v4, 0.0  ;;  %v1469_v13 = vadd.f32 %v3345_v9, %v4201_v52  ;;  %v1981_v14 = vadd.f32 %v3473_v10, %v4201_v52  ;;  %v1460_v15 = vpop.f32.mrb[23].mxu0  ;;  %v1972_v16 = vpop.f32.mrb[23].mxu1 }
 0x115   :  { %v2420_v17 = vmax.f32 %v1458_v7, 0.0  ;;  %v2548_v18 = vmax.f32 %v1970_v8, 0.0  ;;  %v1461_v19 = vadd.f32 %v4201_v52, %v1460_v15  ;;  %v1973_v20 = vadd.f32 %v4201_v52, %v1972_v16 }
 0x116   :  { %2679 = vst.msk [vmem:[%s5560_s3 + $0xb0] sm:$0xff] %vm2656_vm2, %v2422_v11  ;;  %2807 = vst.msk [vmem:[%s5560_s3 + $0x4b0] sm:$0xff] %vm2656_vm2, %v2550_v12  ;;  %v2423_v21 = vmax.f32 %v1469_v13, 0.0  ;;  %v2551_v22 = vmax.f32 %v1981_v14, 0.0 }
 0x117   :  { %2677 = vst.msk [vmem:[%s5560_s3 + $0xa0] sm:$0xff] %vm2656_vm2, %v2420_v17  ;;  %2805 = vst.msk [vmem:[%s5560_s3 + $0x4a0] sm:$0xff] %vm2656_vm2, %v2548_v18  ;;  %v2421_v23 = vmax.f32 %v1461_v19, 0.0  ;;  %v2549_v24 = vmax.f32 %v1973_v20, 0.0 }
 0x118   :  { %2680 = vst.msk [vmem:[%s5560_s3 + $0xb8] sm:$0xff] %vm2656_vm2, %v2423_v21  ;;  %2808 = vst.msk [vmem:[%s5560_s3 + $0x4b8] sm:$0xff] %vm2656_vm2, %v2551_v22 }
 0x119   :  { %2678 = vst.msk [vmem:[%s5560_s3 + $0xa8] sm:$0xff] %vm2656_vm2, %v2421_v23  ;;  %2806 = vst.msk [vmem:[%s5560_s3 + $0x4a8] sm:$0xff] %vm2656_vm2, %v2549_v24  ;;  %v3348_v25 = vpop.f32.mrb[24].mxu0  ;;  %v3476_v26 = vpop.f32.mrb[24].mxu1 }
 0x11a   :  { %v1482_v27 = vadd.f32 %v3348_v25, %v4201_v52  ;;  %v1994_v28 = vadd.f32 %v3476_v26, %v4201_v52  ;;  %v1473_v29 = vpop.f32.mrb[25].mxu0  ;;  %v1985_v30 = vpop.f32.mrb[25].mxu1 }
 0x11b   :  { %v1474_v31 = vadd.f32 %v4201_v52, %v1473_v29  ;;  %v1986_v32 = vadd.f32 %v4201_v52, %v1985_v30  ;;  %v3349_v33 = vpop.f32.mrb[26].mxu0  ;;  %v3477_v34 = vpop.f32.mrb[26].mxu1 }
 0x11c   :  { %v2426_v35 = vmax.f32 %v1482_v27, 0.0  ;;  %v2554_v36 = vmax.f32 %v1994_v28, 0.0  ;;  %v1485_v37 = vadd.f32 %v3349_v33, %v4201_v52  ;;  %v1997_v38 = vadd.f32 %v3477_v34, %v4201_v52  ;;  %v1476_v39 = vpop.f32.mrb[27].mxu0  ;;  %v1988_v40 = vpop.f32.mrb[27].mxu1 }
 0x11d   :  { %v2424_v41 = vmax.f32 %v1474_v31, 0.0  ;;  %v2552_v42 = vmax.f32 %v1986_v32, 0.0  ;;  %v1477_v43 = vadd.f32 %v4201_v52, %v1476_v39  ;;  %v1989_v44 = vadd.f32 %v4201_v52, %v1988_v40 }
 0x11e   :  { %2683 = vst.msk [vmem:[%s5560_s3 + $0xd0] sm:$0xff] %vm2656_vm2, %v2426_v35  ;;  %2811 = vst.msk [vmem:[%s5560_s3 + $0x4d0] sm:$0xff] %vm2656_vm2, %v2554_v36  ;;  %v2427_v45 = vmax.f32 %v1485_v37, 0.0  ;;  %v2555_v46 = vmax.f32 %v1997_v38, 0.0 }
 0x11f   :  { %2681 = vst.msk [vmem:[%s5560_s3 + $0xc0] sm:$0xff] %vm2656_vm2, %v2424_v41  ;;  %2809 = vst.msk [vmem:[%s5560_s3 + $0x4c0] sm:$0xff] %vm2656_vm2, %v2552_v42  ;;  %v2425_v47 = vmax.f32 %v1477_v43, 0.0  ;;  %v2553_v48 = vmax.f32 %v1989_v44, 0.0 }
 0x120   :  { %2684 = vst.msk [vmem:[%s5560_s3 + $0xd8] sm:$0xff] %vm2656_vm2, %v2427_v45  ;;  %2812 = vst.msk [vmem:[%s5560_s3 + $0x4d8] sm:$0xff] %vm2656_vm2, %v2555_v46 }
 0x121   :  { %2682 = vst.msk [vmem:[%s5560_s3 + $0xc8] sm:$0xff] %vm2656_vm2, %v2425_v47  ;;  %2810 = vst.msk [vmem:[%s5560_s3 + $0x4c8] sm:$0xff] %vm2656_vm2, %v2553_v48  ;;  %v3352_v49 = vpop.f32.mrb[28].mxu0  ;;  %v3480_v50 = vpop.f32.mrb[28].mxu1 }
 0x122   :  { %v1498_v51 = vadd.f32 %v3352_v49, %v4201_v52  ;;  %v2010_v53 = vadd.f32 %v3480_v50, %v4201_v52  ;;  %v1489_v54 = vpop.f32.mrb[29].mxu0  ;;  %v2001_v55 = vpop.f32.mrb[29].mxu1 }
 0x123   :  { %v1490_v56 = vadd.f32 %v4201_v52, %v1489_v54  ;;  %v2002_v57 = vadd.f32 %v4201_v52, %v2001_v55  ;;  %v3353_v58 = vpop.f32.mrb[30].mxu0  ;;  %v3481_v59 = vpop.f32.mrb[30].mxu1 }
 0x124   :  { %v2430_v60 = vmax.f32 %v1498_v51, 0.0  ;;  %v2558_v61 = vmax.f32 %v2010_v53, 0.0  ;;  %v1501_v62 = vadd.f32 %v3353_v58, %v4201_v52  ;;  %v2013_v63 = vadd.f32 %v3481_v59, %v4201_v52  ;;  %v1492_v0 = vpop.f32.mrb[31].mxu0  ;;  %v2004_v1 = vpop.f32.mrb[31].mxu1 }
 0x125   :  { %v2428_v2 = vmax.f32 %v1490_v56, 0.0  ;;  %v2556_v3 = vmax.f32 %v2002_v57, 0.0  ;;  %v1493_v4 = vadd.f32 %v4201_v52, %v1492_v0  ;;  %v2005_v5 = vadd.f32 %v4201_v52, %v2004_v1 }
 0x126   :  { %2687 = vst.msk [vmem:[%s5560_s3 + $0xf0] sm:$0xff] %vm2656_vm2, %v2430_v60  ;;  %2815 = vst.msk [vmem:[%s5560_s3 + $0x4f0] sm:$0xff] %vm2656_vm2, %v2558_v61  ;;  %v2431_v6 = vmax.f32 %v1501_v62, 0.0  ;;  %v2559_v7 = vmax.f32 %v2013_v63, 0.0 }
 0x127   :  { %2685 = vst.msk [vmem:[%s5560_s3 + $0xe0] sm:$0xff] %vm2656_vm2, %v2428_v2  ;;  %2813 = vst.msk [vmem:[%s5560_s3 + $0x4e0] sm:$0xff] %vm2656_vm2, %v2556_v3  ;;  %v2429_v8 = vmax.f32 %v1493_v4, 0.0  ;;  %v2557_v9 = vmax.f32 %v2005_v5, 0.0 }
 0x128   :  { %2688 = vst.msk [vmem:[%s5560_s3 + $0xf8] sm:$0xff] %vm2656_vm2, %v2431_v6  ;;  %2816 = vst.msk [vmem:[%s5560_s3 + $0x4f8] sm:$0xff] %vm2656_vm2, %v2559_v7 }
 0x129   :  { %2686 = vst.msk [vmem:[%s5560_s3 + $0xe8] sm:$0xff] %vm2656_vm2, %v2429_v8  ;;  %2814 = vst.msk [vmem:[%s5560_s3 + $0x4e8] sm:$0xff] %vm2656_vm2, %v2557_v9  ;;  %v3356_v10 = vpop.f32.mrb[32].mxu0  ;;  %v3484_v11 = vpop.f32.mrb[32].mxu1 }
 0x12a   :  { %v1514_v12 = vadd.f32 %v3356_v10, %v4201_v52  ;;  %v2026_v13 = vadd.f32 %v3484_v11, %v4201_v52  ;;  %v1505_v14 = vpop.f32.mrb[33].mxu0  ;;  %v2017_v15 = vpop.f32.mrb[33].mxu1 }
 0x12b   :  { %v1506_v16 = vadd.f32 %v4201_v52, %v1505_v14  ;;  %v2018_v17 = vadd.f32 %v4201_v52, %v2017_v15  ;;  %v3357_v18 = vpop.f32.mrb[34].mxu0  ;;  %v3485_v19 = vpop.f32.mrb[34].mxu1 }
 0x12c   :  { %v2434_v20 = vmax.f32 %v1514_v12, 0.0  ;;  %v2562_v21 = vmax.f32 %v2026_v13, 0.0  ;;  %v1517_v22 = vadd.f32 %v3357_v18, %v4201_v52  ;;  %v2029_v23 = vadd.f32 %v3485_v19, %v4201_v52  ;;  %v1508_v24 = vpop.f32.mrb[35].mxu0  ;;  %v2020_v25 = vpop.f32.mrb[35].mxu1 }
 0x12d   :  { %v2432_v26 = vmax.f32 %v1506_v16, 0.0  ;;  %v2560_v27 = vmax.f32 %v2018_v17, 0.0  ;;  %v1509_v28 = vadd.f32 %v4201_v52, %v1508_v24  ;;  %v2021_v29 = vadd.f32 %v4201_v52, %v2020_v25 }
 0x12e   :  { %2691 = vst.msk [vmem:[%s5560_s3 + $0x110] sm:$0xff] %vm2656_vm2, %v2434_v20  ;;  %2819 = vst.msk [vmem:[%s5560_s3 + $0x510] sm:$0xff] %vm2656_vm2, %v2562_v21  ;;  %v2435_v30 = vmax.f32 %v1517_v22, 0.0  ;;  %v2563_v31 = vmax.f32 %v2029_v23, 0.0 }
 0x12f   :  { %2689 = vst.msk [vmem:[%s5560_s3 + $0x100] sm:$0xff] %vm2656_vm2, %v2432_v26  ;;  %2817 = vst.msk [vmem:[%s5560_s3 + $0x500] sm:$0xff] %vm2656_vm2, %v2560_v27  ;;  %v2433_v32 = vmax.f32 %v1509_v28, 0.0  ;;  %v2561_v33 = vmax.f32 %v2021_v29, 0.0 }
 0x130   :  { %2692 = vst.msk [vmem:[%s5560_s3 + $0x118] sm:$0xff] %vm2656_vm2, %v2435_v30  ;;  %2820 = vst.msk [vmem:[%s5560_s3 + $0x518] sm:$0xff] %vm2656_vm2, %v2563_v31 }
 0x131   :  { %2690 = vst.msk [vmem:[%s5560_s3 + $0x108] sm:$0xff] %vm2656_vm2, %v2433_v32  ;;  %2818 = vst.msk [vmem:[%s5560_s3 + $0x508] sm:$0xff] %vm2656_vm2, %v2561_v33  ;;  %v3360_v34 = vpop.f32.mrb[36].mxu0  ;;  %v3488_v35 = vpop.f32.mrb[36].mxu1 }
 0x132   :  { %v1530_v36 = vadd.f32 %v3360_v34, %v4201_v52  ;;  %v2042_v37 = vadd.f32 %v3488_v35, %v4201_v52  ;;  %v1521_v38 = vpop.f32.mrb[37].mxu0  ;;  %v2033_v39 = vpop.f32.mrb[37].mxu1 }
 0x133   :  { %v1522_v40 = vadd.f32 %v4201_v52, %v1521_v38  ;;  %v2034_v41 = vadd.f32 %v4201_v52, %v2033_v39  ;;  %v3361_v42 = vpop.f32.mrb[38].mxu0  ;;  %v3489_v43 = vpop.f32.mrb[38].mxu1 }
 0x134   :  { %v2438_v44 = vmax.f32 %v1530_v36, 0.0  ;;  %v2566_v45 = vmax.f32 %v2042_v37, 0.0  ;;  %v1533_v46 = vadd.f32 %v3361_v42, %v4201_v52  ;;  %v2045_v47 = vadd.f32 %v3489_v43, %v4201_v52  ;;  %v1524_v48 = vpop.f32.mrb[39].mxu0  ;;  %v2036_v49 = vpop.f32.mrb[39].mxu1 }
 0x135   :  { %v2436_v50 = vmax.f32 %v1522_v40, 0.0  ;;  %v2564_v51 = vmax.f32 %v2034_v41, 0.0  ;;  %v1525_v53 = vadd.f32 %v4201_v52, %v1524_v48  ;;  %v2037_v54 = vadd.f32 %v4201_v52, %v2036_v49 }
 0x136   :  { %2695 = vst.msk [vmem:[%s5560_s3 + $0x130] sm:$0xff] %vm2656_vm2, %v2438_v44  ;;  %2823 = vst.msk [vmem:[%s5560_s3 + $0x530] sm:$0xff] %vm2656_vm2, %v2566_v45  ;;  %v2439_v55 = vmax.f32 %v1533_v46, 0.0  ;;  %v2567_v56 = vmax.f32 %v2045_v47, 0.0 }
 0x137   :  { %2693 = vst.msk [vmem:[%s5560_s3 + $0x120] sm:$0xff] %vm2656_vm2, %v2436_v50  ;;  %2821 = vst.msk [vmem:[%s5560_s3 + $0x520] sm:$0xff] %vm2656_vm2, %v2564_v51  ;;  %v2437_v57 = vmax.f32 %v1525_v53, 0.0  ;;  %v2565_v58 = vmax.f32 %v2037_v54, 0.0 }
 0x138   :  { %2696 = vst.msk [vmem:[%s5560_s3 + $0x138] sm:$0xff] %vm2656_vm2, %v2439_v55  ;;  %2824 = vst.msk [vmem:[%s5560_s3 + $0x538] sm:$0xff] %vm2656_vm2, %v2567_v56 }
 0x139   :  { %2694 = vst.msk [vmem:[%s5560_s3 + $0x128] sm:$0xff] %vm2656_vm2, %v2437_v57  ;;  %2822 = vst.msk [vmem:[%s5560_s3 + $0x528] sm:$0xff] %vm2656_vm2, %v2565_v58  ;;  %v3364_v59 = vpop.f32.mrb[40].mxu0  ;;  %v3492_v60 = vpop.f32.mrb[40].mxu1 }
 0x13a   :  { %v1546_v61 = vadd.f32 %v3364_v59, %v4201_v52  ;;  %v2058_v62 = vadd.f32 %v3492_v60, %v4201_v52  ;;  %v1537_v63 = vpop.f32.mrb[41].mxu0  ;;  %v2049_v0 = vpop.f32.mrb[41].mxu1 }
 0x13b   :  { %v1538_v1 = vadd.f32 %v4201_v52, %v1537_v63  ;;  %v2050_v2 = vadd.f32 %v4201_v52, %v2049_v0  ;;  %v3365_v3 = vpop.f32.mrb[42].mxu0  ;;  %v3493_v4 = vpop.f32.mrb[42].mxu1 }
 0x13c   :  { %v2442_v5 = vmax.f32 %v1546_v61, 0.0  ;;  %v2570_v6 = vmax.f32 %v2058_v62, 0.0  ;;  %v1549_v7 = vadd.f32 %v3365_v3, %v4201_v52  ;;  %v2061_v8 = vadd.f32 %v3493_v4, %v4201_v52  ;;  %v1540_v9 = vpop.f32.mrb[43].mxu0  ;;  %v2052_v10 = vpop.f32.mrb[43].mxu1 }
 0x13d   :  { %v2440_v11 = vmax.f32 %v1538_v1, 0.0  ;;  %v2568_v12 = vmax.f32 %v2050_v2, 0.0  ;;  %v1541_v13 = vadd.f32 %v4201_v52, %v1540_v9  ;;  %v2053_v14 = vadd.f32 %v4201_v52, %v2052_v10 }
 0x13e   :  { %2699 = vst.msk [vmem:[%s5560_s3 + $0x150] sm:$0xff] %vm2656_vm2, %v2442_v5  ;;  %2827 = vst.msk [vmem:[%s5560_s3 + $0x550] sm:$0xff] %vm2656_vm2, %v2570_v6  ;;  %v2443_v15 = vmax.f32 %v1549_v7, 0.0  ;;  %v2571_v16 = vmax.f32 %v2061_v8, 0.0 }
 0x13f   :  { %2697 = vst.msk [vmem:[%s5560_s3 + $0x140] sm:$0xff] %vm2656_vm2, %v2440_v11  ;;  %2825 = vst.msk [vmem:[%s5560_s3 + $0x540] sm:$0xff] %vm2656_vm2, %v2568_v12  ;;  %v2441_v17 = vmax.f32 %v1541_v13, 0.0  ;;  %v2569_v18 = vmax.f32 %v2053_v14, 0.0 }
 0x140   :  { %2700 = vst.msk [vmem:[%s5560_s3 + $0x158] sm:$0xff] %vm2656_vm2, %v2443_v15  ;;  %2828 = vst.msk [vmem:[%s5560_s3 + $0x558] sm:$0xff] %vm2656_vm2, %v2571_v16 }
 0x141   :  { %2698 = vst.msk [vmem:[%s5560_s3 + $0x148] sm:$0xff] %vm2656_vm2, %v2441_v17  ;;  %2826 = vst.msk [vmem:[%s5560_s3 + $0x548] sm:$0xff] %vm2656_vm2, %v2569_v18  ;;  %v3368_v19 = vpop.f32.mrb[44].mxu0  ;;  %v3496_v20 = vpop.f32.mrb[44].mxu1 }
 0x142   :  { %v1562_v21 = vadd.f32 %v3368_v19, %v4201_v52  ;;  %v2074_v22 = vadd.f32 %v3496_v20, %v4201_v52  ;;  %v1553_v23 = vpop.f32.mrb[45].mxu0  ;;  %v2065_v24 = vpop.f32.mrb[45].mxu1 }
 0x143   :  { %v1554_v25 = vadd.f32 %v4201_v52, %v1553_v23  ;;  %v2066_v26 = vadd.f32 %v4201_v52, %v2065_v24  ;;  %v3369_v27 = vpop.f32.mrb[46].mxu0  ;;  %v3497_v28 = vpop.f32.mrb[46].mxu1 }
 0x144   :  { %v2446_v29 = vmax.f32 %v1562_v21, 0.0  ;;  %v2574_v30 = vmax.f32 %v2074_v22, 0.0  ;;  %v1565_v31 = vadd.f32 %v3369_v27, %v4201_v52  ;;  %v2077_v32 = vadd.f32 %v3497_v28, %v4201_v52  ;;  %v1556_v33 = vpop.f32.mrb[47].mxu0  ;;  %v2068_v34 = vpop.f32.mrb[47].mxu1 }
 0x145   :  { %v2444_v35 = vmax.f32 %v1554_v25, 0.0  ;;  %v2572_v36 = vmax.f32 %v2066_v26, 0.0  ;;  %v1557_v37 = vadd.f32 %v4201_v52, %v1556_v33  ;;  %v2069_v38 = vadd.f32 %v4201_v52, %v2068_v34 }
 0x146   :  { %2703 = vst.msk [vmem:[%s5560_s3 + $0x170] sm:$0xff] %vm2656_vm2, %v2446_v29  ;;  %2831 = vst.msk [vmem:[%s5560_s3 + $0x570] sm:$0xff] %vm2656_vm2, %v2574_v30  ;;  %v2447_v39 = vmax.f32 %v1565_v31, 0.0  ;;  %v2575_v40 = vmax.f32 %v2077_v32, 0.0 }
 0x147   :  { %2701 = vst.msk [vmem:[%s5560_s3 + $0x160] sm:$0xff] %vm2656_vm2, %v2444_v35  ;;  %2829 = vst.msk [vmem:[%s5560_s3 + $0x560] sm:$0xff] %vm2656_vm2, %v2572_v36  ;;  %v2445_v41 = vmax.f32 %v1557_v37, 0.0  ;;  %v2573_v42 = vmax.f32 %v2069_v38, 0.0 }
 0x148   :  { %2704 = vst.msk [vmem:[%s5560_s3 + $0x178] sm:$0xff] %vm2656_vm2, %v2447_v39  ;;  %2832 = vst.msk [vmem:[%s5560_s3 + $0x578] sm:$0xff] %vm2656_vm2, %v2575_v40 }
 0x149   :  { %2702 = vst.msk [vmem:[%s5560_s3 + $0x168] sm:$0xff] %vm2656_vm2, %v2445_v41  ;;  %2830 = vst.msk [vmem:[%s5560_s3 + $0x568] sm:$0xff] %vm2656_vm2, %v2573_v42  ;;  %v3372_v43 = vpop.f32.mrb[48].mxu0  ;;  %v3500_v44 = vpop.f32.mrb[48].mxu1 }
 0x14a   :  { %v1578_v45 = vadd.f32 %v3372_v43, %v4201_v52  ;;  %v2090_v46 = vadd.f32 %v3500_v44, %v4201_v52  ;;  %v1569_v47 = vpop.f32.mrb[49].mxu0  ;;  %v2081_v48 = vpop.f32.mrb[49].mxu1 }
 0x14b   :  { %v1570_v49 = vadd.f32 %v4201_v52, %v1569_v47  ;;  %v2082_v50 = vadd.f32 %v4201_v52, %v2081_v48  ;;  %v3373_v51 = vpop.f32.mrb[50].mxu0  ;;  %v3501_v53 = vpop.f32.mrb[50].mxu1 }
 0x14c   :  { %v2450_v54 = vmax.f32 %v1578_v45, 0.0  ;;  %v2578_v55 = vmax.f32 %v2090_v46, 0.0  ;;  %v1581_v56 = vadd.f32 %v3373_v51, %v4201_v52  ;;  %v2093_v57 = vadd.f32 %v3501_v53, %v4201_v52  ;;  %v1572_v58 = vpop.f32.mrb[51].mxu0  ;;  %v2084_v59 = vpop.f32.mrb[51].mxu1 }
 0x14d   :  { %v2448_v60 = vmax.f32 %v1570_v49, 0.0  ;;  %v2576_v61 = vmax.f32 %v2082_v50, 0.0  ;;  %v1573_v62 = vadd.f32 %v4201_v52, %v1572_v58  ;;  %v2085_v63 = vadd.f32 %v4201_v52, %v2084_v59 }
 0x14e   :  { %2707 = vst.msk [vmem:[%s5560_s3 + $0x190] sm:$0xff] %vm2656_vm2, %v2450_v54  ;;  %2835 = vst.msk [vmem:[%s5560_s3 + $0x590] sm:$0xff] %vm2656_vm2, %v2578_v55  ;;  %v2451_v0 = vmax.f32 %v1581_v56, 0.0  ;;  %v2579_v1 = vmax.f32 %v2093_v57, 0.0  ;;  %v4880_v54 = vld [vmem:[%s5559_s2] ss:$0 sm:$0xff] }
 0x14f   :  { %2705 = vst.msk [vmem:[%s5560_s3 + $0x180] sm:$0xff] %vm2656_vm2, %v2448_v60  ;;  %2833 = vst.msk [vmem:[%s5560_s3 + $0x580] sm:$0xff] %vm2656_vm2, %v2576_v61  ;;  %v2449_v2 = vmax.f32 %v1573_v62, 0.0  ;;  %v2577_v3 = vmax.f32 %v2085_v63, 0.0 }
 0x150   :  { %2708 = vst.msk [vmem:[%s5560_s3 + $0x198] sm:$0xff] %vm2656_vm2, %v2451_v0  ;;  %2836 = vst.msk [vmem:[%s5560_s3 + $0x598] sm:$0xff] %vm2656_vm2, %v2579_v1 }
 0x151   :  { %2706 = vst.msk [vmem:[%s5560_s3 + $0x188] sm:$0xff] %vm2656_vm2, %v2449_v2  ;;  %2834 = vst.msk [vmem:[%s5560_s3 + $0x588] sm:$0xff] %vm2656_vm2, %v2577_v3  ;;  %v3376_v4 = vpop.f32.mrb[52].mxu0  ;;  %v3504_v5 = vpop.f32.mrb[52].mxu1 }
 0x152   :  { %v1594_v6 = vadd.f32 %v3376_v4, %v4201_v52  ;;  %v2106_v7 = vadd.f32 %v3504_v5, %v4201_v52  ;;  %v1585_v8 = vpop.f32.mrb[53].mxu0  ;;  %v2097_v9 = vpop.f32.mrb[53].mxu1 }
 0x153   :  { %v1586_v10 = vadd.f32 %v4201_v52, %v1585_v8  ;;  %v2098_v11 = vadd.f32 %v4201_v52, %v2097_v9  ;;  %v3377_v12 = vpop.f32.mrb[54].mxu0  ;;  %v3505_v13 = vpop.f32.mrb[54].mxu1 }
 0x154   :  { %v2454_v14 = vmax.f32 %v1594_v6, 0.0  ;;  %v2582_v15 = vmax.f32 %v2106_v7, 0.0  ;;  %v1597_v16 = vadd.f32 %v3377_v12, %v4201_v52  ;;  %v2109_v17 = vadd.f32 %v3505_v13, %v4201_v52  ;;  %v1588_v18 = vpop.f32.mrb[55].mxu0  ;;  %v2100_v19 = vpop.f32.mrb[55].mxu1 }
 0x155   :  { %v2452_v20 = vmax.f32 %v1586_v10, 0.0  ;;  %v2580_v21 = vmax.f32 %v2098_v11, 0.0  ;;  %v1589_v22 = vadd.f32 %v4201_v52, %v1588_v18  ;;  %v2101_v23 = vadd.f32 %v4201_v52, %v2100_v19 }
 0x156   :  { %2711 = vst.msk [vmem:[%s5560_s3 + $0x1b0] sm:$0xff] %vm2656_vm2, %v2454_v14  ;;  %2839 = vst.msk [vmem:[%s5560_s3 + $0x5b0] sm:$0xff] %vm2656_vm2, %v2582_v15  ;;  %v2455_v24 = vmax.f32 %v1597_v16, 0.0  ;;  %v2583_v25 = vmax.f32 %v2109_v17, 0.0 }
 0x157   :  { %2709 = vst.msk [vmem:[%s5560_s3 + $0x1a0] sm:$0xff] %vm2656_vm2, %v2452_v20  ;;  %2837 = vst.msk [vmem:[%s5560_s3 + $0x5a0] sm:$0xff] %vm2656_vm2, %v2580_v21  ;;  %v2453_v26 = vmax.f32 %v1589_v22, 0.0  ;;  %v2581_v27 = vmax.f32 %v2101_v23, 0.0 }
 0x158   :  { %2712 = vst.msk [vmem:[%s5560_s3 + $0x1b8] sm:$0xff] %vm2656_vm2, %v2455_v24  ;;  %2840 = vst.msk [vmem:[%s5560_s3 + $0x5b8] sm:$0xff] %vm2656_vm2, %v2583_v25 }
 0x159   :  { %2710 = vst.msk [vmem:[%s5560_s3 + $0x1a8] sm:$0xff] %vm2656_vm2, %v2453_v26  ;;  %2838 = vst.msk [vmem:[%s5560_s3 + $0x5a8] sm:$0xff] %vm2656_vm2, %v2581_v27  ;;  %v3380_v28 = vpop.f32.mrb[56].mxu0  ;;  %v3508_v29 = vpop.f32.mrb[56].mxu1 }
 0x15a   :  { %v1610_v30 = vadd.f32 %v3380_v28, %v4201_v52  ;;  %v2122_v31 = vadd.f32 %v3508_v29, %v4201_v52  ;;  %v1601_v32 = vpop.f32.mrb[57].mxu0  ;;  %v2113_v33 = vpop.f32.mrb[57].mxu1 }
 0x15b   :  { %v1602_v34 = vadd.f32 %v4201_v52, %v1601_v32  ;;  %v2114_v35 = vadd.f32 %v4201_v52, %v2113_v33  ;;  %v3381_v36 = vpop.f32.mrb[58].mxu0  ;;  %v3509_v37 = vpop.f32.mrb[58].mxu1 }
 0x15c   :  { %v2458_v38 = vmax.f32 %v1610_v30, 0.0  ;;  %v2586_v39 = vmax.f32 %v2122_v31, 0.0  ;;  %v1613_v40 = vadd.f32 %v3381_v36, %v4201_v52  ;;  %v2125_v41 = vadd.f32 %v3509_v37, %v4201_v52  ;;  %v1604_v42 = vpop.f32.mrb[59].mxu0  ;;  %v2116_v43 = vpop.f32.mrb[59].mxu1 }
 0x15d   :  { %v2456_v44 = vmax.f32 %v1602_v34, 0.0  ;;  %v2584_v45 = vmax.f32 %v2114_v35, 0.0  ;;  %v1605_v46 = vadd.f32 %v4201_v52, %v1604_v42  ;;  %v2117_v47 = vadd.f32 %v4201_v52, %v2116_v43 }
 0x15e   :  { %2715 = vst.msk [vmem:[%s5560_s3 + $0x1d0] sm:$0xff] %vm2656_vm2, %v2458_v38  ;;  %2843 = vst.msk [vmem:[%s5560_s3 + $0x5d0] sm:$0xff] %vm2656_vm2, %v2586_v39  ;;  %v2459_v48 = vmax.f32 %v1613_v40, 0.0  ;;  %v2587_v49 = vmax.f32 %v2125_v41, 0.0 }
 0x15f   :  { %2713 = vst.msk [vmem:[%s5560_s3 + $0x1c0] sm:$0xff] %vm2656_vm2, %v2456_v44  ;;  %2841 = vst.msk [vmem:[%s5560_s3 + $0x5c0] sm:$0xff] %vm2656_vm2, %v2584_v45  ;;  %v2457_v52 = vmax.f32 %v1605_v46, 0.0  ;;  %v2585_v50 = vmax.f32 %v2117_v47, 0.0 }
 0x160   :  { %2716 = vst.msk [vmem:[%s5560_s3 + $0x1d8] sm:$0xff] %vm2656_vm2, %v2459_v48  ;;  %2844 = vst.msk [vmem:[%s5560_s3 + $0x5d8] sm:$0xff] %vm2656_vm2, %v2587_v49 }
 0x161   :  { %2714 = vst.msk [vmem:[%s5560_s3 + $0x1c8] sm:$0xff] %vm2656_vm2, %v2457_v52  ;;  %2842 = vst.msk [vmem:[%s5560_s3 + $0x5c8] sm:$0xff] %vm2656_vm2, %v2585_v50  ;;  %v3384_v51 = vpop.f32.mrb[60].mxu0  ;;  %v3512_v53 = vpop.f32.mrb[60].mxu1 }
 0x162   :  { %v1626_v55 = vadd.f32 %v4880_v54, %v3384_v51  ;;  %v2138_v56 = vadd.f32 %v4880_v54, %v3512_v53  ;;  %v1617_v57 = vpop.f32.mrb[61].mxu0  ;;  %v2129_v58 = vpop.f32.mrb[61].mxu1 }
 0x163   :  { %v1618_v59 = vadd.f32 %v4880_v54, %v1617_v57  ;;  %v2130_v60 = vadd.f32 %v4880_v54, %v2129_v58  ;;  %v3385_v61 = vpop.f32.mrb[62].mxu0  ;;  %v3513_v62 = vpop.f32.mrb[62].mxu1 }
 0x164   :  { %v2462_v63 = vmax.f32 %v1626_v55, 0.0  ;;  %v2590_v0 = vmax.f32 %v2138_v56, 0.0  ;;  %v1629_v1 = vadd.f32 %v4880_v54, %v3385_v61  ;;  %v2141_v2 = vadd.f32 %v4880_v54, %v3513_v62  ;;  %v1620_v3 = vpop.f32.mrb[63].mxu0  ;;  %v2132_v4 = vpop.f32.mrb[63].mxu1 }
 0x165   :  { %v2460_v5 = vmax.f32 %v1618_v59, 0.0  ;;  %v2588_v6 = vmax.f32 %v2130_v60, 0.0  ;;  %v1621_v7 = vadd.f32 %v4880_v54, %v1620_v3  ;;  %v2133_v8 = vadd.f32 %v4880_v54, %v2132_v4 }
 0x166   :  { %2719 = vst.msk [vmem:[%s5560_s3 + $0x1f0] sm:$0xff] %vm2656_vm2, %v2462_v63  ;;  %2847 = vst.msk [vmem:[%s5560_s3 + $0x5f0] sm:$0xff] %vm2656_vm2, %v2590_v0  ;;  %v2463_v9 = vmax.f32 %v1629_v1, 0.0  ;;  %v2591_v10 = vmax.f32 %v2141_v2, 0.0 }
 0x167   :  { %2717 = vst.msk [vmem:[%s5560_s3 + $0x1e0] sm:$0xff] %vm2656_vm2, %v2460_v5  ;;  %2845 = vst.msk [vmem:[%s5560_s3 + $0x5e0] sm:$0xff] %vm2656_vm2, %v2588_v6  ;;  %v2461_v11 = vmax.f32 %v1621_v7, 0.0  ;;  %v2589_v12 = vmax.f32 %v2133_v8, 0.0 }
 0x168   :  { %2720 = vst.msk [vmem:[%s5560_s3 + $0x1f8] sm:$0xff] %vm2656_vm2, %v2463_v9  ;;  %2848 = vst.msk [vmem:[%s5560_s3 + $0x5f8] sm:$0xff] %vm2656_vm2, %v2591_v10 }
 0x169   :  { %2718 = vst.msk [vmem:[%s5560_s3 + $0x1e8] sm:$0xff] %vm2656_vm2, %v2461_v11  ;;  %2846 = vst.msk [vmem:[%s5560_s3 + $0x5e8] sm:$0xff] %vm2656_vm2, %v2589_v12  ;;  %v3388_v13 = vpop.f32.mrb[64].mxu0  ;;  %v3516_v14 = vpop.f32.mrb[64].mxu1 }
 0x16a   :  { %v1642_v15 = vadd.f32 %v4880_v54, %v3388_v13  ;;  %v2154_v16 = vadd.f32 %v4880_v54, %v3516_v14  ;;  %v1633_v17 = vpop.f32.mrb[65].mxu0  ;;  %v2145_v18 = vpop.f32.mrb[65].mxu1 }
 0x16b   :  { %v1634_v19 = vadd.f32 %v4880_v54, %v1633_v17  ;;  %v2146_v20 = vadd.f32 %v4880_v54, %v2145_v18  ;;  %v3389_v21 = vpop.f32.mrb[66].mxu0  ;;  %v3517_v22 = vpop.f32.mrb[66].mxu1 }
 0x16c   :  { %v2466_v23 = vmax.f32 %v1642_v15, 0.0  ;;  %v2594_v24 = vmax.f32 %v2154_v16, 0.0  ;;  %v1645_v25 = vadd.f32 %v4880_v54, %v3389_v21  ;;  %v2157_v26 = vadd.f32 %v4880_v54, %v3517_v22  ;;  %v1636_v27 = vpop.f32.mrb[67].mxu0  ;;  %v2148_v28 = vpop.f32.mrb[67].mxu1 }
 0x16d   :  { %v2464_v29 = vmax.f32 %v1634_v19, 0.0  ;;  %v2592_v30 = vmax.f32 %v2146_v20, 0.0  ;;  %v1637_v31 = vadd.f32 %v4880_v54, %v1636_v27  ;;  %v2149_v32 = vadd.f32 %v4880_v54, %v2148_v28 }
 0x16e   :  { %2723 = vst.msk [vmem:[%s5560_s3 + $0x210] sm:$0xff] %vm2656_vm2, %v2466_v23  ;;  %2851 = vst.msk [vmem:[%s5560_s3 + $0x610] sm:$0xff] %vm2656_vm2, %v2594_v24  ;;  %v2467_v33 = vmax.f32 %v1645_v25, 0.0  ;;  %v2595_v34 = vmax.f32 %v2157_v26, 0.0 }
 0x16f   :  { %2721 = vst.msk [vmem:[%s5560_s3 + $0x200] sm:$0xff] %vm2656_vm2, %v2464_v29  ;;  %2849 = vst.msk [vmem:[%s5560_s3 + $0x600] sm:$0xff] %vm2656_vm2, %v2592_v30  ;;  %v2465_v35 = vmax.f32 %v1637_v31, 0.0  ;;  %v2593_v36 = vmax.f32 %v2149_v32, 0.0 }
 0x170   :  { %2724 = vst.msk [vmem:[%s5560_s3 + $0x218] sm:$0xff] %vm2656_vm2, %v2467_v33  ;;  %2852 = vst.msk [vmem:[%s5560_s3 + $0x618] sm:$0xff] %vm2656_vm2, %v2595_v34 }
 0x171   :  { %2722 = vst.msk [vmem:[%s5560_s3 + $0x208] sm:$0xff] %vm2656_vm2, %v2465_v35  ;;  %2850 = vst.msk [vmem:[%s5560_s3 + $0x608] sm:$0xff] %vm2656_vm2, %v2593_v36  ;;  %v3392_v37 = vpop.f32.mrb[68].mxu0  ;;  %v3520_v38 = vpop.f32.mrb[68].mxu1 }
 0x172   :  { %v1658_v39 = vadd.f32 %v4880_v54, %v3392_v37  ;;  %v2170_v40 = vadd.f32 %v4880_v54, %v3520_v38  ;;  %v1649_v41 = vpop.f32.mrb[69].mxu0  ;;  %v2161_v42 = vpop.f32.mrb[69].mxu1 }
 0x173   :  { %v1650_v43 = vadd.f32 %v4880_v54, %v1649_v41  ;;  %v2162_v44 = vadd.f32 %v4880_v54, %v2161_v42  ;;  %v3393_v45 = vpop.f32.mrb[70].mxu0  ;;  %v3521_v46 = vpop.f32.mrb[70].mxu1 }
 0x174   :  { %v2470_v47 = vmax.f32 %v1658_v39, 0.0  ;;  %v2598_v48 = vmax.f32 %v2170_v40, 0.0  ;;  %v1661_v49 = vadd.f32 %v4880_v54, %v3393_v45  ;;  %v2173_v52 = vadd.f32 %v4880_v54, %v3521_v46  ;;  %v1652_v50 = vpop.f32.mrb[71].mxu0  ;;  %v2164_v51 = vpop.f32.mrb[71].mxu1 }
 0x175   :  { %v2468_v53 = vmax.f32 %v1650_v43, 0.0  ;;  %v2596_v55 = vmax.f32 %v2162_v44, 0.0  ;;  %v1653_v56 = vadd.f32 %v4880_v54, %v1652_v50  ;;  %v2165_v57 = vadd.f32 %v4880_v54, %v2164_v51 }
 0x176   :  { %2727 = vst.msk [vmem:[%s5560_s3 + $0x230] sm:$0xff] %vm2656_vm2, %v2470_v47  ;;  %2855 = vst.msk [vmem:[%s5560_s3 + $0x630] sm:$0xff] %vm2656_vm2, %v2598_v48  ;;  %v2471_v58 = vmax.f32 %v1661_v49, 0.0  ;;  %v2599_v59 = vmax.f32 %v2173_v52, 0.0 }
 0x177   :  { %2725 = vst.msk [vmem:[%s5560_s3 + $0x220] sm:$0xff] %vm2656_vm2, %v2468_v53  ;;  %2853 = vst.msk [vmem:[%s5560_s3 + $0x620] sm:$0xff] %vm2656_vm2, %v2596_v55  ;;  %v2469_v60 = vmax.f32 %v1653_v56, 0.0  ;;  %v2597_v61 = vmax.f32 %v2165_v57, 0.0 }
 0x178   :  { %2728 = vst.msk [vmem:[%s5560_s3 + $0x238] sm:$0xff] %vm2656_vm2, %v2471_v58  ;;  %2856 = vst.msk [vmem:[%s5560_s3 + $0x638] sm:$0xff] %vm2656_vm2, %v2599_v59 }
 0x179   :  { %2726 = vst.msk [vmem:[%s5560_s3 + $0x228] sm:$0xff] %vm2656_vm2, %v2469_v60  ;;  %2854 = vst.msk [vmem:[%s5560_s3 + $0x628] sm:$0xff] %vm2656_vm2, %v2597_v61  ;;  %v3396_v62 = vpop.f32.mrb[72].mxu0  ;;  %v3524_v63 = vpop.f32.mrb[72].mxu1 }
 0x17a   :  { %v1674_v0 = vadd.f32 %v4880_v54, %v3396_v62  ;;  %v2186_v1 = vadd.f32 %v4880_v54, %v3524_v63  ;;  %v1665_v2 = vpop.f32.mrb[73].mxu0  ;;  %v2177_v3 = vpop.f32.mrb[73].mxu1 }
 0x17b   :  { %v1666_v4 = vadd.f32 %v4880_v54, %v1665_v2  ;;  %v2178_v5 = vadd.f32 %v4880_v54, %v2177_v3  ;;  %v3397_v6 = vpop.f32.mrb[74].mxu0  ;;  %v3525_v7 = vpop.f32.mrb[74].mxu1 }
 0x17c   :  { %v2474_v8 = vmax.f32 %v1674_v0, 0.0  ;;  %v2602_v9 = vmax.f32 %v2186_v1, 0.0  ;;  %v1677_v10 = vadd.f32 %v4880_v54, %v3397_v6  ;;  %v2189_v11 = vadd.f32 %v4880_v54, %v3525_v7  ;;  %v1668_v12 = vpop.f32.mrb[75].mxu0  ;;  %v2180_v13 = vpop.f32.mrb[75].mxu1 }
 0x17d   :  { %v2472_v14 = vmax.f32 %v1666_v4, 0.0  ;;  %v2600_v15 = vmax.f32 %v2178_v5, 0.0  ;;  %v1669_v16 = vadd.f32 %v4880_v54, %v1668_v12  ;;  %v2181_v17 = vadd.f32 %v4880_v54, %v2180_v13 }
 0x17e   :  { %2731 = vst.msk [vmem:[%s5560_s3 + $0x250] sm:$0xff] %vm2656_vm2, %v2474_v8  ;;  %2859 = vst.msk [vmem:[%s5560_s3 + $0x650] sm:$0xff] %vm2656_vm2, %v2602_v9  ;;  %v2475_v18 = vmax.f32 %v1677_v10, 0.0  ;;  %v2603_v19 = vmax.f32 %v2189_v11, 0.0 }
 0x17f   :  { %2729 = vst.msk [vmem:[%s5560_s3 + $0x240] sm:$0xff] %vm2656_vm2, %v2472_v14  ;;  %2857 = vst.msk [vmem:[%s5560_s3 + $0x640] sm:$0xff] %vm2656_vm2, %v2600_v15  ;;  %v2473_v20 = vmax.f32 %v1669_v16, 0.0  ;;  %v2601_v21 = vmax.f32 %v2181_v17, 0.0 }
 0x180   :  { %2732 = vst.msk [vmem:[%s5560_s3 + $0x258] sm:$0xff] %vm2656_vm2, %v2475_v18  ;;  %2860 = vst.msk [vmem:[%s5560_s3 + $0x658] sm:$0xff] %vm2656_vm2, %v2603_v19 }
 0x181   :  { %2730 = vst.msk [vmem:[%s5560_s3 + $0x248] sm:$0xff] %vm2656_vm2, %v2473_v20  ;;  %2858 = vst.msk [vmem:[%s5560_s3 + $0x648] sm:$0xff] %vm2656_vm2, %v2601_v21  ;;  %v3400_v22 = vpop.f32.mrb[76].mxu0  ;;  %v3528_v23 = vpop.f32.mrb[76].mxu1 }
 0x182   :  { %v1690_v24 = vadd.f32 %v4880_v54, %v3400_v22  ;;  %v2202_v25 = vadd.f32 %v4880_v54, %v3528_v23  ;;  %v1681_v26 = vpop.f32.mrb[77].mxu0  ;;  %v2193_v27 = vpop.f32.mrb[77].mxu1 }
 0x183   :  { %v1682_v28 = vadd.f32 %v4880_v54, %v1681_v26  ;;  %v2194_v29 = vadd.f32 %v4880_v54, %v2193_v27  ;;  %v3401_v30 = vpop.f32.mrb[78].mxu0  ;;  %v3529_v31 = vpop.f32.mrb[78].mxu1 }
 0x184   :  { %v2478_v32 = vmax.f32 %v1690_v24, 0.0  ;;  %v2606_v33 = vmax.f32 %v2202_v25, 0.0  ;;  %v1693_v34 = vadd.f32 %v4880_v54, %v3401_v30  ;;  %v2205_v35 = vadd.f32 %v4880_v54, %v3529_v31  ;;  %v1684_v36 = vpop.f32.mrb[79].mxu0  ;;  %v2196_v37 = vpop.f32.mrb[79].mxu1 }
 0x185   :  { %v2476_v38 = vmax.f32 %v1682_v28, 0.0  ;;  %v2604_v39 = vmax.f32 %v2194_v29, 0.0  ;;  %v1685_v40 = vadd.f32 %v4880_v54, %v1684_v36  ;;  %v2197_v41 = vadd.f32 %v4880_v54, %v2196_v37 }
 0x186   :  { %2735 = vst.msk [vmem:[%s5560_s3 + $0x270] sm:$0xff] %vm2656_vm2, %v2478_v32  ;;  %2863 = vst.msk [vmem:[%s5560_s3 + $0x670] sm:$0xff] %vm2656_vm2, %v2606_v33  ;;  %v2479_v42 = vmax.f32 %v1693_v34, 0.0  ;;  %v2607_v43 = vmax.f32 %v2205_v35, 0.0 }
 0x187   :  { %2733 = vst.msk [vmem:[%s5560_s3 + $0x260] sm:$0xff] %vm2656_vm2, %v2476_v38  ;;  %2861 = vst.msk [vmem:[%s5560_s3 + $0x660] sm:$0xff] %vm2656_vm2, %v2604_v39  ;;  %v2477_v44 = vmax.f32 %v1685_v40, 0.0  ;;  %v2605_v45 = vmax.f32 %v2197_v41, 0.0 }
 0x188   :  { %2736 = vst.msk [vmem:[%s5560_s3 + $0x278] sm:$0xff] %vm2656_vm2, %v2479_v42  ;;  %2864 = vst.msk [vmem:[%s5560_s3 + $0x678] sm:$0xff] %vm2656_vm2, %v2607_v43 }
 0x189   :  { %2734 = vst.msk [vmem:[%s5560_s3 + $0x268] sm:$0xff] %vm2656_vm2, %v2477_v44  ;;  %2862 = vst.msk [vmem:[%s5560_s3 + $0x668] sm:$0xff] %vm2656_vm2, %v2605_v45  ;;  %v3404_v46 = vpop.f32.mrb[80].mxu0  ;;  %v3532_v47 = vpop.f32.mrb[80].mxu1 }
 0x18a   :  { %v1706_v48 = vadd.f32 %v4880_v54, %v3404_v46  ;;  %v2218_v49 = vadd.f32 %v4880_v54, %v3532_v47  ;;  %v1697_v52 = vpop.f32.mrb[81].mxu0  ;;  %v2209_v50 = vpop.f32.mrb[81].mxu1 }
 0x18b   :  { %v1698_v51 = vadd.f32 %v4880_v54, %v1697_v52  ;;  %v2210_v53 = vadd.f32 %v4880_v54, %v2209_v50  ;;  %v3405_v55 = vpop.f32.mrb[82].mxu0  ;;  %v3533_v56 = vpop.f32.mrb[82].mxu1 }
 0x18c   :  { %v2482_v57 = vmax.f32 %v1706_v48, 0.0  ;;  %v2610_v58 = vmax.f32 %v2218_v49, 0.0  ;;  %v1709_v59 = vadd.f32 %v4880_v54, %v3405_v55  ;;  %v2221_v60 = vadd.f32 %v4880_v54, %v3533_v56  ;;  %v1700_v61 = vpop.f32.mrb[83].mxu0  ;;  %v2212_v62 = vpop.f32.mrb[83].mxu1 }
 0x18d   :  { %v2480_v63 = vmax.f32 %v1698_v51, 0.0  ;;  %v2608_v0 = vmax.f32 %v2210_v53, 0.0  ;;  %v1701_v1 = vadd.f32 %v4880_v54, %v1700_v61  ;;  %v2213_v2 = vadd.f32 %v4880_v54, %v2212_v62 }
 0x18e   :  { %2739 = vst.msk [vmem:[%s5560_s3 + $0x290] sm:$0xff] %vm2656_vm2, %v2482_v57  ;;  %2867 = vst.msk [vmem:[%s5560_s3 + $0x690] sm:$0xff] %vm2656_vm2, %v2610_v58  ;;  %v2483_v3 = vmax.f32 %v1709_v59, 0.0  ;;  %v2611_v4 = vmax.f32 %v2221_v60, 0.0 }
 0x18f   :  { %2737 = vst.msk [vmem:[%s5560_s3 + $0x280] sm:$0xff] %vm2656_vm2, %v2480_v63  ;;  %2865 = vst.msk [vmem:[%s5560_s3 + $0x680] sm:$0xff] %vm2656_vm2, %v2608_v0  ;;  %v2481_v5 = vmax.f32 %v1701_v1, 0.0  ;;  %v2609_v6 = vmax.f32 %v2213_v2, 0.0 }
 0x190   :  { %2740 = vst.msk [vmem:[%s5560_s3 + $0x298] sm:$0xff] %vm2656_vm2, %v2483_v3  ;;  %2868 = vst.msk [vmem:[%s5560_s3 + $0x698] sm:$0xff] %vm2656_vm2, %v2611_v4 }
 0x191   :  { %2738 = vst.msk [vmem:[%s5560_s3 + $0x288] sm:$0xff] %vm2656_vm2, %v2481_v5  ;;  %2866 = vst.msk [vmem:[%s5560_s3 + $0x688] sm:$0xff] %vm2656_vm2, %v2609_v6  ;;  %v3408_v7 = vpop.f32.mrb[84].mxu0  ;;  %v3536_v8 = vpop.f32.mrb[84].mxu1 }
 0x192   :  { %v1722_v9 = vadd.f32 %v4880_v54, %v3408_v7  ;;  %v2234_v10 = vadd.f32 %v4880_v54, %v3536_v8  ;;  %v1713_v11 = vpop.f32.mrb[85].mxu0  ;;  %v2225_v12 = vpop.f32.mrb[85].mxu1 }
 0x193   :  { %v1714_v13 = vadd.f32 %v4880_v54, %v1713_v11  ;;  %v2226_v14 = vadd.f32 %v4880_v54, %v2225_v12  ;;  %v3409_v15 = vpop.f32.mrb[86].mxu0  ;;  %v3537_v16 = vpop.f32.mrb[86].mxu1 }
 0x194   :  { %v2486_v17 = vmax.f32 %v1722_v9, 0.0  ;;  %v2614_v18 = vmax.f32 %v2234_v10, 0.0  ;;  %v1725_v19 = vadd.f32 %v4880_v54, %v3409_v15  ;;  %v2237_v20 = vadd.f32 %v4880_v54, %v3537_v16  ;;  %v1716_v21 = vpop.f32.mrb[87].mxu0  ;;  %v2228_v22 = vpop.f32.mrb[87].mxu1 }
 0x195   :  { %v2484_v23 = vmax.f32 %v1714_v13, 0.0  ;;  %v2612_v24 = vmax.f32 %v2226_v14, 0.0  ;;  %v1717_v25 = vadd.f32 %v4880_v54, %v1716_v21  ;;  %v2229_v26 = vadd.f32 %v4880_v54, %v2228_v22 }
 0x196   :  { %2743 = vst.msk [vmem:[%s5560_s3 + $0x2b0] sm:$0xff] %vm2656_vm2, %v2486_v17  ;;  %2871 = vst.msk [vmem:[%s5560_s3 + $0x6b0] sm:$0xff] %vm2656_vm2, %v2614_v18  ;;  %v2487_v27 = vmax.f32 %v1725_v19, 0.0  ;;  %v2615_v28 = vmax.f32 %v2237_v20, 0.0 }
 0x197   :  { %2741 = vst.msk [vmem:[%s5560_s3 + $0x2a0] sm:$0xff] %vm2656_vm2, %v2484_v23  ;;  %2869 = vst.msk [vmem:[%s5560_s3 + $0x6a0] sm:$0xff] %vm2656_vm2, %v2612_v24  ;;  %v2485_v29 = vmax.f32 %v1717_v25, 0.0  ;;  %v2613_v30 = vmax.f32 %v2229_v26, 0.0 }
 0x198   :  { %2744 = vst.msk [vmem:[%s5560_s3 + $0x2b8] sm:$0xff] %vm2656_vm2, %v2487_v27  ;;  %2872 = vst.msk [vmem:[%s5560_s3 + $0x6b8] sm:$0xff] %vm2656_vm2, %v2615_v28 }
 0x199   :  { %2742 = vst.msk [vmem:[%s5560_s3 + $0x2a8] sm:$0xff] %vm2656_vm2, %v2485_v29  ;;  %2870 = vst.msk [vmem:[%s5560_s3 + $0x6a8] sm:$0xff] %vm2656_vm2, %v2613_v30  ;;  %v3412_v31 = vpop.f32.mrb[88].mxu0  ;;  %v3540_v32 = vpop.f32.mrb[88].mxu1 }
 0x19a   :  { %v1738_v33 = vadd.f32 %v4880_v54, %v3412_v31  ;;  %v2250_v34 = vadd.f32 %v4880_v54, %v3540_v32  ;;  %v1729_v35 = vpop.f32.mrb[89].mxu0  ;;  %v2241_v36 = vpop.f32.mrb[89].mxu1 }
 0x19b   :  { %v1730_v37 = vadd.f32 %v4880_v54, %v1729_v35  ;;  %v2242_v38 = vadd.f32 %v4880_v54, %v2241_v36  ;;  %v3413_v39 = vpop.f32.mrb[90].mxu0  ;;  %v3541_v40 = vpop.f32.mrb[90].mxu1 }
 0x19c   :  { %v2490_v41 = vmax.f32 %v1738_v33, 0.0  ;;  %v2618_v42 = vmax.f32 %v2250_v34, 0.0  ;;  %v1741_v43 = vadd.f32 %v4880_v54, %v3413_v39  ;;  %v2253_v44 = vadd.f32 %v4880_v54, %v3541_v40  ;;  %v1732_v45 = vpop.f32.mrb[91].mxu0  ;;  %v2244_v46 = vpop.f32.mrb[91].mxu1 }
 0x19d   :  { %v2488_v47 = vmax.f32 %v1730_v37, 0.0  ;;  %v2616_v48 = vmax.f32 %v2242_v38, 0.0  ;;  %v1733_v49 = vadd.f32 %v4880_v54, %v1732_v45  ;;  %v2245_v52 = vadd.f32 %v4880_v54, %v2244_v46 }
 0x19e   :  { %2747 = vst.msk [vmem:[%s5560_s3 + $0x2d0] sm:$0xff] %vm2656_vm2, %v2490_v41  ;;  %2875 = vst.msk [vmem:[%s5560_s3 + $0x6d0] sm:$0xff] %vm2656_vm2, %v2618_v42  ;;  %v2491_v50 = vmax.f32 %v1741_v43, 0.0  ;;  %v2619_v51 = vmax.f32 %v2253_v44, 0.0 }
 0x19f   :  { %2745 = vst.msk [vmem:[%s5560_s3 + $0x2c0] sm:$0xff] %vm2656_vm2, %v2488_v47  ;;  %2873 = vst.msk [vmem:[%s5560_s3 + $0x6c0] sm:$0xff] %vm2656_vm2, %v2616_v48  ;;  %v2489_v53 = vmax.f32 %v1733_v49, 0.0  ;;  %v2617_v55 = vmax.f32 %v2245_v52, 0.0 }
 0x1a0   :  { %2748 = vst.msk [vmem:[%s5560_s3 + $0x2d8] sm:$0xff] %vm2656_vm2, %v2491_v50  ;;  %2876 = vst.msk [vmem:[%s5560_s3 + $0x6d8] sm:$0xff] %vm2656_vm2, %v2619_v51 }
 0x1a1   :  { %2746 = vst.msk [vmem:[%s5560_s3 + $0x2c8] sm:$0xff] %vm2656_vm2, %v2489_v53  ;;  %2874 = vst.msk [vmem:[%s5560_s3 + $0x6c8] sm:$0xff] %vm2656_vm2, %v2617_v55  ;;  %v3416_v56 = vpop.f32.mrb[92].mxu0  ;;  %v3544_v57 = vpop.f32.mrb[92].mxu1 }
 0x1a2   :  { %v1754_v58 = vadd.f32 %v4880_v54, %v3416_v56  ;;  %v2266_v59 = vadd.f32 %v4880_v54, %v3544_v57  ;;  %v1745_v60 = vpop.f32.mrb[93].mxu0  ;;  %v2257_v61 = vpop.f32.mrb[93].mxu1 }
 0x1a3   :  { %v1746_v62 = vadd.f32 %v4880_v54, %v1745_v60  ;;  %v2258_v63 = vadd.f32 %v4880_v54, %v2257_v61  ;;  %v3417_v0 = vpop.f32.mrb[94].mxu0  ;;  %v3545_v1 = vpop.f32.mrb[94].mxu1 }
 0x1a4   :  { %v2494_v2 = vmax.f32 %v1754_v58, 0.0  ;;  %v2622_v3 = vmax.f32 %v2266_v59, 0.0  ;;  %v1757_v4 = vadd.f32 %v4880_v54, %v3417_v0  ;;  %v2269_v5 = vadd.f32 %v4880_v54, %v3545_v1  ;;  %v1748_v6 = vpop.f32.mrb[95].mxu0  ;;  %v2260_v7 = vpop.f32.mrb[95].mxu1 }
 0x1a5   :  { %v2492_v8 = vmax.f32 %v1746_v62, 0.0  ;;  %v2620_v9 = vmax.f32 %v2258_v63, 0.0  ;;  %v1749_v10 = vadd.f32 %v4880_v54, %v1748_v6  ;;  %v2261_v11 = vadd.f32 %v4880_v54, %v2260_v7 }
 0x1a6   :  { %2751 = vst.msk [vmem:[%s5560_s3 + $0x2f0] sm:$0xff] %vm2656_vm2, %v2494_v2  ;;  %2879 = vst.msk [vmem:[%s5560_s3 + $0x6f0] sm:$0xff] %vm2656_vm2, %v2622_v3  ;;  %v2495_v12 = vmax.f32 %v1757_v4, 0.0  ;;  %v2623_v13 = vmax.f32 %v2269_v5, 0.0 }
 0x1a7   :  { %2749 = vst.msk [vmem:[%s5560_s3 + $0x2e0] sm:$0xff] %vm2656_vm2, %v2492_v8  ;;  %2877 = vst.msk [vmem:[%s5560_s3 + $0x6e0] sm:$0xff] %vm2656_vm2, %v2620_v9  ;;  %v2493_v14 = vmax.f32 %v1749_v10, 0.0  ;;  %v2621_v15 = vmax.f32 %v2261_v11, 0.0 }
 0x1a8   :  { %2752 = vst.msk [vmem:[%s5560_s3 + $0x2f8] sm:$0xff] %vm2656_vm2, %v2495_v12  ;;  %2880 = vst.msk [vmem:[%s5560_s3 + $0x6f8] sm:$0xff] %vm2656_vm2, %v2623_v13 }
 0x1a9   :  { %2750 = vst.msk [vmem:[%s5560_s3 + $0x2e8] sm:$0xff] %vm2656_vm2, %v2493_v14  ;;  %2878 = vst.msk [vmem:[%s5560_s3 + $0x6e8] sm:$0xff] %vm2656_vm2, %v2621_v15  ;;  %v3420_v16 = vpop.f32.mrb[96].mxu0  ;;  %v3548_v17 = vpop.f32.mrb[96].mxu1 }
 0x1aa   :  { %v1770_v18 = vadd.f32 %v4880_v54, %v3420_v16  ;;  %v2282_v19 = vadd.f32 %v4880_v54, %v3548_v17  ;;  %v1761_v20 = vpop.f32.mrb[97].mxu0  ;;  %v2273_v21 = vpop.f32.mrb[97].mxu1 }
 0x1ab   :  { %v1762_v22 = vadd.f32 %v4880_v54, %v1761_v20  ;;  %v2274_v23 = vadd.f32 %v4880_v54, %v2273_v21  ;;  %v3421_v24 = vpop.f32.mrb[98].mxu0  ;;  %v3549_v25 = vpop.f32.mrb[98].mxu1 }
 0x1ac   :  { %v2498_v26 = vmax.f32 %v1770_v18, 0.0  ;;  %v2626_v27 = vmax.f32 %v2282_v19, 0.0  ;;  %v1773_v28 = vadd.f32 %v4880_v54, %v3421_v24  ;;  %v2285_v29 = vadd.f32 %v4880_v54, %v3549_v25  ;;  %v1764_v30 = vpop.f32.mrb[99].mxu0  ;;  %v2276_v31 = vpop.f32.mrb[99].mxu1 }
 0x1ad   :  { %v2496_v32 = vmax.f32 %v1762_v22, 0.0  ;;  %v2624_v33 = vmax.f32 %v2274_v23, 0.0  ;;  %v1765_v34 = vadd.f32 %v4880_v54, %v1764_v30  ;;  %v2277_v35 = vadd.f32 %v4880_v54, %v2276_v31 }
 0x1ae   :  { %2755 = vst.msk [vmem:[%s5560_s3 + $0x310] sm:$0xff] %vm2656_vm2, %v2498_v26  ;;  %2883 = vst.msk [vmem:[%s5560_s3 + $0x710] sm:$0xff] %vm2656_vm2, %v2626_v27  ;;  %v2499_v36 = vmax.f32 %v1773_v28, 0.0  ;;  %v2627_v37 = vmax.f32 %v2285_v29, 0.0 }
 0x1af   :  { %2753 = vst.msk [vmem:[%s5560_s3 + $0x300] sm:$0xff] %vm2656_vm2, %v2496_v32  ;;  %2881 = vst.msk [vmem:[%s5560_s3 + $0x700] sm:$0xff] %vm2656_vm2, %v2624_v33  ;;  %v2497_v38 = vmax.f32 %v1765_v34, 0.0  ;;  %v2625_v39 = vmax.f32 %v2277_v35, 0.0 }
 0x1b0   :  { %2756 = vst.msk [vmem:[%s5560_s3 + $0x318] sm:$0xff] %vm2656_vm2, %v2499_v36  ;;  %2884 = vst.msk [vmem:[%s5560_s3 + $0x718] sm:$0xff] %vm2656_vm2, %v2627_v37 }
 0x1b1   :  { %2754 = vst.msk [vmem:[%s5560_s3 + $0x308] sm:$0xff] %vm2656_vm2, %v2497_v38  ;;  %2882 = vst.msk [vmem:[%s5560_s3 + $0x708] sm:$0xff] %vm2656_vm2, %v2625_v39  ;;  %v3424_v40 = vpop.f32.mrb[100].mxu0  ;;  %v3552_v41 = vpop.f32.mrb[100].mxu1 }
 0x1b2   :  { %v1786_v42 = vadd.f32 %v4880_v54, %v3424_v40  ;;  %v2298_v43 = vadd.f32 %v4880_v54, %v3552_v41  ;;  %v1777_v44 = vpop.f32.mrb[101].mxu0  ;;  %v2289_v45 = vpop.f32.mrb[101].mxu1 }
 0x1b3   :  { %v1778_v46 = vadd.f32 %v4880_v54, %v1777_v44  ;;  %v2290_v47 = vadd.f32 %v4880_v54, %v2289_v45  ;;  %v3425_v48 = vpop.f32.mrb[102].mxu0  ;;  %v3553_v49 = vpop.f32.mrb[102].mxu1 }
 0x1b4   :  { %v2502_v52 = vmax.f32 %v1786_v42, 0.0  ;;  %v2630_v50 = vmax.f32 %v2298_v43, 0.0  ;;  %v1789_v51 = vadd.f32 %v4880_v54, %v3425_v48  ;;  %v2301_v53 = vadd.f32 %v4880_v54, %v3553_v49  ;;  %v1780_v55 = vpop.f32.mrb[103].mxu0  ;;  %v2292_v56 = vpop.f32.mrb[103].mxu1 }
 0x1b5   :  { %v2500_v57 = vmax.f32 %v1778_v46, 0.0  ;;  %v2628_v58 = vmax.f32 %v2290_v47, 0.0  ;;  %v1781_v59 = vadd.f32 %v4880_v54, %v1780_v55  ;;  %v2293_v60 = vadd.f32 %v4880_v54, %v2292_v56 }
 0x1b6   :  { %2759 = vst.msk [vmem:[%s5560_s3 + $0x330] sm:$0xff] %vm2656_vm2, %v2502_v52  ;;  %2887 = vst.msk [vmem:[%s5560_s3 + $0x730] sm:$0xff] %vm2656_vm2, %v2630_v50  ;;  %v2503_v61 = vmax.f32 %v1789_v51, 0.0  ;;  %v2631_v62 = vmax.f32 %v2301_v53, 0.0 }
 0x1b7   :  { %2757 = vst.msk [vmem:[%s5560_s3 + $0x320] sm:$0xff] %vm2656_vm2, %v2500_v57  ;;  %2885 = vst.msk [vmem:[%s5560_s3 + $0x720] sm:$0xff] %vm2656_vm2, %v2628_v58  ;;  %v2501_v63 = vmax.f32 %v1781_v59, 0.0  ;;  %v2629_v0 = vmax.f32 %v2293_v60, 0.0 }
 0x1b8   :  { %2760 = vst.msk [vmem:[%s5560_s3 + $0x338] sm:$0xff] %vm2656_vm2, %v2503_v61  ;;  %2888 = vst.msk [vmem:[%s5560_s3 + $0x738] sm:$0xff] %vm2656_vm2, %v2631_v62 }
 0x1b9   :  { %2758 = vst.msk [vmem:[%s5560_s3 + $0x328] sm:$0xff] %vm2656_vm2, %v2501_v63  ;;  %2886 = vst.msk [vmem:[%s5560_s3 + $0x728] sm:$0xff] %vm2656_vm2, %v2629_v0  ;;  %v3428_v1 = vpop.f32.mrb[104].mxu0  ;;  %v3556_v2 = vpop.f32.mrb[104].mxu1 }
 0x1ba   :  { %v1802_v3 = vadd.f32 %v4880_v54, %v3428_v1  ;;  %v2314_v4 = vadd.f32 %v4880_v54, %v3556_v2  ;;  %v1793_v5 = vpop.f32.mrb[105].mxu0  ;;  %v2305_v6 = vpop.f32.mrb[105].mxu1 }
 0x1bb   :  { %v1794_v7 = vadd.f32 %v4880_v54, %v1793_v5  ;;  %v2306_v8 = vadd.f32 %v4880_v54, %v2305_v6  ;;  %v3429_v9 = vpop.f32.mrb[106].mxu0  ;;  %v3557_v10 = vpop.f32.mrb[106].mxu1 }
 0x1bc   :  { %v2506_v11 = vmax.f32 %v1802_v3, 0.0  ;;  %v2634_v12 = vmax.f32 %v2314_v4, 0.0  ;;  %v1805_v13 = vadd.f32 %v4880_v54, %v3429_v9  ;;  %v2317_v14 = vadd.f32 %v4880_v54, %v3557_v10  ;;  %v1796_v15 = vpop.f32.mrb[107].mxu0  ;;  %v2308_v16 = vpop.f32.mrb[107].mxu1 }
 0x1bd   :  { %v2504_v17 = vmax.f32 %v1794_v7, 0.0  ;;  %v2632_v18 = vmax.f32 %v2306_v8, 0.0  ;;  %v1797_v19 = vadd.f32 %v4880_v54, %v1796_v15  ;;  %v2309_v20 = vadd.f32 %v4880_v54, %v2308_v16 }
 0x1be   :  { %2763 = vst.msk [vmem:[%s5560_s3 + $0x350] sm:$0xff] %vm2656_vm2, %v2506_v11  ;;  %2891 = vst.msk [vmem:[%s5560_s3 + $0x750] sm:$0xff] %vm2656_vm2, %v2634_v12  ;;  %v2507_v21 = vmax.f32 %v1805_v13, 0.0  ;;  %v2635_v22 = vmax.f32 %v2317_v14, 0.0 }
 0x1bf   :  { %2761 = vst.msk [vmem:[%s5560_s3 + $0x340] sm:$0xff] %vm2656_vm2, %v2504_v17  ;;  %2889 = vst.msk [vmem:[%s5560_s3 + $0x740] sm:$0xff] %vm2656_vm2, %v2632_v18  ;;  %v2505_v23 = vmax.f32 %v1797_v19, 0.0  ;;  %v2633_v24 = vmax.f32 %v2309_v20, 0.0 }
 0x1c0   :  { %2764 = vst.msk [vmem:[%s5560_s3 + $0x358] sm:$0xff] %vm2656_vm2, %v2507_v21  ;;  %2892 = vst.msk [vmem:[%s5560_s3 + $0x758] sm:$0xff] %vm2656_vm2, %v2635_v22 }
 0x1c1   :  { %2762 = vst.msk [vmem:[%s5560_s3 + $0x348] sm:$0xff] %vm2656_vm2, %v2505_v23  ;;  %2890 = vst.msk [vmem:[%s5560_s3 + $0x748] sm:$0xff] %vm2656_vm2, %v2633_v24  ;;  %v3432_v25 = vpop.f32.mrb[108].mxu0  ;;  %v3560_v26 = vpop.f32.mrb[108].mxu1 }
 0x1c2   :  { %v1818_v27 = vadd.f32 %v4880_v54, %v3432_v25  ;;  %v2330_v28 = vadd.f32 %v4880_v54, %v3560_v26  ;;  %v1809_v29 = vpop.f32.mrb[109].mxu0  ;;  %v2321_v30 = vpop.f32.mrb[109].mxu1 }
 0x1c3   :  { %v1810_v31 = vadd.f32 %v4880_v54, %v1809_v29  ;;  %v2322_v32 = vadd.f32 %v4880_v54, %v2321_v30  ;;  %v3433_v33 = vpop.f32.mrb[110].mxu0  ;;  %v3561_v34 = vpop.f32.mrb[110].mxu1 }
 0x1c4   :  { %v2510_v35 = vmax.f32 %v1818_v27, 0.0  ;;  %v2638_v36 = vmax.f32 %v2330_v28, 0.0  ;;  %v1821_v37 = vadd.f32 %v4880_v54, %v3433_v33  ;;  %v2333_v38 = vadd.f32 %v4880_v54, %v3561_v34  ;;  %v1812_v39 = vpop.f32.mrb[111].mxu0  ;;  %v2324_v40 = vpop.f32.mrb[111].mxu1 }
 0x1c5   :  { %v2508_v41 = vmax.f32 %v1810_v31, 0.0  ;;  %v2636_v42 = vmax.f32 %v2322_v32, 0.0  ;;  %v1813_v43 = vadd.f32 %v4880_v54, %v1812_v39  ;;  %v2325_v44 = vadd.f32 %v4880_v54, %v2324_v40 }
 0x1c6   :  { %2767 = vst.msk [vmem:[%s5560_s3 + $0x370] sm:$0xff] %vm2656_vm2, %v2510_v35  ;;  %2895 = vst.msk [vmem:[%s5560_s3 + $0x770] sm:$0xff] %vm2656_vm2, %v2638_v36  ;;  %v2511_v45 = vmax.f32 %v1821_v37, 0.0  ;;  %v2639_v46 = vmax.f32 %v2333_v38, 0.0 }
 0x1c7   :  { %2765 = vst.msk [vmem:[%s5560_s3 + $0x360] sm:$0xff] %vm2656_vm2, %v2508_v41  ;;  %2893 = vst.msk [vmem:[%s5560_s3 + $0x760] sm:$0xff] %vm2656_vm2, %v2636_v42  ;;  %v2509_v47 = vmax.f32 %v1813_v43, 0.0  ;;  %v2637_v48 = vmax.f32 %v2325_v44, 0.0 }
 0x1c8   :  { %2768 = vst.msk [vmem:[%s5560_s3 + $0x378] sm:$0xff] %vm2656_vm2, %v2511_v45  ;;  %2896 = vst.msk [vmem:[%s5560_s3 + $0x778] sm:$0xff] %vm2656_vm2, %v2639_v46 }
 0x1c9   :  { %2766 = vst.msk [vmem:[%s5560_s3 + $0x368] sm:$0xff] %vm2656_vm2, %v2509_v47  ;;  %2894 = vst.msk [vmem:[%s5560_s3 + $0x768] sm:$0xff] %vm2656_vm2, %v2637_v48  ;;  %v3436_v49 = vpop.f32.mrb[112].mxu0  ;;  %v3564_v52 = vpop.f32.mrb[112].mxu1 }
 0x1ca   :  { %v1834_v50 = vadd.f32 %v4880_v54, %v3436_v49  ;;  %v2346_v51 = vadd.f32 %v4880_v54, %v3564_v52  ;;  %v1825_v53 = vpop.f32.mrb[113].mxu0  ;;  %v2337_v55 = vpop.f32.mrb[113].mxu1 }
 0x1cb   :  { %v1826_v56 = vadd.f32 %v4880_v54, %v1825_v53  ;;  %v2338_v57 = vadd.f32 %v4880_v54, %v2337_v55  ;;  %v3437_v58 = vpop.f32.mrb[114].mxu0  ;;  %v3565_v59 = vpop.f32.mrb[114].mxu1 }
 0x1cc   :  { %v2514_v60 = vmax.f32 %v1834_v50, 0.0  ;;  %v2642_v61 = vmax.f32 %v2346_v51, 0.0  ;;  %v1837_v62 = vadd.f32 %v4880_v54, %v3437_v58  ;;  %v2349_v63 = vadd.f32 %v4880_v54, %v3565_v59  ;;  %v1828_v0 = vpop.f32.mrb[115].mxu0  ;;  %v2340_v1 = vpop.f32.mrb[115].mxu1 }
 0x1cd   :  { %v2512_v2 = vmax.f32 %v1826_v56, 0.0  ;;  %v2640_v3 = vmax.f32 %v2338_v57, 0.0  ;;  %v1829_v4 = vadd.f32 %v4880_v54, %v1828_v0  ;;  %v2341_v5 = vadd.f32 %v4880_v54, %v2340_v1 }
 0x1ce   :  { %2771 = vst.msk [vmem:[%s5560_s3 + $0x390] sm:$0xff] %vm2656_vm2, %v2514_v60  ;;  %2899 = vst.msk [vmem:[%s5560_s3 + $0x790] sm:$0xff] %vm2656_vm2, %v2642_v61  ;;  %v2515_v6 = vmax.f32 %v1837_v62, 0.0  ;;  %v2643_v7 = vmax.f32 %v2349_v63, 0.0  ;;  %v3724_v60 = vld [vmem:[%s5559_s2] ss:$0 sm:$0xff] }
 0x1cf   :  { %2769 = vst.msk [vmem:[%s5560_s3 + $0x380] sm:$0xff] %vm2656_vm2, %v2512_v2  ;;  %2897 = vst.msk [vmem:[%s5560_s3 + $0x780] sm:$0xff] %vm2656_vm2, %v2640_v3  ;;  %v2513_v8 = vmax.f32 %v1829_v4, 0.0  ;;  %v2641_v9 = vmax.f32 %v2341_v5, 0.0 }
 0x1d0   :  { %2772 = vst.msk [vmem:[%s5560_s3 + $0x398] sm:$0xff] %vm2656_vm2, %v2515_v6  ;;  %2900 = vst.msk [vmem:[%s5560_s3 + $0x798] sm:$0xff] %vm2656_vm2, %v2643_v7 }
 0x1d1   :  { %2770 = vst.msk [vmem:[%s5560_s3 + $0x388] sm:$0xff] %vm2656_vm2, %v2513_v8  ;;  %2898 = vst.msk [vmem:[%s5560_s3 + $0x788] sm:$0xff] %vm2656_vm2, %v2641_v9  ;;  %v3440_v10 = vpop.f32.mrb[116].mxu0  ;;  %v3568_v11 = vpop.f32.mrb[116].mxu1 }
 0x1d2   :  { %v1850_v12 = vadd.f32 %v4880_v54, %v3440_v10  ;;  %v2362_v13 = vadd.f32 %v4880_v54, %v3568_v11  ;;  %v1841_v14 = vpop.f32.mrb[117].mxu0  ;;  %v2353_v15 = vpop.f32.mrb[117].mxu1 }
 0x1d3   :  { %v1842_v16 = vadd.f32 %v4880_v54, %v1841_v14  ;;  %v2354_v17 = vadd.f32 %v4880_v54, %v2353_v15  ;;  %v3441_v18 = vpop.f32.mrb[118].mxu0  ;;  %v3569_v19 = vpop.f32.mrb[118].mxu1 }
 0x1d4   :  { %v2518_v20 = vmax.f32 %v1850_v12, 0.0  ;;  %v2646_v21 = vmax.f32 %v2362_v13, 0.0  ;;  %v1853_v22 = vadd.f32 %v4880_v54, %v3441_v18  ;;  %v2365_v23 = vadd.f32 %v4880_v54, %v3569_v19  ;;  %v1844_v24 = vpop.f32.mrb[119].mxu0  ;;  %v2356_v25 = vpop.f32.mrb[119].mxu1 }
 0x1d5   :  { %v2516_v26 = vmax.f32 %v1842_v16, 0.0  ;;  %v2644_v27 = vmax.f32 %v2354_v17, 0.0  ;;  %v1845_v28 = vadd.f32 %v4880_v54, %v1844_v24  ;;  %v2357_v29 = vadd.f32 %v4880_v54, %v2356_v25 }
 0x1d6   :  { %2775 = vst.msk [vmem:[%s5560_s3 + $0x3b0] sm:$0xff] %vm2656_vm2, %v2518_v20  ;;  %2903 = vst.msk [vmem:[%s5560_s3 + $0x7b0] sm:$0xff] %vm2656_vm2, %v2646_v21  ;;  %v2519_v30 = vmax.f32 %v1853_v22, 0.0  ;;  %v2647_v31 = vmax.f32 %v2365_v23, 0.0 }
 0x1d7   :  { %2773 = vst.msk [vmem:[%s5560_s3 + $0x3a0] sm:$0xff] %vm2656_vm2, %v2516_v26  ;;  %2901 = vst.msk [vmem:[%s5560_s3 + $0x7a0] sm:$0xff] %vm2656_vm2, %v2644_v27  ;;  %v2517_v32 = vmax.f32 %v1845_v28, 0.0  ;;  %v2645_v33 = vmax.f32 %v2357_v29, 0.0 }
 0x1d8   :  { %2776 = vst.msk [vmem:[%s5560_s3 + $0x3b8] sm:$0xff] %vm2656_vm2, %v2519_v30  ;;  %2904 = vst.msk [vmem:[%s5560_s3 + $0x7b8] sm:$0xff] %vm2656_vm2, %v2647_v31 }
 0x1d9   :  { %2774 = vst.msk [vmem:[%s5560_s3 + $0x3a8] sm:$0xff] %vm2656_vm2, %v2517_v32  ;;  %2902 = vst.msk [vmem:[%s5560_s3 + $0x7a8] sm:$0xff] %vm2656_vm2, %v2645_v33  ;;  %v3444_v34 = vpop.f32.mrb[120].mxu0  ;;  %v3572_v35 = vpop.f32.mrb[120].mxu1 }
 0x1da   :  { %v1866_v36 = vadd.f32 %v4880_v54, %v3444_v34  ;;  %v2378_v37 = vadd.f32 %v4880_v54, %v3572_v35  ;;  %v1857_v38 = vpop.f32.mrb[121].mxu0  ;;  %v2369_v39 = vpop.f32.mrb[121].mxu1 }
 0x1db   :  { %v1858_v40 = vadd.f32 %v4880_v54, %v1857_v38  ;;  %v2370_v41 = vadd.f32 %v4880_v54, %v2369_v39  ;;  %v3445_v42 = vpop.f32.mrb[122].mxu0  ;;  %v3573_v43 = vpop.f32.mrb[122].mxu1 }
 0x1dc   :  { %v2522_v44 = vmax.f32 %v1866_v36, 0.0  ;;  %v2650_v45 = vmax.f32 %v2378_v37, 0.0  ;;  %v1869_v46 = vadd.f32 %v4880_v54, %v3445_v42  ;;  %v2381_v47 = vadd.f32 %v4880_v54, %v3573_v43  ;;  %v1860_v48 = vpop.f32.mrb[123].mxu0  ;;  %v2372_v49 = vpop.f32.mrb[123].mxu1 }
 0x1dd   :  { %v2520_v52 = vmax.f32 %v1858_v40, 0.0  ;;  %v2648_v50 = vmax.f32 %v2370_v41, 0.0  ;;  %v1861_v51 = vadd.f32 %v4880_v54, %v1860_v48  ;;  %v2373_v53 = vadd.f32 %v4880_v54, %v2372_v49 }
 0x1de   :  { %2779 = vst.msk [vmem:[%s5560_s3 + $0x3d0] sm:$0xff] %vm2656_vm2, %v2522_v44  ;;  %2907 = vst.msk [vmem:[%s5560_s3 + $0x7d0] sm:$0xff] %vm2656_vm2, %v2650_v45  ;;  %v2523_v55 = vmax.f32 %v1869_v46, 0.0  ;;  %v2651_v56 = vmax.f32 %v2381_v47, 0.0 }
 0x1df   :  { %2777 = vst.msk [vmem:[%s5560_s3 + $0x3c0] sm:$0xff] %vm2656_vm2, %v2520_v52  ;;  %2905 = vst.msk [vmem:[%s5560_s3 + $0x7c0] sm:$0xff] %vm2656_vm2, %v2648_v50  ;;  %v2521_v54 = vmax.f32 %v1861_v51, 0.0  ;;  %v2649_v57 = vmax.f32 %v2373_v53, 0.0 }
 0x1e0   :  { %2780 = vst.msk [vmem:[%s5560_s3 + $0x3d8] sm:$0xff] %vm2656_vm2, %v2523_v55  ;;  %2908 = vst.msk [vmem:[%s5560_s3 + $0x7d8] sm:$0xff] %vm2656_vm2, %v2651_v56 }
 0x1e1   :  { %2778 = vst.msk [vmem:[%s5560_s3 + $0x3c8] sm:$0xff] %vm2656_vm2, %v2521_v54  ;;  %2906 = vst.msk [vmem:[%s5560_s3 + $0x7c8] sm:$0xff] %vm2656_vm2, %v2649_v57  ;;  %v3448_v58 = vpop.f32.mrb[124].mxu0  ;;  %v3576_v59 = vpop.f32.mrb[124].mxu1 }
 0x1e2   :  { %v1882_v61 = vadd.f32 %v3724_v60, %v3448_v58  ;;  %v2394_v62 = vadd.f32 %v3724_v60, %v3576_v59  ;;  %v1873_v63 = vpop.f32.mrb[125].mxu0  ;;  %v2385_v0 = vpop.f32.mrb[125].mxu1 }
 0x1e3   :  { %v1874_v1 = vadd.f32 %v3724_v60, %v1873_v63  ;;  %v2386_v2 = vadd.f32 %v3724_v60, %v2385_v0  ;;  %v3449_v3 = vpop.f32.mrb[126].mxu0  ;;  %v3577_v4 = vpop.f32.mrb[126].mxu1 }
 0x1e4   :  { %v2526_v5 = vmax.f32 %v1882_v61, 0.0  ;;  %v2654_v6 = vmax.f32 %v2394_v62, 0.0  ;;  %v1885_v7 = vadd.f32 %v3724_v60, %v3449_v3  ;;  %v2397_v8 = vadd.f32 %v3724_v60, %v3577_v4  ;;  %v1876_v9 = vpop.f32.mrb[127].mxu0  ;;  %v2388_v10 = vpop.f32.mrb[127].mxu1 }
 0x1e5   :  { %v2524_v11 = vmax.f32 %v1874_v1, 0.0  ;;  %v2652_v12 = vmax.f32 %v2386_v2, 0.0  ;;  %v1877_v13 = vadd.f32 %v3724_v60, %v1876_v9  ;;  %v2389_v14 = vadd.f32 %v3724_v60, %v2388_v10 }
 0x1e6   :  { %2783 = vst.msk [vmem:[%s5560_s3 + $0x3f0] sm:$0xff] %vm2656_vm2, %v2526_v5  ;;  %2911 = vst.msk [vmem:[%s5560_s3 + $0x7f0] sm:$0xff] %vm2656_vm2, %v2654_v6  ;;  %v2527_v15 = vmax.f32 %v1885_v7, 0.0  ;;  %v2655_v16 = vmax.f32 %v2397_v8, 0.0 }
 0x1e7   :  { %2781 = vst.msk [vmem:[%s5560_s3 + $0x3e0] sm:$0xff] %vm2656_vm2, %v2524_v11  ;;  %2909 = vst.msk [vmem:[%s5560_s3 + $0x7e0] sm:$0xff] %vm2656_vm2, %v2652_v12  ;;  %v2525_v17 = vmax.f32 %v1877_v13, 0.0  ;;  %v2653_v18 = vmax.f32 %v2389_v14, 0.0 }
 0x1e8   :  { %2784 = vst.msk [vmem:[%s5560_s3 + $0x3f8] sm:$0xff] %vm2656_vm2, %v2527_v15  ;;  %2912 = vst.msk [vmem:[%s5560_s3 + $0x7f8] sm:$0xff] %vm2656_vm2, %v2655_v16 }
 0x1e9   :  { %2782 = vst.msk [vmem:[%s5560_s3 + $0x3e8] sm:$0xff] %vm2656_vm2, %v2525_v17  ;;  %2910 = vst.msk [vmem:[%s5560_s3 + $0x7e8] sm:$0xff] %vm2656_vm2, %v2653_v18 }

// kernel: _lambda_.30
= control target key start
LH: loop header
LB: loop body
LE: loop exit
PB: predicated region body
PF: predicated region fallthrough
CT: control target
= control target key end

     0   :  { %s996_s10 = smov 120   ;;  %s997_s23 = smov 112   ;;  %vm904_vm0 = vcmask 64512   ;;  %s2457_s0 = inlined_call_operand.vmem [shape: f32[512,32], index: 0, kind: input, shape index: {}]   ;;  %s2458_s1 = inlined_call_operand.vmem [shape: f32[512,8], index: 1, kind: output, shape index: {}]  }
   0x1   :  { %v1012_v0 = vld [vmem:[%s2457_s0 + $0x10] sm:$0xff]  ;;  %v1017_v1 = vld [vmem:[%s2457_s0] sm:$0xff]  ;;  %v1026_v2 = vld [vmem:[%s2457_s0 + $0x18] sm:$0xff] }
   0x2   :  { %2473 = vst [vmem:[#allocation2_spill] sm:$0xff] %v1017_v1  ;;  %140 = vrot.lane.b32.xlu1 %v1012_v0, %s996_s10  ;;  %136 = vrot.lane.b32.xlu0 %v1017_v1, %s996_s10  ;;  %v1031_v3 = vld [vmem:[%s2457_s0 + $0x8] sm:$0xff]  ;;  %v1045_v5 = vld [vmem:[%s2457_s0 + $0x20] sm:$0xff] }
   0x3   :  { %v1040_v4 = vld [vmem:[%s2457_s0 + $0x28] sm:$0xff]  ;;  %v1054_v6 = vld [vmem:[%s2457_s0 + $0x38] sm:$0xff]  ;;  %v1059_v7 = vld [vmem:[%s2457_s0 + $0x30] sm:$0xff] }
   0x4   :  { %v1068_v8 = vld [vmem:[%s2457_s0 + $0x48] sm:$0xff]  ;;  %v1073_v9 = vld [vmem:[%s2457_s0 + $0x40] sm:$0xff]  ;;  %v1082_v10 = vld [vmem:[%s2457_s0 + $0x58] sm:$0xff] }
   0x5   :  { %v1087_v11 = vld [vmem:[%s2457_s0 + $0x50] sm:$0xff]  ;;  %v1096_v12 = vld [vmem:[%s2457_s0 + $0x68] sm:$0xff]  ;;  %v1101_v13 = vld [vmem:[%s2457_s0 + $0x60] sm:$0xff] }
   0x6   :  { %142 = vrot.lane.b32.xlu1 %v1026_v2, %s996_s10  ;;  %138 = vrot.lane.b32.xlu0 %v1031_v3, %s996_s10  ;;  %v1110_v14 = vld [vmem:[%s2457_s0 + $0x78] sm:$0xff]  ;;  %v1115_v15 = vld [vmem:[%s2457_s0 + $0x70] sm:$0xff] }
   0x7   :  { %v1124_v16 = vld [vmem:[%s2457_s0 + $0x88] sm:$0xff]  ;;  %v1129_v17 = vld [vmem:[%s2457_s0 + $0x80] sm:$0xff]  ;;  %v1138_v18 = vld [vmem:[%s2457_s0 + $0x98] sm:$0xff] }
   0x8   :  { %v1143_v19 = vld [vmem:[%s2457_s0 + $0x90] sm:$0xff]  ;;  %v1152_v20 = vld [vmem:[%s2457_s0 + $0xa8] sm:$0xff]  ;;  %v1157_v21 = vld [vmem:[%s2457_s0 + $0xa0] sm:$0xff] }
   0x9   :  { %v1166_v22 = vld [vmem:[%s2457_s0 + $0xb8] sm:$0xff]  ;;  %v1171_v23 = vld [vmem:[%s2457_s0 + $0xb0] sm:$0xff]  ;;  %v1180_v24 = vld [vmem:[%s2457_s0 + $0xc8] sm:$0xff] }
   0xa   :  { %146 = vrot.lane.b32.xlu1 %v1040_v4, %s996_s10  ;;  %144 = vrot.lane.b32.xlu0 %v1045_v5, %s996_s10  ;;  %v1185_v25 = vld [vmem:[%s2457_s0 + $0xc0] sm:$0xff]  ;;  %v1194_v26 = vld [vmem:[%s2457_s0 + $0xd8] sm:$0xff] }
   0xb   :  { %v1199_v27 = vld [vmem:[%s2457_s0 + $0xd0] sm:$0xff]  ;;  %v1208_v28 = vld [vmem:[%s2457_s0 + $0xe8] sm:$0xff]  ;;  %v1213_v29 = vld [vmem:[%s2457_s0 + $0xe0] sm:$0xff] }
   0xc   :  { %v1222_v30 = vld [vmem:[%s2457_s0 + $0xf8] sm:$0xff]  ;;  %v1227_v31 = vld [vmem:[%s2457_s0 + $0xf0] sm:$0xff]  ;;  %v1236_v32 = vld [vmem:[%s2457_s0 + $0x108] sm:$0xff] }
   0xd   :  { %v1241_v33 = vld [vmem:[%s2457_s0 + $0x100] sm:$0xff]  ;;  %v1250_v34 = vld [vmem:[%s2457_s0 + $0x118] sm:$0xff]  ;;  %v1255_v35 = vld [vmem:[%s2457_s0 + $0x110] sm:$0xff] }
   0xe   :  { %150 = vrot.lane.b32.xlu1 %v1054_v6, %s996_s10  ;;  %148 = vrot.lane.b32.xlu0 %v1059_v7, %s996_s10  ;;  %v1264_v36 = vld [vmem:[%s2457_s0 + $0x128] sm:$0xff]  ;;  %v1269_v37 = vld [vmem:[%s2457_s0 + $0x120] sm:$0xff] }
   0xf   :  { %v1278_v38 = vld [vmem:[%s2457_s0 + $0x138] sm:$0xff]  ;;  %v1283_v39 = vld [vmem:[%s2457_s0 + $0x130] sm:$0xff]  ;;  %v1292_v40 = vld [vmem:[%s2457_s0 + $0x148] sm:$0xff] }
  0x10   :  { %v1297_v41 = vld [vmem:[%s2457_s0 + $0x140] sm:$0xff]  ;;  %v1306_v42 = vld [vmem:[%s2457_s0 + $0x158] sm:$0xff]  ;;  %v1311_v43 = vld [vmem:[%s2457_s0 + $0x150] sm:$0xff] }
  0x11   :  { %v1320_v44 = vld [vmem:[%s2457_s0 + $0x168] sm:$0xff]  ;;  %v1325_v45 = vld [vmem:[%s2457_s0 + $0x160] sm:$0xff]  ;;  %v1334_v46 = vld [vmem:[%s2457_s0 + $0x178] sm:$0xff] }
  0x12   :  { %154 = vrot.lane.b32.xlu1 %v1068_v8, %s996_s10  ;;  %152 = vrot.lane.b32.xlu0 %v1073_v9, %s996_s10  ;;  %v1339_v47 = vld [vmem:[%s2457_s0 + $0x170] sm:$0xff]  ;;  %v1348_v48 = vld [vmem:[%s2457_s0 + $0x188] sm:$0xff] }
  0x13   :  { %v1353_v49 = vld [vmem:[%s2457_s0 + $0x180] sm:$0xff]  ;;  %v1362_v50 = vld [vmem:[%s2457_s0 + $0x198] sm:$0xff]  ;;  %v1367_v51 = vld [vmem:[%s2457_s0 + $0x190] sm:$0xff] }
  0x14   :  { %v1376_v52 = vld [vmem:[%s2457_s0 + $0x1a8] sm:$0xff]  ;;  %v1381_v53 = vld [vmem:[%s2457_s0 + $0x1a0] sm:$0xff]  ;;  %v1390_v54 = vld [vmem:[%s2457_s0 + $0x1b8] sm:$0xff] }
  0x15   :  { %2474 = vst [vmem:[#allocation3_spill] sm:$0xff] %v1381_v53  ;;  %2475 = vst [vmem:[#allocation4_spill] sm:$0xff] %v1390_v54  ;;  %v1395_v55 = vld [vmem:[%s2457_s0 + $0x1b0] sm:$0xff]  ;;  %v1404_v56 = vld [vmem:[%s2457_s0 + $0x1c8] sm:$0xff] }
  0x16   :  { %158 = vrot.lane.b32.xlu1 %v1082_v10, %s996_s10  ;;  %156 = vrot.lane.b32.xlu0 %v1087_v11, %s996_s10  ;;  %2476 = vst [vmem:[#allocation5_spill] sm:$0xff] %v1395_v55  ;;  %v1409_v57 = vld [vmem:[%s2457_s0 + $0x1c0] sm:$0xff]  ;;  %v1418_v58 = vld [vmem:[%s2457_s0 + $0x1d8] sm:$0xff] }
  0x17   :  { %2477 = vst [vmem:[#allocation6_spill] sm:$0xff] %v1409_v57  ;;  %2478 = vst [vmem:[#allocation7_spill] sm:$0xff] %v1418_v58  ;;  %v1423_v59 = vld [vmem:[%s2457_s0 + $0x1d0] sm:$0xff]  ;;  %v1436_v62 = vld [vmem:[%s2457_s0 + $0x1e8] sm:$0xff] }
  0x18   :  { %2479 = vst [vmem:[#allocation8_spill] sm:$0xff] %v1423_v59  ;;  %v1441_v63 = vld [vmem:[%s2457_s0 + $0x1e0] sm:$0xff] }
  0x19   :  { %2482 = vst [vmem:[#allocation11_spill] sm:$0xff] %v1441_v63 }
  0x1a   :  { %162 = vrot.lane.b32.xlu1 %v1096_v12, %s996_s10  ;;  %160 = vrot.lane.b32.xlu0 %v1101_v13, %s996_s10 }
  0x1e   :  { %166 = vrot.lane.b32.xlu1 %v1110_v14, %s996_s10  ;;  %164 = vrot.lane.b32.xlu0 %v1115_v15, %s996_s10 }
  0x22   :  { %170 = vrot.lane.b32.xlu1 %v1124_v16, %s996_s10  ;;  %168 = vrot.lane.b32.xlu0 %v1129_v17, %s996_s10 }
  0x26   :  { %174 = vrot.lane.b32.xlu1 %v1138_v18, %s996_s10  ;;  %172 = vrot.lane.b32.xlu0 %v1143_v19, %s996_s10 }
  0x2a   :  { %178 = vrot.lane.b32.xlu1 %v1152_v20, %s996_s10  ;;  %176 = vrot.lane.b32.xlu0 %v1157_v21, %s996_s10 }
  0x2e   :  { %182 = vrot.lane.b32.xlu1 %v1166_v22, %s996_s10  ;;  %180 = vrot.lane.b32.xlu0 %v1171_v23, %s996_s10 }
  0x32   :  { %186 = vrot.lane.b32.xlu1 %v1180_v24, %s996_s10  ;;  %184 = vrot.lane.b32.xlu0 %v1185_v25, %s996_s10 }
  0x36   :  { %190 = vrot.lane.b32.xlu1 %v1194_v26, %s996_s10  ;;  %188 = vrot.lane.b32.xlu0 %v1199_v27, %s996_s10 }
  0x3a   :  { %194 = vrot.lane.b32.xlu1 %v1208_v28, %s996_s10  ;;  %192 = vrot.lane.b32.xlu0 %v1213_v29, %s996_s10 }
  0x3e   :  { %198 = vrot.lane.b32.xlu1 %v1222_v30, %s996_s10  ;;  %196 = vrot.lane.b32.xlu0 %v1227_v31, %s996_s10 }
  0x42   :  { %202 = vrot.lane.b32.xlu1 %v1236_v32, %s996_s10  ;;  %200 = vrot.lane.b32.xlu0 %v1241_v33, %s996_s10 }
  0x46   :  { %206 = vrot.lane.b32.xlu1 %v1250_v34, %s996_s10  ;;  %204 = vrot.lane.b32.xlu0 %v1255_v35, %s996_s10 }
  0x4a   :  { %210 = vrot.lane.b32.xlu1 %v1264_v36, %s996_s10  ;;  %208 = vrot.lane.b32.xlu0 %v1269_v37, %s996_s10 }
  0x4e   :  { %214 = vrot.lane.b32.xlu1 %v1278_v38, %s996_s10  ;;  %212 = vrot.lane.b32.xlu0 %v1283_v39, %s996_s10 }
  0x52   :  { %218 = vrot.lane.b32.xlu1 %v1292_v40, %s996_s10  ;;  %216 = vrot.lane.b32.xlu0 %v1297_v41, %s996_s10 }
  0x56   :  { %222 = vrot.lane.b32.xlu1 %v1306_v42, %s996_s10  ;;  %220 = vrot.lane.b32.xlu0 %v1311_v43, %s996_s10 }
  0x5a   :  { %226 = vrot.lane.b32.xlu1 %v1320_v44, %s996_s10  ;;  %224 = vrot.lane.b32.xlu0 %v1325_v45, %s996_s10 }
  0x5e   :  { %230 = vrot.lane.b32.xlu1 %v1334_v46, %s996_s10  ;;  %228 = vrot.lane.b32.xlu0 %v1339_v47, %s996_s10 }
  0x62   :  { %234 = vrot.lane.b32.xlu1 %v1348_v48, %s996_s10  ;;  %232 = vrot.lane.b32.xlu0 %v1353_v49, %s996_s10 }
  0x66   :  { %238 = vrot.lane.b32.xlu1 %v1362_v50, %s996_s10  ;;  %236 = vrot.lane.b32.xlu0 %v1367_v51, %s996_s10 }
  0x6a   :  { %242 = vrot.lane.b32.xlu1 %v1376_v52, %s996_s10  ;;  %240 = vrot.lane.b32.xlu0 %v1381_v53, %s996_s10 }
  0x6e   :  { %246 = vrot.lane.b32.xlu1 %v1390_v54, %s996_s10  ;;  %244 = vrot.lane.b32.xlu0 %v1395_v55, %s996_s10 }
  0x72   :  { %250 = vrot.lane.b32.xlu1 %v1404_v56, %s996_s10  ;;  %248 = vrot.lane.b32.xlu0 %v1409_v57, %s996_s10 }
  0x74   :  { %v1425_v60 = vpop.permute.xlu1 %140  ;;  %v1427_v61 = vpop.permute.xlu0 %136 }
  0x75   :  { %2480 = vst [vmem:[#allocation9_spill] sm:$0xff] %v1425_v60  ;;  %2481 = vst [vmem:[#allocation10_spill] sm:$0xff] %v1427_v61  ;;  %v1454_v61 = vld [vmem:[%s2457_s0 + $0x1f8] sm:$0xff] }
  0x76   :  { %254 = vrot.lane.b32.xlu1 %v1418_v58, %s996_s10  ;;  %252 = vrot.lane.b32.xlu0 %v1423_v59, %s996_s10  ;;  %v1459_v59 = vld [vmem:[%s2457_s0 + $0x1f0] sm:$0xff] }
  0x77   :  { %2485 = vst [vmem:[#allocation14_spill] sm:$0xff] %v1459_v59 }
  0x78   :  { %v1443_v57 = vpop.permute.xlu1 %142  ;;  %v1445_v60 = vpop.permute.xlu0 %138 }
  0x79   :  { %2483 = vst [vmem:[#allocation12_spill] sm:$0xff] %v1443_v57  ;;  %2484 = vst [vmem:[#allocation13_spill] sm:$0xff] %v1445_v60 }
  0x7a   :  { %258 = vrot.lane.b32.xlu1 %v1436_v62, %s996_s10  ;;  %256 = vrot.lane.b32.xlu0 %v1441_v63, %s996_s10 }
  0x7c   :  { %v1461_v58 = vpop.permute.xlu1 %146  ;;  %v1463_v57 = vpop.permute.xlu0 %144 }
  0x7d   :  { %2486 = vst [vmem:[#allocation15_spill] sm:$0xff] %v1461_v58  ;;  %2487 = vst [vmem:[#allocation16_spill] sm:$0xff] %v1463_v57 }
  0x7e   :  { %262 = vrot.lane.b32.xlu1 %v1454_v61, %s996_s10  ;;  %260 = vrot.lane.b32.xlu0 %v1459_v59, %s996_s10  ;;  %s998_s10 = smov 104  }
  0x80   :  { %v1469_v60 = vpop.permute.xlu1 %150  ;;  %v1471_v63 = vpop.permute.xlu0 %148 }
  0x81   :  { %2488 = vst [vmem:[#allocation17_spill] sm:$0xff] %v1469_v60  ;;  %2489 = vst [vmem:[#allocation18_spill] sm:$0xff] %v1471_v63 }
  0x82   :  { %394 = vrot.lane.b32.xlu1 %v1031_v3, %s997_s23  ;;  %392 = vrot.lane.b32.xlu0 %v1017_v1, %s997_s23 }
  0x84   :  { %v1477_v58 = vpop.permute.xlu1 %154  ;;  %v1479_v57 = vpop.permute.xlu0 %152 }
  0x85   :  { %2490 = vst [vmem:[#allocation19_spill] sm:$0xff] %v1477_v58  ;;  %2491 = vst [vmem:[#allocation20_spill] sm:$0xff] %v1479_v57 }
  0x86   :  { %398 = vrot.lane.b32.xlu1 %v1026_v2, %s997_s23  ;;  %396 = vrot.lane.b32.xlu0 %v1012_v0, %s997_s23 }
  0x88   :  { %v1485_v60 = vpop.permute.xlu1 %158  ;;  %v1487_v63 = vpop.permute.xlu0 %156 }
  0x89   :  { %2492 = vst [vmem:[#allocation21_spill] sm:$0xff] %v1485_v60  ;;  %2493 = vst [vmem:[#allocation22_spill] sm:$0xff] %v1487_v63 }
  0x8a   :  { %402 = vrot.lane.b32.xlu1 %v1040_v4, %s997_s23  ;;  %400 = vrot.lane.b32.xlu0 %v1045_v5, %s997_s23 }
  0x8c   :  { %v1493_v1 = vpop.permute.xlu1 %162  ;;  %v1495_v58 = vpop.permute.xlu0 %160 }
  0x8d   :  { %2494 = vst [vmem:[#allocation23_spill] sm:$0xff] %v1493_v1  ;;  %2495 = vst [vmem:[#allocation24_spill] sm:$0xff] %v1495_v58 }
  0x8e   :  { %406 = vrot.lane.b32.xlu1 %v1054_v6, %s997_s23  ;;  %404 = vrot.lane.b32.xlu0 %v1059_v7, %s997_s23 }
  0x90   :  { %v1501_v57 = vpop.permute.xlu1 %166  ;;  %v1503_v60 = vpop.permute.xlu0 %164 }
  0x91   :  { %2496 = vst [vmem:[#allocation25_spill] sm:$0xff] %v1501_v57  ;;  %2497 = vst [vmem:[#allocation26_spill] sm:$0xff] %v1503_v60 }
  0x92   :  { %410 = vrot.lane.b32.xlu1 %v1068_v8, %s997_s23  ;;  %408 = vrot.lane.b32.xlu0 %v1073_v9, %s997_s23 }
  0x94   :  { %v1509_v63 = vpop.permute.xlu1 %170  ;;  %v1511_v1 = vpop.permute.xlu0 %168 }
  0x95   :  { %2498 = vst [vmem:[#allocation27_spill] sm:$0xff] %v1509_v63  ;;  %2499 = vst [vmem:[#allocation28_spill] sm:$0xff] %v1511_v1 }
  0x96   :  { %414 = vrot.lane.b32.xlu1 %v1082_v10, %s997_s23  ;;  %412 = vrot.lane.b32.xlu0 %v1087_v11, %s997_s23 }
  0x98   :  { %v1517_v58 = vpop.permute.xlu1 %174  ;;  %v1519_v57 = vpop.permute.xlu0 %172 }
  0x99   :  { %2500 = vst [vmem:[#allocation29_spill] sm:$0xff] %v1517_v58  ;;  %2501 = vst [vmem:[#allocation30_spill] sm:$0xff] %v1519_v57 }
  0x9a   :  { %418 = vrot.lane.b32.xlu1 %v1096_v12, %s997_s23  ;;  %416 = vrot.lane.b32.xlu0 %v1101_v13, %s997_s23 }
  0x9c   :  { %v1525_v60 = vpop.permute.xlu1 %178  ;;  %v1527_v63 = vpop.permute.xlu0 %176 }
  0x9d   :  { %2502 = vst [vmem:[#allocation31_spill] sm:$0xff] %v1525_v60  ;;  %2503 = vst [vmem:[#allocation32_spill] sm:$0xff] %v1527_v63 }
  0x9e   :  { %422 = vrot.lane.b32.xlu1 %v1110_v14, %s997_s23  ;;  %420 = vrot.lane.b32.xlu0 %v1115_v15, %s997_s23 }
  0xa0   :  { %v1533_v1 = vpop.permute.xlu1 %182  ;;  %v1535_v58 = vpop.permute.xlu0 %180 }
  0xa1   :  { %2504 = vst [vmem:[#allocation33_spill] sm:$0xff] %v1533_v1  ;;  %2505 = vst [vmem:[#allocation34_spill] sm:$0xff] %v1535_v58 }
  0xa2   :  { %426 = vrot.lane.b32.xlu1 %v1124_v16, %s997_s23  ;;  %424 = vrot.lane.b32.xlu0 %v1129_v17, %s997_s23 }
  0xa4   :  { %v1541_v57 = vpop.permute.xlu1 %186  ;;  %v1543_v60 = vpop.permute.xlu0 %184 }
  0xa5   :  { %2506 = vst [vmem:[#allocation35_spill] sm:$0xff] %v1541_v57  ;;  %2507 = vst [vmem:[#allocation36_spill] sm:$0xff] %v1543_v60 }
  0xa6   :  { %430 = vrot.lane.b32.xlu1 %v1138_v18, %s997_s23  ;;  %428 = vrot.lane.b32.xlu0 %v1143_v19, %s997_s23 }
  0xa8   :  { %v1549_v63 = vpop.permute.xlu1 %190  ;;  %v1551_v1 = vpop.permute.xlu0 %188 }
  0xa9   :  { %2508 = vst [vmem:[#allocation37_spill] sm:$0xff] %v1549_v63  ;;  %2509 = vst [vmem:[#allocation38_spill] sm:$0xff] %v1551_v1 }
  0xaa   :  { %434 = vrot.lane.b32.xlu1 %v1152_v20, %s997_s23  ;;  %432 = vrot.lane.b32.xlu0 %v1157_v21, %s997_s23 }
  0xac   :  { %v1557_v58 = vpop.permute.xlu1 %194  ;;  %v1559_v57 = vpop.permute.xlu0 %192 }
  0xad   :  { %2510 = vst [vmem:[#allocation39_spill] sm:$0xff] %v1557_v58  ;;  %2511 = vst [vmem:[#allocation40_spill] sm:$0xff] %v1559_v57 }
  0xae   :  { %438 = vrot.lane.b32.xlu1 %v1166_v22, %s997_s23  ;;  %436 = vrot.lane.b32.xlu0 %v1171_v23, %s997_s23 }
  0xb0   :  { %v1565_v60 = vpop.permute.xlu1 %198  ;;  %v1567_v63 = vpop.permute.xlu0 %196 }
  0xb1   :  { %2512 = vst [vmem:[#allocation41_spill] sm:$0xff] %v1565_v60  ;;  %2513 = vst [vmem:[#allocation42_spill] sm:$0xff] %v1567_v63 }
  0xb2   :  { %442 = vrot.lane.b32.xlu1 %v1180_v24, %s997_s23  ;;  %440 = vrot.lane.b32.xlu0 %v1185_v25, %s997_s23 }
  0xb4   :  { %v1573_v1 = vpop.permute.xlu1 %202  ;;  %v1575_v58 = vpop.permute.xlu0 %200 }
  0xb5   :  { %2514 = vst [vmem:[#allocation43_spill] sm:$0xff] %v1573_v1  ;;  %2515 = vst [vmem:[#allocation44_spill] sm:$0xff] %v1575_v58 }
  0xb6   :  { %446 = vrot.lane.b32.xlu1 %v1194_v26, %s997_s23  ;;  %444 = vrot.lane.b32.xlu0 %v1199_v27, %s997_s23 }
  0xb8   :  { %v1581_v57 = vpop.permute.xlu1 %206  ;;  %v1583_v60 = vpop.permute.xlu0 %204 }
  0xb9   :  { %2516 = vst [vmem:[#allocation45_spill] sm:$0xff] %v1581_v57  ;;  %2517 = vst [vmem:[#allocation46_spill] sm:$0xff] %v1583_v60 }
  0xba   :  { %450 = vrot.lane.b32.xlu1 %v1208_v28, %s997_s23  ;;  %448 = vrot.lane.b32.xlu0 %v1213_v29, %s997_s23 }
  0xbc   :  { %v1589_v63 = vpop.permute.xlu1 %210  ;;  %v1591_v1 = vpop.permute.xlu0 %208 }
  0xbd   :  { %2518 = vst [vmem:[#allocation47_spill] sm:$0xff] %v1589_v63  ;;  %2519 = vst [vmem:[#allocation48_spill] sm:$0xff] %v1591_v1 }
  0xbe   :  { %454 = vrot.lane.b32.xlu1 %v1222_v30, %s997_s23  ;;  %452 = vrot.lane.b32.xlu0 %v1227_v31, %s997_s23 }
  0xc0   :  { %v1597_v58 = vpop.permute.xlu1 %214  ;;  %v1599_v57 = vpop.permute.xlu0 %212 }
  0xc1   :  { %2520 = vst [vmem:[#allocation49_spill] sm:$0xff] %v1597_v58  ;;  %2521 = vst [vmem:[#allocation50_spill] sm:$0xff] %v1599_v57 }
  0xc2   :  { %458 = vrot.lane.b32.xlu1 %v1236_v32, %s997_s23  ;;  %456 = vrot.lane.b32.xlu0 %v1241_v33, %s997_s23 }
  0xc4   :  { %v1605_v60 = vpop.permute.xlu1 %218  ;;  %v1607_v63 = vpop.permute.xlu0 %216 }
  0xc5   :  { %2522 = vst [vmem:[#allocation51_spill] sm:$0xff] %v1605_v60  ;;  %2523 = vst [vmem:[#allocation52_spill] sm:$0xff] %v1607_v63 }
  0xc6   :  { %462 = vrot.lane.b32.xlu1 %v1250_v34, %s997_s23  ;;  %460 = vrot.lane.b32.xlu0 %v1255_v35, %s997_s23 }
  0xc8   :  { %v1613_v1 = vpop.permute.xlu1 %222  ;;  %v1615_v58 = vpop.permute.xlu0 %220 }
  0xc9   :  { %2524 = vst [vmem:[#allocation53_spill] sm:$0xff] %v1613_v1  ;;  %2525 = vst [vmem:[#allocation54_spill] sm:$0xff] %v1615_v58 }
  0xca   :  { %466 = vrot.lane.b32.xlu1 %v1264_v36, %s997_s23  ;;  %464 = vrot.lane.b32.xlu0 %v1269_v37, %s997_s23 }
  0xcc   :  { %v1621_v57 = vpop.permute.xlu1 %226  ;;  %v1623_v60 = vpop.permute.xlu0 %224 }
  0xcd   :  { %2526 = vst [vmem:[#allocation55_spill] sm:$0xff] %v1621_v57  ;;  %2527 = vst [vmem:[#allocation56_spill] sm:$0xff] %v1623_v60 }
  0xce   :  { %470 = vrot.lane.b32.xlu1 %v1278_v38, %s997_s23  ;;  %468 = vrot.lane.b32.xlu0 %v1283_v39, %s997_s23 }
  0xd0   :  { %v1629_v63 = vpop.permute.xlu1 %230  ;;  %v1631_v1 = vpop.permute.xlu0 %228 }
  0xd1   :  { %2528 = vst [vmem:[#allocation57_spill] sm:$0xff] %v1629_v63  ;;  %2529 = vst [vmem:[#allocation58_spill] sm:$0xff] %v1631_v1 }
  0xd2   :  { %474 = vrot.lane.b32.xlu1 %v1292_v40, %s997_s23  ;;  %472 = vrot.lane.b32.xlu0 %v1297_v41, %s997_s23 }
  0xd4   :  { %v1637_v58 = vpop.permute.xlu1 %234  ;;  %v1639_v57 = vpop.permute.xlu0 %232 }
  0xd5   :  { %2530 = vst [vmem:[#allocation59_spill] sm:$0xff] %v1637_v58  ;;  %2531 = vst [vmem:[#allocation60_spill] sm:$0xff] %v1639_v57 }
  0xd6   :  { %478 = vrot.lane.b32.xlu1 %v1306_v42, %s997_s23  ;;  %476 = vrot.lane.b32.xlu0 %v1311_v43, %s997_s23 }
  0xd8   :  { %v1645_v60 = vpop.permute.xlu1 %238  ;;  %v1647_v63 = vpop.permute.xlu0 %236 }
  0xd9   :  { %2532 = vst [vmem:[#allocation61_spill] sm:$0xff] %v1645_v60  ;;  %2533 = vst [vmem:[#allocation62_spill] sm:$0xff] %v1647_v63 }
  0xda   :  { %482 = vrot.lane.b32.xlu1 %v1320_v44, %s997_s23  ;;  %480 = vrot.lane.b32.xlu0 %v1325_v45, %s997_s23 }
  0xdc   :  { %v1653_v1 = vpop.permute.xlu1 %242  ;;  %v1655_v58 = vpop.permute.xlu0 %240 }
  0xdd   :  { %2534 = vst [vmem:[#allocation63_spill] sm:$0xff] %v1653_v1  ;;  %2535 = vst [vmem:[#allocation64_spill] sm:$0xff] %v1655_v58 }
  0xde   :  { %486 = vrot.lane.b32.xlu1 %v1334_v46, %s997_s23  ;;  %484 = vrot.lane.b32.xlu0 %v1339_v47, %s997_s23 }
  0xe0   :  { %v1661_v57 = vpop.permute.xlu1 %246  ;;  %v1663_v60 = vpop.permute.xlu0 %244 }
  0xe1   :  { %2536 = vst [vmem:[#allocation65_spill] sm:$0xff] %v1661_v57  ;;  %2537 = vst [vmem:[#allocation66_spill] sm:$0xff] %v1663_v60 }
  0xe2   :  { %490 = vrot.lane.b32.xlu1 %v1348_v48, %s997_s23  ;;  %488 = vrot.lane.b32.xlu0 %v1353_v49, %s997_s23 }
  0xe4   :  { %v1669_v63 = vpop.permute.xlu1 %250  ;;  %v1671_v1 = vpop.permute.xlu0 %248 }
  0xe5   :  { %2538 = vst [vmem:[#allocation67_spill] sm:$0xff] %v1669_v63  ;;  %2539 = vst [vmem:[#allocation68_spill] sm:$0xff] %v1671_v1 }
  0xe6   :  { %494 = vrot.lane.b32.xlu1 %v1362_v50, %s997_s23  ;;  %492 = vrot.lane.b32.xlu0 %v1367_v51, %s997_s23 }
  0xe8   :  { %v1677_v58 = vpop.permute.xlu1 %254  ;;  %v1679_v57 = vpop.permute.xlu0 %252 }
  0xe9   :  { %2540 = vst [vmem:[#allocation69_spill] sm:$0xff] %v1677_v58  ;;  %2541 = vst [vmem:[#allocation70_spill] sm:$0xff] %v1679_v57  ;;  %v2546_v57 = vld [vmem:[#allocation6_spill] sm:$0xff] }
  0xea   :  { %498 = vrot.lane.b32.xlu1 %v1376_v52, %s997_s23  ;;  %496 = vrot.lane.b32.xlu0 %v1381_v53, %s997_s23 }
  0xec   :  { %v1685_v60 = vpop.permute.xlu1 %258  ;;  %v1687_v63 = vpop.permute.xlu0 %256 }
  0xed   :  { %2542 = vst [vmem:[#allocation71_spill] sm:$0xff] %v1685_v60  ;;  %2543 = vst [vmem:[#allocation72_spill] sm:$0xff] %v1687_v63  ;;  %v2548_v63 = vld [vmem:[#allocation7_spill] sm:$0xff] }
  0xee   :  { %502 = vrot.lane.b32.xlu1 %v1390_v54, %s997_s23  ;;  %500 = vrot.lane.b32.xlu0 %v1395_v55, %s997_s23  ;;  %v2549_v54 = vld [vmem:[#allocation8_spill] sm:$0xff] }
  0xf0   :  { %v1693_v1 = vpop.permute.xlu1 %262  ;;  %v1695_v58 = vpop.permute.xlu0 %260 }
  0xf1   :  { %2544 = vst [vmem:[#allocation73_spill] sm:$0xff] %v1693_v1  ;;  %2545 = vst [vmem:[#allocation74_spill] sm:$0xff] %v1695_v58  ;;  %v2551_v58 = vld [vmem:[#allocation11_spill] sm:$0xff] }
  0xf2   :  { %506 = vrot.lane.b32.xlu1 %v1404_v56, %s997_s23  ;;  %504 = vrot.lane.b32.xlu0 %v2546_v57, %s997_s23 }
  0xf4   :  { %v1701_v53 = vpop.permute.xlu1 %394  ;;  %v1703_v60 = vpop.permute.xlu0 %392 }
  0xf5   :  { %2547 = vst [vmem:[#allocation75_spill] sm:$0xff] %v1701_v53 }
  0xf6   :  { %510 = vrot.lane.b32.xlu1 %v2548_v63, %s997_s23  ;;  %508 = vrot.lane.b32.xlu0 %v2549_v54, %s997_s23 }
  0xf8   :  { %v1709_v55 = vpop.permute.xlu1 %398  ;;  %v1711_v1 = vpop.permute.xlu0 %396 }
  0xf9   :  { %2550 = vst [vmem:[#allocation7_spill] sm:$0xff] %v1709_v55 }
  0xfa   :  { %514 = vrot.lane.b32.xlu1 %v1436_v62, %s997_s23  ;;  %512 = vrot.lane.b32.xlu0 %v2551_v58, %s997_s23  ;;  %v2556_v58 = vld [vmem:[#allocation2_spill] sm:$0xff] }
  0xfc   :  { %v1717_v57 = vpop.permute.xlu1 %402  ;;  %v1719_v53 = vpop.permute.xlu0 %400 }
  0xfd   :  { %2552 = vst [vmem:[#allocation76_spill] sm:$0xff] %v1717_v57  ;;  %2553 = vst [vmem:[#allocation77_spill] sm:$0xff] %v1719_v53 }
  0xfe   :  { %518 = vrot.lane.b32.xlu1 %v1454_v61, %s997_s23  ;;  %516 = vrot.lane.b32.xlu0 %v1459_v59, %s997_s23 }
 0x100   :  { %v1725_v54 = vpop.permute.xlu1 %406  ;;  %v1727_v55 = vpop.permute.xlu0 %404 }
 0x101   :  { %2554 = vst [vmem:[#allocation78_spill] sm:$0xff] %v1725_v54  ;;  %2555 = vst [vmem:[#allocation79_spill] sm:$0xff] %v1727_v55 }
 0x102   :  { %650 = vrot.lane.b32.xlu1 %v1031_v3, %s998_s10  ;;  %648 = vrot.lane.b32.xlu0 %v2556_v58, %s998_s10 }
 0x104   :  { %v1733_v57 = vpop.permute.xlu1 %410  ;;  %v1735_v53 = vpop.permute.xlu0 %408 }
 0x105   :  { %2557 = vst [vmem:[#allocation2_spill] sm:$0xff] %v1733_v57  ;;  %2558 = vst [vmem:[#allocation80_spill] sm:$0xff] %v1735_v53 }
 0x106   :  { %654 = vrot.lane.b32.xlu1 %v1026_v2, %s998_s10  ;;  %652 = vrot.lane.b32.xlu0 %v1012_v0, %s998_s10 }
 0x108   :  { %v1741_v54 = vpop.permute.xlu1 %414  ;;  %v1743_v55 = vpop.permute.xlu0 %412 }
 0x109   :  { %2559 = vst [vmem:[#allocation81_spill] sm:$0xff] %v1741_v54  ;;  %2560 = vst [vmem:[#allocation82_spill] sm:$0xff] %v1743_v55 }
 0x10a   :  { %658 = vrot.lane.b32.xlu1 %v1040_v4, %s998_s10  ;;  %656 = vrot.lane.b32.xlu0 %v1045_v5, %s998_s10 }
 0x10c   :  { %v1749_v59 = vpop.permute.xlu1 %418  ;;  %v1751_v57 = vpop.permute.xlu0 %416 }
 0x10d   :  { %2561 = vst [vmem:[#allocation83_spill] sm:$0xff] %v1749_v59  ;;  %2562 = vst [vmem:[#allocation84_spill] sm:$0xff] %v1751_v57 }
 0x10e   :  { %662 = vrot.lane.b32.xlu1 %v1054_v6, %s998_s10  ;;  %660 = vrot.lane.b32.xlu0 %v1059_v7, %s998_s10 }
 0x110   :  { %v1757_v53 = vpop.permute.xlu1 %422  ;;  %v1759_v54 = vpop.permute.xlu0 %420 }
 0x111   :  { %2563 = vst [vmem:[#allocation85_spill] sm:$0xff] %v1757_v53  ;;  %2564 = vst [vmem:[#allocation86_spill] sm:$0xff] %v1759_v54 }
 0x112   :  { %666 = vrot.lane.b32.xlu1 %v1068_v8, %s998_s10  ;;  %664 = vrot.lane.b32.xlu0 %v1073_v9, %s998_s10 }
 0x114   :  { %v1765_v55 = vpop.permute.xlu1 %426  ;;  %v1767_v59 = vpop.permute.xlu0 %424 }
 0x115   :  { %2565 = vst [vmem:[#allocation87_spill] sm:$0xff] %v1765_v55  ;;  %2566 = vst [vmem:[#allocation88_spill] sm:$0xff] %v1767_v59 }
 0x116   :  { %670 = vrot.lane.b32.xlu1 %v1082_v10, %s998_s10  ;;  %668 = vrot.lane.b32.xlu0 %v1087_v11, %s998_s10 }
 0x118   :  { %v1773_v57 = vpop.permute.xlu1 %430  ;;  %v1775_v53 = vpop.permute.xlu0 %428 }
 0x119   :  { %2567 = vst [vmem:[#allocation89_spill] sm:$0xff] %v1773_v57  ;;  %2568 = vst [vmem:[#allocation90_spill] sm:$0xff] %v1775_v53 }
 0x11a   :  { %674 = vrot.lane.b32.xlu1 %v1096_v12, %s998_s10  ;;  %672 = vrot.lane.b32.xlu0 %v1101_v13, %s998_s10 }
 0x11c   :  { %v1781_v54 = vpop.permute.xlu1 %434  ;;  %v1783_v55 = vpop.permute.xlu0 %432 }
 0x11d   :  { %2569 = vst [vmem:[#allocation91_spill] sm:$0xff] %v1781_v54  ;;  %2570 = vst [vmem:[#allocation92_spill] sm:$0xff] %v1783_v55 }
 0x11e   :  { %678 = vrot.lane.b32.xlu1 %v1110_v14, %s998_s10  ;;  %676 = vrot.lane.b32.xlu0 %v1115_v15, %s998_s10 }
 0x120   :  { %v1789_v59 = vpop.permute.xlu1 %438  ;;  %v1791_v57 = vpop.permute.xlu0 %436 }
 0x121   :  { %2571 = vst [vmem:[#allocation93_spill] sm:$0xff] %v1789_v59  ;;  %2572 = vst [vmem:[#allocation94_spill] sm:$0xff] %v1791_v57 }
 0x122   :  { %682 = vrot.lane.b32.xlu1 %v1124_v16, %s998_s10  ;;  %680 = vrot.lane.b32.xlu0 %v1129_v17, %s998_s10 }
 0x124   :  { %v1797_v53 = vpop.permute.xlu1 %442  ;;  %v1799_v54 = vpop.permute.xlu0 %440 }
 0x125   :  { %2573 = vst [vmem:[#allocation95_spill] sm:$0xff] %v1797_v53  ;;  %2574 = vst [vmem:[#allocation96_spill] sm:$0xff] %v1799_v54 }
 0x126   :  { %686 = vrot.lane.b32.xlu1 %v1138_v18, %s998_s10  ;;  %684 = vrot.lane.b32.xlu0 %v1143_v19, %s998_s10 }
 0x128   :  { %v1805_v55 = vpop.permute.xlu1 %446  ;;  %v1807_v59 = vpop.permute.xlu0 %444 }
 0x129   :  { %2575 = vst [vmem:[#allocation97_spill] sm:$0xff] %v1805_v55  ;;  %2576 = vst [vmem:[#allocation98_spill] sm:$0xff] %v1807_v59 }
 0x12a   :  { %690 = vrot.lane.b32.xlu1 %v1152_v20, %s998_s10  ;;  %688 = vrot.lane.b32.xlu0 %v1157_v21, %s998_s10 }
 0x12c   :  { %v1813_v57 = vpop.permute.xlu1 %450  ;;  %v1815_v53 = vpop.permute.xlu0 %448 }
 0x12d   :  { %2577 = vst [vmem:[#allocation99_spill] sm:$0xff] %v1813_v57  ;;  %2578 = vst [vmem:[#allocation100_spill] sm:$0xff] %v1815_v53 }
 0x12e   :  { %694 = vrot.lane.b32.xlu1 %v1166_v22, %s998_s10  ;;  %692 = vrot.lane.b32.xlu0 %v1171_v23, %s998_s10 }
 0x130   :  { %v1821_v54 = vpop.permute.xlu1 %454  ;;  %v1823_v55 = vpop.permute.xlu0 %452 }
 0x131   :  { %2579 = vst [vmem:[#allocation101_spill] sm:$0xff] %v1821_v54  ;;  %2580 = vst [vmem:[#allocation102_spill] sm:$0xff] %v1823_v55 }
 0x132   :  { %698 = vrot.lane.b32.xlu1 %v1180_v24, %s998_s10  ;;  %696 = vrot.lane.b32.xlu0 %v1185_v25, %s998_s10 }
 0x134   :  { %v1829_v59 = vpop.permute.xlu1 %458  ;;  %v1831_v57 = vpop.permute.xlu0 %456 }
 0x135   :  { %2581 = vst [vmem:[#allocation103_spill] sm:$0xff] %v1829_v59  ;;  %2582 = vst [vmem:[#allocation104_spill] sm:$0xff] %v1831_v57 }
 0x136   :  { %702 = vrot.lane.b32.xlu1 %v1194_v26, %s998_s10  ;;  %700 = vrot.lane.b32.xlu0 %v1199_v27, %s998_s10 }
 0x138   :  { %v1837_v53 = vpop.permute.xlu1 %462  ;;  %v1839_v54 = vpop.permute.xlu0 %460 }
 0x139   :  { %2583 = vst [vmem:[#allocation105_spill] sm:$0xff] %v1837_v53  ;;  %2584 = vst [vmem:[#allocation106_spill] sm:$0xff] %v1839_v54 }
 0x13a   :  { %706 = vrot.lane.b32.xlu1 %v1208_v28, %s998_s10  ;;  %704 = vrot.lane.b32.xlu0 %v1213_v29, %s998_s10 }
 0x13c   :  { %v1845_v55 = vpop.permute.xlu1 %466  ;;  %v1847_v59 = vpop.permute.xlu0 %464 }
 0x13d   :  { %2585 = vst [vmem:[#allocation107_spill] sm:$0xff] %v1845_v55  ;;  %2586 = vst [vmem:[#allocation108_spill] sm:$0xff] %v1847_v59 }
 0x13e   :  { %710 = vrot.lane.b32.xlu1 %v1222_v30, %s998_s10  ;;  %708 = vrot.lane.b32.xlu0 %v1227_v31, %s998_s10 }
 0x140   :  { %v1853_v57 = vpop.permute.xlu1 %470  ;;  %v1855_v53 = vpop.permute.xlu0 %468 }
 0x141   :  { %2587 = vst [vmem:[#allocation109_spill] sm:$0xff] %v1853_v57  ;;  %2588 = vst [vmem:[#allocation110_spill] sm:$0xff] %v1855_v53 }
 0x142   :  { %714 = vrot.lane.b32.xlu1 %v1236_v32, %s998_s10  ;;  %712 = vrot.lane.b32.xlu0 %v1241_v33, %s998_s10 }
 0x144   :  { %v1861_v54 = vpop.permute.xlu1 %474  ;;  %v1863_v55 = vpop.permute.xlu0 %472 }
 0x145   :  { %2589 = vst [vmem:[#allocation111_spill] sm:$0xff] %v1861_v54  ;;  %2590 = vst [vmem:[#allocation112_spill] sm:$0xff] %v1863_v55 }
 0x146   :  { %718 = vrot.lane.b32.xlu1 %v1250_v34, %s998_s10  ;;  %716 = vrot.lane.b32.xlu0 %v1255_v35, %s998_s10 }
 0x148   :  { %v1869_v59 = vpop.permute.xlu1 %478  ;;  %v1871_v57 = vpop.permute.xlu0 %476 }
 0x149   :  { %2591 = vst [vmem:[#allocation113_spill] sm:$0xff] %v1869_v59  ;;  %2592 = vst [vmem:[#allocation114_spill] sm:$0xff] %v1871_v57 }
 0x14a   :  { %722 = vrot.lane.b32.xlu1 %v1264_v36, %s998_s10  ;;  %720 = vrot.lane.b32.xlu0 %v1269_v37, %s998_s10 }
 0x14c   :  { %v1877_v53 = vpop.permute.xlu1 %482  ;;  %v1879_v54 = vpop.permute.xlu0 %480 }
 0x14d   :  { %2593 = vst [vmem:[#allocation115_spill] sm:$0xff] %v1877_v53  ;;  %2594 = vst [vmem:[#allocation116_spill] sm:$0xff] %v1879_v54 }
 0x14e   :  { %726 = vrot.lane.b32.xlu1 %v1278_v38, %s998_s10  ;;  %724 = vrot.lane.b32.xlu0 %v1283_v39, %s998_s10 }
 0x150   :  { %v1885_v55 = vpop.permute.xlu1 %486  ;;  %v1887_v59 = vpop.permute.xlu0 %484 }
 0x151   :  { %2595 = vst [vmem:[#allocation117_spill] sm:$0xff] %v1885_v55  ;;  %2596 = vst [vmem:[#allocation118_spill] sm:$0xff] %v1887_v59 }
 0x152   :  { %730 = vrot.lane.b32.xlu1 %v1292_v40, %s998_s10  ;;  %728 = vrot.lane.b32.xlu0 %v1297_v41, %s998_s10 }
 0x154   :  { %v1893_v57 = vpop.permute.xlu1 %490  ;;  %v1895_v53 = vpop.permute.xlu0 %488 }
 0x155   :  { %2597 = vst [vmem:[#allocation119_spill] sm:$0xff] %v1893_v57  ;;  %2598 = vst [vmem:[#allocation120_spill] sm:$0xff] %v1895_v53 }
 0x156   :  { %734 = vrot.lane.b32.xlu1 %v1306_v42, %s998_s10  ;;  %732 = vrot.lane.b32.xlu0 %v1311_v43, %s998_s10 }
 0x158   :  { %v1901_v54 = vpop.permute.xlu1 %494  ;;  %v1903_v55 = vpop.permute.xlu0 %492 }
 0x159   :  { %2599 = vst [vmem:[#allocation121_spill] sm:$0xff] %v1901_v54 }
 0x15a   :  { %738 = vrot.lane.b32.xlu1 %v1320_v44, %s998_s10  ;;  %736 = vrot.lane.b32.xlu0 %v1325_v45, %s998_s10 }
 0x15c   :  { %v1909_v59 = vpop.permute.xlu1 %498  ;;  %v1911_v57 = vpop.permute.xlu0 %496 }
 0x15d   :  { %2600 = vst [vmem:[#allocation122_spill] sm:$0xff] %v1911_v57 }
 0x15e   :  { %742 = vrot.lane.b32.xlu1 %v1334_v46, %s998_s10  ;;  %740 = vrot.lane.b32.xlu0 %v1339_v47, %s998_s10 }
 0x160   :  { %v1917_v53 = vpop.permute.xlu1 %502  ;;  %v1919_v54 = vpop.permute.xlu0 %500 }
 0x161   :  { %2601 = vst [vmem:[#allocation123_spill] sm:$0xff] %v1917_v53  ;;  %2602 = vst [vmem:[#allocation124_spill] sm:$0xff] %v1919_v54  ;;  %v2615_v54 = vld [vmem:[#allocation13_spill] sm:$0xff] }
 0x162   :  { %746 = vrot.lane.b32.xlu1 %v1348_v48, %s998_s10  ;;  %744 = vrot.lane.b32.xlu0 %v1353_v49, %s998_s10  ;;  %v2607_v48 = vld [vmem:[#allocation3_spill] sm:$0xff] }
 0x164   :  { %v1925_v44 = vpop.permute.xlu1 %506  ;;  %v1927_v45 = vpop.permute.xlu0 %504 }
 0x165   :  { %2603 = vst [vmem:[#allocation125_spill] sm:$0xff] %v1925_v44  ;;  %2604 = vst [vmem:[#allocation126_spill] sm:$0xff] %v1927_v45  ;;  %v2610_v45 = vld [vmem:[#allocation4_spill] sm:$0xff] }
 0x166   :  { %750 = vrot.lane.b32.xlu1 %v1362_v50, %s998_s10  ;;  %748 = vrot.lane.b32.xlu0 %v1367_v51, %s998_s10  ;;  %v2611_v50 = vld [vmem:[#allocation5_spill] sm:$0xff] }
 0x168   :  { %v1933_v46 = vpop.permute.xlu1 %510  ;;  %v1935_v47 = vpop.permute.xlu0 %508 }
 0x169   :  { %2605 = vst [vmem:[#allocation127_spill] sm:$0xff] %v1933_v46  ;;  %2606 = vst [vmem:[#allocation128_spill] sm:$0xff] %v1935_v47  ;;  %v2614_v47 = vld [vmem:[#allocation10_spill] sm:$0xff] }
 0x16a   :  { %754 = vrot.lane.b32.xlu1 %v1376_v52, %s998_s10  ;;  %752 = vrot.lane.b32.xlu0 %v2607_v48, %s998_s10  ;;  %v328_v52 = vmax.f32 %v2556_v58, %v2614_v47  ;;  %v329_v48 = vmax.f32 %v1031_v3, %v2615_v54  ;;  %v2619_v58 = vld [vmem:[#allocation12_spill] sm:$0xff] }
 0x16b   :  { %v331_v47 = vmax.f32 %v1026_v2, %v2619_v58 }
 0x16c   :  { %v1941_v49 = vpop.permute.xlu1 %514  ;;  %v1943_v44 = vpop.permute.xlu0 %512 }
 0x16d   :  { %2608 = vst [vmem:[#allocation3_spill] sm:$0xff] %v1941_v49  ;;  %2609 = vst [vmem:[#allocation129_spill] sm:$0xff] %v1943_v44  ;;  %v2616_v44 = vld [vmem:[#allocation6_spill] sm:$0xff] }
 0x16e   :  { %758 = vrot.lane.b32.xlu1 %v2610_v45, %s998_s10  ;;  %756 = vrot.lane.b32.xlu0 %v2611_v50, %s998_s10  ;;  %v2617_v45 = vld [vmem:[#allocation75_spill] sm:$0xff]  ;;  %v584_v50 = vmax.f32 %v328_v52, %v1703_v60  ;;  %v2625_v52 = vld [vmem:[#allocation76_spill] sm:$0xff] }
 0x16f   :  { %v585_v49 = vmax.f32 %v329_v48, %v2617_v45 }
 0x170   :  { %v1949_v51 = vpop.permute.xlu1 %518  ;;  %v1951_v46 = vpop.permute.xlu0 %516 }
 0x171   :  { %2612 = vst [vmem:[#allocation4_spill] sm:$0xff] %v1949_v51  ;;  %2613 = vst [vmem:[#allocation5_spill] sm:$0xff] %v1951_v46  ;;  %v2618_v46 = vld [vmem:[#allocation9_spill] sm:$0xff] }
 0x172   :  { %762 = vrot.lane.b32.xlu1 %v1404_v56, %s998_s10  ;;  %760 = vrot.lane.b32.xlu0 %v2616_v44, %s998_s10  ;;  %v330_v57 = vmax.f32 %v1012_v0, %v2618_v46  ;;  %v2620_v56 = vld [vmem:[#allocation8_spill] sm:$0xff]  ;;  %v2621_v44 = vld [vmem:[#allocation7_spill] sm:$0xff] }
 0x173   :  { %v587_v48 = vmax.f32 %v331_v47, %v2621_v44  ;;  %v2623_v46 = vld [vmem:[#allocation16_spill] sm:$0xff] }
 0x174   :  { %v651_v51 = vpop.permute.xlu1 %650  ;;  %v649_v53 = vpop.permute.xlu0 %648  ;;  %v586_v60 = vmax.f32 %v330_v57, %v1711_v1  ;;  %v2624_v57 = vld [vmem:[#allocation11_spill] sm:$0xff] }
 0x175   :  { %v841_v3 = vmax.f32 %v585_v49, %v651_v51  ;;  %v840_v54 = vmax.f32 %v584_v50, %v649_v53  ;;  %v2622_v53 = vld [vmem:[#allocation15_spill] sm:$0xff]  ;;  %v332_v49 = vmax.f32 %v1045_v5, %v2623_v46  ;;  %v2626_v50 = vld [vmem:[#allocation77_spill] sm:$0xff]  ;;  %v2633_v46 = vld [vmem:[#allocation20_spill] sm:$0xff] }
 0x176   :  { %766 = vrot.lane.b32.xlu1 %v2548_v63, %s998_s10  ;;  %764 = vrot.lane.b32.xlu0 %v2620_v56, %s998_s10  ;;  %v333_v63 = vmax.f32 %v1040_v4, %v2622_v53 }
 0x177   :  { %906 = vst.msk [vmem:[%s2458_s1 + $0x8] sm:$0xff] %vm904_vm0, %v841_v3  ;;  %905 = vst.msk [vmem:[%s2458_s1] sm:$0xff] %vm904_vm0, %v840_v54  ;;  %v588_v58 = vmax.f32 %v332_v49, %v2626_v50  ;;  %v2628_v3 = vld [vmem:[#allocation18_spill] sm:$0xff]  ;;  %v336_v49 = vmax.f32 %v1073_v9, %v2633_v46  ;;  %v2643_v46 = vld [vmem:[#allocation84_spill] sm:$0xff] }
 0x178   :  { %v655_v0 = vpop.permute.xlu1 %654  ;;  %v653_v2 = vpop.permute.xlu0 %652  ;;  %v589_v45 = vmax.f32 %v333_v63, %v2625_v52  ;;  %v334_v54 = vmax.f32 %v1059_v7, %v2628_v3 }
 0x179   :  { %v843_v51 = vmax.f32 %v587_v48, %v655_v0  ;;  %v842_v1 = vmax.f32 %v586_v60, %v653_v2  ;;  %v2629_v48 = vld [vmem:[#allocation14_spill] sm:$0xff]  ;;  %v2631_v2 = vld [vmem:[#allocation79_spill] sm:$0xff] }
 0x17a   :  { %770 = vrot.lane.b32.xlu1 %v1436_v62, %s998_s10  ;;  %768 = vrot.lane.b32.xlu0 %v2624_v57, %s998_s10  ;;  %v2627_v62 = vld [vmem:[#allocation17_spill] sm:$0xff]  ;;  %v2630_v60 = vld [vmem:[#allocation78_spill] sm:$0xff]  ;;  %v590_v53 = vmax.f32 %v334_v54, %v2631_v2  ;;  %v2641_v2 = vld [vmem:[#allocation24_spill] sm:$0xff] }
 0x17b   :  { %908 = vst.msk [vmem:[%s2458_s1 + $0x18] sm:$0xff] %vm904_vm0, %v843_v51  ;;  %907 = vst.msk [vmem:[%s2458_s1 + $0x10] sm:$0xff] %vm904_vm0, %v842_v1  ;;  %v335_v47 = vmax.f32 %v1054_v6, %v2627_v62  ;;  %v2634_v57 = vld [vmem:[#allocation2_spill] sm:$0xff]  ;;  %v2638_v54 = vld [vmem:[#allocation81_spill] sm:$0xff] }
 0x17c   :  { %v659_v4 = vpop.permute.xlu1 %658  ;;  %v657_v5 = vpop.permute.xlu0 %656 }
 0x17d   :  { %v845_v56 = vmax.f32 %v589_v45, %v659_v4  ;;  %v844_v44 = vmax.f32 %v588_v58, %v657_v5  ;;  %v591_v0 = vmax.f32 %v335_v47, %v2630_v60  ;;  %v2635_v45 = vld [vmem:[#allocation80_spill] sm:$0xff]  ;;  %v2636_v4 = vld [vmem:[#allocation21_spill] sm:$0xff]  ;;  %v2637_v5 = vld [vmem:[#allocation22_spill] sm:$0xff] }
 0x17e   :  { %774 = vrot.lane.b32.xlu1 %v1454_v61, %s998_s10  ;;  %772 = vrot.lane.b32.xlu0 %v2629_v48, %s998_s10  ;;  %v2632_v61 = vld [vmem:[#allocation19_spill] sm:$0xff]  ;;  %v592_v50 = vmax.f32 %v336_v49, %v2635_v45  ;;  %v339_v9 = vmax.f32 %v1082_v10, %v2636_v4  ;;  %v338_v62 = vmax.f32 %v1087_v11, %v2637_v5  ;;  %v2647_v4 = vld [vmem:[#allocation86_spill] sm:$0xff] }
 0x17f   :  { %910 = vst.msk [vmem:[%s2458_s1 + $0x28] sm:$0xff] %vm904_vm0, %v845_v56  ;;  %909 = vst.msk [vmem:[%s2458_s1 + $0x20] sm:$0xff] %vm904_vm0, %v844_v44  ;;  %v337_v63 = vmax.f32 %v1068_v8, %v2632_v61  ;;  %v2639_v44 = vld [vmem:[#allocation82_spill] sm:$0xff]  ;;  %v2642_v61 = vld [vmem:[#allocation83_spill] sm:$0xff] }
 0x180   :  { %v663_v6 = vpop.permute.xlu1 %662  ;;  %v661_v7 = vpop.permute.xlu0 %660  ;;  %v595_v56 = vmax.f32 %v339_v9, %v2638_v54  ;;  %v594_v48 = vmax.f32 %v338_v62, %v2639_v44  ;;  %v2648_v62 = vld [vmem:[#allocation27_spill] sm:$0xff] }
 0x181   :  { %v847_v51 = vmax.f32 %v591_v0, %v663_v6  ;;  %v846_v1 = vmax.f32 %v590_v53, %v661_v7  ;;  %v593_v52 = vmax.f32 %v337_v63, %v2634_v57  ;;  %v2640_v0 = vld [vmem:[#allocation23_spill] sm:$0xff]  ;;  %v340_v53 = vmax.f32 %v1101_v13, %v2641_v2  ;;  %v2645_v57 = vld [vmem:[#allocation26_spill] sm:$0xff] }
 0x182   :  { %v341_v11 = vmax.f32 %v1096_v12, %v2640_v0  ;;  %v2650_v44 = vld [vmem:[#allocation87_spill] sm:$0xff]  ;;  %v2653_v2 = vld [vmem:[#allocation30_spill] sm:$0xff] }
 0x183   :  { %912 = vst.msk [vmem:[%s2458_s1 + $0x38] sm:$0xff] %vm904_vm0, %v847_v51  ;;  %911 = vst.msk [vmem:[%s2458_s1 + $0x30] sm:$0xff] %vm904_vm0, %v846_v1  ;;  %v596_v49 = vmax.f32 %v340_v53, %v2643_v46  ;;  %v2644_v1 = vld [vmem:[#allocation25_spill] sm:$0xff]  ;;  %v346_v53 = vmax.f32 %v1143_v19, %v2653_v2  ;;  %v2655_v46 = vld [vmem:[#allocation90_spill] sm:$0xff] }
 0x184   :  { %v667_v8 = vpop.permute.xlu1 %666  ;;  %v665_v58 = vpop.permute.xlu0 %664  ;;  %v597_v63 = vmax.f32 %v341_v11, %v2642_v61  ;;  %v343_v13 = vmax.f32 %v1110_v14, %v2644_v1  ;;  %v2652_v11 = vld [vmem:[#allocation29_spill] sm:$0xff]  ;;  %v2657_v1 = vld [vmem:[#allocation32_spill] sm:$0xff] }
 0x185   :  { %v849_v47 = vmax.f32 %v593_v52, %v667_v8  ;;  %v848_v3 = vmax.f32 %v592_v50, %v665_v58  ;;  %v342_v52 = vmax.f32 %v1115_v15, %v2645_v57  ;;  %v2646_v8 = vld [vmem:[#allocation85_spill] sm:$0xff]  ;;  %v345_v15 = vmax.f32 %v1124_v16, %v2648_v62  ;;  %v2667_v2 = vld [vmem:[#allocation96_spill] sm:$0xff] }
 0x186   :  { %v599_v58 = vmax.f32 %v343_v13, %v2646_v8  ;;  %v2654_v61 = vld [vmem:[#allocation89_spill] sm:$0xff]  ;;  %v348_v13 = vmax.f32 %v1157_v21, %v2657_v1  ;;  %v2659_v8 = vld [vmem:[#allocation92_spill] sm:$0xff] }
 0x187   :  { %914 = vst.msk [vmem:[%s2458_s1 + $0x48] sm:$0xff] %vm904_vm0, %v849_v47  ;;  %913 = vst.msk [vmem:[%s2458_s1 + $0x40] sm:$0xff] %vm904_vm0, %v848_v3  ;;  %v598_v9 = vmax.f32 %v342_v52, %v2647_v4  ;;  %v2649_v47 = vld [vmem:[#allocation28_spill] sm:$0xff] }
 0x188   :  { %v671_v10 = vpop.permute.xlu1 %670  ;;  %v669_v60 = vpop.permute.xlu0 %668  ;;  %v344_v3 = vmax.f32 %v1129_v17, %v2649_v47  ;;  %v347_v17 = vmax.f32 %v1138_v18, %v2652_v11  ;;  %v2662_v47 = vld [vmem:[#allocation93_spill] sm:$0xff]  ;;  %v2666_v11 = vld [vmem:[#allocation95_spill] sm:$0xff] }
 0x189   :  { %v851_v6 = vmax.f32 %v595_v56, %v671_v10  ;;  %v850_v7 = vmax.f32 %v594_v48, %v669_v60  ;;  %v601_v48 = vmax.f32 %v345_v15, %v2650_v44  ;;  %v2651_v10 = vld [vmem:[#allocation88_spill] sm:$0xff] }
 0x18a   :  { %v600_v60 = vmax.f32 %v344_v3, %v2651_v10  ;;  %v2665_v10 = vld [vmem:[#allocation36_spill] sm:$0xff] }
 0x18b   :  { %916 = vst.msk [vmem:[%s2458_s1 + $0x58] sm:$0xff] %vm904_vm0, %v851_v6  ;;  %915 = vst.msk [vmem:[%s2458_s1 + $0x50] sm:$0xff] %vm904_vm0, %v850_v7 }
 0x18c   :  { %v675_v12 = vpop.permute.xlu1 %674  ;;  %v673_v51 = vpop.permute.xlu0 %672 }
 0x18d   :  { %v853_v45 = vmax.f32 %v597_v63, %v675_v12  ;;  %v852_v50 = vmax.f32 %v596_v49, %v673_v51  ;;  %v603_v63 = vmax.f32 %v347_v17, %v2654_v61  ;;  %v602_v49 = vmax.f32 %v346_v53, %v2655_v46  ;;  %v2656_v51 = vld [vmem:[#allocation31_spill] sm:$0xff]  ;;  %v2669_v61 = vld [vmem:[#allocation38_spill] sm:$0xff] }
 0x18e   :  { %v349_v19 = vmax.f32 %v1152_v20, %v2656_v51  ;;  %v2671_v51 = vld [vmem:[#allocation98_spill] sm:$0xff] }
 0x18f   :  { %918 = vst.msk [vmem:[%s2458_s1 + $0x68] sm:$0xff] %vm904_vm0, %v853_v45  ;;  %917 = vst.msk [vmem:[%s2458_s1 + $0x60] sm:$0xff] %vm904_vm0, %v852_v50  ;;  %v2658_v45 = vld [vmem:[#allocation91_spill] sm:$0xff] }
 0x190   :  { %v679_v14 = vpop.permute.xlu1 %678  ;;  %v677_v5 = vpop.permute.xlu0 %676  ;;  %v605_v50 = vmax.f32 %v349_v19, %v2658_v45 }
 0x191   :  { %v855_v54 = vmax.f32 %v599_v58, %v679_v14  ;;  %v854_v56 = vmax.f32 %v598_v9, %v677_v5  ;;  %v604_v58 = vmax.f32 %v348_v13, %v2659_v8  ;;  %v2660_v9 = vld [vmem:[#allocation33_spill] sm:$0xff]  ;;  %v2661_v14 = vld [vmem:[#allocation34_spill] sm:$0xff]  ;;  %v2672_v13 = vld [vmem:[#allocation39_spill] sm:$0xff] }
 0x192   :  { %v351_v21 = vmax.f32 %v1166_v22, %v2660_v9  ;;  %v350_v5 = vmax.f32 %v1171_v23, %v2661_v14  ;;  %v2674_v8 = vld [vmem:[#allocation99_spill] sm:$0xff]  ;;  %v2677_v14 = vld [vmem:[#allocation42_spill] sm:$0xff] }
 0x193   :  { %920 = vst.msk [vmem:[%s2458_s1 + $0x78] sm:$0xff] %vm904_vm0, %v855_v54  ;;  %919 = vst.msk [vmem:[%s2458_s1 + $0x70] sm:$0xff] %vm904_vm0, %v854_v56  ;;  %v2663_v54 = vld [vmem:[#allocation94_spill] sm:$0xff] }
 0x194   :  { %v683_v16 = vpop.permute.xlu1 %682  ;;  %v681_v0 = vpop.permute.xlu0 %680  ;;  %v607_v3 = vmax.f32 %v351_v21, %v2662_v47  ;;  %v606_v56 = vmax.f32 %v350_v5, %v2663_v54  ;;  %v2676_v21 = vld [vmem:[#allocation41_spill] sm:$0xff]  ;;  %v358_v5 = vmax.f32 %v1227_v31, %v2677_v14  ;;  %v2679_v54 = vld [vmem:[#allocation102_spill] sm:$0xff] }
 0x195   :  { %v857_v6 = vmax.f32 %v601_v48, %v683_v16  ;;  %v856_v7 = vmax.f32 %v600_v60, %v681_v0  ;;  %v2664_v48 = vld [vmem:[#allocation35_spill] sm:$0xff]  ;;  %v352_v60 = vmax.f32 %v1185_v25, %v2665_v10  ;;  %v2678_v47 = vld [vmem:[#allocation101_spill] sm:$0xff] }
 0x196   :  { %v353_v23 = vmax.f32 %v1180_v24, %v2664_v48  ;;  %v2681_v48 = vld [vmem:[#allocation44_spill] sm:$0xff] }
 0x197   :  { %922 = vst.msk [vmem:[%s2458_s1 + $0x88] sm:$0xff] %vm904_vm0, %v857_v6  ;;  %921 = vst.msk [vmem:[%s2458_s1 + $0x80] sm:$0xff] %vm904_vm0, %v856_v7  ;;  %v608_v53 = vmax.f32 %v352_v60, %v2667_v2  ;;  %v2668_v7 = vld [vmem:[#allocation37_spill] sm:$0xff] }
 0x198   :  { %v687_v18 = vpop.permute.xlu1 %686  ;;  %v685_v12 = vpop.permute.xlu0 %684  ;;  %v609_v17 = vmax.f32 %v353_v23, %v2666_v11  ;;  %v355_v25 = vmax.f32 %v1194_v26, %v2668_v7  ;;  %v360_v23 = vmax.f32 %v1241_v33, %v2681_v48  ;;  %v2683_v11 = vld [vmem:[#allocation104_spill] sm:$0xff]  ;;  %v2701_v48 = vld [vmem:[#allocation54_spill] sm:$0xff] }
 0x199   :  { %v859_v57 = vmax.f32 %v603_v63, %v687_v18  ;;  %v858_v52 = vmax.f32 %v602_v49, %v685_v12  ;;  %v354_v63 = vmax.f32 %v1199_v27, %v2669_v61  ;;  %v2670_v18 = vld [vmem:[#allocation97_spill] sm:$0xff]  ;;  %v357_v27 = vmax.f32 %v1208_v28, %v2672_v13  ;;  %v2690_v13 = vld [vmem:[#allocation107_spill] sm:$0xff] }
 0x19a   :  { %v611_v12 = vmax.f32 %v355_v25, %v2670_v18  ;;  %v2686_v61 = vld [vmem:[#allocation105_spill] sm:$0xff] }
 0x19b   :  { %924 = vst.msk [vmem:[%s2458_s1 + $0x98] sm:$0xff] %vm904_vm0, %v859_v57  ;;  %923 = vst.msk [vmem:[%s2458_s1 + $0x90] sm:$0xff] %vm904_vm0, %v858_v52  ;;  %v610_v19 = vmax.f32 %v354_v63, %v2671_v51  ;;  %v2673_v57 = vld [vmem:[#allocation40_spill] sm:$0xff] }
 0x19c   :  { %v691_v20 = vpop.permute.xlu1 %690  ;;  %v689_v4 = vpop.permute.xlu0 %688  ;;  %v356_v52 = vmax.f32 %v1213_v29, %v2673_v57  ;;  %v359_v29 = vmax.f32 %v1222_v30, %v2676_v21  ;;  %v2689_v51 = vld [vmem:[#allocation48_spill] sm:$0xff]  ;;  %v2695_v21 = vld [vmem:[#allocation110_spill] sm:$0xff] }
 0x19d   :  { %v861_v62 = vmax.f32 %v605_v50, %v691_v20  ;;  %v860_v15 = vmax.f32 %v604_v58, %v689_v4  ;;  %v613_v58 = vmax.f32 %v357_v27, %v2674_v8  ;;  %v2675_v20 = vld [vmem:[#allocation100_spill] sm:$0xff]  ;;  %v2693_v8 = vld [vmem:[#allocation50_spill] sm:$0xff] }
 0x19e   :  { %v612_v4 = vmax.f32 %v356_v52, %v2675_v20  ;;  %v2691_v57 = vld [vmem:[#allocation108_spill] sm:$0xff] }
 0x19f   :  { %926 = vst.msk [vmem:[%s2458_s1 + $0xa8] sm:$0xff] %vm904_vm0, %v861_v62  ;;  %925 = vst.msk [vmem:[%s2458_s1 + $0xa0] sm:$0xff] %vm904_vm0, %v860_v15 }
 0x1a0   :  { %v695_v22 = vpop.permute.xlu1 %694  ;;  %v693_v44 = vpop.permute.xlu0 %692 }
 0x1a1   :  { %v863_v16 = vmax.f32 %v607_v3, %v695_v22  ;;  %v862_v0 = vmax.f32 %v606_v56, %v693_v44  ;;  %v615_v3 = vmax.f32 %v359_v29, %v2678_v47  ;;  %v614_v56 = vmax.f32 %v358_v5, %v2679_v54  ;;  %v2680_v44 = vld [vmem:[#allocation43_spill] sm:$0xff] }
 0x1a2   :  { %v361_v31 = vmax.f32 %v1236_v32, %v2680_v44  ;;  %v2696_v5 = vld [vmem:[#allocation51_spill] sm:$0xff] }
 0x1a3   :  { %928 = vst.msk [vmem:[%s2458_s1 + $0xb8] sm:$0xff] %vm904_vm0, %v863_v16  ;;  %927 = vst.msk [vmem:[%s2458_s1 + $0xb0] sm:$0xff] %vm904_vm0, %v862_v0  ;;  %v2682_v16 = vld [vmem:[#allocation103_spill] sm:$0xff] }
 0x1a4   :  { %v699_v24 = vpop.permute.xlu1 %698  ;;  %v697_v6 = vpop.permute.xlu0 %696  ;;  %v617_v0 = vmax.f32 %v361_v31, %v2682_v16  ;;  %v2698_v54 = vld [vmem:[#allocation111_spill] sm:$0xff]  ;;  %v2700_v31 = vld [vmem:[#allocation53_spill] sm:$0xff] }
 0x1a5   :  { %v865_v46 = vmax.f32 %v609_v17, %v699_v24  ;;  %v864_v49 = vmax.f32 %v608_v53, %v697_v6  ;;  %v616_v17 = vmax.f32 %v360_v23, %v2683_v11  ;;  %v2684_v53 = vld [vmem:[#allocation45_spill] sm:$0xff]  ;;  %v2685_v24 = vld [vmem:[#allocation46_spill] sm:$0xff]  ;;  %v370_v23 = vmax.f32 %v1311_v43, %v2701_v48  ;;  %v976_v43 = vld [vmem:[%s2457_s0 + $0x168] sm:$0xff] }
 0x1a6   :  { %v363_v33 = vmax.f32 %v1250_v34, %v2684_v53  ;;  %v362_v6 = vmax.f32 %v1255_v35, %v2685_v24  ;;  %v2702_v16 = vld [vmem:[#allocation113_spill] sm:$0xff]  ;;  %v2703_v11 = vld [vmem:[#allocation114_spill] sm:$0xff]  ;;  %v2705_v24 = vld [vmem:[#allocation56_spill] sm:$0xff] }
 0x1a7   :  { %930 = vst.msk [vmem:[%s2458_s1 + $0xc8] sm:$0xff] %vm904_vm0, %v865_v46  ;;  %929 = vst.msk [vmem:[%s2458_s1 + $0xc0] sm:$0xff] %vm904_vm0, %v864_v49  ;;  %v2687_v46 = vld [vmem:[#allocation106_spill] sm:$0xff] }
 0x1a8   :  { %v703_v26 = vpop.permute.xlu1 %702  ;;  %v701_v1 = vpop.permute.xlu0 %700  ;;  %v619_v63 = vmax.f32 %v363_v33, %v2686_v61  ;;  %v618_v49 = vmax.f32 %v362_v6, %v2687_v46  ;;  %v977_v33 = vld [vmem:[%s2457_s0 + $0x160] sm:$0xff]  ;;  %v2706_v61 = vld [vmem:[#allocation115_spill] sm:$0xff]  ;;  %v2707_v46 = vld [vmem:[#allocation116_spill] sm:$0xff] }
 0x1a9   :  { %v867_v45 = vmax.f32 %v611_v12, %v703_v26  ;;  %v866_v50 = vmax.f32 %v610_v19, %v701_v1  ;;  %v2688_v12 = vld [vmem:[#allocation47_spill] sm:$0xff]  ;;  %v364_v19 = vmax.f32 %v1269_v37, %v2689_v51  ;;  %v372_v6 = vmax.f32 %v977_v33, %v2705_v24 }
 0x1aa   :  { %v365_v35 = vmax.f32 %v1264_v36, %v2688_v12  ;;  %v978_v12 = vld [vmem:[%s2457_s0 + $0x178] sm:$0xff] }
 0x1ab   :  { %932 = vst.msk [vmem:[%s2458_s1 + $0xd8] sm:$0xff] %vm904_vm0, %v867_v45  ;;  %931 = vst.msk [vmem:[%s2458_s1 + $0xd0] sm:$0xff] %vm904_vm0, %v866_v50  ;;  %v620_v52 = vmax.f32 %v364_v19, %v2691_v57  ;;  %v2692_v50 = vld [vmem:[#allocation49_spill] sm:$0xff]  ;;  %v979_v19 = vld [vmem:[%s2457_s0 + $0x170] sm:$0xff] }
 0x1ac   :  { %v707_v28 = vpop.permute.xlu1 %706  ;;  %v705_v9 = vpop.permute.xlu0 %704  ;;  %v621_v27 = vmax.f32 %v365_v35, %v2690_v13  ;;  %v367_v37 = vmax.f32 %v1278_v38, %v2692_v50  ;;  %v2708_v35 = vld [vmem:[#allocation57_spill] sm:$0xff] }
 0x1ad   :  { %v869_v62 = vmax.f32 %v613_v58, %v707_v28  ;;  %v868_v15 = vmax.f32 %v612_v4, %v705_v9  ;;  %v366_v58 = vmax.f32 %v1283_v39, %v2693_v8  ;;  %v2694_v28 = vld [vmem:[#allocation109_spill] sm:$0xff]  ;;  %v369_v39 = vmax.f32 %v1292_v40, %v2696_v5  ;;  %v980_v8 = vld [vmem:[%s2457_s0 + $0x188] sm:$0xff]  ;;  %v2715_v5 = vld [vmem:[#allocation120_spill] sm:$0xff] }
 0x1ae   :  { %v623_v9 = vmax.f32 %v367_v37, %v2694_v28  ;;  %v375_v51 = vmax.f32 %v978_v12, %v2708_v35  ;;  %v2710_v57 = vld [vmem:[#allocation117_spill] sm:$0xff]  ;;  %v2713_v28 = vld [vmem:[#allocation60_spill] sm:$0xff] }
 0x1af   :  { %934 = vst.msk [vmem:[%s2458_s1 + $0xe8] sm:$0xff] %vm904_vm0, %v869_v62  ;;  %933 = vst.msk [vmem:[%s2458_s1 + $0xe0] sm:$0xff] %vm904_vm0, %v868_v15  ;;  %v622_v29 = vmax.f32 %v366_v58, %v2695_v21  ;;  %v2697_v62 = vld [vmem:[#allocation52_spill] sm:$0xff]  ;;  %v2712_v58 = vld [vmem:[#allocation59_spill] sm:$0xff] }
 0x1b0   :  { %v711_v30 = vpop.permute.xlu1 %710  ;;  %v709_v22 = vpop.permute.xlu0 %708  ;;  %v368_v15 = vmax.f32 %v1297_v41, %v2697_v62  ;;  %v371_v41 = vmax.f32 %v1306_v42, %v2700_v31  ;;  %v2718_v31 = vld [vmem:[#allocation121_spill] sm:$0xff]  ;;  %v2725_v12 = vld [vmem:[#allocation124_spill] sm:$0xff] }
 0x1b1   :  { %v871_v10 = vmax.f32 %v615_v3, %v711_v30  ;;  %v870_v60 = vmax.f32 %v614_v56, %v709_v22  ;;  %v625_v56 = vmax.f32 %v369_v39, %v2698_v54  ;;  %v2699_v30 = vld [vmem:[#allocation112_spill] sm:$0xff] }
 0x1b2   :  { %v624_v22 = vmax.f32 %v368_v15, %v2699_v30  ;;  %v2717_v30 = vld [vmem:[#allocation62_spill] sm:$0xff] }
 0x1b3   :  { %936 = vst.msk [vmem:[%s2458_s1 + $0xf8] sm:$0xff] %vm904_vm0, %v871_v10  ;;  %935 = vst.msk [vmem:[%s2458_s1 + $0xf0] sm:$0xff] %vm904_vm0, %v870_v60 }
 0x1b4   :  { %v715_v32 = vpop.permute.xlu1 %714  ;;  %v713_v2 = vpop.permute.xlu0 %712 }
 0x1b5   :  { %v873_v7 = vmax.f32 %v617_v0, %v715_v32  ;;  %v872_v25 = vmax.f32 %v616_v17, %v713_v2  ;;  %v627_v0 = vmax.f32 %v371_v41, %v2702_v16  ;;  %v626_v17 = vmax.f32 %v370_v23, %v2703_v11  ;;  %v2704_v2 = vld [vmem:[#allocation55_spill] sm:$0xff]  ;;  %v2720_v11 = vld [vmem:[#allocation64_spill] sm:$0xff] }
 0x1b6   :  { %v373_v53 = vmax.f32 %v976_v43, %v2704_v2  ;;  %v2719_v16 = vld [vmem:[#allocation63_spill] sm:$0xff]  ;;  %v2721_v2 = vld [vmem:[#allocation122_spill] sm:$0xff] }
 0x1b7   :  { %938 = vst.msk [vmem:[%s2458_s1 + $0x108] sm:$0xff] %vm904_vm0, %v873_v7  ;;  %937 = vst.msk [vmem:[%s2458_s1 + $0x100] sm:$0xff] %vm904_vm0, %v872_v25 }
 0x1b8   :  { %v719_v34 = vpop.permute.xlu1 %718  ;;  %v717_v18 = vpop.permute.xlu0 %716 }
 0x1b9   :  { %v875_v26 = vmax.f32 %v619_v63, %v719_v34  ;;  %v874_v1 = vmax.f32 %v618_v49, %v717_v18  ;;  %v629_v63 = vmax.f32 %v373_v53, %v2706_v61  ;;  %v628_v49 = vmax.f32 %v372_v6, %v2707_v46  ;;  %v986_v6 = vld [vmem:[%s2457_s0 + $0x1b8] sm:$0xff]  ;;  %v2723_v61 = vld [vmem:[#allocation66_spill] sm:$0xff] }
 0x1bb   :  { %940 = vst.msk [vmem:[%s2458_s1 + $0x118] sm:$0xff] %vm904_vm0, %v875_v26  ;;  %939 = vst.msk [vmem:[%s2458_s1 + $0x110] sm:$0xff] %vm904_vm0, %v874_v1  ;;  %v2709_v26 = vld [vmem:[#allocation58_spill] sm:$0xff] }
 0x1bc   :  { %v723_v36 = vpop.permute.xlu1 %722  ;;  %v721_v45 = vpop.permute.xlu0 %720  ;;  %v374_v1 = vmax.f32 %v979_v19, %v2709_v26  ;;  %v988_v26 = vld [vmem:[%s2457_s0 + $0x1c8] sm:$0xff] }
 0x1bd   :  { %v877_v20 = vmax.f32 %v621_v27, %v723_v36  ;;  %v876_v4 = vmax.f32 %v620_v52, %v721_v45  ;;  %v631_v52 = vmax.f32 %v375_v51, %v2710_v57  ;;  %v2711_v36 = vld [vmem:[#allocation118_spill] sm:$0xff]  ;;  %v2727_v57 = vld [vmem:[#allocation68_spill] sm:$0xff] }
 0x1be   :  { %v630_v45 = vmax.f32 %v374_v1, %v2711_v36  ;;  %v2726_v1 = vld [vmem:[#allocation67_spill] sm:$0xff] }
 0x1bf   :  { %942 = vst.msk [vmem:[%s2458_s1 + $0x128] sm:$0xff] %vm904_vm0, %v877_v20  ;;  %941 = vst.msk [vmem:[%s2458_s1 + $0x120] sm:$0xff] %vm904_vm0, %v876_v4  ;;  %v377_v20 = vmax.f32 %v980_v8, %v2712_v58  ;;  %v981_v4 = vld [vmem:[%s2457_s0 + $0x180] sm:$0xff] }
 0x1c0   :  { %v727_v38 = vpop.permute.xlu1 %726  ;;  %v725_v14 = vpop.permute.xlu0 %724  ;;  %v2729_v8 = vld [vmem:[#allocation126_spill] sm:$0xff] }
 0x1c1   :  { %v879_v47 = vmax.f32 %v623_v9, %v727_v38  ;;  %v878_v3 = vmax.f32 %v622_v29, %v725_v14  ;;  %v376_v9 = vmax.f32 %v981_v4, %v2713_v28  ;;  %v2714_v38 = vld [vmem:[#allocation119_spill] sm:$0xff]  ;;  %v990_v28 = vld [vmem:[%s2457_s0 + $0x1d8] sm:$0xff] }
 0x1c2   :  { %v633_v14 = vmax.f32 %v377_v20, %v2714_v38  ;;  %v2731_v38 = vld [vmem:[#allocation70_spill] sm:$0xff] }
 0x1c3   :  { %944 = vst.msk [vmem:[%s2458_s1 + $0x138] sm:$0xff] %vm904_vm0, %v879_v47  ;;  %943 = vst.msk [vmem:[%s2458_s1 + $0x130] sm:$0xff] %vm904_vm0, %v878_v3  ;;  %v632_v39 = vmax.f32 %v376_v9, %v2715_v5  ;;  %v982_v47 = vld [vmem:[%s2457_s0 + $0x198] sm:$0xff] }
 0x1c4   :  { %v731_v40 = vpop.permute.xlu1 %730  ;;  %v729_v44 = vpop.permute.xlu0 %728  ;;  %v2716_v3 = vld [vmem:[#allocation61_spill] sm:$0xff] }
 0x1c5   :  { %v881_v10 = vmax.f32 %v625_v56, %v731_v40  ;;  %v880_v60 = vmax.f32 %v624_v22, %v729_v44  ;;  %v379_v54 = vmax.f32 %v982_v47, %v2716_v3  ;;  %v983_v56 = vld [vmem:[%s2457_s0 + $0x190] sm:$0xff]  ;;  %v2730_v9 = vld [vmem:[#allocation69_spill] sm:$0xff] }
 0x1c6   :  { %v378_v22 = vmax.f32 %v983_v56, %v2717_v30  ;;  %v2733_v47 = vld [vmem:[#allocation128_spill] sm:$0xff]  ;;  %v992_v30 = vld [vmem:[%s2457_s0 + $0x1e8] sm:$0xff] }
 0x1c7   :  { %946 = vst.msk [vmem:[%s2458_s1 + $0x148] sm:$0xff] %vm904_vm0, %v881_v10  ;;  %945 = vst.msk [vmem:[%s2458_s1 + $0x140] sm:$0xff] %vm904_vm0, %v880_v60  ;;  %v635_v41 = vmax.f32 %v379_v54, %v2718_v31  ;;  %v984_v60 = vld [vmem:[%s2457_s0 + $0x1a8] sm:$0xff]  ;;  %v2735_v31 = vld [vmem:[#allocation72_spill] sm:$0xff] }
 0x1c8   :  { %v735_v42 = vpop.permute.xlu1 %734  ;;  %v733_v32 = vpop.permute.xlu0 %732  ;;  %v634_v48 = vmax.f32 %v378_v22, %v1903_v55  ;;  %v985_v55 = vld [vmem:[%s2457_s0 + $0x1a0] sm:$0xff]  ;;  %v2734_v22 = vld [vmem:[#allocation71_spill] sm:$0xff] }
 0x1c9   :  { %v883_v7 = vmax.f32 %v627_v0, %v735_v42  ;;  %v882_v25 = vmax.f32 %v626_v17, %v733_v32  ;;  %v381_v0 = vmax.f32 %v984_v60, %v2719_v16  ;;  %v380_v17 = vmax.f32 %v985_v55, %v2720_v11  ;;  %v2737_v16 = vld [vmem:[#allocation129_spill] sm:$0xff] }
 0x1cb   :  { %948 = vst.msk [vmem:[%s2458_s1 + $0x158] sm:$0xff] %vm904_vm0, %v883_v7  ;;  %947 = vst.msk [vmem:[%s2458_s1 + $0x150] sm:$0xff] %vm904_vm0, %v882_v25  ;;  %v637_v43 = vmax.f32 %v381_v0, %v1909_v59  ;;  %v636_v53 = vmax.f32 %v380_v17, %v2721_v2  ;;  %v2722_v7 = vld [vmem:[#allocation65_spill] sm:$0xff]  ;;  %v987_v25 = vld [vmem:[%s2457_s0 + $0x1b0] sm:$0xff] }
 0x1cc   :  { %v739_v34 = vpop.permute.xlu1 %738  ;;  %v737_v18 = vpop.permute.xlu0 %736  ;;  %v383_v59 = vmax.f32 %v986_v6, %v2722_v7  ;;  %v994_v17 = vld [vmem:[%s2457_s0 + $0x1f8] sm:$0xff]  ;;  %v2739_v2 = vld [vmem:[#allocation74_spill] sm:$0xff]  ;;  %v2740_v6 = vld [vmem:[#allocation4_spill] sm:$0xff] }
 0x1cd   :  { %v885_v13 = vmax.f32 %v629_v63, %v739_v34  ;;  %v884_v27 = vmax.f32 %v628_v49, %v737_v18  ;;  %v382_v63 = vmax.f32 %v987_v25, %v2723_v61  ;;  %v2724_v34 = vld [vmem:[#allocation123_spill] sm:$0xff] }
 0x1ce   :  { %v639_v18 = vmax.f32 %v383_v59, %v2724_v34  ;;  %v2741_v59 = vld [vmem:[#allocation5_spill] sm:$0xff] }
 0x1cf   :  { %950 = vst.msk [vmem:[%s2458_s1 + $0x168] sm:$0xff] %vm904_vm0, %v885_v13  ;;  %949 = vst.msk [vmem:[%s2458_s1 + $0x160] sm:$0xff] %vm904_vm0, %v884_v27  ;;  %v638_v35 = vmax.f32 %v382_v63, %v2725_v12  ;;  %v385_v13 = vmax.f32 %v988_v26, %v2726_v1  ;;  %v989_v27 = vld [vmem:[%s2457_s0 + $0x1c0] sm:$0xff] }
 0x1d0   :  { %v743_v50 = vpop.permute.xlu1 %742  ;;  %v741_v37 = vpop.permute.xlu0 %740 }
 0x1d1   :  { %v887_v21 = vmax.f32 %v631_v52, %v743_v50  ;;  %v886_v29 = vmax.f32 %v630_v45, %v741_v37  ;;  %v384_v52 = vmax.f32 %v989_v27, %v2727_v57  ;;  %v2728_v50 = vld [vmem:[#allocation125_spill] sm:$0xff] }
 0x1d2   :  { %v641_v37 = vmax.f32 %v385_v13, %v2728_v50 }
 0x1d3   :  { %952 = vst.msk [vmem:[%s2458_s1 + $0x178] sm:$0xff] %vm904_vm0, %v887_v21  ;;  %951 = vst.msk [vmem:[%s2458_s1 + $0x170] sm:$0xff] %vm904_vm0, %v886_v29  ;;  %v640_v58 = vmax.f32 %v384_v52, %v2729_v8  ;;  %v387_v21 = vmax.f32 %v990_v28, %v2730_v9  ;;  %v991_v29 = vld [vmem:[%s2457_s0 + $0x1d0] sm:$0xff] }
 0x1d4   :  { %v747_v62 = vpop.permute.xlu1 %746  ;;  %v745_v15 = vpop.permute.xlu0 %744 }
 0x1d5   :  { %v889_v40 = vmax.f32 %v633_v14, %v747_v62  ;;  %v888_v44 = vmax.f32 %v632_v39, %v745_v15  ;;  %v386_v14 = vmax.f32 %v991_v29, %v2731_v38  ;;  %v2732_v62 = vld [vmem:[#allocation127_spill] sm:$0xff] }
 0x1d6   :  { %v643_v15 = vmax.f32 %v387_v21, %v2732_v62 }
 0x1d7   :  { %954 = vst.msk [vmem:[%s2458_s1 + $0x188] sm:$0xff] %vm904_vm0, %v889_v40  ;;  %953 = vst.msk [vmem:[%s2458_s1 + $0x180] sm:$0xff] %vm904_vm0, %v888_v44  ;;  %v642_v3 = vmax.f32 %v386_v14, %v2733_v47  ;;  %v389_v40 = vmax.f32 %v992_v30, %v2734_v22  ;;  %v993_v44 = vld [vmem:[%s2457_s0 + $0x1e0] sm:$0xff] }
 0x1d8   :  { %v751_v23 = vpop.permute.xlu1 %750  ;;  %v749_v10 = vpop.permute.xlu0 %748 }
 0x1d9   :  { %v891_v42 = vmax.f32 %v635_v41, %v751_v23  ;;  %v890_v32 = vmax.f32 %v634_v48, %v749_v10  ;;  %v388_v41 = vmax.f32 %v993_v44, %v2735_v31  ;;  %v2736_v10 = vld [vmem:[#allocation3_spill] sm:$0xff] }
 0x1da   :  { %v645_v60 = vmax.f32 %v389_v40, %v2736_v10 }
 0x1db   :  { %956 = vst.msk [vmem:[%s2458_s1 + $0x198] sm:$0xff] %vm904_vm0, %v891_v42  ;;  %955 = vst.msk [vmem:[%s2458_s1 + $0x190] sm:$0xff] %vm904_vm0, %v890_v32  ;;  %v644_v0 = vmax.f32 %v388_v41, %v2737_v16  ;;  %v2738_v42 = vld [vmem:[#allocation73_spill] sm:$0xff] }
 0x1dc   :  { %v755_v33 = vpop.permute.xlu1 %754  ;;  %v753_v24 = vpop.permute.xlu0 %752  ;;  %v391_v32 = vmax.f32 %v994_v17, %v2738_v42 }
 0x1dd   :  { %v893_v46 = vmax.f32 %v637_v43, %v755_v33  ;;  %v892_v49 = vmax.f32 %v636_v53, %v753_v24  ;;  %v995_v43 = vld [vmem:[%s2457_s0 + $0x1f0] sm:$0xff] }
 0x1de   :  { %v390_v53 = vmax.f32 %v995_v43, %v2739_v2  ;;  %v647_v7 = vmax.f32 %v391_v32, %v2740_v6 }
 0x1df   :  { %958 = vst.msk [vmem:[%s2458_s1 + $0x1a8] sm:$0xff] %vm904_vm0, %v893_v46  ;;  %957 = vst.msk [vmem:[%s2458_s1 + $0x1a0] sm:$0xff] %vm904_vm0, %v892_v49 }
 0x1e0   :  { %v759_v51 = vpop.permute.xlu1 %758  ;;  %v757_v19 = vpop.permute.xlu0 %756  ;;  %v646_v25 = vmax.f32 %v390_v53, %v2741_v59 }
 0x1e1   :  { %v895_v36 = vmax.f32 %v639_v18, %v759_v51  ;;  %v894_v45 = vmax.f32 %v638_v35, %v757_v19 }
 0x1e3   :  { %960 = vst.msk [vmem:[%s2458_s1 + $0x1b8] sm:$0xff] %vm904_vm0, %v895_v36  ;;  %959 = vst.msk [vmem:[%s2458_s1 + $0x1b0] sm:$0xff] %vm904_vm0, %v894_v45 }
 0x1e4   :  { %v763_v20 = vpop.permute.xlu1 %762  ;;  %v761_v4 = vpop.permute.xlu0 %760 }
 0x1e5   :  { %v897_v5 = vmax.f32 %v641_v37, %v763_v20  ;;  %v896_v39 = vmax.f32 %v640_v58, %v761_v4 }
 0x1e7   :  { %962 = vst.msk [vmem:[%s2458_s1 + $0x1c8] sm:$0xff] %vm904_vm0, %v897_v5  ;;  %961 = vst.msk [vmem:[%s2458_s1 + $0x1c0] sm:$0xff] %vm904_vm0, %v896_v39 }
 0x1e8   :  { %v767_v54 = vpop.permute.xlu1 %766  ;;  %v765_v56 = vpop.permute.xlu0 %764 }
 0x1e9   :  { %v899_v48 = vmax.f32 %v643_v15, %v767_v54  ;;  %v898_v23 = vmax.f32 %v642_v3, %v765_v56 }
 0x1eb   :  { %964 = vst.msk [vmem:[%s2458_s1 + $0x1d8] sm:$0xff] %vm904_vm0, %v899_v48  ;;  %963 = vst.msk [vmem:[%s2458_s1 + $0x1d0] sm:$0xff] %vm904_vm0, %v898_v23 }
 0x1ec   :  { %v771_v55 = vpop.permute.xlu1 %770  ;;  %v769_v11 = vpop.permute.xlu0 %768 }
 0x1ed   :  { %v901_v33 = vmax.f32 %v645_v60, %v771_v55  ;;  %v900_v24 = vmax.f32 %v644_v0, %v769_v11 }
 0x1ef   :  { %966 = vst.msk [vmem:[%s2458_s1 + $0x1e8] sm:$0xff] %vm904_vm0, %v901_v33  ;;  %965 = vst.msk [vmem:[%s2458_s1 + $0x1e0] sm:$0xff] %vm904_vm0, %v900_v24 }
 0x1f0   :  { %v775_v61 = vpop.permute.xlu1 %774  ;;  %v773_v63 = vpop.permute.xlu0 %772 }
 0x1f1   :  { %v903_v46 = vmax.f32 %v647_v7, %v775_v61  ;;  %v902_v49 = vmax.f32 %v646_v25, %v773_v63 }
 0x1f3   :  { %968 = vst.msk [vmem:[%s2458_s1 + $0x1f8] sm:$0xff] %vm904_vm0, %v903_v46  ;;  %967 = vst.msk [vmem:[%s2458_s1 + $0x1f0] sm:$0xff] %vm904_vm0, %v902_v49 }

// kernel: _lambda_.31
= control target key start
LH: loop header
LB: loop body
LE: loop exit
PB: predicated region body
PF: predicated region fallthrough
CT: control target
= control target key end

     0   :  { %vm282_vm0 = vcmask 588800   ;;  %vm379_vm1 = vcmask 1043456   ;;  %vm736_vm2 = vcmask 130048   ;;  %s1523_s1 = inlined_call_operand.vmem [shape: bf16[72,16], index: 1, kind: input, shape index: {}]   ;;  %s1524_s0 = inlined_call_operand.vmem [shape: bf16[512,72], index: 0, kind: input, shape index: {}]   ;;  %s1525_s2 = inlined_call_operand.vmem [shape: f32[1,16], index: 2, kind: input, shape index: {}]   ;;  %s1526_s3 = inlined_call_operand.vmem [shape: f32[512,16], index: 3, kind: output, shape index: {}]  }
   0x1   :  { %v998_v0 = vld [vmem:[%s1523_s1] sm:$0xff]   ;;  %v999_v1 = vld [vmem:[%s1523_s1 + $0x8] sm:$0xff]   ;;  %v1000_v2 = vld [vmem:[%s1523_s1 + $0x10] sm:$0xff]  }
   0x2   :  { %912 = vmatprep.subr.bf16.mxu0 %v998_v0  ;;  %986 = vmatprep.subr.bf16.mxu1 %v998_v0  ;;  %v1003_v3 = vld [vmem:[%s1524_s0] sm:$0xff]   ;;  %v1001_v5 = vld [vmem:[%s1523_s1 + $0x18] sm:$0xff]   ;;  %v1005_v8 = vld [vmem:[%s1524_s0 + $0x8] sm:$0xff]  }
   0x3   :  { %913 = vmatpush3.bf16.msra.mxu0 %v998_v0  ;;  %991 = vmatpush3.bf16.msra.mxu1 %v998_v0  ;;  %v1004_v4 = vld [vmem:[%s1524_s0 + $0x80] sm:$0xff]   ;;  %v1006_v9 = vld [vmem:[%s1524_s0 + $0x88] sm:$0xff]   ;;  %v1007_v10 = vld [vmem:[%s1524_s0 + $0x10] sm:$0xff]  }
   0x4   :  { %914 = vmatprep.subr.bf16.mxu0 %v999_v1  ;;  %987 = vmatprep.subr.bf16.mxu1 %v999_v1  ;;  %v1002_v6 = vld [vmem:[%s1523_s1 + $0x20] ss:$0 sps:$4 sm:$0xff]   ;;  %v1008_v11 = vld [vmem:[%s1524_s0 + $0x90] sm:$0xff]   ;;  %v1009_v12 = vld [vmem:[%s1524_s0 + $0x18] sm:$0xff]  }
   0x5   :  { %922 = vmatprep.mubr.msk.bf16.mxu0 %vm282_vm0, %v1003_v3  ;;  %954 = vmatprep.mubr.msk.bf16.mxu1 %vm282_vm0, %v1004_v4  ;;  %v381_v7 = vsel %vm379_vm1, %v1002_v6, 0  ;;  %v1010_v13 = vld [vmem:[%s1524_s0 + $0x98] sm:$0xff]   ;;  %v1011_v14 = vld [vmem:[%s1524_s0 + $0x20] sm:$0xff]   ;;  %v1013_v16 = vld [vmem:[%s1524_s0 + $0x28] sm:$0xff]  }
   0x6   :  { %v1012_v15 = vld [vmem:[%s1524_s0 + $0xa0] sm:$0xff]   ;;  %v1014_v17 = vld [vmem:[%s1524_s0 + $0xa8] sm:$0xff]   ;;  %v1015_v18 = vld [vmem:[%s1524_s0 + $0x30] sm:$0xff]  }
   0x7   :  { %915 = vmatpush3.bf16.msra.mxu0 %v999_v1  ;;  %992 = vmatpush3.bf16.msra.mxu1 %v999_v1  ;;  %v1016_v19 = vld [vmem:[%s1524_s0 + $0xb0] sm:$0xff]   ;;  %v1017_v20 = vld [vmem:[%s1524_s0 + $0x38] sm:$0xff]   ;;  %v1019_v22 = vld [vmem:[%s1524_s0 + $0x40] sm:$0xff]  }
   0x8   :  { %916 = vmatprep.subr.bf16.mxu0 %v1000_v2  ;;  %988 = vmatprep.subr.bf16.mxu1 %v1000_v2  ;;  %v1018_v21 = vld [vmem:[%s1524_s0 + $0xb8] sm:$0xff]   ;;  %v1020_v23 = vld [vmem:[%s1524_s0 + $0xc0] sm:$0xff]   ;;  %v1021_v24 = vld [vmem:[%s1524_s0 + $0x48] sm:$0xff]  }
   0x9   :  { %v1022_v25 = vld [vmem:[%s1524_s0 + $0xc8] sm:$0xff]   ;;  %v1023_v26 = vld [vmem:[%s1524_s0 + $0x50] sm:$0xff]   ;;  %v1025_v28 = vld [vmem:[%s1524_s0 + $0x58] sm:$0xff]  }
   0xa   :  { %v1024_v27 = vld [vmem:[%s1524_s0 + $0xd0] sm:$0xff]   ;;  %v1026_v29 = vld [vmem:[%s1524_s0 + $0xd8] sm:$0xff]   ;;  %v1027_v30 = vld [vmem:[%s1524_s0 + $0x60] sm:$0xff]  }
   0xb   :  { %917 = vmatpush3.bf16.msra.mxu0 %v1000_v2  ;;  %993 = vmatpush3.bf16.msra.mxu1 %v1000_v2  ;;  %v1028_v31 = vld [vmem:[%s1524_s0 + $0xe0] sm:$0xff]   ;;  %v1029_v32 = vld [vmem:[%s1524_s0 + $0x68] sm:$0xff]   ;;  %v1031_v34 = vld [vmem:[%s1524_s0 + $0x70] sm:$0xff]  }
   0xc   :  { %918 = vmatprep.subr.bf16.mxu0 %v1001_v5  ;;  %989 = vmatprep.subr.bf16.mxu1 %v1001_v5  ;;  %v1030_v33 = vld [vmem:[%s1524_s0 + $0xe8] sm:$0xff]   ;;  %v1032_v35 = vld [vmem:[%s1524_s0 + $0xf0] sm:$0xff]   ;;  %v1033_v36 = vld [vmem:[%s1524_s0 + $0x78] sm:$0xff]  }
   0xd   :  { %v1034_v37 = vld [vmem:[%s1524_s0 + $0xf8] sm:$0xff]   ;;  %v1201_v38 = vld [vmem:[%s1525_s2] ss:$0 sm:$0xff] }
   0xf   :  { %919 = vmatpush3.bf16.msra.mxu0 %v1001_v5  ;;  %994 = vmatpush3.bf16.msra.mxu1 %v1001_v5 }
  0x10   :  { %996 = vmatprep.subr.msk.bf16.mxu0 %vm379_vm1, %v1002_v6  ;;  %997 = vmatprep.subr.msk.bf16.mxu1 %vm379_vm1, %v1002_v6 }
  0x13   :  { %921 = vmatpush3.bf16.msra.mxu0 %v381_v7  ;;  %995 = vmatpush3.bf16.msra.mxu1 %v381_v7 }
  0x16   :  { %923 = vmatmul.mubr.msk.bf16.vlgmr.msra.gmra.mrb[0].mxu0 %vm282_vm0, %v1005_v8  ;;  %955 = vmatmul.mubr.msk.bf16.vlgmr.msra.gmra.mrb[0].mxu1 %vm282_vm0, %v1006_v9 }
  0x17   :  { %926 = vmatprep.mubr.msk.bf16.mxu0 %vm282_vm0, %v1007_v10  ;;  %958 = vmatprep.mubr.msk.bf16.mxu1 %vm282_vm0, %v1008_v11 }
  0x1e   :  { %927 = vmatmul.mubr.msk.bf16.gmra.mrb[4].mxu0 %vm282_vm0, %v1009_v12  ;;  %959 = vmatmul.mubr.msk.bf16.gmra.mrb[4].mxu1 %vm282_vm0, %v1010_v13 }
  0x1f   :  { %930 = vmatprep.mubr.msk.bf16.mxu0 %vm282_vm0, %v1011_v14  ;;  %962 = vmatprep.mubr.msk.bf16.mxu1 %vm282_vm0, %v1012_v15 }
  0x26   :  { %931 = vmatmul.mubr.msk.bf16.gmra.mrb[8].mxu0 %vm282_vm0, %v1013_v16  ;;  %963 = vmatmul.mubr.msk.bf16.gmra.mrb[8].mxu1 %vm282_vm0, %v1014_v17 }
  0x27   :  { %934 = vmatprep.mubr.msk.bf16.mxu0 %vm282_vm0, %v1015_v18  ;;  %966 = vmatprep.mubr.msk.bf16.mxu1 %vm282_vm0, %v1016_v19 }
  0x2e   :  { %935 = vmatmul.mubr.msk.bf16.gmra.mrb[12].mxu0 %vm282_vm0, %v1017_v20  ;;  %967 = vmatmul.mubr.msk.bf16.gmra.mrb[12].mxu1 %vm282_vm0, %v1018_v21 }
  0x2f   :  { %938 = vmatprep.mubr.msk.bf16.mxu0 %vm282_vm0, %v1019_v22  ;;  %970 = vmatprep.mubr.msk.bf16.mxu1 %vm282_vm0, %v1020_v23 }
  0x36   :  { %939 = vmatmul.mubr.msk.bf16.gmra.mrb[16].mxu0 %vm282_vm0, %v1021_v24  ;;  %971 = vmatmul.mubr.msk.bf16.gmra.mrb[16].mxu1 %vm282_vm0, %v1022_v25 }
  0x37   :  { %942 = vmatprep.mubr.msk.bf16.mxu0 %vm282_vm0, %v1023_v26  ;;  %974 = vmatprep.mubr.msk.bf16.mxu1 %vm282_vm0, %v1024_v27 }
  0x3e   :  { %943 = vmatmul.mubr.msk.bf16.gmra.mrb[20].mxu0 %vm282_vm0, %v1025_v28  ;;  %975 = vmatmul.mubr.msk.bf16.gmra.mrb[20].mxu1 %vm282_vm0, %v1026_v29 }
  0x3f   :  { %946 = vmatprep.mubr.msk.bf16.mxu0 %vm282_vm0, %v1027_v30  ;;  %978 = vmatprep.mubr.msk.bf16.mxu1 %vm282_vm0, %v1028_v31 }
  0x46   :  { %947 = vmatmul.mubr.msk.bf16.gmra.mrb[24].mxu0 %vm282_vm0, %v1029_v32  ;;  %979 = vmatmul.mubr.msk.bf16.gmra.mrb[24].mxu1 %vm282_vm0, %v1030_v33 }
  0x47   :  { %950 = vmatprep.mubr.msk.bf16.mxu0 %vm282_vm0, %v1031_v34  ;;  %982 = vmatprep.mubr.msk.bf16.mxu1 %vm282_vm0, %v1032_v35 }
  0x4e   :  { %951 = vmatmul.mubr.msk.bf16.gmra.mrb[28].mxu0 %vm282_vm0, %v1033_v36  ;;  %983 = vmatmul.mubr.msk.bf16.gmra.mrb[28].mxu1 %vm282_vm0, %v1034_v37 }
  0xe9   :  { %v924_v39 = vpop.f32.mrb[0].mxu0  ;;  %v956_v40 = vpop.f32.mrb[0].mxu1 }
  0xea   :  { %v426_v41 = vadd.f32 %v924_v39, %v1201_v38  ;;  %v554_v42 = vadd.f32 %v956_v40, %v1201_v38  ;;  %v417_v43 = vpop.f32.mrb[1].mxu0  ;;  %v545_v44 = vpop.f32.mrb[1].mxu1 }
  0xeb   :  { %v418_v45 = vadd.f32 %v1201_v38, %v417_v43  ;;  %v546_v46 = vadd.f32 %v1201_v38, %v545_v44  ;;  %v925_v47 = vpop.f32.mrb[2].mxu0  ;;  %v957_v48 = vpop.f32.mrb[2].mxu1 }
  0xec   :  { %v674_v49 = vmax.f32 %v426_v41, 0.0  ;;  %v706_v50 = vmax.f32 %v554_v42, 0.0  ;;  %v429_v51 = vadd.f32 %v925_v47, %v1201_v38  ;;  %v557_v52 = vadd.f32 %v957_v48, %v1201_v38  ;;  %v420_v53 = vpop.f32.mrb[3].mxu0  ;;  %v548_v54 = vpop.f32.mrb[3].mxu1 }
  0xed   :  { %v672_v55 = vmax.f32 %v418_v45, 0.0  ;;  %v704_v56 = vmax.f32 %v546_v46, 0.0  ;;  %v421_v57 = vadd.f32 %v1201_v38, %v420_v53  ;;  %v549_v58 = vadd.f32 %v1201_v38, %v548_v54 }
  0xee   :  { %739 = vst.msk [vmem:[%s1526_s3 + $0x10] sm:$0xff] %vm736_vm2, %v674_v49  ;;  %771 = vst.msk [vmem:[%s1526_s3 + $0x110] sm:$0xff] %vm736_vm2, %v706_v50  ;;  %v675_v59 = vmax.f32 %v429_v51, 0.0  ;;  %v707_v60 = vmax.f32 %v557_v52, 0.0 }
  0xef   :  { %737 = vst.msk [vmem:[%s1526_s3] sm:$0xff] %vm736_vm2, %v672_v55  ;;  %769 = vst.msk [vmem:[%s1526_s3 + $0x100] sm:$0xff] %vm736_vm2, %v704_v56  ;;  %v673_v61 = vmax.f32 %v421_v57, 0.0  ;;  %v705_v62 = vmax.f32 %v549_v58, 0.0 }
  0xf0   :  { %740 = vst.msk [vmem:[%s1526_s3 + $0x18] sm:$0xff] %vm736_vm2, %v675_v59  ;;  %772 = vst.msk [vmem:[%s1526_s3 + $0x118] sm:$0xff] %vm736_vm2, %v707_v60 }
  0xf1   :  { %738 = vst.msk [vmem:[%s1526_s3 + $0x8] sm:$0xff] %vm736_vm2, %v673_v61  ;;  %770 = vst.msk [vmem:[%s1526_s3 + $0x108] sm:$0xff] %vm736_vm2, %v705_v62  ;;  %v928_v63 = vpop.f32.mrb[4].mxu0  ;;  %v960_v0 = vpop.f32.mrb[4].mxu1 }
  0xf2   :  { %v442_v1 = vadd.f32 %v928_v63, %v1201_v38  ;;  %v570_v2 = vadd.f32 %v960_v0, %v1201_v38  ;;  %v433_v3 = vpop.f32.mrb[5].mxu0  ;;  %v561_v4 = vpop.f32.mrb[5].mxu1 }
  0xf3   :  { %v434_v5 = vadd.f32 %v1201_v38, %v433_v3  ;;  %v562_v6 = vadd.f32 %v1201_v38, %v561_v4  ;;  %v929_v7 = vpop.f32.mrb[6].mxu0  ;;  %v961_v8 = vpop.f32.mrb[6].mxu1 }
  0xf4   :  { %v678_v9 = vmax.f32 %v442_v1, 0.0  ;;  %v710_v10 = vmax.f32 %v570_v2, 0.0  ;;  %v445_v11 = vadd.f32 %v929_v7, %v1201_v38  ;;  %v573_v12 = vadd.f32 %v961_v8, %v1201_v38  ;;  %v436_v13 = vpop.f32.mrb[7].mxu0  ;;  %v564_v14 = vpop.f32.mrb[7].mxu1 }
  0xf5   :  { %v676_v15 = vmax.f32 %v434_v5, 0.0  ;;  %v708_v16 = vmax.f32 %v562_v6, 0.0  ;;  %v437_v17 = vadd.f32 %v1201_v38, %v436_v13  ;;  %v565_v18 = vadd.f32 %v1201_v38, %v564_v14 }
  0xf6   :  { %743 = vst.msk [vmem:[%s1526_s3 + $0x30] sm:$0xff] %vm736_vm2, %v678_v9  ;;  %775 = vst.msk [vmem:[%s1526_s3 + $0x130] sm:$0xff] %vm736_vm2, %v710_v10  ;;  %v679_v19 = vmax.f32 %v445_v11, 0.0  ;;  %v711_v20 = vmax.f32 %v573_v12, 0.0 }
  0xf7   :  { %741 = vst.msk [vmem:[%s1526_s3 + $0x20] sm:$0xff] %vm736_vm2, %v676_v15  ;;  %773 = vst.msk [vmem:[%s1526_s3 + $0x120] sm:$0xff] %vm736_vm2, %v708_v16  ;;  %v677_v21 = vmax.f32 %v437_v17, 0.0  ;;  %v709_v22 = vmax.f32 %v565_v18, 0.0 }
  0xf8   :  { %744 = vst.msk [vmem:[%s1526_s3 + $0x38] sm:$0xff] %vm736_vm2, %v679_v19  ;;  %776 = vst.msk [vmem:[%s1526_s3 + $0x138] sm:$0xff] %vm736_vm2, %v711_v20 }
  0xf9   :  { %742 = vst.msk [vmem:[%s1526_s3 + $0x28] sm:$0xff] %vm736_vm2, %v677_v21  ;;  %774 = vst.msk [vmem:[%s1526_s3 + $0x128] sm:$0xff] %vm736_vm2, %v709_v22  ;;  %v932_v23 = vpop.f32.mrb[8].mxu0  ;;  %v964_v24 = vpop.f32.mrb[8].mxu1 }
  0xfa   :  { %v458_v25 = vadd.f32 %v932_v23, %v1201_v38  ;;  %v586_v26 = vadd.f32 %v964_v24, %v1201_v38  ;;  %v449_v27 = vpop.f32.mrb[9].mxu0  ;;  %v577_v28 = vpop.f32.mrb[9].mxu1 }
  0xfb   :  { %v450_v29 = vadd.f32 %v1201_v38, %v449_v27  ;;  %v578_v30 = vadd.f32 %v1201_v38, %v577_v28  ;;  %v933_v31 = vpop.f32.mrb[10].mxu0  ;;  %v965_v32 = vpop.f32.mrb[10].mxu1 }
  0xfc   :  { %v682_v33 = vmax.f32 %v458_v25, 0.0  ;;  %v714_v34 = vmax.f32 %v586_v26, 0.0  ;;  %v461_v35 = vadd.f32 %v933_v31, %v1201_v38  ;;  %v589_v36 = vadd.f32 %v965_v32, %v1201_v38  ;;  %v452_v37 = vpop.f32.mrb[11].mxu0  ;;  %v580_v39 = vpop.f32.mrb[11].mxu1 }
  0xfd   :  { %v680_v40 = vmax.f32 %v450_v29, 0.0  ;;  %v712_v41 = vmax.f32 %v578_v30, 0.0  ;;  %v453_v42 = vadd.f32 %v1201_v38, %v452_v37  ;;  %v581_v43 = vadd.f32 %v1201_v38, %v580_v39 }
  0xfe   :  { %747 = vst.msk [vmem:[%s1526_s3 + $0x50] sm:$0xff] %vm736_vm2, %v682_v33  ;;  %779 = vst.msk [vmem:[%s1526_s3 + $0x150] sm:$0xff] %vm736_vm2, %v714_v34  ;;  %v683_v44 = vmax.f32 %v461_v35, 0.0  ;;  %v715_v45 = vmax.f32 %v589_v36, 0.0 }
  0xff   :  { %745 = vst.msk [vmem:[%s1526_s3 + $0x40] sm:$0xff] %vm736_vm2, %v680_v40  ;;  %777 = vst.msk [vmem:[%s1526_s3 + $0x140] sm:$0xff] %vm736_vm2, %v712_v41  ;;  %v681_v46 = vmax.f32 %v453_v42, 0.0  ;;  %v713_v47 = vmax.f32 %v581_v43, 0.0 }
 0x100   :  { %748 = vst.msk [vmem:[%s1526_s3 + $0x58] sm:$0xff] %vm736_vm2, %v683_v44  ;;  %780 = vst.msk [vmem:[%s1526_s3 + $0x158] sm:$0xff] %vm736_vm2, %v715_v45 }
 0x101   :  { %746 = vst.msk [vmem:[%s1526_s3 + $0x48] sm:$0xff] %vm736_vm2, %v681_v46  ;;  %778 = vst.msk [vmem:[%s1526_s3 + $0x148] sm:$0xff] %vm736_vm2, %v713_v47  ;;  %v936_v48 = vpop.f32.mrb[12].mxu0  ;;  %v968_v49 = vpop.f32.mrb[12].mxu1 }
 0x102   :  { %v474_v50 = vadd.f32 %v936_v48, %v1201_v38  ;;  %v602_v51 = vadd.f32 %v968_v49, %v1201_v38  ;;  %v465_v52 = vpop.f32.mrb[13].mxu0  ;;  %v593_v53 = vpop.f32.mrb[13].mxu1 }
 0x103   :  { %v466_v54 = vadd.f32 %v1201_v38, %v465_v52  ;;  %v594_v55 = vadd.f32 %v1201_v38, %v593_v53  ;;  %v937_v56 = vpop.f32.mrb[14].mxu0  ;;  %v969_v57 = vpop.f32.mrb[14].mxu1 }
 0x104   :  { %v686_v58 = vmax.f32 %v474_v50, 0.0  ;;  %v718_v59 = vmax.f32 %v602_v51, 0.0  ;;  %v477_v60 = vadd.f32 %v937_v56, %v1201_v38  ;;  %v605_v61 = vadd.f32 %v969_v57, %v1201_v38  ;;  %v468_v62 = vpop.f32.mrb[15].mxu0  ;;  %v596_v63 = vpop.f32.mrb[15].mxu1 }
 0x105   :  { %v684_v0 = vmax.f32 %v466_v54, 0.0  ;;  %v716_v1 = vmax.f32 %v594_v55, 0.0  ;;  %v469_v2 = vadd.f32 %v1201_v38, %v468_v62  ;;  %v597_v3 = vadd.f32 %v1201_v38, %v596_v63 }
 0x106   :  { %751 = vst.msk [vmem:[%s1526_s3 + $0x70] sm:$0xff] %vm736_vm2, %v686_v58  ;;  %783 = vst.msk [vmem:[%s1526_s3 + $0x170] sm:$0xff] %vm736_vm2, %v718_v59  ;;  %v687_v4 = vmax.f32 %v477_v60, 0.0  ;;  %v719_v5 = vmax.f32 %v605_v61, 0.0 }
 0x107   :  { %749 = vst.msk [vmem:[%s1526_s3 + $0x60] sm:$0xff] %vm736_vm2, %v684_v0  ;;  %781 = vst.msk [vmem:[%s1526_s3 + $0x160] sm:$0xff] %vm736_vm2, %v716_v1  ;;  %v685_v6 = vmax.f32 %v469_v2, 0.0  ;;  %v717_v7 = vmax.f32 %v597_v3, 0.0 }
 0x108   :  { %752 = vst.msk [vmem:[%s1526_s3 + $0x78] sm:$0xff] %vm736_vm2, %v687_v4  ;;  %784 = vst.msk [vmem:[%s1526_s3 + $0x178] sm:$0xff] %vm736_vm2, %v719_v5 }
 0x109   :  { %750 = vst.msk [vmem:[%s1526_s3 + $0x68] sm:$0xff] %vm736_vm2, %v685_v6  ;;  %782 = vst.msk [vmem:[%s1526_s3 + $0x168] sm:$0xff] %vm736_vm2, %v717_v7  ;;  %v940_v8 = vpop.f32.mrb[16].mxu0  ;;  %v972_v9 = vpop.f32.mrb[16].mxu1 }
 0x10a   :  { %v490_v10 = vadd.f32 %v940_v8, %v1201_v38  ;;  %v618_v11 = vadd.f32 %v972_v9, %v1201_v38  ;;  %v481_v12 = vpop.f32.mrb[17].mxu0  ;;  %v609_v13 = vpop.f32.mrb[17].mxu1 }
 0x10b   :  { %v482_v14 = vadd.f32 %v1201_v38, %v481_v12  ;;  %v610_v15 = vadd.f32 %v1201_v38, %v609_v13  ;;  %v941_v16 = vpop.f32.mrb[18].mxu0  ;;  %v973_v17 = vpop.f32.mrb[18].mxu1 }
 0x10c   :  { %v690_v18 = vmax.f32 %v490_v10, 0.0  ;;  %v722_v19 = vmax.f32 %v618_v11, 0.0  ;;  %v493_v20 = vadd.f32 %v941_v16, %v1201_v38  ;;  %v621_v21 = vadd.f32 %v973_v17, %v1201_v38  ;;  %v484_v22 = vpop.f32.mrb[19].mxu0  ;;  %v612_v23 = vpop.f32.mrb[19].mxu1 }
 0x10d   :  { %v688_v24 = vmax.f32 %v482_v14, 0.0  ;;  %v720_v25 = vmax.f32 %v610_v15, 0.0  ;;  %v485_v26 = vadd.f32 %v1201_v38, %v484_v22  ;;  %v613_v27 = vadd.f32 %v1201_v38, %v612_v23 }
 0x10e   :  { %755 = vst.msk [vmem:[%s1526_s3 + $0x90] sm:$0xff] %vm736_vm2, %v690_v18  ;;  %787 = vst.msk [vmem:[%s1526_s3 + $0x190] sm:$0xff] %vm736_vm2, %v722_v19  ;;  %v691_v28 = vmax.f32 %v493_v20, 0.0  ;;  %v723_v29 = vmax.f32 %v621_v21, 0.0 }
 0x10f   :  { %753 = vst.msk [vmem:[%s1526_s3 + $0x80] sm:$0xff] %vm736_vm2, %v688_v24  ;;  %785 = vst.msk [vmem:[%s1526_s3 + $0x180] sm:$0xff] %vm736_vm2, %v720_v25  ;;  %v689_v30 = vmax.f32 %v485_v26, 0.0  ;;  %v721_v31 = vmax.f32 %v613_v27, 0.0 }
 0x110   :  { %756 = vst.msk [vmem:[%s1526_s3 + $0x98] sm:$0xff] %vm736_vm2, %v691_v28  ;;  %788 = vst.msk [vmem:[%s1526_s3 + $0x198] sm:$0xff] %vm736_vm2, %v723_v29 }
 0x111   :  { %754 = vst.msk [vmem:[%s1526_s3 + $0x88] sm:$0xff] %vm736_vm2, %v689_v30  ;;  %786 = vst.msk [vmem:[%s1526_s3 + $0x188] sm:$0xff] %vm736_vm2, %v721_v31  ;;  %v944_v32 = vpop.f32.mrb[20].mxu0  ;;  %v976_v33 = vpop.f32.mrb[20].mxu1 }
 0x112   :  { %v506_v34 = vadd.f32 %v944_v32, %v1201_v38  ;;  %v634_v35 = vadd.f32 %v976_v33, %v1201_v38  ;;  %v497_v36 = vpop.f32.mrb[21].mxu0  ;;  %v625_v37 = vpop.f32.mrb[21].mxu1 }
 0x113   :  { %v498_v39 = vadd.f32 %v1201_v38, %v497_v36  ;;  %v626_v40 = vadd.f32 %v1201_v38, %v625_v37  ;;  %v945_v41 = vpop.f32.mrb[22].mxu0  ;;  %v977_v42 = vpop.f32.mrb[22].mxu1 }
 0x114   :  { %v694_v43 = vmax.f32 %v506_v34, 0.0  ;;  %v726_v44 = vmax.f32 %v634_v35, 0.0  ;;  %v509_v45 = vadd.f32 %v945_v41, %v1201_v38  ;;  %v637_v46 = vadd.f32 %v977_v42, %v1201_v38  ;;  %v500_v47 = vpop.f32.mrb[23].mxu0  ;;  %v628_v48 = vpop.f32.mrb[23].mxu1 }
 0x115   :  { %v692_v49 = vmax.f32 %v498_v39, 0.0  ;;  %v724_v50 = vmax.f32 %v626_v40, 0.0  ;;  %v501_v51 = vadd.f32 %v1201_v38, %v500_v47  ;;  %v629_v52 = vadd.f32 %v1201_v38, %v628_v48 }
 0x116   :  { %759 = vst.msk [vmem:[%s1526_s3 + $0xb0] sm:$0xff] %vm736_vm2, %v694_v43  ;;  %791 = vst.msk [vmem:[%s1526_s3 + $0x1b0] sm:$0xff] %vm736_vm2, %v726_v44  ;;  %v695_v53 = vmax.f32 %v509_v45, 0.0  ;;  %v727_v54 = vmax.f32 %v637_v46, 0.0 }
 0x117   :  { %757 = vst.msk [vmem:[%s1526_s3 + $0xa0] sm:$0xff] %vm736_vm2, %v692_v49  ;;  %789 = vst.msk [vmem:[%s1526_s3 + $0x1a0] sm:$0xff] %vm736_vm2, %v724_v50  ;;  %v693_v55 = vmax.f32 %v501_v51, 0.0  ;;  %v725_v56 = vmax.f32 %v629_v52, 0.0 }
 0x118   :  { %760 = vst.msk [vmem:[%s1526_s3 + $0xb8] sm:$0xff] %vm736_vm2, %v695_v53  ;;  %792 = vst.msk [vmem:[%s1526_s3 + $0x1b8] sm:$0xff] %vm736_vm2, %v727_v54 }
 0x119   :  { %758 = vst.msk [vmem:[%s1526_s3 + $0xa8] sm:$0xff] %vm736_vm2, %v693_v55  ;;  %790 = vst.msk [vmem:[%s1526_s3 + $0x1a8] sm:$0xff] %vm736_vm2, %v725_v56  ;;  %v948_v57 = vpop.f32.mrb[24].mxu0  ;;  %v980_v58 = vpop.f32.mrb[24].mxu1 }
 0x11a   :  { %v522_v59 = vadd.f32 %v948_v57, %v1201_v38  ;;  %v650_v60 = vadd.f32 %v980_v58, %v1201_v38  ;;  %v513_v61 = vpop.f32.mrb[25].mxu0  ;;  %v641_v62 = vpop.f32.mrb[25].mxu1 }
 0x11b   :  { %v514_v63 = vadd.f32 %v1201_v38, %v513_v61  ;;  %v642_v0 = vadd.f32 %v1201_v38, %v641_v62  ;;  %v949_v1 = vpop.f32.mrb[26].mxu0  ;;  %v981_v2 = vpop.f32.mrb[26].mxu1 }
 0x11c   :  { %v698_v3 = vmax.f32 %v522_v59, 0.0  ;;  %v730_v4 = vmax.f32 %v650_v60, 0.0  ;;  %v525_v5 = vadd.f32 %v949_v1, %v1201_v38  ;;  %v653_v6 = vadd.f32 %v981_v2, %v1201_v38  ;;  %v516_v7 = vpop.f32.mrb[27].mxu0  ;;  %v644_v8 = vpop.f32.mrb[27].mxu1 }
 0x11d   :  { %v696_v9 = vmax.f32 %v514_v63, 0.0  ;;  %v728_v10 = vmax.f32 %v642_v0, 0.0  ;;  %v517_v11 = vadd.f32 %v1201_v38, %v516_v7  ;;  %v645_v12 = vadd.f32 %v1201_v38, %v644_v8 }
 0x11e   :  { %763 = vst.msk [vmem:[%s1526_s3 + $0xd0] sm:$0xff] %vm736_vm2, %v698_v3  ;;  %795 = vst.msk [vmem:[%s1526_s3 + $0x1d0] sm:$0xff] %vm736_vm2, %v730_v4  ;;  %v699_v13 = vmax.f32 %v525_v5, 0.0  ;;  %v731_v14 = vmax.f32 %v653_v6, 0.0 }
 0x11f   :  { %761 = vst.msk [vmem:[%s1526_s3 + $0xc0] sm:$0xff] %vm736_vm2, %v696_v9  ;;  %793 = vst.msk [vmem:[%s1526_s3 + $0x1c0] sm:$0xff] %vm736_vm2, %v728_v10  ;;  %v697_v15 = vmax.f32 %v517_v11, 0.0  ;;  %v729_v16 = vmax.f32 %v645_v12, 0.0 }
 0x120   :  { %764 = vst.msk [vmem:[%s1526_s3 + $0xd8] sm:$0xff] %vm736_vm2, %v699_v13  ;;  %796 = vst.msk [vmem:[%s1526_s3 + $0x1d8] sm:$0xff] %vm736_vm2, %v731_v14 }
 0x121   :  { %762 = vst.msk [vmem:[%s1526_s3 + $0xc8] sm:$0xff] %vm736_vm2, %v697_v15  ;;  %794 = vst.msk [vmem:[%s1526_s3 + $0x1c8] sm:$0xff] %vm736_vm2, %v729_v16  ;;  %v952_v17 = vpop.f32.mrb[28].mxu0  ;;  %v984_v18 = vpop.f32.mrb[28].mxu1 }
 0x122   :  { %v538_v19 = vadd.f32 %v952_v17, %v1201_v38  ;;  %v666_v20 = vadd.f32 %v984_v18, %v1201_v38  ;;  %v529_v21 = vpop.f32.mrb[29].mxu0  ;;  %v657_v22 = vpop.f32.mrb[29].mxu1 }
 0x123   :  { %v530_v23 = vadd.f32 %v1201_v38, %v529_v21  ;;  %v658_v24 = vadd.f32 %v1201_v38, %v657_v22  ;;  %v953_v25 = vpop.f32.mrb[30].mxu0  ;;  %v985_v26 = vpop.f32.mrb[30].mxu1 }
 0x124   :  { %v702_v27 = vmax.f32 %v538_v19, 0.0  ;;  %v734_v28 = vmax.f32 %v666_v20, 0.0  ;;  %v541_v29 = vadd.f32 %v953_v25, %v1201_v38  ;;  %v669_v30 = vadd.f32 %v985_v26, %v1201_v38  ;;  %v532_v31 = vpop.f32.mrb[31].mxu0  ;;  %v660_v32 = vpop.f32.mrb[31].mxu1 }
 0x125   :  { %v700_v33 = vmax.f32 %v530_v23, 0.0  ;;  %v732_v34 = vmax.f32 %v658_v24, 0.0  ;;  %v533_v35 = vadd.f32 %v1201_v38, %v532_v31  ;;  %v661_v36 = vadd.f32 %v1201_v38, %v660_v32 }
 0x126   :  { %767 = vst.msk [vmem:[%s1526_s3 + $0xf0] sm:$0xff] %vm736_vm2, %v702_v27  ;;  %799 = vst.msk [vmem:[%s1526_s3 + $0x1f0] sm:$0xff] %vm736_vm2, %v734_v28  ;;  %v703_v37 = vmax.f32 %v541_v29, 0.0  ;;  %v735_v39 = vmax.f32 %v669_v30, 0.0 }
 0x127   :  { %765 = vst.msk [vmem:[%s1526_s3 + $0xe0] sm:$0xff] %vm736_vm2, %v700_v33  ;;  %797 = vst.msk [vmem:[%s1526_s3 + $0x1e0] sm:$0xff] %vm736_vm2, %v732_v34  ;;  %v701_v38 = vmax.f32 %v533_v35, 0.0  ;;  %v733_v40 = vmax.f32 %v661_v36, 0.0 }
 0x128   :  { %768 = vst.msk [vmem:[%s1526_s3 + $0xf8] sm:$0xff] %vm736_vm2, %v703_v37  ;;  %800 = vst.msk [vmem:[%s1526_s3 + $0x1f8] sm:$0xff] %vm736_vm2, %v735_v39 }
 0x129   :  { %766 = vst.msk [vmem:[%s1526_s3 + $0xe8] sm:$0xff] %vm736_vm2, %v701_v38  ;;  %798 = vst.msk [vmem:[%s1526_s3 + $0x1e8] sm:$0xff] %vm736_vm2, %v733_v40 }

// kernel: _lambda_.32
= control target key start
LH: loop header
LB: loop body
LE: loop exit
PB: predicated region body
PF: predicated region fallthrough
CT: control target
= control target key end

     0   :  { %v1194_v0 = vmov 0   ;;  %vm446_vm0 = vcmask 130048   ;;  %s1791_s1 = inlined_call_operand.vmem [shape: bf16[144,16], index: 1, kind: input, shape index: {}]   ;;  %s1792_s0 = inlined_call_operand.vmem [shape: bf16[512,144], index: 0, kind: input, shape index: {}]   ;;  %s1793_s2 = inlined_call_operand.vmem [shape: f32[1,16], index: 2, kind: input, shape index: {}]   ;;  %s1794_s3 = inlined_call_operand.vmem [shape: f32[512,16], index: 3, kind: output, shape index: {}]  }
   0x1   :  { %543 = vmatprep.subr.bf16.mxu0 %v1194_v0  ;;  %1070 = vmatprep.subr.bf16.mxu1 %v1194_v0  ;;  %v1089_v1 = vld [vmem:[%s1791_s1] sm:$0xff]   ;;  %v1090_v2 = vld [vmem:[%s1791_s1 + $0x8] sm:$0xff]   ;;  %v1091_v3 = vld [vmem:[%s1791_s1 + $0x10] sm:$0xff]  }
   0x2   :  { %544 = vmatpush1.bf16.msra.mxu0 %v1089_v1  ;;  %1079 = vmatpush1.bf16.msra.mxu1 %v1089_v1  ;;  %v1092_v4 = vld [vmem:[%s1791_s1 + $0x18] sm:$0xff]   ;;  %v1100_v5 = vld [vmem:[%s1792_s0 + $0x4] ss:$8 sps:$4 sm:$0xff]   ;;  %v1095_v9 = vld [vmem:[%s1791_s1 + $0x30] sm:$0xff]  }
   0x3   :  { %545 = vmatprep.subr.bf16.mxu0 %v1194_v0  ;;  %1071 = vmatprep.subr.bf16.mxu1 %v1194_v0  ;;  %v1103_v6 = vld [vmem:[%s1792_s0 + $0x104] ss:$8 sps:$4 sm:$0xff]   ;;  %v1096_v10 = vld [vmem:[%s1791_s1 + $0x38] sm:$0xff]   ;;  %v1098_v12 = vld [vmem:[%s1792_s0] ss:$8 sps:$4 sm:$0xff]  }
   0x4   :  { %1038 = vmatprep.mubr.msk.bf16.mxu0 %vm446_vm0, %v1100_v5  ;;  %1054 = vmatprep.mubr.msk.bf16.mxu1 %vm446_vm0, %v1103_v6  ;;  %v1093_v7 = vld [vmem:[%s1791_s1 + $0x20] sm:$0xff]   ;;  %v1094_v8 = vld [vmem:[%s1791_s1 + $0x28] sm:$0xff]   ;;  %v1104_v14 = vld [vmem:[%s1792_s0 + $0x14] ss:$8 sps:$4 sm:$0xff]  }
   0x5   :  { %v1097_v11 = vld [vmem:[%s1791_s1 + $0x40] sm:$0xff]   ;;  %v1106_v15 = vld [vmem:[%s1792_s0 + $0x114] ss:$8 sps:$4 sm:$0xff]   ;;  %v1108_v16 = vld [vmem:[%s1792_s0 + $0x10] ss:$8 sps:$4 sm:$0xff]  }
   0x6   :  { %546 = vmatpush1.bf16.msra.mxu0 %v1090_v2  ;;  %1080 = vmatpush1.bf16.msra.mxu1 %v1090_v2  ;;  %v1101_v13 = vld [vmem:[%s1792_s0 + $0x100] ss:$8 sps:$4 sm:$0xff]   ;;  %v1109_v17 = vld [vmem:[%s1792_s0 + $0x110] ss:$8 sps:$4 sm:$0xff]   ;;  %v1110_v18 = vld [vmem:[%s1792_s0 + $0x24] ss:$8 sps:$4 sm:$0xff]  }
   0x7   :  { %547 = vmatprep.subr.bf16.mxu0 %v1194_v0  ;;  %1072 = vmatprep.subr.bf16.mxu1 %v1194_v0  ;;  %v1112_v19 = vld [vmem:[%s1792_s0 + $0x124] ss:$8 sps:$4 sm:$0xff]   ;;  %v1114_v20 = vld [vmem:[%s1792_s0 + $0x20] ss:$8 sps:$4 sm:$0xff]   ;;  %v1116_v22 = vld [vmem:[%s1792_s0 + $0x34] ss:$8 sps:$4 sm:$0xff]  }
   0x8   :  { %v1115_v21 = vld [vmem:[%s1792_s0 + $0x120] ss:$8 sps:$4 sm:$0xff]   ;;  %v1118_v23 = vld [vmem:[%s1792_s0 + $0x134] ss:$8 sps:$4 sm:$0xff]   ;;  %v1120_v24 = vld [vmem:[%s1792_s0 + $0x30] ss:$8 sps:$4 sm:$0xff]  }
   0x9   :  { %v1121_v25 = vld [vmem:[%s1792_s0 + $0x130] ss:$8 sps:$4 sm:$0xff]   ;;  %v1122_v26 = vld [vmem:[%s1792_s0 + $0x44] ss:$8 sps:$4 sm:$0xff]   ;;  %v1126_v28 = vld [vmem:[%s1792_s0 + $0x40] ss:$8 sps:$4 sm:$0xff]  }
   0xa   :  { %548 = vmatpush1.bf16.msra.mxu0 %v1091_v3  ;;  %1081 = vmatpush1.bf16.msra.mxu1 %v1091_v3  ;;  %v1124_v27 = vld [vmem:[%s1792_s0 + $0x144] ss:$8 sps:$4 sm:$0xff]   ;;  %v1127_v29 = vld [vmem:[%s1792_s0 + $0x140] ss:$8 sps:$4 sm:$0xff]   ;;  %v1128_v30 = vld [vmem:[%s1792_s0 + $0x54] ss:$8 sps:$4 sm:$0xff]  }
   0xb   :  { %549 = vmatprep.subr.bf16.mxu0 %v1194_v0  ;;  %1073 = vmatprep.subr.bf16.mxu1 %v1194_v0  ;;  %v1130_v31 = vld [vmem:[%s1792_s0 + $0x154] ss:$8 sps:$4 sm:$0xff]   ;;  %v1132_v32 = vld [vmem:[%s1792_s0 + $0x50] ss:$8 sps:$4 sm:$0xff]   ;;  %v1134_v34 = vld [vmem:[%s1792_s0 + $0x64] ss:$8 sps:$4 sm:$0xff]  }
   0xc   :  { %v1133_v33 = vld [vmem:[%s1792_s0 + $0x150] ss:$8 sps:$4 sm:$0xff]   ;;  %v1136_v35 = vld [vmem:[%s1792_s0 + $0x164] ss:$8 sps:$4 sm:$0xff]   ;;  %v1138_v36 = vld [vmem:[%s1792_s0 + $0x60] ss:$8 sps:$4 sm:$0xff]  }
   0xd   :  { %v1139_v37 = vld [vmem:[%s1792_s0 + $0x160] ss:$8 sps:$4 sm:$0xff]   ;;  %v1140_v38 = vld [vmem:[%s1792_s0 + $0x74] ss:$8 sps:$4 sm:$0xff]   ;;  %v1144_v40 = vld [vmem:[%s1792_s0 + $0x70] ss:$8 sps:$4 sm:$0xff]  }
   0xe   :  { %550 = vmatpush1.bf16.msra.mxu0 %v1092_v4  ;;  %1082 = vmatpush1.bf16.msra.mxu1 %v1092_v4  ;;  %v1142_v39 = vld [vmem:[%s1792_s0 + $0x174] ss:$8 sps:$4 sm:$0xff]   ;;  %v1145_v41 = vld [vmem:[%s1792_s0 + $0x170] ss:$8 sps:$4 sm:$0xff]   ;;  %v1146_v42 = vld [vmem:[%s1792_s0 + $0x84] ss:$8 sps:$4 sm:$0xff]  }
   0xf   :  { %551 = vmatprep.subr.bf16.mxu0 %v1194_v0  ;;  %1074 = vmatprep.subr.bf16.mxu1 %v1194_v0  ;;  %v1148_v43 = vld [vmem:[%s1792_s0 + $0x184] ss:$8 sps:$4 sm:$0xff]   ;;  %v1150_v44 = vld [vmem:[%s1792_s0 + $0x80] ss:$8 sps:$4 sm:$0xff]   ;;  %v1152_v46 = vld [vmem:[%s1792_s0 + $0x94] ss:$8 sps:$4 sm:$0xff]  }
  0x10   :  { %v1151_v45 = vld [vmem:[%s1792_s0 + $0x180] ss:$8 sps:$4 sm:$0xff]   ;;  %v1154_v47 = vld [vmem:[%s1792_s0 + $0x194] ss:$8 sps:$4 sm:$0xff]   ;;  %v1156_v48 = vld [vmem:[%s1792_s0 + $0x90] ss:$8 sps:$4 sm:$0xff]  }
  0x11   :  { %v1157_v49 = vld [vmem:[%s1792_s0 + $0x190] ss:$8 sps:$4 sm:$0xff]   ;;  %v1158_v50 = vld [vmem:[%s1792_s0 + $0xa4] ss:$8 sps:$4 sm:$0xff]   ;;  %v1162_v52 = vld [vmem:[%s1792_s0 + $0xa0] ss:$8 sps:$4 sm:$0xff]  }
  0x12   :  { %552 = vmatpush1.bf16.msra.mxu0 %v1093_v7  ;;  %1083 = vmatpush1.bf16.msra.mxu1 %v1093_v7  ;;  %v1160_v51 = vld [vmem:[%s1792_s0 + $0x1a4] ss:$8 sps:$4 sm:$0xff]   ;;  %v1163_v53 = vld [vmem:[%s1792_s0 + $0x1a0] ss:$8 sps:$4 sm:$0xff]   ;;  %v1164_v54 = vld [vmem:[%s1792_s0 + $0xb4] ss:$8 sps:$4 sm:$0xff]  }
  0x13   :  { %553 = vmatprep.subr.bf16.mxu0 %v1194_v0  ;;  %1075 = vmatprep.subr.bf16.mxu1 %v1194_v0  ;;  %v1166_v55 = vld [vmem:[%s1792_s0 + $0x1b4] ss:$8 sps:$4 sm:$0xff]   ;;  %v1168_v56 = vld [vmem:[%s1792_s0 + $0xb0] ss:$8 sps:$4 sm:$0xff]   ;;  %v1170_v58 = vld [vmem:[%s1792_s0 + $0xc4] ss:$8 sps:$4 sm:$0xff]  }
  0x14   :  { %v1169_v57 = vld [vmem:[%s1792_s0 + $0x1b0] ss:$8 sps:$4 sm:$0xff]   ;;  %v1172_v59 = vld [vmem:[%s1792_s0 + $0x1c4] ss:$8 sps:$4 sm:$0xff]   ;;  %v1174_v60 = vld [vmem:[%s1792_s0 + $0xc0] ss:$8 sps:$4 sm:$0xff]  }
  0x15   :  { %v1175_v61 = vld [vmem:[%s1792_s0 + $0x1c0] ss:$8 sps:$4 sm:$0xff]   ;;  %v1176_v62 = vld [vmem:[%s1792_s0 + $0xd4] ss:$8 sps:$4 sm:$0xff]   ;;  %v1181_v1 = vld [vmem:[%s1792_s0 + $0x1d0] ss:$8 sps:$4 sm:$0xff]  }
  0x16   :  { %554 = vmatpush1.bf16.msra.mxu0 %v1094_v8  ;;  %1084 = vmatpush1.bf16.msra.mxu1 %v1094_v8  ;;  %v1178_v63 = vld [vmem:[%s1792_s0 + $0x1d4] ss:$8 sps:$4 sm:$0xff]   ;;  %v1182_v2 = vld [vmem:[%s1792_s0 + $0xe4] ss:$8 sps:$4 sm:$0xff]   ;;  %v1186_v4 = vld [vmem:[%s1792_s0 + $0xe0] ss:$8 sps:$4 sm:$0xff]  }
  0x17   :  { %555 = vmatprep.subr.bf16.mxu0 %v1194_v0  ;;  %1076 = vmatprep.subr.bf16.mxu1 %v1194_v0  ;;  %v1184_v3 = vld [vmem:[%s1792_s0 + $0x1e4] ss:$8 sps:$4 sm:$0xff]   ;;  %v1187_v5 = vld [vmem:[%s1792_s0 + $0x1e0] ss:$8 sps:$4 sm:$0xff]   ;;  %v1188_v6 = vld [vmem:[%s1792_s0 + $0xf4] ss:$8 sps:$4 sm:$0xff]  }
  0x18   :  { %v1190_v7 = vld [vmem:[%s1792_s0 + $0x1f4] ss:$8 sps:$4 sm:$0xff]   ;;  %v1192_v8 = vld [vmem:[%s1792_s0 + $0xf0] ss:$8 sps:$4 sm:$0xff]  }
  0x1a   :  { %556 = vmatpush1.bf16.msra.mxu0 %v1095_v9  ;;  %1085 = vmatpush1.bf16.msra.mxu1 %v1095_v9  ;;  %v1193_v9 = vld [vmem:[%s1792_s0 + $0x1f0] ss:$8 sps:$4 sm:$0xff]  }
  0x1b   :  { %557 = vmatprep.subr.bf16.mxu0 %v1194_v0  ;;  %1077 = vmatprep.subr.bf16.mxu1 %v1194_v0 }
  0x1e   :  { %558 = vmatpush1.bf16.msra.mxu0 %v1096_v10  ;;  %1086 = vmatpush1.bf16.msra.mxu1 %v1096_v10  ;;  %v1469_v10 = vld [vmem:[%s1793_s2] ss:$0 sm:$0xff] }
  0x1f   :  { %559 = vmatprep.subr.bf16.mxu0 %v1194_v0  ;;  %1078 = vmatprep.subr.bf16.mxu1 %v1194_v0  ;;  %v1180_v0 = vld [vmem:[%s1792_s0 + $0xd0] ss:$8 sps:$4 sm:$0xff]  }
  0x22   :  { %560 = vmatpush1.bf16.msra.mxu0 %v1097_v11  ;;  %1087 = vmatpush1.bf16.msra.mxu1 %v1097_v11 }
  0x25   :  { %576 = vmatmul.mubr.bf16.vlgmr.msra.gmra.mrb[0].mxu0 %v1098_v12  ;;  %704 = vmatmul.mubr.bf16.vlgmr.msra.gmra.mrb[0].mxu1 %v1101_v13 }
  0x26   :  { %1039 = vmatprep.mubr.msk.bf16.mxu0 %vm446_vm0, %v1104_v14  ;;  %1055 = vmatprep.mubr.msk.bf16.mxu1 %vm446_vm0, %v1106_v15 }
  0x2d   :  { %584 = vmatmul.mubr.bf16.gmra.mrb[4].mxu0 %v1108_v16  ;;  %712 = vmatmul.mubr.bf16.gmra.mrb[4].mxu1 %v1109_v17 }
  0x2e   :  { %1040 = vmatprep.mubr.msk.bf16.mxu0 %vm446_vm0, %v1110_v18  ;;  %1056 = vmatprep.mubr.msk.bf16.mxu1 %vm446_vm0, %v1112_v19 }
  0x35   :  { %592 = vmatmul.mubr.bf16.gmra.mrb[8].mxu0 %v1114_v20  ;;  %720 = vmatmul.mubr.bf16.gmra.mrb[8].mxu1 %v1115_v21 }
  0x36   :  { %1041 = vmatprep.mubr.msk.bf16.mxu0 %vm446_vm0, %v1116_v22  ;;  %1057 = vmatprep.mubr.msk.bf16.mxu1 %vm446_vm0, %v1118_v23 }
  0x3d   :  { %600 = vmatmul.mubr.bf16.gmra.mrb[12].mxu0 %v1120_v24  ;;  %728 = vmatmul.mubr.bf16.gmra.mrb[12].mxu1 %v1121_v25 }
  0x3e   :  { %1042 = vmatprep.mubr.msk.bf16.mxu0 %vm446_vm0, %v1122_v26  ;;  %1058 = vmatprep.mubr.msk.bf16.mxu1 %vm446_vm0, %v1124_v27 }
  0x45   :  { %608 = vmatmul.mubr.bf16.gmra.mrb[16].mxu0 %v1126_v28  ;;  %736 = vmatmul.mubr.bf16.gmra.mrb[16].mxu1 %v1127_v29 }
  0x46   :  { %1043 = vmatprep.mubr.msk.bf16.mxu0 %vm446_vm0, %v1128_v30  ;;  %1059 = vmatprep.mubr.msk.bf16.mxu1 %vm446_vm0, %v1130_v31 }
  0x4d   :  { %616 = vmatmul.mubr.bf16.gmra.mrb[20].mxu0 %v1132_v32  ;;  %744 = vmatmul.mubr.bf16.gmra.mrb[20].mxu1 %v1133_v33 }
  0x4e   :  { %1044 = vmatprep.mubr.msk.bf16.mxu0 %vm446_vm0, %v1134_v34  ;;  %1060 = vmatprep.mubr.msk.bf16.mxu1 %vm446_vm0, %v1136_v35 }
  0x55   :  { %624 = vmatmul.mubr.bf16.gmra.mrb[24].mxu0 %v1138_v36  ;;  %752 = vmatmul.mubr.bf16.gmra.mrb[24].mxu1 %v1139_v37 }
  0x56   :  { %1045 = vmatprep.mubr.msk.bf16.mxu0 %vm446_vm0, %v1140_v38  ;;  %1061 = vmatprep.mubr.msk.bf16.mxu1 %vm446_vm0, %v1142_v39 }
  0x5d   :  { %632 = vmatmul.mubr.bf16.gmra.mrb[28].mxu0 %v1144_v40  ;;  %760 = vmatmul.mubr.bf16.gmra.mrb[28].mxu1 %v1145_v41 }
  0x5e   :  { %1046 = vmatprep.mubr.msk.bf16.mxu0 %vm446_vm0, %v1146_v42  ;;  %1062 = vmatprep.mubr.msk.bf16.mxu1 %vm446_vm0, %v1148_v43 }
  0x65   :  { %640 = vmatmul.mubr.bf16.gmra.mrb[32].mxu0 %v1150_v44  ;;  %768 = vmatmul.mubr.bf16.gmra.mrb[32].mxu1 %v1151_v45 }
  0x66   :  { %1047 = vmatprep.mubr.msk.bf16.mxu0 %vm446_vm0, %v1152_v46  ;;  %1063 = vmatprep.mubr.msk.bf16.mxu1 %vm446_vm0, %v1154_v47 }
  0x6d   :  { %648 = vmatmul.mubr.bf16.gmra.mrb[36].mxu0 %v1156_v48  ;;  %776 = vmatmul.mubr.bf16.gmra.mrb[36].mxu1 %v1157_v49 }
  0x6e   :  { %1048 = vmatprep.mubr.msk.bf16.mxu0 %vm446_vm0, %v1158_v50  ;;  %1064 = vmatprep.mubr.msk.bf16.mxu1 %vm446_vm0, %v1160_v51 }
  0x75   :  { %656 = vmatmul.mubr.bf16.gmra.mrb[40].mxu0 %v1162_v52  ;;  %784 = vmatmul.mubr.bf16.gmra.mrb[40].mxu1 %v1163_v53 }
  0x76   :  { %1049 = vmatprep.mubr.msk.bf16.mxu0 %vm446_vm0, %v1164_v54  ;;  %1065 = vmatprep.mubr.msk.bf16.mxu1 %vm446_vm0, %v1166_v55 }
  0x7d   :  { %664 = vmatmul.mubr.bf16.gmra.mrb[44].mxu0 %v1168_v56  ;;  %792 = vmatmul.mubr.bf16.gmra.mrb[44].mxu1 %v1169_v57 }
  0x7e   :  { %1050 = vmatprep.mubr.msk.bf16.mxu0 %vm446_vm0, %v1170_v58  ;;  %1066 = vmatprep.mubr.msk.bf16.mxu1 %vm446_vm0, %v1172_v59 }
  0x85   :  { %672 = vmatmul.mubr.bf16.gmra.mrb[48].mxu0 %v1174_v60  ;;  %800 = vmatmul.mubr.bf16.gmra.mrb[48].mxu1 %v1175_v61 }
  0x86   :  { %1051 = vmatprep.mubr.msk.bf16.mxu0 %vm446_vm0, %v1176_v62  ;;  %1067 = vmatprep.mubr.msk.bf16.mxu1 %vm446_vm0, %v1178_v63 }
  0x8d   :  { %680 = vmatmul.mubr.bf16.gmra.mrb[52].mxu0 %v1180_v0  ;;  %808 = vmatmul.mubr.bf16.gmra.mrb[52].mxu1 %v1181_v1 }
  0x8e   :  { %1052 = vmatprep.mubr.msk.bf16.mxu0 %vm446_vm0, %v1182_v2  ;;  %1068 = vmatprep.mubr.msk.bf16.mxu1 %vm446_vm0, %v1184_v3 }
  0x95   :  { %688 = vmatmul.mubr.bf16.gmra.mrb[56].mxu0 %v1186_v4  ;;  %816 = vmatmul.mubr.bf16.gmra.mrb[56].mxu1 %v1187_v5 }
  0x96   :  { %1053 = vmatprep.mubr.msk.bf16.mxu0 %vm446_vm0, %v1188_v6  ;;  %1069 = vmatprep.mubr.msk.bf16.mxu1 %vm446_vm0, %v1190_v7 }
  0x9d   :  { %696 = vmatmul.mubr.bf16.gmra.mrb[60].mxu0 %v1192_v8  ;;  %824 = vmatmul.mubr.bf16.gmra.mrb[60].mxu1 %v1193_v9 }
  0xf8   :  { %v577_v11 = vpop.f32.mrb[0].mxu0  ;;  %v705_v12 = vpop.f32.mrb[0].mxu1 }
  0xf9   :  { %v578_v13 = vadd.f32 %v1469_v10, %v577_v11  ;;  %v706_v14 = vadd.f32 %v1469_v10, %v705_v12  ;;  %v579_v15 = vpop.f32.mrb[1].mxu0  ;;  %v707_v16 = vpop.f32.mrb[1].mxu1 }
  0xfa   :  { %v580_v17 = vpop.f32.mrb[2].mxu0  ;;  %v708_v18 = vpop.f32.mrb[2].mxu1 }
  0xfb   :  { %v832_v19 = vmax.f32 %v578_v13, 0.0  ;;  %v864_v20 = vmax.f32 %v706_v14, 0.0  ;;  %v581_v21 = vadd.f32 %v1469_v10, %v580_v17  ;;  %v709_v22 = vadd.f32 %v1469_v10, %v708_v18  ;;  %v582_v23 = vpop.f32.mrb[3].mxu0  ;;  %v710_v24 = vpop.f32.mrb[3].mxu1 }
  0xfd   :  { %896 = vst.msk [vmem:[%s1794_s3] sm:$0xff] %vm446_vm0, %v832_v19  ;;  %928 = vst.msk [vmem:[%s1794_s3 + $0x100] sm:$0xff] %vm446_vm0, %v864_v20  ;;  %v833_v25 = vmax.f32 %v581_v21, 0.0  ;;  %v865_v26 = vmax.f32 %v709_v22, 0.0 }
  0xff   :  { %897 = vst.msk [vmem:[%s1794_s3 + $0x8] sm:$0xff] %vm446_vm0, %v833_v25  ;;  %929 = vst.msk [vmem:[%s1794_s3 + $0x108] sm:$0xff] %vm446_vm0, %v865_v26 }
 0x100   :  { %v585_v27 = vpop.f32.mrb[4].mxu0  ;;  %v713_v28 = vpop.f32.mrb[4].mxu1 }
 0x101   :  { %v586_v29 = vadd.f32 %v1469_v10, %v585_v27  ;;  %v714_v30 = vadd.f32 %v1469_v10, %v713_v28  ;;  %v587_v31 = vpop.f32.mrb[5].mxu0  ;;  %v715_v32 = vpop.f32.mrb[5].mxu1 }
 0x102   :  { %v588_v33 = vpop.f32.mrb[6].mxu0  ;;  %v716_v34 = vpop.f32.mrb[6].mxu1 }
 0x103   :  { %v834_v35 = vmax.f32 %v586_v29, 0.0  ;;  %v866_v36 = vmax.f32 %v714_v30, 0.0  ;;  %v589_v37 = vadd.f32 %v1469_v10, %v588_v33  ;;  %v717_v38 = vadd.f32 %v1469_v10, %v716_v34  ;;  %v590_v39 = vpop.f32.mrb[7].mxu0  ;;  %v718_v40 = vpop.f32.mrb[7].mxu1 }
 0x105   :  { %898 = vst.msk [vmem:[%s1794_s3 + $0x10] sm:$0xff] %vm446_vm0, %v834_v35  ;;  %930 = vst.msk [vmem:[%s1794_s3 + $0x110] sm:$0xff] %vm446_vm0, %v866_v36  ;;  %v835_v41 = vmax.f32 %v589_v37, 0.0  ;;  %v867_v42 = vmax.f32 %v717_v38, 0.0 }
 0x107   :  { %899 = vst.msk [vmem:[%s1794_s3 + $0x18] sm:$0xff] %vm446_vm0, %v835_v41  ;;  %931 = vst.msk [vmem:[%s1794_s3 + $0x118] sm:$0xff] %vm446_vm0, %v867_v42 }
 0x108   :  { %v593_v43 = vpop.f32.mrb[8].mxu0  ;;  %v721_v44 = vpop.f32.mrb[8].mxu1 }
 0x109   :  { %v594_v45 = vadd.f32 %v1469_v10, %v593_v43  ;;  %v722_v46 = vadd.f32 %v1469_v10, %v721_v44  ;;  %v595_v47 = vpop.f32.mrb[9].mxu0  ;;  %v723_v48 = vpop.f32.mrb[9].mxu1 }
 0x10a   :  { %v596_v49 = vpop.f32.mrb[10].mxu0  ;;  %v724_v50 = vpop.f32.mrb[10].mxu1 }
 0x10b   :  { %v836_v51 = vmax.f32 %v594_v45, 0.0  ;;  %v868_v52 = vmax.f32 %v722_v46, 0.0  ;;  %v597_v53 = vadd.f32 %v1469_v10, %v596_v49  ;;  %v725_v54 = vadd.f32 %v1469_v10, %v724_v50  ;;  %v598_v55 = vpop.f32.mrb[11].mxu0  ;;  %v726_v56 = vpop.f32.mrb[11].mxu1 }
 0x10d   :  { %900 = vst.msk [vmem:[%s1794_s3 + $0x20] sm:$0xff] %vm446_vm0, %v836_v51  ;;  %932 = vst.msk [vmem:[%s1794_s3 + $0x120] sm:$0xff] %vm446_vm0, %v868_v52  ;;  %v837_v57 = vmax.f32 %v597_v53, 0.0  ;;  %v869_v58 = vmax.f32 %v725_v54, 0.0 }
 0x10f   :  { %901 = vst.msk [vmem:[%s1794_s3 + $0x28] sm:$0xff] %vm446_vm0, %v837_v57  ;;  %933 = vst.msk [vmem:[%s1794_s3 + $0x128] sm:$0xff] %vm446_vm0, %v869_v58 }
 0x110   :  { %v601_v59 = vpop.f32.mrb[12].mxu0  ;;  %v729_v60 = vpop.f32.mrb[12].mxu1 }
 0x111   :  { %v602_v61 = vadd.f32 %v1469_v10, %v601_v59  ;;  %v730_v62 = vadd.f32 %v1469_v10, %v729_v60  ;;  %v603_v63 = vpop.f32.mrb[13].mxu0  ;;  %v731_v0 = vpop.f32.mrb[13].mxu1 }
 0x112   :  { %v604_v1 = vpop.f32.mrb[14].mxu0  ;;  %v732_v2 = vpop.f32.mrb[14].mxu1 }
 0x113   :  { %v838_v3 = vmax.f32 %v602_v61, 0.0  ;;  %v870_v4 = vmax.f32 %v730_v62, 0.0  ;;  %v605_v5 = vadd.f32 %v1469_v10, %v604_v1  ;;  %v733_v6 = vadd.f32 %v1469_v10, %v732_v2  ;;  %v606_v7 = vpop.f32.mrb[15].mxu0  ;;  %v734_v8 = vpop.f32.mrb[15].mxu1 }
 0x115   :  { %902 = vst.msk [vmem:[%s1794_s3 + $0x30] sm:$0xff] %vm446_vm0, %v838_v3  ;;  %934 = vst.msk [vmem:[%s1794_s3 + $0x130] sm:$0xff] %vm446_vm0, %v870_v4  ;;  %v839_v9 = vmax.f32 %v605_v5, 0.0  ;;  %v871_v11 = vmax.f32 %v733_v6, 0.0 }
 0x117   :  { %903 = vst.msk [vmem:[%s1794_s3 + $0x38] sm:$0xff] %vm446_vm0, %v839_v9  ;;  %935 = vst.msk [vmem:[%s1794_s3 + $0x138] sm:$0xff] %vm446_vm0, %v871_v11 }
 0x118   :  { %v609_v12 = vpop.f32.mrb[16].mxu0  ;;  %v737_v13 = vpop.f32.mrb[16].mxu1 }
 0x119   :  { %v610_v14 = vadd.f32 %v1469_v10, %v609_v12  ;;  %v738_v15 = vadd.f32 %v1469_v10, %v737_v13  ;;  %v611_v16 = vpop.f32.mrb[17].mxu0  ;;  %v739_v17 = vpop.f32.mrb[17].mxu1 }
 0x11a   :  { %v612_v18 = vpop.f32.mrb[18].mxu0  ;;  %v740_v19 = vpop.f32.mrb[18].mxu1 }
 0x11b   :  { %v840_v20 = vmax.f32 %v610_v14, 0.0  ;;  %v872_v21 = vmax.f32 %v738_v15, 0.0  ;;  %v613_v22 = vadd.f32 %v1469_v10, %v612_v18  ;;  %v741_v23 = vadd.f32 %v1469_v10, %v740_v19  ;;  %v614_v24 = vpop.f32.mrb[19].mxu0  ;;  %v742_v25 = vpop.f32.mrb[19].mxu1 }
 0x11d   :  { %904 = vst.msk [vmem:[%s1794_s3 + $0x40] sm:$0xff] %vm446_vm0, %v840_v20  ;;  %936 = vst.msk [vmem:[%s1794_s3 + $0x140] sm:$0xff] %vm446_vm0, %v872_v21  ;;  %v841_v26 = vmax.f32 %v613_v22, 0.0  ;;  %v873_v27 = vmax.f32 %v741_v23, 0.0 }
 0x11f   :  { %905 = vst.msk [vmem:[%s1794_s3 + $0x48] sm:$0xff] %vm446_vm0, %v841_v26  ;;  %937 = vst.msk [vmem:[%s1794_s3 + $0x148] sm:$0xff] %vm446_vm0, %v873_v27 }
 0x120   :  { %v617_v28 = vpop.f32.mrb[20].mxu0  ;;  %v745_v29 = vpop.f32.mrb[20].mxu1 }
 0x121   :  { %v618_v30 = vadd.f32 %v1469_v10, %v617_v28  ;;  %v746_v31 = vadd.f32 %v1469_v10, %v745_v29  ;;  %v619_v32 = vpop.f32.mrb[21].mxu0  ;;  %v747_v33 = vpop.f32.mrb[21].mxu1 }
 0x122   :  { %v620_v34 = vpop.f32.mrb[22].mxu0  ;;  %v748_v35 = vpop.f32.mrb[22].mxu1 }
 0x123   :  { %v842_v36 = vmax.f32 %v618_v30, 0.0  ;;  %v874_v37 = vmax.f32 %v746_v31, 0.0  ;;  %v621_v38 = vadd.f32 %v1469_v10, %v620_v34  ;;  %v749_v39 = vadd.f32 %v1469_v10, %v748_v35  ;;  %v622_v40 = vpop.f32.mrb[23].mxu0  ;;  %v750_v41 = vpop.f32.mrb[23].mxu1 }
 0x125   :  { %906 = vst.msk [vmem:[%s1794_s3 + $0x50] sm:$0xff] %vm446_vm0, %v842_v36  ;;  %938 = vst.msk [vmem:[%s1794_s3 + $0x150] sm:$0xff] %vm446_vm0, %v874_v37  ;;  %v843_v42 = vmax.f32 %v621_v38, 0.0  ;;  %v875_v43 = vmax.f32 %v749_v39, 0.0 }
 0x127   :  { %907 = vst.msk [vmem:[%s1794_s3 + $0x58] sm:$0xff] %vm446_vm0, %v843_v42  ;;  %939 = vst.msk [vmem:[%s1794_s3 + $0x158] sm:$0xff] %vm446_vm0, %v875_v43 }
 0x128   :  { %v625_v44 = vpop.f32.mrb[24].mxu0  ;;  %v753_v45 = vpop.f32.mrb[24].mxu1 }
 0x129   :  { %v626_v46 = vadd.f32 %v1469_v10, %v625_v44  ;;  %v754_v47 = vadd.f32 %v1469_v10, %v753_v45  ;;  %v627_v48 = vpop.f32.mrb[25].mxu0  ;;  %v755_v49 = vpop.f32.mrb[25].mxu1 }
 0x12a   :  { %v628_v50 = vpop.f32.mrb[26].mxu0  ;;  %v756_v51 = vpop.f32.mrb[26].mxu1 }
 0x12b   :  { %v844_v52 = vmax.f32 %v626_v46, 0.0  ;;  %v876_v53 = vmax.f32 %v754_v47, 0.0  ;;  %v629_v54 = vadd.f32 %v1469_v10, %v628_v50  ;;  %v757_v55 = vadd.f32 %v1469_v10, %v756_v51  ;;  %v630_v56 = vpop.f32.mrb[27].mxu0  ;;  %v758_v57 = vpop.f32.mrb[27].mxu1 }
 0x12d   :  { %908 = vst.msk [vmem:[%s1794_s3 + $0x60] sm:$0xff] %vm446_vm0, %v844_v52  ;;  %940 = vst.msk [vmem:[%s1794_s3 + $0x160] sm:$0xff] %vm446_vm0, %v876_v53  ;;  %v845_v58 = vmax.f32 %v629_v54, 0.0  ;;  %v877_v59 = vmax.f32 %v757_v55, 0.0 }
 0x12f   :  { %909 = vst.msk [vmem:[%s1794_s3 + $0x68] sm:$0xff] %vm446_vm0, %v845_v58  ;;  %941 = vst.msk [vmem:[%s1794_s3 + $0x168] sm:$0xff] %vm446_vm0, %v877_v59 }
 0x130   :  { %v633_v60 = vpop.f32.mrb[28].mxu0  ;;  %v761_v61 = vpop.f32.mrb[28].mxu1 }
 0x131   :  { %v634_v62 = vadd.f32 %v1469_v10, %v633_v60  ;;  %v762_v63 = vadd.f32 %v1469_v10, %v761_v61  ;;  %v635_v0 = vpop.f32.mrb[29].mxu0  ;;  %v763_v1 = vpop.f32.mrb[29].mxu1 }
 0x132   :  { %v636_v2 = vpop.f32.mrb[30].mxu0  ;;  %v764_v3 = vpop.f32.mrb[30].mxu1 }
 0x133   :  { %v846_v4 = vmax.f32 %v634_v62, 0.0  ;;  %v878_v5 = vmax.f32 %v762_v63, 0.0  ;;  %v637_v6 = vadd.f32 %v1469_v10, %v636_v2  ;;  %v765_v7 = vadd.f32 %v1469_v10, %v764_v3  ;;  %v638_v8 = vpop.f32.mrb[31].mxu0  ;;  %v766_v9 = vpop.f32.mrb[31].mxu1 }
 0x135   :  { %910 = vst.msk [vmem:[%s1794_s3 + $0x70] sm:$0xff] %vm446_vm0, %v846_v4  ;;  %942 = vst.msk [vmem:[%s1794_s3 + $0x170] sm:$0xff] %vm446_vm0, %v878_v5  ;;  %v847_v11 = vmax.f32 %v637_v6, 0.0  ;;  %v879_v12 = vmax.f32 %v765_v7, 0.0 }
 0x137   :  { %911 = vst.msk [vmem:[%s1794_s3 + $0x78] sm:$0xff] %vm446_vm0, %v847_v11  ;;  %943 = vst.msk [vmem:[%s1794_s3 + $0x178] sm:$0xff] %vm446_vm0, %v879_v12 }
 0x138   :  { %v641_v13 = vpop.f32.mrb[32].mxu0  ;;  %v769_v14 = vpop.f32.mrb[32].mxu1 }
 0x139   :  { %v642_v15 = vadd.f32 %v1469_v10, %v641_v13  ;;  %v770_v16 = vadd.f32 %v1469_v10, %v769_v14  ;;  %v643_v17 = vpop.f32.mrb[33].mxu0  ;;  %v771_v18 = vpop.f32.mrb[33].mxu1 }
 0x13a   :  { %v644_v19 = vpop.f32.mrb[34].mxu0  ;;  %v772_v20 = vpop.f32.mrb[34].mxu1 }
 0x13b   :  { %v848_v21 = vmax.f32 %v642_v15, 0.0  ;;  %v880_v22 = vmax.f32 %v770_v16, 0.0  ;;  %v645_v23 = vadd.f32 %v1469_v10, %v644_v19  ;;  %v773_v24 = vadd.f32 %v1469_v10, %v772_v20  ;;  %v646_v25 = vpop.f32.mrb[35].mxu0  ;;  %v774_v26 = vpop.f32.mrb[35].mxu1 }
 0x13d   :  { %912 = vst.msk [vmem:[%s1794_s3 + $0x80] sm:$0xff] %vm446_vm0, %v848_v21  ;;  %944 = vst.msk [vmem:[%s1794_s3 + $0x180] sm:$0xff] %vm446_vm0, %v880_v22  ;;  %v849_v27 = vmax.f32 %v645_v23, 0.0  ;;  %v881_v28 = vmax.f32 %v773_v24, 0.0 }
 0x13f   :  { %913 = vst.msk [vmem:[%s1794_s3 + $0x88] sm:$0xff] %vm446_vm0, %v849_v27  ;;  %945 = vst.msk [vmem:[%s1794_s3 + $0x188] sm:$0xff] %vm446_vm0, %v881_v28 }
 0x140   :  { %v649_v29 = vpop.f32.mrb[36].mxu0  ;;  %v777_v30 = vpop.f32.mrb[36].mxu1 }
 0x141   :  { %v650_v31 = vadd.f32 %v1469_v10, %v649_v29  ;;  %v778_v32 = vadd.f32 %v1469_v10, %v777_v30  ;;  %v651_v33 = vpop.f32.mrb[37].mxu0  ;;  %v779_v34 = vpop.f32.mrb[37].mxu1 }
 0x142   :  { %v652_v35 = vpop.f32.mrb[38].mxu0  ;;  %v780_v36 = vpop.f32.mrb[38].mxu1 }
 0x143   :  { %v850_v37 = vmax.f32 %v650_v31, 0.0  ;;  %v882_v38 = vmax.f32 %v778_v32, 0.0  ;;  %v653_v39 = vadd.f32 %v1469_v10, %v652_v35  ;;  %v781_v40 = vadd.f32 %v1469_v10, %v780_v36  ;;  %v654_v41 = vpop.f32.mrb[39].mxu0  ;;  %v782_v42 = vpop.f32.mrb[39].mxu1 }
 0x145   :  { %914 = vst.msk [vmem:[%s1794_s3 + $0x90] sm:$0xff] %vm446_vm0, %v850_v37  ;;  %946 = vst.msk [vmem:[%s1794_s3 + $0x190] sm:$0xff] %vm446_vm0, %v882_v38  ;;  %v851_v43 = vmax.f32 %v653_v39, 0.0  ;;  %v883_v44 = vmax.f32 %v781_v40, 0.0 }
 0x147   :  { %915 = vst.msk [vmem:[%s1794_s3 + $0x98] sm:$0xff] %vm446_vm0, %v851_v43  ;;  %947 = vst.msk [vmem:[%s1794_s3 + $0x198] sm:$0xff] %vm446_vm0, %v883_v44 }
 0x148   :  { %v657_v45 = vpop.f32.mrb[40].mxu0  ;;  %v785_v46 = vpop.f32.mrb[40].mxu1 }
 0x149   :  { %v658_v47 = vadd.f32 %v1469_v10, %v657_v45  ;;  %v786_v48 = vadd.f32 %v1469_v10, %v785_v46  ;;  %v659_v49 = vpop.f32.mrb[41].mxu0  ;;  %v787_v50 = vpop.f32.mrb[41].mxu1 }
 0x14a   :  { %v660_v51 = vpop.f32.mrb[42].mxu0  ;;  %v788_v52 = vpop.f32.mrb[42].mxu1 }
 0x14b   :  { %v852_v53 = vmax.f32 %v658_v47, 0.0  ;;  %v884_v54 = vmax.f32 %v786_v48, 0.0  ;;  %v661_v55 = vadd.f32 %v1469_v10, %v660_v51  ;;  %v789_v56 = vadd.f32 %v1469_v10, %v788_v52  ;;  %v662_v57 = vpop.f32.mrb[43].mxu0  ;;  %v790_v58 = vpop.f32.mrb[43].mxu1 }
 0x14d   :  { %916 = vst.msk [vmem:[%s1794_s3 + $0xa0] sm:$0xff] %vm446_vm0, %v852_v53  ;;  %948 = vst.msk [vmem:[%s1794_s3 + $0x1a0] sm:$0xff] %vm446_vm0, %v884_v54  ;;  %v853_v59 = vmax.f32 %v661_v55, 0.0  ;;  %v885_v60 = vmax.f32 %v789_v56, 0.0 }
 0x14f   :  { %917 = vst.msk [vmem:[%s1794_s3 + $0xa8] sm:$0xff] %vm446_vm0, %v853_v59  ;;  %949 = vst.msk [vmem:[%s1794_s3 + $0x1a8] sm:$0xff] %vm446_vm0, %v885_v60 }
 0x150   :  { %v665_v61 = vpop.f32.mrb[44].mxu0  ;;  %v793_v62 = vpop.f32.mrb[44].mxu1 }
 0x151   :  { %v666_v63 = vadd.f32 %v1469_v10, %v665_v61  ;;  %v794_v0 = vadd.f32 %v1469_v10, %v793_v62  ;;  %v667_v1 = vpop.f32.mrb[45].mxu0  ;;  %v795_v2 = vpop.f32.mrb[45].mxu1 }
 0x152   :  { %v668_v3 = vpop.f32.mrb[46].mxu0  ;;  %v796_v4 = vpop.f32.mrb[46].mxu1 }
 0x153   :  { %v854_v5 = vmax.f32 %v666_v63, 0.0  ;;  %v886_v6 = vmax.f32 %v794_v0, 0.0  ;;  %v669_v7 = vadd.f32 %v1469_v10, %v668_v3  ;;  %v797_v8 = vadd.f32 %v1469_v10, %v796_v4  ;;  %v670_v9 = vpop.f32.mrb[47].mxu0  ;;  %v798_v11 = vpop.f32.mrb[47].mxu1 }
 0x155   :  { %918 = vst.msk [vmem:[%s1794_s3 + $0xb0] sm:$0xff] %vm446_vm0, %v854_v5  ;;  %950 = vst.msk [vmem:[%s1794_s3 + $0x1b0] sm:$0xff] %vm446_vm0, %v886_v6  ;;  %v855_v12 = vmax.f32 %v669_v7, 0.0  ;;  %v887_v13 = vmax.f32 %v797_v8, 0.0 }
 0x157   :  { %919 = vst.msk [vmem:[%s1794_s3 + $0xb8] sm:$0xff] %vm446_vm0, %v855_v12  ;;  %951 = vst.msk [vmem:[%s1794_s3 + $0x1b8] sm:$0xff] %vm446_vm0, %v887_v13 }
 0x158   :  { %v673_v14 = vpop.f32.mrb[48].mxu0  ;;  %v801_v15 = vpop.f32.mrb[48].mxu1 }
 0x159   :  { %v674_v16 = vadd.f32 %v1469_v10, %v673_v14  ;;  %v802_v17 = vadd.f32 %v1469_v10, %v801_v15  ;;  %v675_v18 = vpop.f32.mrb[49].mxu0  ;;  %v803_v19 = vpop.f32.mrb[49].mxu1 }
 0x15a   :  { %v676_v20 = vpop.f32.mrb[50].mxu0  ;;  %v804_v21 = vpop.f32.mrb[50].mxu1 }
 0x15b   :  { %v856_v22 = vmax.f32 %v674_v16, 0.0  ;;  %v888_v23 = vmax.f32 %v802_v17, 0.0  ;;  %v677_v24 = vadd.f32 %v1469_v10, %v676_v20  ;;  %v805_v25 = vadd.f32 %v1469_v10, %v804_v21  ;;  %v678_v26 = vpop.f32.mrb[51].mxu0  ;;  %v806_v27 = vpop.f32.mrb[51].mxu1 }
 0x15d   :  { %920 = vst.msk [vmem:[%s1794_s3 + $0xc0] sm:$0xff] %vm446_vm0, %v856_v22  ;;  %952 = vst.msk [vmem:[%s1794_s3 + $0x1c0] sm:$0xff] %vm446_vm0, %v888_v23  ;;  %v857_v28 = vmax.f32 %v677_v24, 0.0  ;;  %v889_v29 = vmax.f32 %v805_v25, 0.0 }
 0x15f   :  { %921 = vst.msk [vmem:[%s1794_s3 + $0xc8] sm:$0xff] %vm446_vm0, %v857_v28  ;;  %953 = vst.msk [vmem:[%s1794_s3 + $0x1c8] sm:$0xff] %vm446_vm0, %v889_v29 }
 0x160   :  { %v681_v30 = vpop.f32.mrb[52].mxu0  ;;  %v809_v31 = vpop.f32.mrb[52].mxu1 }
 0x161   :  { %v682_v32 = vadd.f32 %v1469_v10, %v681_v30  ;;  %v810_v33 = vadd.f32 %v1469_v10, %v809_v31  ;;  %v683_v34 = vpop.f32.mrb[53].mxu0  ;;  %v811_v35 = vpop.f32.mrb[53].mxu1 }
 0x162   :  { %v684_v36 = vpop.f32.mrb[54].mxu0  ;;  %v812_v37 = vpop.f32.mrb[54].mxu1 }
 0x163   :  { %v858_v38 = vmax.f32 %v682_v32, 0.0  ;;  %v890_v39 = vmax.f32 %v810_v33, 0.0  ;;  %v685_v40 = vadd.f32 %v1469_v10, %v684_v36  ;;  %v813_v41 = vadd.f32 %v1469_v10, %v812_v37  ;;  %v686_v42 = vpop.f32.mrb[55].mxu0  ;;  %v814_v43 = vpop.f32.mrb[55].mxu1 }
 0x165   :  { %922 = vst.msk [vmem:[%s1794_s3 + $0xd0] sm:$0xff] %vm446_vm0, %v858_v38  ;;  %954 = vst.msk [vmem:[%s1794_s3 + $0x1d0] sm:$0xff] %vm446_vm0, %v890_v39  ;;  %v859_v44 = vmax.f32 %v685_v40, 0.0  ;;  %v891_v45 = vmax.f32 %v813_v41, 0.0 }
 0x167   :  { %923 = vst.msk [vmem:[%s1794_s3 + $0xd8] sm:$0xff] %vm446_vm0, %v859_v44  ;;  %955 = vst.msk [vmem:[%s1794_s3 + $0x1d8] sm:$0xff] %vm446_vm0, %v891_v45 }
 0x168   :  { %v689_v46 = vpop.f32.mrb[56].mxu0  ;;  %v817_v47 = vpop.f32.mrb[56].mxu1 }
 0x169   :  { %v690_v48 = vadd.f32 %v1469_v10, %v689_v46  ;;  %v818_v49 = vadd.f32 %v1469_v10, %v817_v47  ;;  %v691_v50 = vpop.f32.mrb[57].mxu0  ;;  %v819_v51 = vpop.f32.mrb[57].mxu1 }
 0x16a   :  { %v692_v52 = vpop.f32.mrb[58].mxu0  ;;  %v820_v53 = vpop.f32.mrb[58].mxu1 }
 0x16b   :  { %v860_v54 = vmax.f32 %v690_v48, 0.0  ;;  %v892_v55 = vmax.f32 %v818_v49, 0.0  ;;  %v693_v56 = vadd.f32 %v1469_v10, %v692_v52  ;;  %v821_v57 = vadd.f32 %v1469_v10, %v820_v53  ;;  %v694_v58 = vpop.f32.mrb[59].mxu0  ;;  %v822_v59 = vpop.f32.mrb[59].mxu1 }
 0x16d   :  { %924 = vst.msk [vmem:[%s1794_s3 + $0xe0] sm:$0xff] %vm446_vm0, %v860_v54  ;;  %956 = vst.msk [vmem:[%s1794_s3 + $0x1e0] sm:$0xff] %vm446_vm0, %v892_v55  ;;  %v861_v60 = vmax.f32 %v693_v56, 0.0  ;;  %v893_v61 = vmax.f32 %v821_v57, 0.0 }
 0x16f   :  { %925 = vst.msk [vmem:[%s1794_s3 + $0xe8] sm:$0xff] %vm446_vm0, %v861_v60  ;;  %957 = vst.msk [vmem:[%s1794_s3 + $0x1e8] sm:$0xff] %vm446_vm0, %v893_v61 }
 0x170   :  { %v697_v62 = vpop.f32.mrb[60].mxu0  ;;  %v825_v63 = vpop.f32.mrb[60].mxu1 }
 0x171   :  { %v698_v0 = vadd.f32 %v1469_v10, %v697_v62  ;;  %v826_v1 = vadd.f32 %v1469_v10, %v825_v63  ;;  %v699_v2 = vpop.f32.mrb[61].mxu0  ;;  %v827_v3 = vpop.f32.mrb[61].mxu1 }
 0x172   :  { %v700_v4 = vpop.f32.mrb[62].mxu0  ;;  %v828_v5 = vpop.f32.mrb[62].mxu1 }
 0x173   :  { %v862_v6 = vmax.f32 %v698_v0, 0.0  ;;  %v894_v7 = vmax.f32 %v826_v1, 0.0  ;;  %v701_v8 = vadd.f32 %v1469_v10, %v700_v4  ;;  %v829_v9 = vadd.f32 %v1469_v10, %v828_v5  ;;  %v702_v11 = vpop.f32.mrb[63].mxu0  ;;  %v830_v12 = vpop.f32.mrb[63].mxu1 }
 0x175   :  { %926 = vst.msk [vmem:[%s1794_s3 + $0xf0] sm:$0xff] %vm446_vm0, %v862_v6  ;;  %958 = vst.msk [vmem:[%s1794_s3 + $0x1f0] sm:$0xff] %vm446_vm0, %v894_v7  ;;  %v863_v13 = vmax.f32 %v701_v8, 0.0  ;;  %v895_v14 = vmax.f32 %v829_v9, 0.0 }
 0x177   :  { %927 = vst.msk [vmem:[%s1794_s3 + $0xf8] sm:$0xff] %vm446_vm0, %v863_v13  ;;  %959 = vst.msk [vmem:[%s1794_s3 + $0x1f8] sm:$0xff] %vm446_vm0, %v895_v14 }

// kernel: _lambda_.33
= control target key start
LH: loop header
LB: loop body
LE: loop exit
PB: predicated region body
PF: predicated region fallthrough
CT: control target
= control target key end

     0   :  { %s256_s10 = smov 112   ;;  %s257_s11 = smov 96   ;;  %vm232_vm0 = vcmask 130048   ;;  %s513_s0 = inlined_call_operand.vmem [shape: f32[128,64], index: 0, kind: input, shape index: {}]   ;;  %s514_s1 = inlined_call_operand.vmem [shape: f32[128,16], index: 1, kind: output, shape index: {}]  }
   0x1   :  { %v272_v0 = vld [vmem:[%s513_s0 + $0x10] sm:$0xff]  ;;  %v277_v1 = vld [vmem:[%s513_s0] sm:$0xff]  ;;  %v284_v2 = vld [vmem:[%s513_s0 + $0x18] sm:$0xff] }
   0x2   :  { %44 = vrot.lane.b32.xlu1 %v272_v0, %s256_s10  ;;  %40 = vrot.lane.b32.xlu0 %v277_v1, %s256_s10  ;;  %v289_v3 = vld [vmem:[%s513_s0 + $0x8] sm:$0xff]  ;;  %v301_v5 = vld [vmem:[%s513_s0 + $0x20] sm:$0xff] }
   0x3   :  { %v296_v4 = vld [vmem:[%s513_s0 + $0x28] sm:$0xff]  ;;  %v308_v6 = vld [vmem:[%s513_s0 + $0x38] sm:$0xff]  ;;  %v313_v7 = vld [vmem:[%s513_s0 + $0x30] sm:$0xff] }
   0x4   :  { %v320_v8 = vld [vmem:[%s513_s0 + $0x48] sm:$0xff]  ;;  %v325_v9 = vld [vmem:[%s513_s0 + $0x40] sm:$0xff]  ;;  %v332_v10 = vld [vmem:[%s513_s0 + $0x58] sm:$0xff] }
   0x5   :  { %v337_v11 = vld [vmem:[%s513_s0 + $0x50] sm:$0xff]  ;;  %v344_v12 = vld [vmem:[%s513_s0 + $0x68] sm:$0xff]  ;;  %v349_v13 = vld [vmem:[%s513_s0 + $0x60] sm:$0xff] }
   0x6   :  { %46 = vrot.lane.b32.xlu1 %v284_v2, %s256_s10  ;;  %42 = vrot.lane.b32.xlu0 %v289_v3, %s256_s10  ;;  %v356_v14 = vld [vmem:[%s513_s0 + $0x78] sm:$0xff]  ;;  %v361_v15 = vld [vmem:[%s513_s0 + $0x70] sm:$0xff]  ;;  %s258_s0 = smov 80  }
   0xa   :  { %50 = vrot.lane.b32.xlu1 %v296_v4, %s256_s10  ;;  %48 = vrot.lane.b32.xlu0 %v301_v5, %s256_s10 }
   0xe   :  { %54 = vrot.lane.b32.xlu1 %v308_v6, %s256_s10  ;;  %52 = vrot.lane.b32.xlu0 %v313_v7, %s256_s10 }
  0x12   :  { %58 = vrot.lane.b32.xlu1 %v320_v8, %s256_s10  ;;  %56 = vrot.lane.b32.xlu0 %v325_v9, %s256_s10 }
  0x16   :  { %62 = vrot.lane.b32.xlu1 %v332_v10, %s256_s10  ;;  %60 = vrot.lane.b32.xlu0 %v337_v11, %s256_s10 }
  0x1a   :  { %66 = vrot.lane.b32.xlu1 %v344_v12, %s256_s10  ;;  %64 = vrot.lane.b32.xlu0 %v349_v13, %s256_s10 }
  0x1e   :  { %70 = vrot.lane.b32.xlu1 %v356_v14, %s256_s10  ;;  %68 = vrot.lane.b32.xlu0 %v361_v15, %s256_s10 }
  0x22   :  { %106 = vrot.lane.b32.xlu1 %v289_v3, %s257_s11  ;;  %104 = vrot.lane.b32.xlu0 %v277_v1, %s257_s11 }
  0x26   :  { %110 = vrot.lane.b32.xlu1 %v284_v2, %s257_s11  ;;  %108 = vrot.lane.b32.xlu0 %v272_v0, %s257_s11 }
  0x2a   :  { %114 = vrot.lane.b32.xlu1 %v296_v4, %s257_s11  ;;  %112 = vrot.lane.b32.xlu0 %v301_v5, %s257_s11 }
  0x2e   :  { %118 = vrot.lane.b32.xlu1 %v308_v6, %s257_s11  ;;  %116 = vrot.lane.b32.xlu0 %v313_v7, %s257_s11 }
  0x32   :  { %122 = vrot.lane.b32.xlu1 %v320_v8, %s257_s11  ;;  %120 = vrot.lane.b32.xlu0 %v325_v9, %s257_s11 }
  0x36   :  { %126 = vrot.lane.b32.xlu1 %v332_v10, %s257_s11  ;;  %124 = vrot.lane.b32.xlu0 %v337_v11, %s257_s11 }
  0x3a   :  { %130 = vrot.lane.b32.xlu1 %v344_v12, %s257_s11  ;;  %128 = vrot.lane.b32.xlu0 %v349_v13, %s257_s11 }
  0x3e   :  { %134 = vrot.lane.b32.xlu1 %v356_v14, %s257_s11  ;;  %132 = vrot.lane.b32.xlu0 %v361_v15, %s257_s11 }
  0x42   :  { %170 = vrot.lane.b32.xlu1 %v289_v3, %s258_s0  ;;  %168 = vrot.lane.b32.xlu0 %v277_v1, %s258_s0 }
  0x46   :  { %174 = vrot.lane.b32.xlu1 %v284_v2, %s258_s0  ;;  %172 = vrot.lane.b32.xlu0 %v272_v0, %s258_s0 }
  0x4a   :  { %178 = vrot.lane.b32.xlu1 %v296_v4, %s258_s0  ;;  %176 = vrot.lane.b32.xlu0 %v301_v5, %s258_s0 }
  0x4e   :  { %182 = vrot.lane.b32.xlu1 %v308_v6, %s258_s0  ;;  %180 = vrot.lane.b32.xlu0 %v313_v7, %s258_s0 }
  0x52   :  { %186 = vrot.lane.b32.xlu1 %v320_v8, %s258_s0  ;;  %184 = vrot.lane.b32.xlu0 %v325_v9, %s258_s0 }
  0x56   :  { %190 = vrot.lane.b32.xlu1 %v332_v10, %s258_s0  ;;  %188 = vrot.lane.b32.xlu0 %v337_v11, %s258_s0 }
  0x5a   :  { %194 = vrot.lane.b32.xlu1 %v344_v12, %s258_s0  ;;  %192 = vrot.lane.b32.xlu0 %v349_v13, %s258_s0 }
  0x5e   :  { %198 = vrot.lane.b32.xlu1 %v356_v14, %s258_s0  ;;  %196 = vrot.lane.b32.xlu0 %v361_v15, %s258_s0 }
  0x74   :  { %v45_v16 = vpop.permute.xlu1 %44  ;;  %v41_v17 = vpop.permute.xlu0 %40 }
  0x75   :  { %v88_v48 = vmax.f32 %v277_v1, %v41_v17  ;;  %v90_v54 = vmax.f32 %v272_v0, %v45_v16 }
  0x78   :  { %v47_v18 = vpop.permute.xlu1 %46  ;;  %v43_v19 = vpop.permute.xlu0 %42 }
  0x79   :  { %v89_v49 = vmax.f32 %v289_v3, %v43_v19  ;;  %v91_v55 = vmax.f32 %v284_v2, %v47_v18 }
  0x7c   :  { %v51_v20 = vpop.permute.xlu1 %50  ;;  %v49_v21 = vpop.permute.xlu0 %48 }
  0x7d   :  { %v93_v62 = vmax.f32 %v296_v4, %v51_v20  ;;  %v92_v63 = vmax.f32 %v301_v5, %v49_v21 }
  0x80   :  { %v55_v22 = vpop.permute.xlu1 %54  ;;  %v53_v23 = vpop.permute.xlu0 %52 }
  0x81   :  { %v95_v4 = vmax.f32 %v308_v6, %v55_v22  ;;  %v94_v5 = vmax.f32 %v313_v7, %v53_v23 }
  0x84   :  { %v397_v24 = vpop.permute.xlu1 %58  ;;  %v399_v25 = vpop.permute.xlu0 %56 }
  0x85   :  { %v97_v6 = vmax.f32 %v320_v8, %v397_v24  ;;  %v96_v7 = vmax.f32 %v325_v9, %v399_v25 }
  0x88   :  { %v401_v26 = vpop.permute.xlu1 %62  ;;  %v403_v27 = vpop.permute.xlu0 %60 }
  0x89   :  { %v99_v8 = vmax.f32 %v332_v10, %v401_v26  ;;  %v98_v9 = vmax.f32 %v337_v11, %v403_v27 }
  0x8c   :  { %v405_v28 = vpop.permute.xlu1 %66  ;;  %v407_v29 = vpop.permute.xlu0 %64 }
  0x8d   :  { %v101_v10 = vmax.f32 %v344_v12, %v405_v28  ;;  %v100_v11 = vmax.f32 %v349_v13, %v407_v29 }
  0x90   :  { %v409_v30 = vpop.permute.xlu1 %70  ;;  %v411_v31 = vpop.permute.xlu0 %68 }
  0x91   :  { %v103_v13 = vmax.f32 %v356_v14, %v409_v30  ;;  %v102_v29 = vmax.f32 %v361_v15, %v411_v31 }
  0x94   :  { %v107_v32 = vpop.permute.xlu1 %106  ;;  %v105_v33 = vpop.permute.xlu0 %104 }
  0x95   :  { %v153_v50 = vmax.f32 %v89_v49, %v107_v32  ;;  %v152_v51 = vmax.f32 %v88_v48, %v105_v33 }
  0x98   :  { %v111_v34 = vpop.permute.xlu1 %110  ;;  %v109_v35 = vpop.permute.xlu0 %108 }
  0x99   :  { %v155_v58 = vmax.f32 %v91_v55, %v111_v34  ;;  %v154_v59 = vmax.f32 %v90_v54, %v109_v35 }
  0x9c   :  { %v115_v36 = vpop.permute.xlu1 %114  ;;  %v113_v37 = vpop.permute.xlu0 %112 }
  0x9d   :  { %v157_v2 = vmax.f32 %v93_v62, %v115_v36  ;;  %v156_v3 = vmax.f32 %v92_v63, %v113_v37 }
  0xa0   :  { %v119_v38 = vpop.permute.xlu1 %118  ;;  %v117_v39 = vpop.permute.xlu0 %116 }
  0xa1   :  { %v159_v20 = vmax.f32 %v95_v4, %v119_v38  ;;  %v158_v21 = vmax.f32 %v94_v5, %v117_v39 }
  0xa4   :  { %v123_v40 = vpop.permute.xlu1 %122  ;;  %v121_v41 = vpop.permute.xlu0 %120 }
  0xa5   :  { %v161_v34 = vmax.f32 %v97_v6, %v123_v40  ;;  %v160_v35 = vmax.f32 %v96_v7, %v121_v41 }
  0xa8   :  { %v127_v42 = vpop.permute.xlu1 %126  ;;  %v125_v43 = vpop.permute.xlu0 %124 }
  0xa9   :  { %v163_v38 = vmax.f32 %v99_v8, %v127_v42  ;;  %v162_v39 = vmax.f32 %v98_v9, %v125_v43 }
  0xac   :  { %v413_v44 = vpop.permute.xlu1 %130  ;;  %v415_v45 = vpop.permute.xlu0 %128 }
  0xad   :  { %v165_v42 = vmax.f32 %v101_v10, %v413_v44  ;;  %v164_v43 = vmax.f32 %v100_v11, %v415_v45 }
  0xb0   :  { %v417_v46 = vpop.permute.xlu1 %134  ;;  %v419_v47 = vpop.permute.xlu0 %132 }
  0xb1   :  { %v167_v48 = vmax.f32 %v103_v13, %v417_v46  ;;  %v166_v49 = vmax.f32 %v102_v29, %v419_v47 }
  0xb4   :  { %v171_v52 = vpop.permute.xlu1 %170  ;;  %v169_v53 = vpop.permute.xlu0 %168 }
  0xb5   :  { %v217_v56 = vmax.f32 %v153_v50, %v171_v52  ;;  %v216_v57 = vmax.f32 %v152_v51, %v169_v53 }
  0xb7   :  { %234 = vst.msk [vmem:[%s514_s1 + $0x8] sm:$0xff] %vm232_vm0, %v217_v56  ;;  %233 = vst.msk [vmem:[%s514_s1] sm:$0xff] %vm232_vm0, %v216_v57 }
  0xb8   :  { %v175_v60 = vpop.permute.xlu1 %174  ;;  %v173_v61 = vpop.permute.xlu0 %172 }
  0xb9   :  { %v219_v0 = vmax.f32 %v155_v58, %v175_v60  ;;  %v218_v1 = vmax.f32 %v154_v59, %v173_v61 }
  0xbb   :  { %236 = vst.msk [vmem:[%s514_s1 + $0x18] sm:$0xff] %vm232_vm0, %v219_v0  ;;  %235 = vst.msk [vmem:[%s514_s1 + $0x10] sm:$0xff] %vm232_vm0, %v218_v1 }
  0xbc   :  { %v179_v16 = vpop.permute.xlu1 %178  ;;  %v177_v17 = vpop.permute.xlu0 %176 }
  0xbd   :  { %v221_v18 = vmax.f32 %v157_v2, %v179_v16  ;;  %v220_v19 = vmax.f32 %v156_v3, %v177_v17 }
  0xbf   :  { %238 = vst.msk [vmem:[%s514_s1 + $0x28] sm:$0xff] %vm232_vm0, %v221_v18  ;;  %237 = vst.msk [vmem:[%s514_s1 + $0x20] sm:$0xff] %vm232_vm0, %v220_v19 }
  0xc0   :  { %v183_v32 = vpop.permute.xlu1 %182  ;;  %v181_v33 = vpop.permute.xlu0 %180 }
  0xc1   :  { %v223_v22 = vmax.f32 %v159_v20, %v183_v32  ;;  %v222_v23 = vmax.f32 %v158_v21, %v181_v33 }
  0xc3   :  { %240 = vst.msk [vmem:[%s514_s1 + $0x38] sm:$0xff] %vm232_vm0, %v223_v22  ;;  %239 = vst.msk [vmem:[%s514_s1 + $0x30] sm:$0xff] %vm232_vm0, %v222_v23 }
  0xc4   :  { %v187_v36 = vpop.permute.xlu1 %186  ;;  %v185_v37 = vpop.permute.xlu0 %184 }
  0xc5   :  { %v225_v24 = vmax.f32 %v161_v34, %v187_v36  ;;  %v224_v25 = vmax.f32 %v160_v35, %v185_v37 }
  0xc7   :  { %242 = vst.msk [vmem:[%s514_s1 + $0x48] sm:$0xff] %vm232_vm0, %v225_v24  ;;  %241 = vst.msk [vmem:[%s514_s1 + $0x40] sm:$0xff] %vm232_vm0, %v224_v25 }
  0xc8   :  { %v191_v40 = vpop.permute.xlu1 %190  ;;  %v189_v41 = vpop.permute.xlu0 %188 }
  0xc9   :  { %v227_v26 = vmax.f32 %v163_v38, %v191_v40  ;;  %v226_v27 = vmax.f32 %v162_v39, %v189_v41 }
  0xcb   :  { %244 = vst.msk [vmem:[%s514_s1 + $0x58] sm:$0xff] %vm232_vm0, %v227_v26  ;;  %243 = vst.msk [vmem:[%s514_s1 + $0x50] sm:$0xff] %vm232_vm0, %v226_v27 }
  0xcc   :  { %v195_v12 = vpop.permute.xlu1 %194  ;;  %v193_v28 = vpop.permute.xlu0 %192 }
  0xcd   :  { %v229_v44 = vmax.f32 %v165_v42, %v195_v12  ;;  %v228_v45 = vmax.f32 %v164_v43, %v193_v28 }
  0xcf   :  { %246 = vst.msk [vmem:[%s514_s1 + $0x68] sm:$0xff] %vm232_vm0, %v229_v44  ;;  %245 = vst.msk [vmem:[%s514_s1 + $0x60] sm:$0xff] %vm232_vm0, %v228_v45 }
  0xd0   :  { %v199_v14 = vpop.permute.xlu1 %198  ;;  %v197_v30 = vpop.permute.xlu0 %196 }
  0xd1   :  { %v231_v50 = vmax.f32 %v167_v48, %v199_v14  ;;  %v230_v15 = vmax.f32 %v166_v49, %v197_v30 }
  0xd3   :  { %248 = vst.msk [vmem:[%s514_s1 + $0x78] sm:$0xff] %vm232_vm0, %v231_v50  ;;  %247 = vst.msk [vmem:[%s514_s1 + $0x70] sm:$0xff] %vm232_vm0, %v230_v15 }

// kernel: _lambda_.34
= control target key start
LH: loop header
LB: loop body
LE: loop exit
PB: predicated region body
PF: predicated region fallthrough
CT: control target
= control target key end

     0   :  { %v426_v0 = vmov 0   ;;  %vm182_vm0 = vcmask 130048   ;;  %s615_s1 = inlined_call_operand.vmem [shape: bf16[144,16], index: 1, kind: input, shape index: {}]   ;;  %s616_s0 = inlined_call_operand.vmem [shape: bf16[128,144], index: 0, kind: input, shape index: {}]   ;;  %s617_s2 = inlined_call_operand.vmem [shape: f32[1,16], index: 2, kind: input, shape index: {}]   ;;  %s618_s3 = inlined_call_operand.vmem [shape: f32[128,16], index: 3, kind: output, shape index: {}]  }
   0x1   :  { %207 = vmatprep.subr.bf16.mxu0 %v426_v0  ;;  %374 = vmatprep.subr.bf16.mxu1 %v426_v0  ;;  %v393_v1 = vld [vmem:[%s615_s1] sm:$0xff]   ;;  %v394_v2 = vld [vmem:[%s615_s1 + $0x8] sm:$0xff]   ;;  %v395_v3 = vld [vmem:[%s615_s1 + $0x10] sm:$0xff]  }
   0x2   :  { %208 = vmatpush1.bf16.msra.mxu0 %v393_v1  ;;  %383 = vmatpush1.bf16.msra.mxu1 %v393_v1  ;;  %v396_v4 = vld [vmem:[%s615_s1 + $0x18] sm:$0xff]   ;;  %v404_v5 = vld [vmem:[%s616_s0 + $0x4] ss:$8 sps:$4 sm:$0xff]   ;;  %v399_v9 = vld [vmem:[%s615_s1 + $0x30] sm:$0xff]  }
   0x3   :  { %209 = vmatprep.subr.bf16.mxu0 %v426_v0  ;;  %375 = vmatprep.subr.bf16.mxu1 %v426_v0  ;;  %v407_v6 = vld [vmem:[%s616_s0 + $0x44] ss:$8 sps:$4 sm:$0xff]   ;;  %v400_v10 = vld [vmem:[%s615_s1 + $0x38] sm:$0xff]   ;;  %v402_v12 = vld [vmem:[%s616_s0] ss:$8 sps:$4 sm:$0xff]  }
   0x4   :  { %366 = vmatprep.mubr.msk.bf16.mxu0 %vm182_vm0, %v404_v5  ;;  %370 = vmatprep.mubr.msk.bf16.mxu1 %vm182_vm0, %v407_v6  ;;  %v397_v7 = vld [vmem:[%s615_s1 + $0x20] sm:$0xff]   ;;  %v398_v8 = vld [vmem:[%s615_s1 + $0x28] sm:$0xff]   ;;  %v408_v14 = vld [vmem:[%s616_s0 + $0x14] ss:$8 sps:$4 sm:$0xff]  }
   0x5   :  { %v401_v11 = vld [vmem:[%s615_s1 + $0x40] sm:$0xff]   ;;  %v410_v15 = vld [vmem:[%s616_s0 + $0x54] ss:$8 sps:$4 sm:$0xff]   ;;  %v412_v16 = vld [vmem:[%s616_s0 + $0x10] ss:$8 sps:$4 sm:$0xff]  }
   0x6   :  { %210 = vmatpush1.bf16.msra.mxu0 %v394_v2  ;;  %384 = vmatpush1.bf16.msra.mxu1 %v394_v2  ;;  %v405_v13 = vld [vmem:[%s616_s0 + $0x40] ss:$8 sps:$4 sm:$0xff]   ;;  %v413_v17 = vld [vmem:[%s616_s0 + $0x50] ss:$8 sps:$4 sm:$0xff]   ;;  %v414_v18 = vld [vmem:[%s616_s0 + $0x24] ss:$8 sps:$4 sm:$0xff]  }
   0x7   :  { %211 = vmatprep.subr.bf16.mxu0 %v426_v0  ;;  %376 = vmatprep.subr.bf16.mxu1 %v426_v0  ;;  %v416_v19 = vld [vmem:[%s616_s0 + $0x64] ss:$8 sps:$4 sm:$0xff]   ;;  %v418_v20 = vld [vmem:[%s616_s0 + $0x20] ss:$8 sps:$4 sm:$0xff]   ;;  %v420_v22 = vld [vmem:[%s616_s0 + $0x34] ss:$8 sps:$4 sm:$0xff]  }
   0x8   :  { %v419_v21 = vld [vmem:[%s616_s0 + $0x60] ss:$8 sps:$4 sm:$0xff]   ;;  %v422_v23 = vld [vmem:[%s616_s0 + $0x74] ss:$8 sps:$4 sm:$0xff]   ;;  %v424_v24 = vld [vmem:[%s616_s0 + $0x30] ss:$8 sps:$4 sm:$0xff]  }
   0x9   :  { %v425_v25 = vld [vmem:[%s616_s0 + $0x70] ss:$8 sps:$4 sm:$0xff]   ;;  %v533_v26 = vld [vmem:[%s617_s2] ss:$0 sm:$0xff] }
   0xa   :  { %212 = vmatpush1.bf16.msra.mxu0 %v395_v3  ;;  %385 = vmatpush1.bf16.msra.mxu1 %v395_v3 }
   0xb   :  { %213 = vmatprep.subr.bf16.mxu0 %v426_v0  ;;  %377 = vmatprep.subr.bf16.mxu1 %v426_v0 }
   0xe   :  { %214 = vmatpush1.bf16.msra.mxu0 %v396_v4  ;;  %386 = vmatpush1.bf16.msra.mxu1 %v396_v4 }
   0xf   :  { %215 = vmatprep.subr.bf16.mxu0 %v426_v0  ;;  %378 = vmatprep.subr.bf16.mxu1 %v426_v0 }
  0x12   :  { %216 = vmatpush1.bf16.msra.mxu0 %v397_v7  ;;  %387 = vmatpush1.bf16.msra.mxu1 %v397_v7 }
  0x13   :  { %217 = vmatprep.subr.bf16.mxu0 %v426_v0  ;;  %379 = vmatprep.subr.bf16.mxu1 %v426_v0 }
  0x16   :  { %218 = vmatpush1.bf16.msra.mxu0 %v398_v8  ;;  %388 = vmatpush1.bf16.msra.mxu1 %v398_v8 }
  0x17   :  { %219 = vmatprep.subr.bf16.mxu0 %v426_v0  ;;  %380 = vmatprep.subr.bf16.mxu1 %v426_v0 }
  0x1a   :  { %220 = vmatpush1.bf16.msra.mxu0 %v399_v9  ;;  %389 = vmatpush1.bf16.msra.mxu1 %v399_v9 }
  0x1b   :  { %221 = vmatprep.subr.bf16.mxu0 %v426_v0  ;;  %381 = vmatprep.subr.bf16.mxu1 %v426_v0 }
  0x1e   :  { %222 = vmatpush1.bf16.msra.mxu0 %v400_v10  ;;  %390 = vmatpush1.bf16.msra.mxu1 %v400_v10 }
  0x1f   :  { %223 = vmatprep.subr.bf16.mxu0 %v426_v0  ;;  %382 = vmatprep.subr.bf16.mxu1 %v426_v0 }
  0x22   :  { %224 = vmatpush1.bf16.msra.mxu0 %v401_v11  ;;  %391 = vmatpush1.bf16.msra.mxu1 %v401_v11 }
  0x25   :  { %240 = vmatmul.mubr.bf16.vlgmr.msra.gmra.mrb[0].mxu0 %v402_v12  ;;  %272 = vmatmul.mubr.bf16.vlgmr.msra.gmra.mrb[0].mxu1 %v405_v13 }
  0x26   :  { %367 = vmatprep.mubr.msk.bf16.mxu0 %vm182_vm0, %v408_v14  ;;  %371 = vmatprep.mubr.msk.bf16.mxu1 %vm182_vm0, %v410_v15 }
  0x2d   :  { %248 = vmatmul.mubr.bf16.gmra.mrb[4].mxu0 %v412_v16  ;;  %280 = vmatmul.mubr.bf16.gmra.mrb[4].mxu1 %v413_v17 }
  0x2e   :  { %368 = vmatprep.mubr.msk.bf16.mxu0 %vm182_vm0, %v414_v18  ;;  %372 = vmatprep.mubr.msk.bf16.mxu1 %vm182_vm0, %v416_v19 }
  0x35   :  { %256 = vmatmul.mubr.bf16.gmra.mrb[8].mxu0 %v418_v20  ;;  %288 = vmatmul.mubr.bf16.gmra.mrb[8].mxu1 %v419_v21 }
  0x36   :  { %369 = vmatprep.mubr.msk.bf16.mxu0 %vm182_vm0, %v420_v22  ;;  %373 = vmatprep.mubr.msk.bf16.mxu1 %vm182_vm0, %v422_v23 }
  0x3d   :  { %264 = vmatmul.mubr.bf16.gmra.mrb[12].mxu0 %v424_v24  ;;  %296 = vmatmul.mubr.bf16.gmra.mrb[12].mxu1 %v425_v25 }
  0xf8   :  { %v241_v27 = vpop.f32.mrb[0].mxu0  ;;  %v273_v28 = vpop.f32.mrb[0].mxu1 }
  0xf9   :  { %v242_v29 = vadd.f32 %v533_v26, %v241_v27  ;;  %v274_v30 = vadd.f32 %v533_v26, %v273_v28  ;;  %v243_v31 = vpop.f32.mrb[1].mxu0  ;;  %v275_v32 = vpop.f32.mrb[1].mxu1 }
  0xfa   :  { %v244_v33 = vpop.f32.mrb[2].mxu0  ;;  %v276_v34 = vpop.f32.mrb[2].mxu1 }
  0xfb   :  { %v304_v35 = vmax.f32 %v242_v29, 0.0  ;;  %v312_v36 = vmax.f32 %v274_v30, 0.0  ;;  %v245_v37 = vadd.f32 %v533_v26, %v244_v33  ;;  %v277_v38 = vadd.f32 %v533_v26, %v276_v34  ;;  %v246_v39 = vpop.f32.mrb[3].mxu0  ;;  %v278_v40 = vpop.f32.mrb[3].mxu1 }
  0xfd   :  { %320 = vst.msk [vmem:[%s618_s3] sm:$0xff] %vm182_vm0, %v304_v35  ;;  %328 = vst.msk [vmem:[%s618_s3 + $0x40] sm:$0xff] %vm182_vm0, %v312_v36  ;;  %v305_v41 = vmax.f32 %v245_v37, 0.0  ;;  %v313_v42 = vmax.f32 %v277_v38, 0.0 }
  0xff   :  { %321 = vst.msk [vmem:[%s618_s3 + $0x8] sm:$0xff] %vm182_vm0, %v305_v41  ;;  %329 = vst.msk [vmem:[%s618_s3 + $0x48] sm:$0xff] %vm182_vm0, %v313_v42 }
 0x100   :  { %v249_v43 = vpop.f32.mrb[4].mxu0  ;;  %v281_v44 = vpop.f32.mrb[4].mxu1 }
 0x101   :  { %v250_v45 = vadd.f32 %v533_v26, %v249_v43  ;;  %v282_v46 = vadd.f32 %v533_v26, %v281_v44  ;;  %v251_v47 = vpop.f32.mrb[5].mxu0  ;;  %v283_v48 = vpop.f32.mrb[5].mxu1 }
 0x102   :  { %v252_v49 = vpop.f32.mrb[6].mxu0  ;;  %v284_v50 = vpop.f32.mrb[6].mxu1 }
 0x103   :  { %v306_v51 = vmax.f32 %v250_v45, 0.0  ;;  %v314_v52 = vmax.f32 %v282_v46, 0.0  ;;  %v253_v53 = vadd.f32 %v533_v26, %v252_v49  ;;  %v285_v54 = vadd.f32 %v533_v26, %v284_v50  ;;  %v254_v55 = vpop.f32.mrb[7].mxu0  ;;  %v286_v56 = vpop.f32.mrb[7].mxu1 }
 0x105   :  { %322 = vst.msk [vmem:[%s618_s3 + $0x10] sm:$0xff] %vm182_vm0, %v306_v51  ;;  %330 = vst.msk [vmem:[%s618_s3 + $0x50] sm:$0xff] %vm182_vm0, %v314_v52  ;;  %v307_v57 = vmax.f32 %v253_v53, 0.0  ;;  %v315_v58 = vmax.f32 %v285_v54, 0.0 }
 0x107   :  { %323 = vst.msk [vmem:[%s618_s3 + $0x18] sm:$0xff] %vm182_vm0, %v307_v57  ;;  %331 = vst.msk [vmem:[%s618_s3 + $0x58] sm:$0xff] %vm182_vm0, %v315_v58 }
 0x108   :  { %v257_v59 = vpop.f32.mrb[8].mxu0  ;;  %v289_v60 = vpop.f32.mrb[8].mxu1 }
 0x109   :  { %v258_v61 = vadd.f32 %v533_v26, %v257_v59  ;;  %v290_v62 = vadd.f32 %v533_v26, %v289_v60  ;;  %v259_v63 = vpop.f32.mrb[9].mxu0  ;;  %v291_v0 = vpop.f32.mrb[9].mxu1 }
 0x10a   :  { %v260_v1 = vpop.f32.mrb[10].mxu0  ;;  %v292_v2 = vpop.f32.mrb[10].mxu1 }
 0x10b   :  { %v308_v3 = vmax.f32 %v258_v61, 0.0  ;;  %v316_v4 = vmax.f32 %v290_v62, 0.0  ;;  %v261_v5 = vadd.f32 %v533_v26, %v260_v1  ;;  %v293_v6 = vadd.f32 %v533_v26, %v292_v2  ;;  %v262_v7 = vpop.f32.mrb[11].mxu0  ;;  %v294_v8 = vpop.f32.mrb[11].mxu1 }
 0x10d   :  { %324 = vst.msk [vmem:[%s618_s3 + $0x20] sm:$0xff] %vm182_vm0, %v308_v3  ;;  %332 = vst.msk [vmem:[%s618_s3 + $0x60] sm:$0xff] %vm182_vm0, %v316_v4  ;;  %v309_v9 = vmax.f32 %v261_v5, 0.0  ;;  %v317_v10 = vmax.f32 %v293_v6, 0.0 }
 0x10f   :  { %325 = vst.msk [vmem:[%s618_s3 + $0x28] sm:$0xff] %vm182_vm0, %v309_v9  ;;  %333 = vst.msk [vmem:[%s618_s3 + $0x68] sm:$0xff] %vm182_vm0, %v317_v10 }
 0x110   :  { %v265_v11 = vpop.f32.mrb[12].mxu0  ;;  %v297_v12 = vpop.f32.mrb[12].mxu1 }
 0x111   :  { %v266_v13 = vadd.f32 %v533_v26, %v265_v11  ;;  %v298_v14 = vadd.f32 %v533_v26, %v297_v12  ;;  %v267_v15 = vpop.f32.mrb[13].mxu0  ;;  %v299_v16 = vpop.f32.mrb[13].mxu1 }
 0x112   :  { %v268_v17 = vpop.f32.mrb[14].mxu0  ;;  %v300_v18 = vpop.f32.mrb[14].mxu1 }
 0x113   :  { %v310_v19 = vmax.f32 %v266_v13, 0.0  ;;  %v318_v20 = vmax.f32 %v298_v14, 0.0  ;;  %v269_v21 = vadd.f32 %v533_v26, %v268_v17  ;;  %v301_v22 = vadd.f32 %v533_v26, %v300_v18  ;;  %v270_v23 = vpop.f32.mrb[15].mxu0  ;;  %v302_v24 = vpop.f32.mrb[15].mxu1 }
 0x115   :  { %326 = vst.msk [vmem:[%s618_s3 + $0x30] sm:$0xff] %vm182_vm0, %v310_v19  ;;  %334 = vst.msk [vmem:[%s618_s3 + $0x70] sm:$0xff] %vm182_vm0, %v318_v20  ;;  %v311_v25 = vmax.f32 %v269_v21, 0.0  ;;  %v319_v27 = vmax.f32 %v301_v22, 0.0 }
 0x117   :  { %327 = vst.msk [vmem:[%s618_s3 + $0x38] sm:$0xff] %vm182_vm0, %v311_v25  ;;  %335 = vst.msk [vmem:[%s618_s3 + $0x78] sm:$0xff] %vm182_vm0, %v319_v27 }

// kernel: _lambda_.37
= control target key start
LH: loop header
LB: loop body
LE: loop exit
PB: predicated region body
PF: predicated region fallthrough
CT: control target
= control target key end

     0   :  { %s76_s10 = smov 112   ;;  %s77_s15 = smov 96   ;;  %vm64_vm0 = vcmask 130048   ;;  %s117_s0 = inlined_call_operand.vmem [shape: f32[32,64], index: 0, kind: input, shape index: {}]   ;;  %s118_s1 = inlined_call_operand.vmem [shape: f32[32,16], index: 1, kind: output, shape index: {}]  }
   0x1   :  { %v10_v0 = vld [vmem:[%s117_s0 + $0x10] sm:$0xff]  ;;  %v8_v1 = vld [vmem:[%s117_s0] sm:$0xff]  ;;  %v11_v2 = vld [vmem:[%s117_s0 + $0x18] sm:$0xff]  ;;  %s78_s16 = smov 80  }
   0x2   :  { %20 = vrot.lane.b32.xlu1 %v10_v0, %s76_s10  ;;  %16 = vrot.lane.b32.xlu0 %v8_v1, %s76_s10  ;;  %v9_v3 = vld [vmem:[%s117_s0 + $0x8] sm:$0xff] }
   0x6   :  { %22 = vrot.lane.b32.xlu1 %v11_v2, %s76_s10  ;;  %18 = vrot.lane.b32.xlu0 %v9_v3, %s76_s10 }
   0xa   :  { %34 = vrot.lane.b32.xlu1 %v9_v3, %s77_s15  ;;  %32 = vrot.lane.b32.xlu0 %v8_v1, %s77_s15 }
   0xe   :  { %38 = vrot.lane.b32.xlu1 %v11_v2, %s77_s15  ;;  %36 = vrot.lane.b32.xlu0 %v10_v0, %s77_s15 }
  0x12   :  { %50 = vrot.lane.b32.xlu1 %v9_v3, %s78_s16  ;;  %48 = vrot.lane.b32.xlu0 %v8_v1, %s78_s16 }
  0x16   :  { %54 = vrot.lane.b32.xlu1 %v11_v2, %s78_s16  ;;  %52 = vrot.lane.b32.xlu0 %v10_v0, %s78_s16 }
  0x74   :  { %v21_v4 = vpop.permute.xlu1 %20  ;;  %v17_v5 = vpop.permute.xlu0 %16 }
  0x75   :  { %v28_v12 = vmax.f32 %v8_v1, %v17_v5  ;;  %v30_v18 = vmax.f32 %v10_v0, %v21_v4 }
  0x78   :  { %v23_v6 = vpop.permute.xlu1 %22  ;;  %v19_v7 = vpop.permute.xlu0 %18 }
  0x79   :  { %v29_v13 = vmax.f32 %v9_v3, %v19_v7  ;;  %v31_v19 = vmax.f32 %v11_v2, %v23_v6 }
  0x7c   :  { %v35_v8 = vpop.permute.xlu1 %34  ;;  %v33_v9 = vpop.permute.xlu0 %32 }
  0x7d   :  { %v45_v14 = vmax.f32 %v29_v13, %v35_v8  ;;  %v44_v15 = vmax.f32 %v28_v12, %v33_v9 }
  0x80   :  { %v39_v10 = vpop.permute.xlu1 %38  ;;  %v37_v11 = vpop.permute.xlu0 %36 }
  0x81   :  { %v47_v22 = vmax.f32 %v31_v19, %v39_v10  ;;  %v46_v23 = vmax.f32 %v30_v18, %v37_v11 }
  0x84   :  { %v51_v16 = vpop.permute.xlu1 %50  ;;  %v49_v17 = vpop.permute.xlu0 %48 }
  0x85   :  { %v61_v20 = vmax.f32 %v45_v14, %v51_v16  ;;  %v60_v21 = vmax.f32 %v44_v15, %v49_v17 }
  0x87   :  { %66 = vst.msk [vmem:[%s118_s1 + $0x8] sm:$0xff] %vm64_vm0, %v61_v20  ;;  %65 = vst.msk [vmem:[%s118_s1] sm:$0xff] %vm64_vm0, %v60_v21 }
  0x88   :  { %v55_v24 = vpop.permute.xlu1 %54  ;;  %v53_v25 = vpop.permute.xlu0 %52 }
  0x89   :  { %v63_v26 = vmax.f32 %v47_v22, %v55_v24  ;;  %v62_v27 = vmax.f32 %v46_v23, %v53_v25 }
  0x8b   :  { %68 = vst.msk [vmem:[%s118_s1 + $0x18] sm:$0xff] %vm64_vm0, %v63_v26  ;;  %67 = vst.msk [vmem:[%s118_s1 + $0x10] sm:$0xff] %vm64_vm0, %v62_v27 }

// kernel: _lambda_.38
= control target key start
LH: loop header
LB: loop body
LE: loop exit
PB: predicated region body
PF: predicated region fallthrough
CT: control target
= control target key end

     0   :  { %v235_v0 = vmov 0   ;;  %vm116_vm0 = vcmask 130048   ;;  %vm176_vm1 = vcmask 261120   ;;  %s310_s1 = inlined_call_operand.vmem [shape: bf16[144,32], index: 1, kind: input, shape index: {}]   ;;  %s311_s0 = inlined_call_operand.vmem [shape: bf16[32,144], index: 0, kind: input, shape index: {}]   ;;  %s312_s2 = inlined_call_operand.vmem [shape: f32[1,32], index: 2, kind: input, shape index: {}]   ;;  %s313_s3 = inlined_call_operand.vmem [shape: f32[32,32], index: 3, kind: output, shape index: {}]  }
   0x1   :  { %123 = vmatprep.subr.bf16.mxu0 %v235_v0  ;;  %201 = vmatprep.subr.bf16.mxu1 %v235_v0  ;;  %v220_v1 = vld [vmem:[%s310_s1] sm:$0xff]   ;;  %v221_v2 = vld [vmem:[%s310_s1 + $0x8] sm:$0xff]   ;;  %v222_v3 = vld [vmem:[%s310_s1 + $0x10] sm:$0xff]  }
   0x2   :  { %124 = vmatpush1.bf16.msra.mxu0 %v220_v1  ;;  %210 = vmatpush1.bf16.msra.mxu1 %v220_v1  ;;  %v223_v4 = vld [vmem:[%s310_s1 + $0x18] sm:$0xff]   ;;  %v231_v5 = vld [vmem:[%s311_s0 + $0x4] ss:$8 sps:$4 sm:$0xff]   ;;  %v226_v9 = vld [vmem:[%s310_s1 + $0x30] sm:$0xff]  }
   0x3   :  { %125 = vmatprep.subr.bf16.mxu0 %v235_v0  ;;  %202 = vmatprep.subr.bf16.mxu1 %v235_v0  ;;  %v234_v6 = vld [vmem:[%s311_s0 + $0x14] ss:$8 sps:$4 sm:$0xff]   ;;  %v224_v7 = vld [vmem:[%s310_s1 + $0x20] sm:$0xff]   ;;  %v225_v8 = vld [vmem:[%s310_s1 + $0x28] sm:$0xff]  }
   0x4   :  { %199 = vmatprep.mubr.msk.bf16.mxu0 %vm116_vm0, %v231_v5  ;;  %200 = vmatprep.mubr.msk.bf16.mxu1 %vm116_vm0, %v234_v6  ;;  %v227_v10 = vld [vmem:[%s310_s1 + $0x38] sm:$0xff]   ;;  %v228_v11 = vld [vmem:[%s310_s1 + $0x40] sm:$0xff]  }
   0x5   :  { %v229_v12 = vld [vmem:[%s311_s0] ss:$8 sps:$4 sm:$0xff]   ;;  %v232_v13 = vld [vmem:[%s311_s0 + $0x10] ss:$8 sps:$4 sm:$0xff]  }
   0x6   :  { %126 = vmatpush1.bf16.msra.mxu0 %v221_v2  ;;  %211 = vmatpush1.bf16.msra.mxu1 %v221_v2  ;;  %v185_v14 = vld [vmem:[%s312_s2] ss:$0 sm:$0xff] }
   0x7   :  { %127 = vmatprep.subr.bf16.mxu0 %v235_v0  ;;  %203 = vmatprep.subr.bf16.mxu1 %v235_v0 }
   0xa   :  { %128 = vmatpush1.bf16.msra.mxu0 %v222_v3  ;;  %212 = vmatpush1.bf16.msra.mxu1 %v222_v3 }
   0xb   :  { %129 = vmatprep.subr.bf16.mxu0 %v235_v0  ;;  %204 = vmatprep.subr.bf16.mxu1 %v235_v0 }
   0xe   :  { %130 = vmatpush1.bf16.msra.mxu0 %v223_v4  ;;  %213 = vmatpush1.bf16.msra.mxu1 %v223_v4 }
   0xf   :  { %131 = vmatprep.subr.bf16.mxu0 %v235_v0  ;;  %205 = vmatprep.subr.bf16.mxu1 %v235_v0 }
  0x12   :  { %132 = vmatpush1.bf16.msra.mxu0 %v224_v7  ;;  %214 = vmatpush1.bf16.msra.mxu1 %v224_v7 }
  0x13   :  { %133 = vmatprep.subr.bf16.mxu0 %v235_v0  ;;  %206 = vmatprep.subr.bf16.mxu1 %v235_v0 }
  0x16   :  { %134 = vmatpush1.bf16.msra.mxu0 %v225_v8  ;;  %215 = vmatpush1.bf16.msra.mxu1 %v225_v8 }
  0x17   :  { %135 = vmatprep.subr.bf16.mxu0 %v235_v0  ;;  %207 = vmatprep.subr.bf16.mxu1 %v235_v0 }
  0x1a   :  { %136 = vmatpush1.bf16.msra.mxu0 %v226_v9  ;;  %216 = vmatpush1.bf16.msra.mxu1 %v226_v9 }
  0x1b   :  { %137 = vmatprep.subr.bf16.mxu0 %v235_v0  ;;  %208 = vmatprep.subr.bf16.mxu1 %v235_v0 }
  0x1e   :  { %138 = vmatpush1.bf16.msra.mxu0 %v227_v10  ;;  %217 = vmatpush1.bf16.msra.mxu1 %v227_v10 }
  0x1f   :  { %139 = vmatprep.subr.bf16.mxu0 %v235_v0  ;;  %209 = vmatprep.subr.bf16.mxu1 %v235_v0 }
  0x22   :  { %140 = vmatpush1.bf16.msra.mxu0 %v228_v11  ;;  %218 = vmatpush1.bf16.msra.mxu1 %v228_v11 }
  0x25   :  { %156 = vmatmul.mubr.bf16.vlgmr.msra.gmra.mrb[0].mxu0 %v229_v12  ;;  %164 = vmatmul.mubr.bf16.vlgmr.msra.gmra.mrb[0].mxu1 %v232_v13 }
  0xf8   :  { %v157_v15 = vpop.f32.mrb[0].mxu0  ;;  %v165_v16 = vpop.f32.mrb[0].mxu1 }
  0xf9   :  { %v158_v17 = vadd.f32 %v185_v14, %v157_v15  ;;  %v166_v18 = vadd.f32 %v185_v14, %v165_v16  ;;  %v159_v19 = vpop.f32.mrb[1].mxu0  ;;  %v167_v20 = vpop.f32.mrb[1].mxu1 }
  0xfa   :  { %v160_v21 = vpop.f32.mrb[2].mxu0  ;;  %v168_v22 = vpop.f32.mrb[2].mxu1 }
  0xfb   :  { %v172_v23 = vmax.f32 %v158_v17, 0.0  ;;  %v174_v24 = vmax.f32 %v166_v18, 0.0  ;;  %v161_v25 = vadd.f32 %v185_v14, %v160_v21  ;;  %v169_v26 = vadd.f32 %v185_v14, %v168_v22  ;;  %v162_v27 = vpop.f32.mrb[3].mxu0  ;;  %v170_v28 = vpop.f32.mrb[3].mxu1 }
  0xfd   :  { %177 = vst.msk [vmem:[%s313_s3] sm:$0xff] %vm176_vm1, %v172_v23  ;;  %179 = vst.msk [vmem:[%s313_s3 + $0x10] sm:$0xff] %vm176_vm1, %v174_v24  ;;  %v173_v29 = vmax.f32 %v161_v25, 0.0  ;;  %v175_v30 = vmax.f32 %v169_v26, 0.0 }
  0xff   :  { %178 = vst.msk [vmem:[%s313_s3 + $0x8] sm:$0xff] %vm176_vm1, %v173_v29  ;;  %180 = vst.msk [vmem:[%s313_s3 + $0x18] sm:$0xff] %vm176_vm1, %v175_v30 }

// kernel: _lambda_.52
= control target key start
LH: loop header
LB: loop body
LE: loop exit
PB: predicated region body
PF: predicated region fallthrough
CT: control target
= control target key end

     0   :  { %vm204_vm0 = vcmask 261120   ;;  %vm309_vm1 = vcmask 228352   ;;  %s522_s1 = inlined_call_operand.vmem [shape: bf16[288,28], index: 1, kind: input, shape index: {}]   ;;  %s523_s0 = inlined_call_operand.vmem [shape: bf16[32,288], index: 0, kind: input, shape index: {}]   ;;  %s524_s2 = inlined_call_operand.vmem [shape: f32[1,28], index: 2, kind: input, shape index: {}]   ;;  %s525_s3 = inlined_call_operand.vmem [shape: f32[32,28], index: 3, kind: output, shape index: {}]  }
   0x1   :  { %v385_v0 = vld [vmem:[%s522_s1 + $0x40] sm:$0xff]   ;;  %v387_v2 = vld [vmem:[%s522_s1 + $0x48] sm:$0xff]   ;;  %v389_v4 = vld [vmem:[%s522_s1 + $0x50] sm:$0xff]  }
   0x2   :  { %v386_v1 = vld [vmem:[%s522_s1] sm:$0xff]   ;;  %345 = vmatprep.subr.bf16.mxu0 %v385_v0  ;;  %v388_v3 = vld [vmem:[%s522_s1 + $0x8] sm:$0xff]   ;;  %v390_v5 = vld [vmem:[%s522_s1 + $0x10] sm:$0xff]  }
   0x3   :  { %346 = vmatpush3.bf16.msra.mxu0 %v386_v1  ;;  %v391_v6 = vld [vmem:[%s522_s1 + $0x58] sm:$0xff]   ;;  %v393_v8 = vld [vmem:[%s522_s1 + $0x60] sm:$0xff]   ;;  %v395_v11 = vld [vmem:[%s522_s1 + $0x68] sm:$0xff]  }
   0x4   :  { %347 = vmatprep.subr.bf16.mxu0 %v387_v2  ;;  %v392_v7 = vld [vmem:[%s522_s1 + $0x18] sm:$0xff]   ;;  %v394_v9 = vld [vmem:[%s522_s1 + $0x20] sm:$0xff]   ;;  %v396_v12 = vld [vmem:[%s522_s1 + $0x28] sm:$0xff]  }
   0x5   :  { %v400_v10 = vld [vmem:[%s522_s1 + $0x80] sm:$0xff]   ;;  %v397_v13 = vld [vmem:[%s522_s1 + $0x70] sm:$0xff]   ;;  %v405_v15 = vld [vmem:[%s522_s1 + $0x88] sm:$0xff]  }
   0x6   :  { %377 = vmatprep.subr.bf16.mxu1 %v400_v10  ;;  %v404_v14 = vld [vmem:[%s523_s0 + $0x4] ss:$12 sps:$4 sm:$0xff]   ;;  %v406_v16 = vld [vmem:[%s523_s0 + $0x8] ss:$12 sps:$4 sm:$0xff]   ;;  %v407_v17 = vld [vmem:[%s523_s0 + $0x20] ss:$12 sps:$4 sm:$0xff]  }
   0x7   :  { %348 = vmatpush3.bf16.msra.mxu0 %v388_v3  ;;  %378 = vmatpush3.bf16.msra.mxu1 %v400_v10  ;;  %v398_v18 = vld [vmem:[%s522_s1 + $0x30] sm:$0xff]   ;;  %v399_v19 = vld [vmem:[%s522_s1 + $0x78] sm:$0xff]   ;;  %v402_v21 = vld [vmem:[%s523_s0] ss:$12 sps:$4 sm:$0xff]  }
   0x8   :  { %349 = vmatprep.subr.bf16.mxu0 %v389_v4  ;;  %243 = vmatprep.mubr.bf16.mxu0 %v404_v14  ;;  %v401_v20 = vld [vmem:[%s522_s1 + $0x38] sm:$0xff]   ;;  %v318_v30 = vld [vmem:[%s524_s2] ss:$0 sm:$0xff] }
   0x9   :  { %379 = vmatprep.subr.bf16.mxu1 %v405_v15  ;;  %381 = vmatprep.mubr.msk.bf16.mxu1 %vm204_vm0, %v406_v16  ;;  %v408_v22 = vld [vmem:[%s523_s0 + $0x1c] ss:$12 sps:$4 sm:$0xff]   ;;  %v410_v23 = vld [vmem:[%s523_s0 + $0x18] ss:$12 sps:$4 sm:$0xff]  }
   0xb   :  { %350 = vmatpush3.bf16.msra.mxu0 %v390_v5  ;;  %380 = vmatpush3.bf16.msra.mxu1 %v405_v15 }
   0xc   :  { %351 = vmatprep.subr.bf16.mxu0 %v391_v6 }
   0xe   :  { %382 = vmatmul.mubr.msk.bf16.vlgmr.msra.gmra.mrb[0].mxu1 %vm204_vm0, %v407_v17 }
   0xf   :  { %352 = vmatpush3.bf16.msra.mxu0 %v392_v7 }
  0x10   :  { %353 = vmatprep.subr.bf16.mxu0 %v393_v8 }
  0x13   :  { %354 = vmatpush3.bf16.msra.mxu0 %v394_v9 }
  0x14   :  { %355 = vmatprep.subr.bf16.mxu0 %v395_v11 }
  0x17   :  { %356 = vmatpush3.bf16.msra.mxu0 %v396_v12 }
  0x18   :  { %357 = vmatprep.subr.bf16.mxu0 %v397_v13 }
  0x1b   :  { %358 = vmatpush3.bf16.msra.mxu0 %v398_v18 }
  0x1c   :  { %359 = vmatprep.subr.bf16.mxu0 %v399_v19 }
  0x1f   :  { %360 = vmatpush3.bf16.msra.mxu0 %v401_v20 }
  0x22   :  { %244 = vmatmul.mubr.bf16.vlgmr.msra.gmra.mrb[0].mxu0 %v402_v21 }
  0x23   :  { %251 = vmatprep.mubr.bf16.mxu0 %v408_v22 }
  0x2a   :  { %252 = vmatmul.mubr.bf16.gmra.mrb[4].mxu0 %v410_v23 }
  0xe1   :  { %v383_v24 = vpop.f32.mrb[0].mxu1 }
  0xe2   :  { %v294_v25 = vpop.f32.mrb[1].mxu1 }
  0xe3   :  { %v384_v26 = vpop.f32.mrb[2].mxu1 }
  0xe4   :  { %v297_v27 = vpop.f32.mrb[3].mxu1 }
  0xf5   :  { %v361_v28 = vpop.f32.mrb[0].mxu0 }
  0xf6   :  { %v362_v29 = vpop.f32.mrb[1].mxu0 }
  0xf7   :  { %v363_v31 = vadd.f32 %v362_v29, %v361_v28  ;;  %v364_v32 = vpop.f32.mrb[2].mxu0 }
  0xf8   :  { %v365_v33 = vpop.f32.mrb[3].mxu0 }
  0xf9   :  { %v366_v34 = vadd.f32 %v365_v33, %v364_v32  ;;  %v246_v35 = vadd.f32 %v363_v31, %v318_v30 }
  0xfb   :  { %v295_v36 = vadd.f32 %v294_v25, %v246_v35  ;;  %v249_v37 = vadd.f32 %v366_v34, %v318_v30 }
  0xfd   :  { %310 = vst.msk [vmem:[%s525_s3] sm:$0xff] %vm309_vm1, %v295_v36  ;;  %v298_v38 = vadd.f32 %v297_v27, %v249_v37  ;;  %v367_v39 = vpop.f32.mrb[4].mxu0 }
  0xfe   :  { %v368_v40 = vpop.f32.mrb[5].mxu0 }
  0xff   :  { %311 = vst.msk [vmem:[%s525_s3 + $0x8] sm:$0xff] %vm309_vm1, %v298_v38  ;;  %v369_v41 = vadd.f32 %v368_v40, %v367_v39  ;;  %v370_v42 = vpop.f32.mrb[6].mxu0 }
 0x100   :  { %v371_v43 = vpop.f32.mrb[7].mxu0 }
 0x101   :  { %v254_v44 = vadd.f32 %v369_v41, %v318_v30  ;;  %v372_v45 = vadd.f32 %v371_v43, %v370_v42 }
 0x103   :  { %v303_v46 = vadd.f32 %v383_v24, %v254_v44  ;;  %v257_v47 = vadd.f32 %v372_v45, %v318_v30 }
 0x105   :  { %312 = vst.msk [vmem:[%s525_s3 + $0x10] sm:$0xff] %vm309_vm1, %v303_v46  ;;  %v306_v48 = vadd.f32 %v384_v26, %v257_v47 }
 0x107   :  { %313 = vst.msk [vmem:[%s525_s3 + $0x18] sm:$0xff] %vm309_vm1, %v306_v48 }

// kernel: _lambda_.39
= control target key start
LH: loop header
LB: loop body
LE: loop exit
PB: predicated region body
PF: predicated region fallthrough
CT: control target
= control target key end

     0   :  { %vm204_vm0 = vcmask 261120   ;;  %s527_s1 = inlined_call_operand.vmem [shape: bf16[288,32], index: 1, kind: input, shape index: {}]   ;;  %s528_s0 = inlined_call_operand.vmem [shape: bf16[32,288], index: 0, kind: input, shape index: {}]   ;;  %s529_s2 = inlined_call_operand.vmem [shape: f32[1,32], index: 2, kind: input, shape index: {}]   ;;  %s530_s3 = inlined_call_operand.vmem [shape: f32[32,32], index: 3, kind: output, shape index: {}]  }
   0x1   :  { %v388_v0 = vld [vmem:[%s527_s1 + $0x40] sm:$0xff]   ;;  %v390_v2 = vld [vmem:[%s527_s1 + $0x48] sm:$0xff]   ;;  %v392_v4 = vld [vmem:[%s527_s1 + $0x50] sm:$0xff]  }
   0x2   :  { %v389_v1 = vld [vmem:[%s527_s1] sm:$0xff]   ;;  %348 = vmatprep.subr.bf16.mxu0 %v388_v0  ;;  %v391_v3 = vld [vmem:[%s527_s1 + $0x8] sm:$0xff]   ;;  %v393_v5 = vld [vmem:[%s527_s1 + $0x10] sm:$0xff]  }
   0x3   :  { %349 = vmatpush3.bf16.msra.mxu0 %v389_v1  ;;  %v394_v6 = vld [vmem:[%s527_s1 + $0x58] sm:$0xff]   ;;  %v396_v8 = vld [vmem:[%s527_s1 + $0x60] sm:$0xff]   ;;  %v398_v11 = vld [vmem:[%s527_s1 + $0x68] sm:$0xff]  }
   0x4   :  { %350 = vmatprep.subr.bf16.mxu0 %v390_v2  ;;  %v395_v7 = vld [vmem:[%s527_s1 + $0x18] sm:$0xff]   ;;  %v397_v9 = vld [vmem:[%s527_s1 + $0x20] sm:$0xff]   ;;  %v399_v12 = vld [vmem:[%s527_s1 + $0x28] sm:$0xff]  }
   0x5   :  { %v403_v10 = vld [vmem:[%s527_s1 + $0x80] sm:$0xff]   ;;  %v400_v13 = vld [vmem:[%s527_s1 + $0x70] sm:$0xff]   ;;  %v408_v15 = vld [vmem:[%s527_s1 + $0x88] sm:$0xff]  }
   0x6   :  { %380 = vmatprep.subr.bf16.mxu1 %v403_v10  ;;  %v407_v14 = vld [vmem:[%s528_s0 + $0x4] ss:$12 sps:$4 sm:$0xff]   ;;  %v409_v16 = vld [vmem:[%s528_s0 + $0x8] ss:$12 sps:$4 sm:$0xff]   ;;  %v410_v17 = vld [vmem:[%s528_s0 + $0x20] ss:$12 sps:$4 sm:$0xff]  }
   0x7   :  { %351 = vmatpush3.bf16.msra.mxu0 %v391_v3  ;;  %381 = vmatpush3.bf16.msra.mxu1 %v403_v10  ;;  %v401_v18 = vld [vmem:[%s527_s1 + $0x30] sm:$0xff]   ;;  %v402_v19 = vld [vmem:[%s527_s1 + $0x78] sm:$0xff]   ;;  %v405_v21 = vld [vmem:[%s528_s0] ss:$12 sps:$4 sm:$0xff]  }
   0x8   :  { %352 = vmatprep.subr.bf16.mxu0 %v392_v4  ;;  %243 = vmatprep.mubr.bf16.mxu0 %v407_v14  ;;  %v404_v20 = vld [vmem:[%s527_s1 + $0x38] sm:$0xff]   ;;  %v321_v30 = vld [vmem:[%s529_s2] ss:$0 sm:$0xff] }
   0x9   :  { %382 = vmatprep.subr.bf16.mxu1 %v408_v15  ;;  %384 = vmatprep.mubr.msk.bf16.mxu1 %vm204_vm0, %v409_v16  ;;  %v411_v22 = vld [vmem:[%s528_s0 + $0x1c] ss:$12 sps:$4 sm:$0xff]   ;;  %v413_v23 = vld [vmem:[%s528_s0 + $0x18] ss:$12 sps:$4 sm:$0xff]  }
   0xb   :  { %353 = vmatpush3.bf16.msra.mxu0 %v393_v5  ;;  %383 = vmatpush3.bf16.msra.mxu1 %v408_v15 }
   0xc   :  { %354 = vmatprep.subr.bf16.mxu0 %v394_v6 }
   0xe   :  { %385 = vmatmul.mubr.msk.bf16.vlgmr.msra.gmra.mrb[0].mxu1 %vm204_vm0, %v410_v17 }
   0xf   :  { %355 = vmatpush3.bf16.msra.mxu0 %v395_v7 }
  0x10   :  { %356 = vmatprep.subr.bf16.mxu0 %v396_v8 }
  0x13   :  { %357 = vmatpush3.bf16.msra.mxu0 %v397_v9 }
  0x14   :  { %358 = vmatprep.subr.bf16.mxu0 %v398_v11 }
  0x17   :  { %359 = vmatpush3.bf16.msra.mxu0 %v399_v12 }
  0x18   :  { %360 = vmatprep.subr.bf16.mxu0 %v400_v13 }
  0x1b   :  { %361 = vmatpush3.bf16.msra.mxu0 %v401_v18 }
  0x1c   :  { %362 = vmatprep.subr.bf16.mxu0 %v402_v19 }
  0x1f   :  { %363 = vmatpush3.bf16.msra.mxu0 %v404_v20 }
  0x22   :  { %244 = vmatmul.mubr.bf16.vlgmr.msra.gmra.mrb[0].mxu0 %v405_v21 }
  0x23   :  { %251 = vmatprep.mubr.bf16.mxu0 %v411_v22 }
  0x2a   :  { %252 = vmatmul.mubr.bf16.gmra.mrb[4].mxu0 %v413_v23 }
  0xe1   :  { %v386_v24 = vpop.f32.mrb[0].mxu1 }
  0xe2   :  { %v294_v25 = vpop.f32.mrb[1].mxu1 }
  0xe3   :  { %v387_v26 = vpop.f32.mrb[2].mxu1 }
  0xe4   :  { %v297_v27 = vpop.f32.mrb[3].mxu1 }
  0xf5   :  { %v364_v28 = vpop.f32.mrb[0].mxu0 }
  0xf6   :  { %v365_v29 = vpop.f32.mrb[1].mxu0 }
  0xf7   :  { %v366_v31 = vadd.f32 %v365_v29, %v364_v28  ;;  %v367_v32 = vpop.f32.mrb[2].mxu0 }
  0xf8   :  { %v368_v33 = vpop.f32.mrb[3].mxu0 }
  0xf9   :  { %v369_v34 = vadd.f32 %v368_v33, %v367_v32  ;;  %v246_v35 = vadd.f32 %v366_v31, %v321_v30 }
  0xfb   :  { %v295_v36 = vadd.f32 %v294_v25, %v246_v35  ;;  %v249_v37 = vadd.f32 %v369_v34, %v321_v30 }
  0xfd   :  { %v309_v38 = vmax.f32 %v295_v36, 0.0  ;;  %v298_v39 = vadd.f32 %v297_v27, %v249_v37  ;;  %v370_v40 = vpop.f32.mrb[4].mxu0 }
  0xfe   :  { %v371_v41 = vpop.f32.mrb[5].mxu0 }
  0xff   :  { %313 = vst.msk [vmem:[%s530_s3] sm:$0xff] %vm204_vm0, %v309_v38  ;;  %v310_v42 = vmax.f32 %v298_v39, 0.0  ;;  %v372_v43 = vadd.f32 %v371_v41, %v370_v40  ;;  %v373_v44 = vpop.f32.mrb[6].mxu0 }
 0x100   :  { %v374_v45 = vpop.f32.mrb[7].mxu0 }
 0x101   :  { %314 = vst.msk [vmem:[%s530_s3 + $0x8] sm:$0xff] %vm204_vm0, %v310_v42  ;;  %v254_v46 = vadd.f32 %v372_v43, %v321_v30  ;;  %v375_v47 = vadd.f32 %v374_v45, %v373_v44 }
 0x103   :  { %v303_v48 = vadd.f32 %v386_v24, %v254_v46  ;;  %v257_v49 = vadd.f32 %v375_v47, %v321_v30 }
 0x105   :  { %v311_v50 = vmax.f32 %v303_v48, 0.0  ;;  %v306_v51 = vadd.f32 %v387_v26, %v257_v49 }
 0x107   :  { %315 = vst.msk [vmem:[%s530_s3 + $0x10] sm:$0xff] %vm204_vm0, %v311_v50  ;;  %v312_v52 = vmax.f32 %v306_v51, 0.0 }
 0x109   :  { %316 = vst.msk [vmem:[%s530_s3 + $0x18] sm:$0xff] %vm204_vm0, %v312_v52 }

// kernel: _lambda_.41
= control target key start
LH: loop header
LB: loop body
LE: loop exit
PB: predicated region body
PF: predicated region fallthrough
CT: control target
= control target key end

     0   :  { %s31_s8 = smov 96   ;;  %s32_s9 = smov 32   ;;  %vm22_vm0 = vcmask 261120   ;;  %s50_s0 = inlined_call_operand.vmem [shape: f32[8,128], index: 0, kind: input, shape index: {}]   ;;  %s51_s1 = inlined_call_operand.vmem [shape: f32[8,32], index: 1, kind: output, shape index: {}]  }
   0x1   :  { %v8_v0 = vld [vmem:[%s50_s0] sm:$0xff]  ;;  %s33_s10 = smov 64  }
   0x2   :  { %10 = vrot.lane.b32.xlu0 %v8_v0, %s31_s8  ;;  %18 = vrot.lane.b32.xlu1 %v8_v0, %s32_s9 }
   0x6   :  { %14 = vrot.lane.b32.xlu0 %v8_v0, %s33_s10 }
  0x74   :  { %v11_v1 = vpop.permute.xlu0 %10  ;;  %v19_v4 = vpop.permute.xlu1 %18 }
  0x75   :  { %v13_v2 = vmax.f32 %v8_v0, %v11_v1 }
  0x78   :  { %v15_v3 = vpop.permute.xlu0 %14 }
  0x79   :  { %v17_v5 = vmax.f32 %v13_v2, %v15_v3 }
  0x7b   :  { %v21_v6 = vmax.f32 %v17_v5, %v19_v4 }
  0x7d   :  { %23 = vst.msk [vmem:[%s51_s1] sm:$0xff] %vm22_vm0, %v21_v6 }

// kernel: _lambda_.42
= control target key start
LH: loop header
LB: loop body
LE: loop exit
PB: predicated region body
PF: predicated region fallthrough
CT: control target
= control target key end

     0   :  { %v347_v1 = vmov 0.0   ;;  %vm348_vm0 = vmmov 0   ;;  %vm178_vm1 = vcmask 261120   ;;  %s437_s1 = inlined_call_operand.vmem [shape: bf16[288,32], index: 1, kind: input, shape index: {}]   ;;  %s438_s0 = inlined_call_operand.vmem [shape: bf16[8,288], index: 0, kind: input, shape index: {}]   ;;  %s439_s2 = inlined_call_operand.vmem [shape: f32[1,32], index: 2, kind: input, shape index: {}]   ;;  %s440_s3 = inlined_call_operand.vmem [shape: f32[8,32], index: 3, kind: output, shape index: {}]  }
   0x1   :  { %v326_v0 = vld [vmem:[%s437_s1 + $0x40] sm:$0xff]   ;;  %316 = vmatprep.subr.bf16.mxu1 %v347_v1  ;;  %320 = vmatprep.mubr.msk.bf16.mxu1 %vm348_vm0, %v347_v1  ;;  %v328_v3 = vld [vmem:[%s437_s1 + $0x48] sm:$0xff]   ;;  %v330_v5 = vld [vmem:[%s437_s1 + $0x50] sm:$0xff]  }
   0x2   :  { %v327_v2 = vld [vmem:[%s437_s1] sm:$0xff]   ;;  %291 = vmatprep.subr.bf16.mxu0 %v326_v0  ;;  %v329_v4 = vld [vmem:[%s437_s1 + $0x8] sm:$0xff]   ;;  %v331_v6 = vld [vmem:[%s437_s1 + $0x10] sm:$0xff]  }
   0x3   :  { %292 = vmatpush3.bf16.msra.mxu0 %v327_v2  ;;  %v332_v7 = vld [vmem:[%s437_s1 + $0x58] sm:$0xff]   ;;  %v334_v9 = vld [vmem:[%s437_s1 + $0x60] sm:$0xff]   ;;  %v336_v12 = vld [vmem:[%s437_s1 + $0x68] sm:$0xff]  }
   0x4   :  { %293 = vmatprep.subr.bf16.mxu0 %v328_v3  ;;  %v333_v8 = vld [vmem:[%s437_s1 + $0x18] sm:$0xff]   ;;  %v340_v10 = vld [vmem:[%s437_s1 + $0x80] sm:$0xff]   ;;  %v346_v15 = vld [vmem:[%s437_s1 + $0x88] sm:$0xff]  }
   0x5   :  { %v335_v11 = vld [vmem:[%s437_s1 + $0x20] sm:$0xff]   ;;  %317 = vmatpush3.bf16.msra.mxu1 %v340_v10  ;;  %v337_v16 = vld [vmem:[%s437_s1 + $0x28] sm:$0xff]   ;;  %v338_v17 = vld [vmem:[%s437_s1 + $0x70] sm:$0xff]  }
   0x6   :  { %318 = vmatprep.subr.bf16.mxu1 %v347_v1  ;;  %v15_v13 = vld [vmem:[%s438_s0] sm:$0xff]  ;;  %v345_v18 = vld [vmem:[%s438_s0 + $0x8] ss:$0 sps:$4 sm:$0xff]   ;;  %v339_v19 = vld [vmem:[%s437_s1 + $0x30] sm:$0xff]  }
   0x7   :  { %294 = vmatpush3.bf16.msra.mxu0 %v329_v4  ;;  %v270_v14 = vcombine.high %v15_v13, %v15_v13  ;;  %v341_v20 = vld [vmem:[%s437_s1 + $0x78] sm:$0xff]   ;;  %v269_v22 = vcombine.low %v15_v13, %v15_v13  ;;  %v268_v29 = vld [vmem:[%s439_s2] ss:$0 sm:$0xff] }
   0x8   :  { %295 = vmatprep.subr.bf16.mxu0 %v330_v5  ;;  %v342_v21 = vld [vmem:[%s437_s1 + $0x38] sm:$0xff]  }
   0x9   :  { %214 = vmatprep.mubr.bf16.mxu0 %v270_v14  ;;  %319 = vmatpush3.bf16.msra.mxu1 %v346_v15 }
   0xb   :  { %296 = vmatpush3.bf16.msra.mxu0 %v331_v6 }
   0xc   :  { %297 = vmatprep.subr.bf16.mxu0 %v332_v7  ;;  %321 = vmatmul.mubr.msk.bf16.vlgmr.msra.gmra.mrb[0].mxu1 %vm178_vm1, %v345_v18 }
   0xf   :  { %298 = vmatpush3.bf16.msra.mxu0 %v333_v8 }
  0x10   :  { %299 = vmatprep.subr.bf16.mxu0 %v334_v9 }
  0x13   :  { %300 = vmatpush3.bf16.msra.mxu0 %v335_v11 }
  0x14   :  { %301 = vmatprep.subr.bf16.mxu0 %v336_v12 }
  0x17   :  { %302 = vmatpush3.bf16.msra.mxu0 %v337_v16 }
  0x18   :  { %303 = vmatprep.subr.bf16.mxu0 %v338_v17 }
  0x1b   :  { %304 = vmatpush3.bf16.msra.mxu0 %v339_v19 }
  0x1c   :  { %305 = vmatprep.subr.bf16.mxu0 %v341_v20 }
  0x1f   :  { %306 = vmatpush3.bf16.msra.mxu0 %v342_v21 }
  0x22   :  { %215 = vmatmul.mubr.bf16.vlgmr.msra.gmra.mrb[0].mxu0 %v269_v22 }
  0xdf   :  { %v256_v23 = vpop.f32.mrb[0].mxu1 }
  0xe0   :  { %v322_v24 = vpop.f32.mrb[1].mxu1 }
  0xe1   :  { %v259_v25 = vpop.f32.mrb[2].mxu1 }
  0xe2   :  { %v323_v26 = vpop.f32.mrb[3].mxu1 }
  0xf5   :  { %v307_v27 = vpop.f32.mrb[0].mxu0 }
  0xf6   :  { %v308_v28 = vpop.f32.mrb[1].mxu0 }
  0xf7   :  { %v309_v30 = vadd.f32 %v308_v28, %v307_v27  ;;  %v310_v31 = vpop.f32.mrb[2].mxu0 }
  0xf8   :  { %v311_v32 = vpop.f32.mrb[3].mxu0 }
  0xf9   :  { %v217_v33 = vadd.f32 %v309_v30, %v268_v29 }
  0xfb   :  { %v257_v34 = vadd.f32 %v256_v23, %v217_v33 }
  0xfd   :  { %v262_v35 = vmax.f32 %v257_v34, 0.0 }
  0xff   :  { %263 = vst.msk [vmem:[%s440_s3] sm:$0xff] %vm178_vm1, %v262_v35 }

// kernel: _lambda_.45
= control target key start
LH: loop header
LB: loop body
LE: loop exit
PB: predicated region body
PF: predicated region fallthrough
CT: control target
= control target key end

     0   :  { %s48_s8 = smov 96   ;;  %s49_s9 = smov 32   ;;  %vm39_vm0 = vcmask 261120   ;;  %s73_s0 = inlined_call_operand.vmem [shape: f32[8,288], index: 0, kind: input, shape index: {}]   ;;  %s74_s1 = inlined_call_operand.vmem [shape: f32[8,32], index: 1, kind: output, shape index: {}]  }
   0x1   :  { %v8_v0 = vld [vmem:[%s73_s0] sm:$0xff]  ;;  %v9_v1 = vld [vmem:[%s73_s0 + $0x8] sm:$0xff]  ;;  %s50_s12 = smov 64   ;;  %v10_v14 = vld [vmem:[%s73_s0 + $0x10] sm:$0xff] }
   0x2   :  { %12 = vrot.lane.b32.xlu0 %v8_v0, %s48_s8  ;;  %20 = vrot.lane.b32.xlu1 %v8_v0, %s49_s9 }
   0x6   :  { %16 = vrot.lane.b32.xlu0 %v8_v0, %s50_s12  ;;  %26 = vrot.lane.b32.xlu1 %v9_v1, %s48_s8 }
   0xa   :  { %30 = vrot.lane.b32.xlu0 %v9_v1, %s50_s12  ;;  %34 = vrot.lane.b32.xlu1 %v9_v1, %s49_s9 }
  0x74   :  { %v13_v2 = vpop.permute.xlu0 %12  ;;  %v21_v3 = vpop.permute.xlu1 %20 }
  0x75   :  { %v15_v4 = vmax.f32 %v8_v0, %v13_v2 }
  0x78   :  { %v17_v5 = vpop.permute.xlu0 %16  ;;  %v27_v7 = vpop.permute.xlu1 %26 }
  0x79   :  { %v19_v6 = vmax.f32 %v15_v4, %v17_v5 }
  0x7b   :  { %v23_v8 = vmax.f32 %v19_v6, %v21_v3 }
  0x7c   :  { %v31_v10 = vpop.permute.xlu0 %30  ;;  %v35_v12 = vpop.permute.xlu1 %34 }
  0x7d   :  { %v24_v9 = vmax.f32 %v23_v8, %v9_v1 }
  0x7f   :  { %v29_v11 = vmax.f32 %v24_v9, %v27_v7 }
  0x81   :  { %v33_v13 = vmax.f32 %v29_v11, %v31_v10 }
  0x83   :  { %v37_v15 = vmax.f32 %v33_v13, %v35_v12 }
  0x85   :  { %v38_v16 = vmax.f32 %v37_v15, %v10_v14 }
  0x87   :  { %40 = vst.msk [vmem:[%s74_s1] sm:$0xff] %vm39_vm0, %v38_v16 }

// kernel: _lambda_.47
= control target key start
LH: loop header
LB: loop body
LE: loop exit
PB: predicated region body
PF: predicated region fallthrough
CT: control target
= control target key end

     0   :  { %v108_v0 = vmov 0.0   ;;  %vm109_vm0 = vmmov 0   ;;  %vm39_vm1 = vcmask 261120   ;;  %s145_s1 = inlined_call_operand.vmem [shape: bf16[32,32], index: 1, kind: input, shape index: {}]   ;;  %s146_s0 = inlined_call_operand.vmem [shape: bf16[8,32], index: 0, kind: input, shape index: {}]   ;;  %s147_s2 = inlined_call_operand.vmem [shape: f32[1,32], index: 2, kind: input, shape index: {}]   ;;  %s148_s3 = inlined_call_operand.vmem [shape: f32[8,32], index: 3, kind: output, shape index: {}]  }
   0x1   :  { %96 = vmatprep.subr.bf16.mxu0 %v108_v0  ;;  %v106_v1 = vld [vmem:[%s145_s1] sm:$0xff]   ;;  %100 = vmatprep.mubr.msk.bf16.mxu0 %vm109_vm0, %v108_v0  ;;  %v107_v2 = vld [vmem:[%s145_s1 + $0x8] sm:$0xff]  }
   0x2   :  { %97 = vmatpush3.bf16.msra.mxu0 %v106_v1  ;;  %v15_v3 = vld [vmem:[%s146_s0] sm:$0xf] }
   0x3   :  { %98 = vmatprep.subr.bf16.mxu0 %v108_v0  ;;  %v89_v4 = vld [vmem:[%s147_s2] ss:$0 sm:$0xff] }
   0x6   :  { %99 = vmatpush3.bf16.msra.mxu0 %v107_v2 }
   0x9   :  { %101 = vmatmul.mubr.msk.bf16.vlgmr.msra.gmra.mrb[0].mxu0 %vm39_vm1, %v15_v3 }
  0xdc   :  { %v77_v5 = vpop.f32.mrb[0].mxu0 }
  0xdd   :  { %v78_v6 = vadd.f32 %v89_v4, %v77_v5  ;;  %v102_v7 = vpop.f32.mrb[1].mxu0 }
  0xde   :  { %v80_v8 = vpop.f32.mrb[2].mxu0 }
  0xdf   :  { %v83_v9 = vmax.f32 %v78_v6, 0.0  ;;  %v103_v10 = vpop.f32.mrb[3].mxu0 }
  0xe1   :  { %84 = vst.msk [vmem:[%s148_s3] sm:$0xff] %vm39_vm1, %v83_v9 }

// kernel: _lambda_.53
= control target key start
LH: loop header
LB: loop body
LE: loop exit
PB: predicated region body
PF: predicated region fallthrough
CT: control target
= control target key end

     0   :  { %v347_v1 = vmov 0.0   ;;  %vm348_vm0 = vmmov 0   ;;  %vm178_vm1 = vcmask 261120   ;;  %vm262_vm2 = vcmask 228352   ;;  %s435_s1 = inlined_call_operand.vmem [shape: bf16[288,28], index: 1, kind: input, shape index: {}]   ;;  %s436_s0 = inlined_call_operand.vmem [shape: bf16[8,288], index: 0, kind: input, shape index: {}]   ;;  %s437_s2 = inlined_call_operand.vmem [shape: f32[1,28], index: 2, kind: input, shape index: {}]   ;;  %s438_s3 = inlined_call_operand.vmem [shape: f32[8,28], index: 3, kind: output, shape index: {}]  }
   0x1   :  { %v326_v0 = vld [vmem:[%s435_s1 + $0x40] sm:$0xff]   ;;  %316 = vmatprep.subr.bf16.mxu1 %v347_v1  ;;  %320 = vmatprep.mubr.msk.bf16.mxu1 %vm348_vm0, %v347_v1  ;;  %v328_v3 = vld [vmem:[%s435_s1 + $0x48] sm:$0xff]   ;;  %v330_v5 = vld [vmem:[%s435_s1 + $0x50] sm:$0xff]  }
   0x2   :  { %v327_v2 = vld [vmem:[%s435_s1] sm:$0xff]   ;;  %291 = vmatprep.subr.bf16.mxu0 %v326_v0  ;;  %v329_v4 = vld [vmem:[%s435_s1 + $0x8] sm:$0xff]   ;;  %v331_v6 = vld [vmem:[%s435_s1 + $0x10] sm:$0xff]  }
   0x3   :  { %292 = vmatpush3.bf16.msra.mxu0 %v327_v2  ;;  %v332_v7 = vld [vmem:[%s435_s1 + $0x58] sm:$0xff]   ;;  %v334_v9 = vld [vmem:[%s435_s1 + $0x60] sm:$0xff]   ;;  %v336_v12 = vld [vmem:[%s435_s1 + $0x68] sm:$0xff]  }
   0x4   :  { %293 = vmatprep.subr.bf16.mxu0 %v328_v3  ;;  %v333_v8 = vld [vmem:[%s435_s1 + $0x18] sm:$0xff]   ;;  %v340_v10 = vld [vmem:[%s435_s1 + $0x80] sm:$0xff]   ;;  %v346_v15 = vld [vmem:[%s435_s1 + $0x88] sm:$0xff]  }
   0x5   :  { %v335_v11 = vld [vmem:[%s435_s1 + $0x20] sm:$0xff]   ;;  %317 = vmatpush3.bf16.msra.mxu1 %v340_v10  ;;  %v337_v16 = vld [vmem:[%s435_s1 + $0x28] sm:$0xff]   ;;  %v338_v17 = vld [vmem:[%s435_s1 + $0x70] sm:$0xff]  }
   0x6   :  { %318 = vmatprep.subr.bf16.mxu1 %v347_v1  ;;  %v15_v13 = vld [vmem:[%s436_s0] sm:$0xff]  ;;  %v345_v18 = vld [vmem:[%s436_s0 + $0x8] ss:$0 sps:$4 sm:$0xff]   ;;  %v339_v19 = vld [vmem:[%s435_s1 + $0x30] sm:$0xff]  }
   0x7   :  { %294 = vmatpush3.bf16.msra.mxu0 %v329_v4  ;;  %v270_v14 = vcombine.high %v15_v13, %v15_v13  ;;  %v341_v20 = vld [vmem:[%s435_s1 + $0x78] sm:$0xff]   ;;  %v269_v22 = vcombine.low %v15_v13, %v15_v13  ;;  %v268_v29 = vld [vmem:[%s437_s2] ss:$0 sm:$0xff] }
   0x8   :  { %295 = vmatprep.subr.bf16.mxu0 %v330_v5  ;;  %v342_v21 = vld [vmem:[%s435_s1 + $0x38] sm:$0xff]  }
   0x9   :  { %214 = vmatprep.mubr.bf16.mxu0 %v270_v14  ;;  %319 = vmatpush3.bf16.msra.mxu1 %v346_v15 }
   0xb   :  { %296 = vmatpush3.bf16.msra.mxu0 %v331_v6 }
   0xc   :  { %297 = vmatprep.subr.bf16.mxu0 %v332_v7  ;;  %321 = vmatmul.mubr.msk.bf16.vlgmr.msra.gmra.mrb[0].mxu1 %vm178_vm1, %v345_v18 }
   0xf   :  { %298 = vmatpush3.bf16.msra.mxu0 %v333_v8 }
  0x10   :  { %299 = vmatprep.subr.bf16.mxu0 %v334_v9 }
  0x13   :  { %300 = vmatpush3.bf16.msra.mxu0 %v335_v11 }
  0x14   :  { %301 = vmatprep.subr.bf16.mxu0 %v336_v12 }
  0x17   :  { %302 = vmatpush3.bf16.msra.mxu0 %v337_v16 }
  0x18   :  { %303 = vmatprep.subr.bf16.mxu0 %v338_v17 }
  0x1b   :  { %304 = vmatpush3.bf16.msra.mxu0 %v339_v19 }
  0x1c   :  { %305 = vmatprep.subr.bf16.mxu0 %v341_v20 }
  0x1f   :  { %306 = vmatpush3.bf16.msra.mxu0 %v342_v21 }
  0x22   :  { %215 = vmatmul.mubr.bf16.vlgmr.msra.gmra.mrb[0].mxu0 %v269_v22 }
  0xdf   :  { %v256_v23 = vpop.f32.mrb[0].mxu1 }
  0xe0   :  { %v322_v24 = vpop.f32.mrb[1].mxu1 }
  0xe1   :  { %v259_v25 = vpop.f32.mrb[2].mxu1 }
  0xe2   :  { %v323_v26 = vpop.f32.mrb[3].mxu1 }
  0xf5   :  { %v307_v27 = vpop.f32.mrb[0].mxu0 }
  0xf6   :  { %v308_v28 = vpop.f32.mrb[1].mxu0 }
  0xf7   :  { %v309_v30 = vadd.f32 %v308_v28, %v307_v27  ;;  %v310_v31 = vpop.f32.mrb[2].mxu0 }
  0xf8   :  { %v311_v32 = vpop.f32.mrb[3].mxu0 }
  0xf9   :  { %v217_v33 = vadd.f32 %v309_v30, %v268_v29 }
  0xfb   :  { %v257_v34 = vadd.f32 %v256_v23, %v217_v33 }
  0xfd   :  { %263 = vst.msk [vmem:[%s438_s3] sm:$0xff] %vm262_vm2, %v257_v34 }

// kernel: _lambda_.48
= control target key start
LH: loop header
LB: loop body
LE: loop exit
PB: predicated region body
PF: predicated region fallthrough
CT: control target
= control target key end

     0   :  { %v109_v0 = vmov 0.0   ;;  %vm110_vm0 = vmmov 0   ;;  %vm39_vm1 = vcmask 261120   ;;  %vm84_vm2 = vcmask 130048   ;;  %s146_s1 = inlined_call_operand.vmem [shape: bf16[32,16], index: 1, kind: input, shape index: {}]   ;;  %s147_s0 = inlined_call_operand.vmem [shape: bf16[8,32], index: 0, kind: input, shape index: {}]   ;;  %s148_s2 = inlined_call_operand.vmem [shape: f32[1,16], index: 2, kind: input, shape index: {}]   ;;  %s149_s3 = inlined_call_operand.vmem [shape: f32[8,16], index: 3, kind: output, shape index: {}]  }
   0x1   :  { %97 = vmatprep.subr.bf16.mxu0 %v109_v0  ;;  %v107_v1 = vld [vmem:[%s146_s1] sm:$0xff]   ;;  %101 = vmatprep.mubr.msk.bf16.mxu0 %vm110_vm0, %v109_v0  ;;  %v108_v2 = vld [vmem:[%s146_s1 + $0x8] sm:$0xff]  }
   0x2   :  { %98 = vmatpush3.bf16.msra.mxu0 %v107_v1  ;;  %v15_v3 = vld [vmem:[%s147_s0] sm:$0xf] }
   0x3   :  { %99 = vmatprep.subr.bf16.mxu0 %v109_v0  ;;  %v90_v4 = vld [vmem:[%s148_s2] ss:$0 sm:$0xff] }
   0x6   :  { %100 = vmatpush3.bf16.msra.mxu0 %v108_v2 }
   0x9   :  { %102 = vmatmul.mubr.msk.bf16.vlgmr.msra.gmra.mrb[0].mxu0 %vm39_vm1, %v15_v3 }
  0xdc   :  { %v77_v5 = vpop.f32.mrb[0].mxu0 }
  0xdd   :  { %v78_v6 = vadd.f32 %v90_v4, %v77_v5  ;;  %v103_v7 = vpop.f32.mrb[1].mxu0 }
  0xde   :  { %v80_v8 = vpop.f32.mrb[2].mxu0 }
  0xdf   :  { %v83_v9 = vmax.f32 %v78_v6, 0.0  ;;  %v104_v10 = vpop.f32.mrb[3].mxu0 }
  0xe1   :  { %85 = vst.msk [vmem:[%s149_s3] sm:$0xff] %vm84_vm2, %v83_v9 }

// kernel: _lambda_.49
= control target key start
LH: loop header
LB: loop body
LE: loop exit
PB: predicated region body
PF: predicated region fallthrough
CT: control target
= control target key end

     0   :  { %v192_v0 = vmov 0   ;;  %v193_v2 = vmov 1966171168   ;;  %v53_v4 = vlaneseq  ;;  %vm119_vm0 = vcmask 130048   ;;  %s250_s1 = inlined_call_operand.vmem [shape: bf16[144,32], index: 1, kind: input, shape index: {}]   ;;  %s251_s0 = inlined_call_operand.vmem [shape: bf16[2,144], index: 0, kind: input, shape index: {}]   ;;  %s252_s2 = inlined_call_operand.vmem [shape: f32[1,32], index: 2, kind: input, shape index: {}]   ;;  %s253_s3 = inlined_call_operand.vmem [shape: f32[2,32], index: 3, kind: output, shape index: {}]  }
   0x1   :  { %123 = vmatprep.subr.bf16.mxu0 %v192_v0  ;;  %v183_v1 = vld [vmem:[%s250_s1] sm:$0xff]   ;;  %v51_v3 = vunpack.c.l.s4 %v193_v2  ;;  %v184_v5 = vld [vmem:[%s250_s1 + $0x8] sm:$0xff]   ;;  %v185_v8 = vld [vmem:[%s250_s1 + $0x10] sm:$0xff]   ;;  %vm163_vm1 = vcmask 254976  }
   0x2   :  { %124 = vmatpush1.bf16.msra.mxu0 %v183_v1  ;;  %v54_v7 = vshrl.u32 %v53_v4, 7  ;;  %v170_v10 = vld.sshfl [vmem:[%s251_s0] sm:$0x11 pattern:$0x75316420]  ;;  %v186_v11 = vld [vmem:[%s250_s1 + $0x18] sm:$0xff]  }
   0x3   :  { %125 = vmatprep.subr.bf16.mxu0 %v192_v0  ;;  %v52_v6 = vunpack.c.0.s8 %v51_v3  ;;  %v49_v12 = vcombine.high %v170_v10, %v170_v10  ;;  %v187_v14 = vld [vmem:[%s250_s1 + $0x20] sm:$0xff]   ;;  %v188_v15 = vld [vmem:[%s250_s1 + $0x28] sm:$0xff]   ;;  %v189_v16 = vld [vmem:[%s250_s1 + $0x30] sm:$0xff]  }
   0x4   :  { %v190_v17 = vld [vmem:[%s250_s1 + $0x38] sm:$0xff]   ;;  %v191_v18 = vld [vmem:[%s250_s1 + $0x40] sm:$0xff]  }
   0x5   :  { %v55_v9 = vsub.s32 %v52_v6, %v54_v7  ;;  %v169_v20 = vld [vmem:[%s252_s2] ss:$0 sm:$0xff] }
   0x6   :  { %126 = vmatpush1.bf16.msra.mxu0 %v184_v5 }
   0x7   :  { %127 = vmatprep.subr.bf16.mxu0 %v192_v0  ;;  %v63_v13 = vrot.slane %v49_v12, %v55_v9  ;;  %v56_v19 = vrot.slane %v170_v10, %v55_v9 }
   0x9   :  { %180 = vmatprep.mubr.msk.bf16.mxu0 %vm119_vm0, %v63_v13 }
   0xa   :  { %128 = vmatpush1.bf16.msra.mxu0 %v185_v8 }
   0xb   :  { %129 = vmatprep.subr.bf16.mxu0 %v192_v0 }
   0xe   :  { %130 = vmatpush1.bf16.msra.mxu0 %v186_v11 }
   0xf   :  { %131 = vmatprep.subr.bf16.mxu0 %v192_v0 }
  0x12   :  { %132 = vmatpush1.bf16.msra.mxu0 %v187_v14 }
  0x13   :  { %133 = vmatprep.subr.bf16.mxu0 %v192_v0 }
  0x16   :  { %134 = vmatpush1.bf16.msra.mxu0 %v188_v15 }
  0x17   :  { %135 = vmatprep.subr.bf16.mxu0 %v192_v0 }
  0x1a   :  { %136 = vmatpush1.bf16.msra.mxu0 %v189_v16 }
  0x1b   :  { %137 = vmatprep.subr.bf16.mxu0 %v192_v0 }
  0x1e   :  { %138 = vmatpush1.bf16.msra.mxu0 %v190_v17 }
  0x1f   :  { %139 = vmatprep.subr.bf16.mxu0 %v192_v0 }
  0x22   :  { %140 = vmatpush1.bf16.msra.mxu0 %v191_v18 }
  0x25   :  { %156 = vmatmul.mubr.bf16.vlgmr.msra.gmra.mrb[0].mxu0 %v56_v19 }
  0xf8   :  { %v157_v21 = vpop.f32.mrb[0].mxu0 }
  0xf9   :  { %v158_v22 = vadd.f32 %v169_v20, %v157_v21  ;;  %v159_v23 = vpop.f32.mrb[1].mxu0 }
  0xfa   :  { %v160_v24 = vpop.f32.mrb[2].mxu0 }
  0xfb   :  { %164 = vst.msk [vmem:[%s253_s3] sm:$0x3] %vm163_vm1, %v158_v22  ;;  %v161_v25 = vpop.f32.mrb[3].mxu0 }

// kernel: _lambda_.50
= control target key start
LH: loop header
LB: loop body
LE: loop exit
PB: predicated region body
PF: predicated region fallthrough
CT: control target
= control target key end

     0   :  { %v109_v0 = vmov 0.0   ;;  %vm110_vm0 = vmmov 0   ;;  %vm39_vm1 = vcmask 261120   ;;  %vm84_vm2 = vcmask 123904   ;;  %s146_s1 = inlined_call_operand.vmem [shape: bf16[32,16], index: 1, kind: input, shape index: {}]   ;;  %s147_s0 = inlined_call_operand.vmem [shape: bf16[2,32], index: 0, kind: input, shape index: {}]   ;;  %s148_s2 = inlined_call_operand.vmem [shape: f32[1,16], index: 2, kind: input, shape index: {}]   ;;  %s149_s3 = inlined_call_operand.vmem [shape: f32[2,16], index: 3, kind: output, shape index: {}]  }
   0x1   :  { %97 = vmatprep.subr.bf16.mxu0 %v109_v0  ;;  %v107_v1 = vld [vmem:[%s146_s1] sm:$0xff]   ;;  %101 = vmatprep.mubr.msk.bf16.mxu0 %vm110_vm0, %v109_v0  ;;  %v108_v2 = vld [vmem:[%s146_s1 + $0x8] sm:$0xff]  }
   0x2   :  { %98 = vmatpush3.bf16.msra.mxu0 %v107_v1  ;;  %v15_v3 = vld [vmem:[%s147_s0] sm:$0x1] }
   0x3   :  { %99 = vmatprep.subr.bf16.mxu0 %v109_v0  ;;  %v90_v4 = vld [vmem:[%s148_s2] ss:$0 sm:$0xff] }
   0x6   :  { %100 = vmatpush3.bf16.msra.mxu0 %v108_v2 }
   0x9   :  { %102 = vmatmul.mubr.msk.bf16.vlgmr.msra.gmra.mrb[0].mxu0 %vm39_vm1, %v15_v3 }
  0xdc   :  { %v77_v5 = vpop.f32.mrb[0].mxu0 }
  0xdd   :  { %v78_v6 = vadd.f32 %v90_v4, %v77_v5  ;;  %v103_v7 = vpop.f32.mrb[1].mxu0 }
  0xde   :  { %v80_v8 = vpop.f32.mrb[2].mxu0 }
  0xdf   :  { %v83_v9 = vmax.f32 %v78_v6, 0.0  ;;  %v104_v10 = vpop.f32.mrb[3].mxu0 }
  0xe1   :  { %85 = vst.msk [vmem:[%s149_s3] sm:$0x3] %vm84_vm2, %v83_v9 }

// kernel: _lambda_.55
= control target key start
LH: loop header
LB: loop body
LE: loop exit
PB: predicated region body
PF: predicated region fallthrough
CT: control target
= control target key end

     0   :  { %v358_v1 = vmov 0.0   ;;  %vm359_vm0 = vmmov 0   ;;  %v360_v6 = vmov 1966171168   ;;  %v71_v8 = vlaneseq  ;;  %s444_s1 = inlined_call_operand.vmem [shape: bf16[288,28], index: 1, kind: input, shape index: {}]   ;;  %s445_s0 = inlined_call_operand.vmem [shape: bf16[2,288], index: 0, kind: input, shape index: {}]   ;;  %s446_s2 = inlined_call_operand.vmem [shape: f32[1,28], index: 2, kind: input, shape index: {}]   ;;  %s447_s3 = inlined_call_operand.vmem [shape: f32[2,28], index: 3, kind: output, shape index: {}]  }
   0x1   :  { %v340_v0 = vld [vmem:[%s444_s1 + $0x40] sm:$0xff]   ;;  %329 = vmatprep.subr.bf16.mxu1 %v358_v1  ;;  %333 = vmatprep.mubr.msk.bf16.mxu1 %vm359_vm0, %v358_v1  ;;  %v342_v3 = vld [vmem:[%s444_s1 + $0x48] sm:$0xff]   ;;  %v344_v5 = vld [vmem:[%s444_s1 + $0x50] sm:$0xff]   ;;  %v69_v7 = vunpack.c.l.s4 %v360_v6  ;;  %vm193_vm1 = vcmask 261120   ;;  %vm277_vm2 = vcmask 222208  }
   0x2   :  { %v341_v2 = vld [vmem:[%s444_s1] sm:$0xff]   ;;  %304 = vmatprep.subr.bf16.mxu0 %v340_v0  ;;  %v343_v4 = vld [vmem:[%s444_s1 + $0x8] sm:$0xff]   ;;  %v345_v9 = vld [vmem:[%s444_s1 + $0x10] sm:$0xff]   ;;  %v72_v12 = vshrl.u32 %v71_v8, 7 }
   0x3   :  { %305 = vmatpush3.bf16.msra.mxu0 %v341_v2  ;;  %v346_v10 = vld [vmem:[%s444_s1 + $0x58] sm:$0xff]   ;;  %v70_v11 = vunpack.c.0.s8 %v69_v7  ;;  %v348_v14 = vld [vmem:[%s444_s1 + $0x60] sm:$0xff]   ;;  %v350_v18 = vld [vmem:[%s444_s1 + $0x68] sm:$0xff]  }
   0x4   :  { %306 = vmatprep.subr.bf16.mxu0 %v342_v3  ;;  %v347_v13 = vld [vmem:[%s444_s1 + $0x18] sm:$0xff]   ;;  %v354_v15 = vld [vmem:[%s444_s1 + $0x80] sm:$0xff]   ;;  %v357_v21 = vld [vmem:[%s444_s1 + $0x88] sm:$0xff]  }
   0x5   :  { %v73_v16 = vsub.s32 %v70_v11, %v72_v12  ;;  %v349_v17 = vld [vmem:[%s444_s1 + $0x20] sm:$0xff]   ;;  %330 = vmatpush3.bf16.msra.mxu1 %v354_v15  ;;  %v351_v23 = vld [vmem:[%s444_s1 + $0x28] sm:$0xff]   ;;  %v352_v24 = vld [vmem:[%s444_s1 + $0x70] sm:$0xff]  }
   0x6   :  { %331 = vmatprep.subr.bf16.mxu1 %v358_v1  ;;  %v284_v19 = vld.sshfl [vmem:[%s445_s0] sm:$0x13 pattern:$0x75316420]  ;;  %v353_v27 = vld [vmem:[%s444_s1 + $0x30] sm:$0xff]   ;;  %v355_v28 = vld [vmem:[%s444_s1 + $0x78] sm:$0xff]  }
   0x7   :  { %307 = vmatpush3.bf16.msra.mxu0 %v343_v4  ;;  %v67_v20 = vcombine.high %v284_v19, %v284_v19  ;;  %v74_v22 = vrot.slane %v284_v19, %v73_v16  ;;  %v356_v29 = vld [vmem:[%s444_s1 + $0x38] sm:$0xff]   ;;  %v283_v36 = vld [vmem:[%s446_s2] ss:$0 sm:$0xff] }
   0x8   :  { %308 = vmatprep.subr.bf16.mxu0 %v344_v5 }
   0x9   :  { %v81_v25 = vrot.slane %v67_v20, %v73_v16  ;;  %332 = vmatpush3.bf16.msra.mxu1 %v357_v21  ;;  %v82_v26 = vcombine.high %v74_v22, %v74_v22 }
   0xb   :  { %309 = vmatpush3.bf16.msra.mxu0 %v345_v9  ;;  %229 = vmatprep.mubr.bf16.mxu0 %v81_v25 }
   0xc   :  { %310 = vmatprep.subr.bf16.mxu0 %v346_v10  ;;  %334 = vmatmul.mubr.msk.bf16.vlgmr.msra.gmra.mrb[0].mxu1 %vm193_vm1, %v82_v26 }
   0xf   :  { %311 = vmatpush3.bf16.msra.mxu0 %v347_v13 }
  0x10   :  { %312 = vmatprep.subr.bf16.mxu0 %v348_v14 }
  0x13   :  { %313 = vmatpush3.bf16.msra.mxu0 %v349_v17 }
  0x14   :  { %314 = vmatprep.subr.bf16.mxu0 %v350_v18 }
  0x17   :  { %315 = vmatpush3.bf16.msra.mxu0 %v351_v23 }
  0x18   :  { %316 = vmatprep.subr.bf16.mxu0 %v352_v24 }
  0x1b   :  { %317 = vmatpush3.bf16.msra.mxu0 %v353_v27 }
  0x1c   :  { %318 = vmatprep.subr.bf16.mxu0 %v355_v28 }
  0x1f   :  { %319 = vmatpush3.bf16.msra.mxu0 %v356_v29 }
  0x22   :  { %230 = vmatmul.mubr.bf16.vlgmr.msra.gmra.mrb[0].mxu0 %v74_v22 }
  0xdf   :  { %v271_v30 = vpop.f32.mrb[0].mxu1 }
  0xe0   :  { %v335_v31 = vpop.f32.mrb[1].mxu1 }
  0xe1   :  { %v274_v32 = vpop.f32.mrb[2].mxu1 }
  0xe2   :  { %v336_v33 = vpop.f32.mrb[3].mxu1 }
  0xf5   :  { %v320_v34 = vpop.f32.mrb[0].mxu0 }
  0xf6   :  { %v321_v35 = vpop.f32.mrb[1].mxu0 }
  0xf7   :  { %v322_v37 = vadd.f32 %v321_v35, %v320_v34  ;;  %v323_v38 = vpop.f32.mrb[2].mxu0 }
  0xf8   :  { %v324_v39 = vpop.f32.mrb[3].mxu0 }
  0xf9   :  { %v232_v40 = vadd.f32 %v322_v37, %v283_v36 }
  0xfb   :  { %v272_v41 = vadd.f32 %v271_v30, %v232_v40 }
  0xfd   :  { %278 = vst.msk [vmem:[%s447_s3] sm:$0x3] %vm277_vm2, %v272_v41 }

</bundles_post_ra>
